<compile_context>
chip_gen: v5e
topology: v5e:2x2
jax: 0.10.0
libtpu: 0.0.40
codegen_flags: <defaults>
</compile_context>

<pallas_src>
import jax
import jax.numpy as jnp
from jax import lax
from jax.experimental import pallas as pl
from jax.experimental.pallas import tpu as pltpu

# ---------------------------------------------------------------------------
# Vocabularies (built in-script, deterministic)
# ---------------------------------------------------------------------------
GRAPHEMES = ["<pad>", "<unk>", "</s>"] + list("abcdefghijklmnopqrstuvwxyz")
GRAPHEMES += [f"<g_extra_{i}>" for i in range(32 - len(GRAPHEMES))]          # Vg = 32

_SPECIAL = ["<pad>", "<unk>", "<s>", "</s>", " ", ".", ",", "?", "!", "<sil>"]
_ARPABET = ["AA", "AE", "AH", "AO", "AW", "AY", "B", "CH", "D", "DH", "EH",
            "ER", "EY", "F", "G", "HH", "IH", "IY", "JH", "K", "L", "M", "N",
            "NG", "OW", "OY", "P", "R", "S", "SH", "T", "TH", "UH", "UW", "V",
            "W", "Y", "Z", "ZH"]
PHONEMES = _SPECIAL + _ARPABET
PHONEMES += [f"<p_extra_{i}>" for i in range(128 - len(PHONEMES))]           # Vp = 128

VG = len(GRAPHEMES)          # 32
VP = len(PHONEMES)           # 128
EMB = 128                    # embedding dim
HID = 128                    # GRU hidden dim
T_IN = 16                    # (padded) grapheme sequence length
T_OUT = 16                   # fixed greedy-decode length

B_TOTAL = 16                 # words per call (small demo batch)
B_TILE = 8                   # batch rows per grid step (>=8 sublanes)

START_ID = PHONEMES.index("<s>")     # decoder start token
EOS_ID = PHONEMES.index("</s>")
SPACE_ID = PHONEMES.index(" ")       # token to remove
SIL_ID = PHONEMES.index("<sil>")
PUNCT_IDS = tuple(PHONEMES.index(t) for t in [".", ",", "?", "!"])


# ---------------------------------------------------------------------------
# Kernel: batched GRU encoder + greedy GRU decoder + fused postprocess
# ---------------------------------------------------------------------------
def _gru_cell(gx, h, whh_bf16, b_hn):
    """One GRU step.  gx already contains W_ih@x + b_ih (+ b_hh for r,z)."""
    H = b_hn.shape[-1]
    gh = jnp.dot(h.astype(jnp.bfloat16), whh_bf16,
                 preferred_element_type=jnp.float32)              # (B, 3H)
    r = jax.nn.sigmoid(gx[:, 0:H] + gh[:, 0:H])
    z = jax.nn.sigmoid(gx[:, H:2 * H] + gh[:, H:2 * H])
    n = jnp.tanh(gx[:, 2 * H:3 * H] + r * (gh[:, 2 * H:3 * H] + b_hn))
    return (1.0 - z) * n + z * h


def g2p_kernel(ids_ref,
               fused_enc_ref, enc_whh_ref, enc_b_hn_ref,
               fused_dec_ref, dec_whh_ref, dec_b_hn_ref,
               fc_w_ref, fc_b_ref,
               out_ids_ref, keep_ref):
    f32 = jnp.float32
    bf16 = jnp.bfloat16

    B, T_in = ids_ref.shape
    Vg = fused_enc_ref.shape[0]
    Vp = fc_w_ref.shape[1]
    T_out = out_ids_ref.shape[1]

    # Whole weight set loaded once (resident across the unrolled recurrences).
    fused_enc = fused_enc_ref[...]        # (Vg, 3H) bf16, biases folded in
    enc_whh = enc_whh_ref[...]            # (H, 3H)  bf16
    enc_b_hn = enc_b_hn_ref[...]          # (1, H)   f32
    fused_dec = fused_dec_ref[...]        # (Vp, 3H) bf16, biases folded in
    dec_whh = dec_whh_ref[...]            # (H, 3H)  bf16
    dec_b_hn = dec_b_hn_ref[...]          # (1, H)   f32
    fc_w = fc_w_ref[...]                  # (H, Vp)  bf16
    fc_b = fc_b_ref[...]                  # (1, Vp)  f32

    # --- Encoder (fully unrolled; gx_t is off the h critical path) ---------
    ids = ids_ref[...]                                            # (B, T_in) i32
    vg_iota = lax.broadcasted_iota(jnp.int32, (1, Vg), 1)

    h = jnp.zeros((B, HID), f32)
    for t in range(T_in):
        onehot_t = (ids[:, t:t + 1] == vg_iota).astype(bf16)      # (B, Vg)
        gx_t = jnp.dot(onehot_t, fused_enc,
                       preferred_element_type=f32)                # (B, 3H)
        h = _gru_cell(gx_t, h, enc_whh, enc_b_hn)

    # --- Greedy decoder (fully unrolled serial chain) -----------------------
    vp_iota = lax.broadcasted_iota(jnp.int32, (1, Vp), 1)
    tout_iota = lax.broadcasted_iota(jnp.int32, (1, T_out), 1)

    prev = jnp.broadcast_to((vp_iota == START_ID), (B, Vp)).astype(bf16)
    ids_acc = jnp.zeros((B, T_out), jnp.int32)

    for t in range(T_out):
        gx = jnp.dot(prev, fused_dec, preferred_element_type=f32)  # (B, 3H)
        h = _gru_cell(gx, h, dec_whh, dec_b_hn)
        logits = jnp.dot(h.astype(bf16), fc_w,
                         preferred_element_type=f32) + fc_b        # (B, Vp)
        # manual argmax (first max), NaN-safe clamp to the vocabulary
        m = jnp.max(logits, axis=-1, keepdims=True)
        cand = jnp.where(logits >= m, vp_iota, Vp)
        idx = jnp.minimum(jnp.min(cand, axis=-1, keepdims=True), Vp - 1)
        prev = (vp_iota == idx).astype(bf16)
        ids_acc = jnp.where(tout_iota == t, idx, ids_acc)

    # --- Fused postprocess epilogue -----------------------------------------
    is_punct = (ids_acc == PUNCT_IDS[0]) | (ids_acc == PUNCT_IDS[1]) \
             | (ids_acc == PUNCT_IDS[2]) | (ids_acc == PUNCT_IDS[3])
    out_ids_ref[...] = jnp.where(is_punct, jnp.int32(SIL_ID), ids_acc)
    keep_ref[...] = (ids_acc != SPACE_ID).astype(jnp.int32)


# ---------------------------------------------------------------------------
# Parameters (synthetic, deterministic) + host-side fusion / bf16 cast
# ---------------------------------------------------------------------------
def make_params(key):
    ks = jax.random.split(key, 12)

    def init(k, shape, scale=0.1):
        return jax.random.normal(k, shape, jnp.float32) * scale

    return dict(
        enc_emb=init(ks[0], (VG, EMB)),
        enc_wih=init(ks[1], (EMB, 3 * HID)),
        enc_whh=init(ks[2], (HID, 3 * HID)),
        enc_bih=init(ks[3], (1, 3 * HID)),
        enc_bhh=init(ks[4], (1, 3 * HID)),
        dec_emb=init(ks[5], (VP, EMB)),
        dec_wih=init(ks[6], (EMB, 3 * HID)),
        dec_whh=init(ks[7], (HID, 3 * HID)),
        dec_bih=init(ks[8], (1, 3 * HID)),
        dec_bhh=init(ks[9], (1, 3 * HID)),
        fc_w=init(ks[10], (HID, VP)),
        fc_b=init(ks[11], (1, VP)),
    )


def prepare_params(p):
    """Fuse embedding @ W_ih (+ all foldable biases) and cast MXU operands to bf16."""
    H = HID
    bf16 = jnp.bfloat16

    def fold(bih, bhh):
        # fold b_hh's r/z slices into the input-path bias; keep b_hh_n separate
        b_in = bih.at[:, :2 * H].add(bhh[:, :2 * H])     # (1, 3H)
        b_hn = bhh[:, 2 * H:]                            # (1, H)
        return b_in, b_hn

    enc_b_in, enc_b_hn = fold(p["enc_bih"], p["enc_bhh"])
    dec_b_in, dec_b_hn = fold(p["dec_bih"], p["dec_bhh"])

    # one-hot rows select exactly one row, so biases fold exactly into the table
    fused_enc = p["enc_emb"] @ p["enc_wih"] + enc_b_in   # (Vg, 3H)
    fused_dec = p["dec_emb"] @ p["dec_wih"] + dec_b_in   # (Vp, 3H)

    return dict(
        fused_enc=fused_enc.astype(bf16),
        enc_whh=p["enc_whh"].astype(bf16),
        enc_b_hn=enc_b_hn.astype(jnp.float32),
        fused_dec=fused_dec.astype(bf16),
        dec_whh=p["dec_whh"].astype(bf16),
        dec_b_hn=dec_b_hn.astype(jnp.float32),
        fc_w=p["fc_w"].astype(bf16),
        fc_b=p["fc_b"].astype(jnp.float32),
    )


_WEIGHT_ORDER = ("fused_enc", "enc_whh", "enc_b_hn",
                 "fused_dec", "dec_whh", "dec_b_hn",
                 "fc_w", "fc_b")


# ---------------------------------------------------------------------------
# pallas_call wrapper (batch axis tiled over a parallel grid)
# ---------------------------------------------------------------------------
def _g2p_forward_impl(ids, kparams):
    B = ids.shape[0]
    assert B % B_TILE == 0
    weights = [kparams[k] for k in _WEIGHT_ORDER]

    def whole(arr):
        # full-array block, revisited every grid step (no re-DMA)
        return pl.BlockSpec(arr.shape, lambda b: (0,) * arr.ndim)

    in_specs = [pl.BlockSpec((B_TILE, T_IN), lambda b: (b, 0))] \
             + [whole(w) for w in weights]
    out_specs = (pl.BlockSpec((B_TILE, T_OUT), lambda b: (b, 0)),
                 pl.BlockSpec((B_TILE, T_OUT), lambda b: (b, 0)))

    return pl.pallas_call(
        g2p_kernel,
        out_shape=(jax.ShapeDtypeStruct((B, T_OUT), jnp.int32),
                   jax.ShapeDtypeStruct((B, T_OUT), jnp.int32)),
        grid=(B // B_TILE,),
        in_specs=in_specs,
        out_specs=out_specs,
        compiler_params=pltpu.CompilerParams(
            dimension_semantics=("parallel",)),
    )(ids, *weights)


g2p_forward = jax.jit(_g2p_forward_impl)


# ---------------------------------------------------------------------------
# Host-side glue (string processing, list compaction)
# ---------------------------------------------------------------------------
def encode_texts(texts, batch):
    # TODO(synk): g2p_en's CMU-dict lookup + NLTK POS tagging are host-side
    # string processing with no Pallas equivalent; we feed raw characters.
    g2i = {g: i for i, g in enumerate(GRAPHEMES)}
    rows = []
    for text in texts:
        ids = [g2i.get(c, 1) for c in text.lower()][:T_IN]
        ids += [0] * (T_IN - len(ids))
        rows.append(ids)
    while len(rows) < batch:
        rows.append([0] * T_IN)
    return jnp.asarray(rows, jnp.int32)


def g2p_transform(texts, kparams):
    """Mirrors G2PTransform.forward for a batch: text -> List[str] of phonemes."""
    ids = encode_texts(texts, B_TOTAL)
    out_ids, keep = g2p_forward(ids, kparams)
    jax.block_until_ready((out_ids, keep))

    # TODO(synk): variable-length list compaction (removal of ' ') has no
    # fixed-shape Pallas equivalent; kernel emits a keep-mask, compaction here.
    out_h = out_ids.tolist()
    keep_h = keep.tolist()
    results = []
    for r in range(len(texts)):
        toks = []
        for pid, k in zip(out_h[r], keep_h[r]):
            if pid == EOS_ID:      # greedy decode stop condition
                break
            if k == 0:             # ' ' token removed
                continue
            toks.append(PHONEMES[pid])
        results.append(toks)
    return results, out_ids, keep


if __name__ == "__main__":
    key = jax.random.PRNGKey(0)
    params = prepare_params(make_params(key))

    texts = ["hello world.", "pallas tpu!", "grapheme, phoneme?", "ok"]
    phoneme_lists, out_ids, keep = g2p_transform(texts, params)
    jax.block_until_ready((out_ids, keep))

    # Basic sanity checks on shapes / dtypes / semantics.
    assert out_ids.shape == (B_TOTAL, T_OUT) and out_ids.dtype == jnp.int32
    assert keep.shape == (B_TOTAL, T_OUT) and keep.dtype == jnp.int32
    assert bool(jnp.all((out_ids >= 0) & (out_ids < VP)))
    for phonemes in phoneme_lists:
        assert isinstance(phonemes, list)
        assert all(isinstance(p, str) for p in phonemes)
        # replacement semantics: no raw punctuation survives, spaces filtered out
        assert all(p not in [".", ",", "?", "!", " "] for p in phonemes)

    print("KERNEL_OK")
</pallas_src>

<mosaic_0001>
module attributes {stable_mosaic.version = 11 : i64} {
  func.func @g2p_kernel(%arg0: i32, %arg1: memref<8x16xi32, #tpu.memory_space<vmem>>, %arg2: memref<32x384xbf16, #tpu.memory_space<vmem>>, %arg3: memref<128x384xbf16, #tpu.memory_space<vmem>>, %arg4: memref<1x128xf32, #tpu.memory_space<vmem>>, %arg5: memref<128x384xbf16, #tpu.memory_space<vmem>>, %arg6: memref<128x384xbf16, #tpu.memory_space<vmem>>, %arg7: memref<1x128xf32, #tpu.memory_space<vmem>>, %arg8: memref<128x128xbf16, #tpu.memory_space<vmem>>, %arg9: memref<1x128xf32, #tpu.memory_space<vmem>>, %arg10: memref<8x16xi32, #tpu.memory_space<vmem>>, %arg11: memref<8x16xi32, #tpu.memory_space<vmem>>) attributes {dimension_semantics = [#tpu.dimension_semantics<parallel>], iteration_bounds = array<i64: 2>, scalar_prefetch = 0 : i64, scratch_operands = 0 : i64, tpu.core_type = #tpu.core_type<tc>, window_params = [{transform_indices = @transform_0, window_bounds = array<i64: 8, 16>}, {pipeline_mode = #tpu.pipeline_mode<synchronous>, transform_indices = @transform_1, window_bounds = array<i64: 32, 384>}, {pipeline_mode = #tpu.pipeline_mode<synchronous>, transform_indices = @transform_2, window_bounds = array<i64: 128, 384>}, {pipeline_mode = #tpu.pipeline_mode<synchronous>, transform_indices = @transform_3, window_bounds = array<i64: 1, 128>}, {pipeline_mode = #tpu.pipeline_mode<synchronous>, transform_indices = @transform_4, window_bounds = array<i64: 128, 384>}, {pipeline_mode = #tpu.pipeline_mode<synchronous>, transform_indices = @transform_5, window_bounds = array<i64: 128, 384>}, {pipeline_mode = #tpu.pipeline_mode<synchronous>, transform_indices = @transform_6, window_bounds = array<i64: 1, 128>}, {pipeline_mode = #tpu.pipeline_mode<synchronous>, transform_indices = @transform_7, window_bounds = array<i64: 128, 128>}, {pipeline_mode = #tpu.pipeline_mode<synchronous>, transform_indices = @transform_8, window_bounds = array<i64: 1, 128>}, {transform_indices = @transform_9, window_bounds = array<i64: 8, 16>}, {transform_indices = @transform_10, window_bounds = array<i64: 8, 16>}]} {
    %c0 = arith.constant 0 : index
    %c0_0 = arith.constant 0 : index
    %0 = vector.load %arg2[%c0, %c0_0] : memref<32x384xbf16, #tpu.memory_space<vmem>>, vector<32x384xbf16>
    %c0_1 = arith.constant 0 : index
    %c0_2 = arith.constant 0 : index
    %1 = vector.load %arg3[%c0_1, %c0_2] : memref<128x384xbf16, #tpu.memory_space<vmem>>, vector<128x384xbf16>
    %c0_3 = arith.constant 0 : index
    %c0_4 = arith.constant 0 : index
    %2 = vector.load %arg4[%c0_3, %c0_4] : memref<1x128xf32, #tpu.memory_space<vmem>>, vector<1x128xf32>
    %c0_5 = arith.constant 0 : index
    %c0_6 = arith.constant 0 : index
    %3 = vector.load %arg5[%c0_5, %c0_6] : memref<128x384xbf16, #tpu.memory_space<vmem>>, vector<128x384xbf16>
    %c0_7 = arith.constant 0 : index
    %c0_8 = arith.constant 0 : index
    %4 = vector.load %arg6[%c0_7, %c0_8] : memref<128x384xbf16, #tpu.memory_space<vmem>>, vector<128x384xbf16>
    %c0_9 = arith.constant 0 : index
    %c0_10 = arith.constant 0 : index
    %5 = vector.load %arg7[%c0_9, %c0_10] : memref<1x128xf32, #tpu.memory_space<vmem>>, vector<1x128xf32>
    %c0_11 = arith.constant 0 : index
    %c0_12 = arith.constant 0 : index
    %6 = vector.load %arg8[%c0_11, %c0_12] : memref<128x128xbf16, #tpu.memory_space<vmem>>, vector<128x128xbf16>
    %c0_13 = arith.constant 0 : index
    %c0_14 = arith.constant 0 : index
    %7 = vector.load %arg9[%c0_13, %c0_14] : memref<1x128xf32, #tpu.memory_space<vmem>>, vector<1x128xf32>
    %c0_15 = arith.constant 0 : index
    %c0_16 = arith.constant 0 : index
    %8 = vector.load %arg1[%c0_15, %c0_16] : memref<8x16xi32, #tpu.memory_space<vmem>>, vector<8x16xi32>
    %9 = tpu.iota {dimensions = array<i32: 1>} : vector<1x32xi32>
    %cst = arith.constant 0.000000e+00 : f32
    %10 = vector.broadcast %cst : f32 to vector<8x128xf32>
    %11 = vector.extract_strided_slice %8 {offsets = [0, 0], sizes = [8, 1], strides = [1, 1]} : vector<8x16xi32> to vector<8x1xi32>
    %12 = vector.broadcast %11 : vector<8x1xi32> to vector<8x32xi32>
    %13 = vector.broadcast %9 : vector<1x32xi32> to vector<8x32xi32>
    %14 = arith.cmpi eq, %12, %13 : vector<8x32xi32>
    %15 = arith.extui %14 : vector<8x32xi1> to vector<8x32xi32>
    %16 = arith.sitofp %15 : vector<8x32xi32> to vector<8x32xf32>
    %17 = arith.truncf %16 : vector<8x32xf32> to vector<8x32xbf16>
    %cst_17 = arith.constant dense<0.000000e+00> : vector<8x384xf32>
    %18 = tpu.matmul %17, %0, %cst_17 {dimension_numbers = #tpu.dot_dimension_numbers<[1], [0], [0], [1], [0, 0, 1, 1], [], []>} : vector<8x32xbf16>, vector<32x384xbf16>, vector<8x384xf32> -> vector<8x384xf32>
    %19 = arith.truncf %10 : vector<8x128xf32> to vector<8x128xbf16>
    %cst_18 = arith.constant dense<0.000000e+00> : vector<8x384xf32>
    %20 = tpu.matmul %19, %1, %cst_18 {dimension_numbers = #tpu.dot_dimension_numbers<[1], [0], [0], [1], [0, 0, 1, 1], [], []>} : vector<8x128xbf16>, vector<128x384xbf16>, vector<8x384xf32> -> vector<8x384xf32>
    %21 = vector.extract_strided_slice %18 {offsets = [0, 0], sizes = [8, 128], strides = [1, 1]} : vector<8x384xf32> to vector<8x128xf32>
    %22 = vector.extract_strided_slice %20 {offsets = [0, 0], sizes = [8, 128], strides = [1, 1]} : vector<8x384xf32> to vector<8x128xf32>
    %23 = arith.addf %21, %22 : vector<8x128xf32>
    %24 = arith.negf %23 : vector<8x128xf32>
    %25 = math.exp %24 : vector<8x128xf32>
    %cst_19 = arith.constant 1.000000e+00 : f32
    %26 = vector.broadcast %cst_19 : f32 to vector<8x128xf32>
    %27 = arith.addf %26, %25 : vector<8x128xf32>
    %28 = arith.divf %26, %27 : vector<8x128xf32>
    %29 = vector.extract_strided_slice %18 {offsets = [0, 128], sizes = [8, 128], strides = [1, 1]} : vector<8x384xf32> to vector<8x128xf32>
    %30 = vector.extract_strided_slice %20 {offsets = [0, 128], sizes = [8, 128], strides = [1, 1]} : vector<8x384xf32> to vector<8x128xf32>
    %31 = arith.addf %29, %30 : vector<8x128xf32>
    %32 = arith.negf %31 : vector<8x128xf32>
    %33 = math.exp %32 : vector<8x128xf32>
    %cst_20 = arith.constant 1.000000e+00 : f32
    %34 = vector.broadcast %cst_20 : f32 to vector<8x128xf32>
    %35 = arith.addf %34, %33 : vector<8x128xf32>
    %36 = arith.divf %34, %35 : vector<8x128xf32>
    %37 = vector.extract_strided_slice %18 {offsets = [0, 256], sizes = [8, 128], strides = [1, 1]} : vector<8x384xf32> to vector<8x128xf32>
    %38 = vector.extract_strided_slice %20 {offsets = [0, 256], sizes = [8, 128], strides = [1, 1]} : vector<8x384xf32> to vector<8x128xf32>
    %39 = vector.broadcast %2 : vector<1x128xf32> to vector<8x128xf32>
    %40 = arith.addf %38, %39 : vector<8x128xf32>
    %41 = arith.mulf %28, %40 : vector<8x128xf32>
    %42 = arith.addf %37, %41 : vector<8x128xf32>
    %43 = math.tanh %42 : vector<8x128xf32>
    %cst_21 = arith.constant 1.000000e+00 : f32
    %44 = vector.broadcast %cst_21 : f32 to vector<8x128xf32>
    %45 = arith.subf %44, %36 : vector<8x128xf32>
    %46 = arith.mulf %45, %43 : vector<8x128xf32>
    %47 = arith.mulf %36, %10 : vector<8x128xf32>
    %48 = arith.addf %46, %47 : vector<8x128xf32>
    %49 = vector.extract_strided_slice %8 {offsets = [0, 1], sizes = [8, 1], strides = [1, 1]} : vector<8x16xi32> to vector<8x1xi32>
    %50 = vector.broadcast %49 : vector<8x1xi32> to vector<8x32xi32>
    %51 = vector.broadcast %9 : vector<1x32xi32> to vector<8x32xi32>
    %52 = arith.cmpi eq, %50, %51 : vector<8x32xi32>
    %53 = arith.extui %52 : vector<8x32xi1> to vector<8x32xi32>
    %54 = arith.sitofp %53 : vector<8x32xi32> to vector<8x32xf32>
    %55 = arith.truncf %54 : vector<8x32xf32> to vector<8x32xbf16>
    %cst_22 = arith.constant dense<0.000000e+00> : vector<8x384xf32>
    %56 = tpu.matmul %55, %0, %cst_22 {dimension_numbers = #tpu.dot_dimension_numbers<[1], [0], [0], [1], [0, 0, 1, 1], [], []>} : vector<8x32xbf16>, vector<32x384xbf16>, vector<8x384xf32> -> vector<8x384xf32>
    %57 = arith.truncf %48 : vector<8x128xf32> to vector<8x128xbf16>
    %cst_23 = arith.constant dense<0.000000e+00> : vector<8x384xf32>
    %58 = tpu.matmul %57, %1, %cst_23 {dimension_numbers = #tpu.dot_dimension_numbers<[1], [0], [0], [1], [0, 0, 1, 1], [], []>} : vector<8x128xbf16>, vector<128x384xbf16>, vector<8x384xf32> -> vector<8x384xf32>
    %59 = vector.extract_strided_slice %56 {offsets = [0, 0], sizes = [8, 128], strides = [1, 1]} : vector<8x384xf32> to vector<8x128xf32>
    %60 = vector.extract_strided_slice %58 {offsets = [0, 0], sizes = [8, 128], strides = [1, 1]} : vector<8x384xf32> to vector<8x128xf32>
    %61 = arith.addf %59, %60 : vector<8x128xf32>
    %62 = arith.negf %61 : vector<8x128xf32>
    %63 = math.exp %62 : vector<8x128xf32>
    %cst_24 = arith.constant 1.000000e+00 : f32
    %64 = vector.broadcast %cst_24 : f32 to vector<8x128xf32>
    %65 = arith.addf %64, %63 : vector<8x128xf32>
    %66 = arith.divf %64, %65 : vector<8x128xf32>
    %67 = vector.extract_strided_slice %56 {offsets = [0, 128], sizes = [8, 128], strides = [1, 1]} : vector<8x384xf32> to vector<8x128xf32>
    %68 = vector.extract_strided_slice %58 {offsets = [0, 128], sizes = [8, 128], strides = [1, 1]} : vector<8x384xf32> to vector<8x128xf32>
    %69 = arith.addf %67, %68 : vector<8x128xf32>
    %70 = arith.negf %69 : vector<8x128xf32>
    %71 = math.exp %70 : vector<8x128xf32>
    %cst_25 = arith.constant 1.000000e+00 : f32
    %72 = vector.broadcast %cst_25 : f32 to vector<8x128xf32>
    %73 = arith.addf %72, %71 : vector<8x128xf32>
    %74 = arith.divf %72, %73 : vector<8x128xf32>
    %75 = vector.extract_strided_slice %56 {offsets = [0, 256], sizes = [8, 128], strides = [1, 1]} : vector<8x384xf32> to vector<8x128xf32>
    %76 = vector.extract_strided_slice %58 {offsets = [0, 256], sizes = [8, 128], strides = [1, 1]} : vector<8x384xf32> to vector<8x128xf32>
    %77 = vector.broadcast %2 : vector<1x128xf32> to vector<8x128xf32>
    %78 = arith.addf %76, %77 : vector<8x128xf32>
    %79 = arith.mulf %66, %78 : vector<8x128xf32>
    %80 = arith.addf %75, %79 : vector<8x128xf32>
    %81 = math.tanh %80 : vector<8x128xf32>
    %cst_26 = arith.constant 1.000000e+00 : f32
    %82 = vector.broadcast %cst_26 : f32 to vector<8x128xf32>
    %83 = arith.subf %82, %74 : vector<8x128xf32>
    %84 = arith.mulf %83, %81 : vector<8x128xf32>
    %85 = arith.mulf %74, %48 : vector<8x128xf32>
    %86 = arith.addf %84, %85 : vector<8x128xf32>
    %87 = vector.extract_strided_slice %8 {offsets = [0, 2], sizes = [8, 1], strides = [1, 1]} : vector<8x16xi32> to vector<8x1xi32>
    %88 = vector.broadcast %87 : vector<8x1xi32> to vector<8x32xi32>
    %89 = vector.broadcast %9 : vector<1x32xi32> to vector<8x32xi32>
    %90 = arith.cmpi eq, %88, %89 : vector<8x32xi32>
    %91 = arith.extui %90 : vector<8x32xi1> to vector<8x32xi32>
    %92 = arith.sitofp %91 : vector<8x32xi32> to vector<8x32xf32>
    %93 = arith.truncf %92 : vector<8x32xf32> to vector<8x32xbf16>
    %cst_27 = arith.constant dense<0.000000e+00> : vector<8x384xf32>
    %94 = tpu.matmul %93, %0, %cst_27 {dimension_numbers = #tpu.dot_dimension_numbers<[1], [0], [0], [1], [0, 0, 1, 1], [], []>} : vector<8x32xbf16>, vector<32x384xbf16>, vector<8x384xf32> -> vector<8x384xf32>
    %95 = arith.truncf %86 : vector<8x128xf32> to vector<8x128xbf16>
    %cst_28 = arith.constant dense<0.000000e+00> : vector<8x384xf32>
    %96 = tpu.matmul %95, %1, %cst_28 {dimension_numbers = #tpu.dot_dimension_numbers<[1], [0], [0], [1], [0, 0, 1, 1], [], []>} : vector<8x128xbf16>, vector<128x384xbf16>, vector<8x384xf32> -> vector<8x384xf32>
    %97 = vector.extract_strided_slice %94 {offsets = [0, 0], sizes = [8, 128], strides = [1, 1]} : vector<8x384xf32> to vector<8x128xf32>
    %98 = vector.extract_strided_slice %96 {offsets = [0, 0], sizes = [8, 128], strides = [1, 1]} : vector<8x384xf32> to vector<8x128xf32>
    %99 = arith.addf %97, %98 : vector<8x128xf32>
    %100 = arith.negf %99 : vector<8x128xf32>
    %101 = math.exp %100 : vector<8x128xf32>
    %cst_29 = arith.constant 1.000000e+00 : f32
    %102 = vector.broadcast %cst_29 : f32 to vector<8x128xf32>
    %103 = arith.addf %102, %101 : vector<8x128xf32>
    %104 = arith.divf %102, %103 : vector<8x128xf32>
    %105 = vector.extract_strided_slice %94 {offsets = [0, 128], sizes = [8, 128], strides = [1, 1]} : vector<8x384xf32> to vector<8x128xf32>
    %106 = vector.extract_strided_slice %96 {offsets = [0, 128], sizes = [8, 128], strides = [1, 1]} : vector<8x384xf32> to vector<8x128xf32>
    %107 = arith.addf %105, %106 : vector<8x128xf32>
    %108 = arith.negf %107 : vector<8x128xf32>
    %109 = math.exp %108 : vector<8x128xf32>
    %cst_30 = arith.constant 1.000000e+00 : f32
    %110 = vector.broadcast %cst_30 : f32 to vector<8x128xf32>
    %111 = arith.addf %110, %109 : vector<8x128xf32>
    %112 = arith.divf %110, %111 : vector<8x128xf32>
    %113 = vector.extract_strided_slice %94 {offsets = [0, 256], sizes = [8, 128], strides = [1, 1]} : vector<8x384xf32> to vector<8x128xf32>
    %114 = vector.extract_strided_slice %96 {offsets = [0, 256], sizes = [8, 128], strides = [1, 1]} : vector<8x384xf32> to vector<8x128xf32>
    %115 = vector.broadcast %2 : vector<1x128xf32> to vector<8x128xf32>
    %116 = arith.addf %114, %115 : vector<8x128xf32>
    %117 = arith.mulf %104, %116 : vector<8x128xf32>
    %118 = arith.addf %113, %117 : vector<8x128xf32>
    %119 = math.tanh %118 : vector<8x128xf32>
    %cst_31 = arith.constant 1.000000e+00 : f32
    %120 = vector.broadcast %cst_31 : f32 to vector<8x128xf32>
    %121 = arith.subf %120, %112 : vector<8x128xf32>
    %122 = arith.mulf %121, %119 : vector<8x128xf32>
    %123 = arith.mulf %112, %86 : vector<8x128xf32>
    %124 = arith.addf %122, %123 : vector<8x128xf32>
    %125 = vector.extract_strided_slice %8 {offsets = [0, 3], sizes = [8, 1], strides = [1, 1]} : vector<8x16xi32> to vector<8x1xi32>
    %126 = vector.broadcast %125 : vector<8x1xi32> to vector<8x32xi32>
    %127 = vector.broadcast %9 : vector<1x32xi32> to vector<8x32xi32>
    %128 = arith.cmpi eq, %126, %127 : vector<8x32xi32>
    %129 = arith.extui %128 : vector<8x32xi1> to vector<8x32xi32>
    %130 = arith.sitofp %129 : vector<8x32xi32> to vector<8x32xf32>
    %131 = arith.truncf %130 : vector<8x32xf32> to vector<8x32xbf16>
    %cst_32 = arith.constant dense<0.000000e+00> : vector<8x384xf32>
    %132 = tpu.matmul %131, %0, %cst_32 {dimension_numbers = #tpu.dot_dimension_numbers<[1], [0], [0], [1], [0, 0, 1, 1], [], []>} : vector<8x32xbf16>, vector<32x384xbf16>, vector<8x384xf32> -> vector<8x384xf32>
    %133 = arith.truncf %124 : vector<8x128xf32> to vector<8x128xbf16>
    %cst_33 = arith.constant dense<0.000000e+00> : vector<8x384xf32>
    %134 = tpu.matmul %133, %1, %cst_33 {dimension_numbers = #tpu.dot_dimension_numbers<[1], [0], [0], [1], [0, 0, 1, 1], [], []>} : vector<8x128xbf16>, vector<128x384xbf16>, vector<8x384xf32> -> vector<8x384xf32>
    %135 = vector.extract_strided_slice %132 {offsets = [0, 0], sizes = [8, 128], strides = [1, 1]} : vector<8x384xf32> to vector<8x128xf32>
    %136 = vector.extract_strided_slice %134 {offsets = [0, 0], sizes = [8, 128], strides = [1, 1]} : vector<8x384xf32> to vector<8x128xf32>
    %137 = arith.addf %135, %136 : vector<8x128xf32>
    %138 = arith.negf %137 : vector<8x128xf32>
    %139 = math.exp %138 : vector<8x128xf32>
    %cst_34 = arith.constant 1.000000e+00 : f32
    %140 = vector.broadcast %cst_34 : f32 to vector<8x128xf32>
    %141 = arith.addf %140, %139 : vector<8x128xf32>
    %142 = arith.divf %140, %141 : vector<8x128xf32>
    %143 = vector.extract_strided_slice %132 {offsets = [0, 128], sizes = [8, 128], strides = [1, 1]} : vector<8x384xf32> to vector<8x128xf32>
    %144 = vector.extract_strided_slice %134 {offsets = [0, 128], sizes = [8, 128], strides = [1, 1]} : vector<8x384xf32> to vector<8x128xf32>
    %145 = arith.addf %143, %144 : vector<8x128xf32>
    %146 = arith.negf %145 : vector<8x128xf32>
    %147 = math.exp %146 : vector<8x128xf32>
    %cst_35 = arith.constant 1.000000e+00 : f32
    %148 = vector.broadcast %cst_35 : f32 to vector<8x128xf32>
    %149 = arith.addf %148, %147 : vector<8x128xf32>
    %150 = arith.divf %148, %149 : vector<8x128xf32>
    %151 = vector.extract_strided_slice %132 {offsets = [0, 256], sizes = [8, 128], strides = [1, 1]} : vector<8x384xf32> to vector<8x128xf32>
    %152 = vector.extract_strided_slice %134 {offsets = [0, 256], sizes = [8, 128], strides = [1, 1]} : vector<8x384xf32> to vector<8x128xf32>
    %153 = vector.broadcast %2 : vector<1x128xf32> to vector<8x128xf32>
    %154 = arith.addf %152, %153 : vector<8x128xf32>
    %155 = arith.mulf %142, %154 : vector<8x128xf32>
    %156 = arith.addf %151, %155 : vector<8x128xf32>
    %157 = math.tanh %156 : vector<8x128xf32>
    %cst_36 = arith.constant 1.000000e+00 : f32
    %158 = vector.broadcast %cst_36 : f32 to vector<8x128xf32>
    %159 = arith.subf %158, %150 : vector<8x128xf32>
    %160 = arith.mulf %159, %157 : vector<8x128xf32>
    %161 = arith.mulf %150, %124 : vector<8x128xf32>
    %162 = arith.addf %160, %161 : vector<8x128xf32>
    %163 = vector.extract_strided_slice %8 {offsets = [0, 4], sizes = [8, 1], strides = [1, 1]} : vector<8x16xi32> to vector<8x1xi32>
    %164 = vector.broadcast %163 : vector<8x1xi32> to vector<8x32xi32>
    %165 = vector.broadcast %9 : vector<1x32xi32> to vector<8x32xi32>
    %166 = arith.cmpi eq, %164, %165 : vector<8x32xi32>
    %167 = arith.extui %166 : vector<8x32xi1> to vector<8x32xi32>
    %168 = arith.sitofp %167 : vector<8x32xi32> to vector<8x32xf32>
    %169 = arith.truncf %168 : vector<8x32xf32> to vector<8x32xbf16>
    %cst_37 = arith.constant dense<0.000000e+00> : vector<8x384xf32>
    %170 = tpu.matmul %169, %0, %cst_37 {dimension_numbers = #tpu.dot_dimension_numbers<[1], [0], [0], [1], [0, 0, 1, 1], [], []>} : vector<8x32xbf16>, vector<32x384xbf16>, vector<8x384xf32> -> vector<8x384xf32>
    %171 = arith.truncf %162 : vector<8x128xf32> to vector<8x128xbf16>
    %cst_38 = arith.constant dense<0.000000e+00> : vector<8x384xf32>
    %172 = tpu.matmul %171, %1, %cst_38 {dimension_numbers = #tpu.dot_dimension_numbers<[1], [0], [0], [1], [0, 0, 1, 1], [], []>} : vector<8x128xbf16>, vector<128x384xbf16>, vector<8x384xf32> -> vector<8x384xf32>
    %173 = vector.extract_strided_slice %170 {offsets = [0, 0], sizes = [8, 128], strides = [1, 1]} : vector<8x384xf32> to vector<8x128xf32>
    %174 = vector.extract_strided_slice %172 {offsets = [0, 0], sizes = [8, 128], strides = [1, 1]} : vector<8x384xf32> to vector<8x128xf32>
    %175 = arith.addf %173, %174 : vector<8x128xf32>
    %176 = arith.negf %175 : vector<8x128xf32>
    %177 = math.exp %176 : vector<8x128xf32>
    %cst_39 = arith.constant 1.000000e+00 : f32
    %178 = vector.broadcast %cst_39 : f32 to vector<8x128xf32>
    %179 = arith.addf %178, %177 : vector<8x128xf32>
    %180 = arith.divf %178, %179 : vector<8x128xf32>
    %181 = vector.extract_strided_slice %170 {offsets = [0, 128], sizes = [8, 128], strides = [1, 1]} : vector<8x384xf32> to vector<8x128xf32>
    %182 = vector.extract_strided_slice %172 {offsets = [0, 128], sizes = [8, 128], strides = [1, 1]} : vector<8x384xf32> to vector<8x128xf32>
    %183 = arith.addf %181, %182 : vector<8x128xf32>
    %184 = arith.negf %183 : vector<8x128xf32>
    %185 = math.exp %184 : vector<8x128xf32>
    %cst_40 = arith.constant 1.000000e+00 : f32
    %186 = vector.broadcast %cst_40 : f32 to vector<8x128xf32>
    %187 = arith.addf %186, %185 : vector<8x128xf32>
    %188 = arith.divf %186, %187 : vector<8x128xf32>
    %189 = vector.extract_strided_slice %170 {offsets = [0, 256], sizes = [8, 128], strides = [1, 1]} : vector<8x384xf32> to vector<8x128xf32>
    %190 = vector.extract_strided_slice %172 {offsets = [0, 256], sizes = [8, 128], strides = [1, 1]} : vector<8x384xf32> to vector<8x128xf32>
    %191 = vector.broadcast %2 : vector<1x128xf32> to vector<8x128xf32>
    %192 = arith.addf %190, %191 : vector<8x128xf32>
    %193 = arith.mulf %180, %192 : vector<8x128xf32>
    %194 = arith.addf %189, %193 : vector<8x128xf32>
    %195 = math.tanh %194 : vector<8x128xf32>
    %cst_41 = arith.constant 1.000000e+00 : f32
    %196 = vector.broadcast %cst_41 : f32 to vector<8x128xf32>
    %197 = arith.subf %196, %188 : vector<8x128xf32>
    %198 = arith.mulf %197, %195 : vector<8x128xf32>
    %199 = arith.mulf %188, %162 : vector<8x128xf32>
    %200 = arith.addf %198, %199 : vector<8x128xf32>
    %201 = vector.extract_strided_slice %8 {offsets = [0, 5], sizes = [8, 1], strides = [1, 1]} : vector<8x16xi32> to vector<8x1xi32>
    %202 = vector.broadcast %201 : vector<8x1xi32> to vector<8x32xi32>
    %203 = vector.broadcast %9 : vector<1x32xi32> to vector<8x32xi32>
    %204 = arith.cmpi eq, %202, %203 : vector<8x32xi32>
    %205 = arith.extui %204 : vector<8x32xi1> to vector<8x32xi32>
    %206 = arith.sitofp %205 : vector<8x32xi32> to vector<8x32xf32>
    %207 = arith.truncf %206 : vector<8x32xf32> to vector<8x32xbf16>
    %cst_42 = arith.constant dense<0.000000e+00> : vector<8x384xf32>
    %208 = tpu.matmul %207, %0, %cst_42 {dimension_numbers = #tpu.dot_dimension_numbers<[1], [0], [0], [1], [0, 0, 1, 1], [], []>} : vector<8x32xbf16>, vector<32x384xbf16>, vector<8x384xf32> -> vector<8x384xf32>
    %209 = arith.truncf %200 : vector<8x128xf32> to vector<8x128xbf16>
    %cst_43 = arith.constant dense<0.000000e+00> : vector<8x384xf32>
    %210 = tpu.matmul %209, %1, %cst_43 {dimension_numbers = #tpu.dot_dimension_numbers<[1], [0], [0], [1], [0, 0, 1, 1], [], []>} : vector<8x128xbf16>, vector<128x384xbf16>, vector<8x384xf32> -> vector<8x384xf32>
    %211 = vector.extract_strided_slice %208 {offsets = [0, 0], sizes = [8, 128], strides = [1, 1]} : vector<8x384xf32> to vector<8x128xf32>
    %212 = vector.extract_strided_slice %210 {offsets = [0, 0], sizes = [8, 128], strides = [1, 1]} : vector<8x384xf32> to vector<8x128xf32>
    %213 = arith.addf %211, %212 : vector<8x128xf32>
    %214 = arith.negf %213 : vector<8x128xf32>
    %215 = math.exp %214 : vector<8x128xf32>
    %cst_44 = arith.constant 1.000000e+00 : f32
    %216 = vector.broadcast %cst_44 : f32 to vector<8x128xf32>
    %217 = arith.addf %216, %215 : vector<8x128xf32>
    %218 = arith.divf %216, %217 : vector<8x128xf32>
    %219 = vector.extract_strided_slice %208 {offsets = [0, 128], sizes = [8, 128], strides = [1, 1]} : vector<8x384xf32> to vector<8x128xf32>
    %220 = vector.extract_strided_slice %210 {offsets = [0, 128], sizes = [8, 128], strides = [1, 1]} : vector<8x384xf32> to vector<8x128xf32>
    %221 = arith.addf %219, %220 : vector<8x128xf32>
    %222 = arith.negf %221 : vector<8x128xf32>
    %223 = math.exp %222 : vector<8x128xf32>
    %cst_45 = arith.constant 1.000000e+00 : f32
    %224 = vector.broadcast %cst_45 : f32 to vector<8x128xf32>
    %225 = arith.addf %224, %223 : vector<8x128xf32>
    %226 = arith.divf %224, %225 : vector<8x128xf32>
    %227 = vector.extract_strided_slice %208 {offsets = [0, 256], sizes = [8, 128], strides = [1, 1]} : vector<8x384xf32> to vector<8x128xf32>
    %228 = vector.extract_strided_slice %210 {offsets = [0, 256], sizes = [8, 128], strides = [1, 1]} : vector<8x384xf32> to vector<8x128xf32>
    %229 = vector.broadcast %2 : vector<1x128xf32> to vector<8x128xf32>
    %230 = arith.addf %228, %229 : vector<8x128xf32>
    %231 = arith.mulf %218, %230 : vector<8x128xf32>
    %232 = arith.addf %227, %231 : vector<8x128xf32>
    %233 = math.tanh %232 : vector<8x128xf32>
    %cst_46 = arith.constant 1.000000e+00 : f32
    %234 = vector.broadcast %cst_46 : f32 to vector<8x128xf32>
    %235 = arith.subf %234, %226 : vector<8x128xf32>
    %236 = arith.mulf %235, %233 : vector<8x128xf32>
    %237 = arith.mulf %226, %200 : vector<8x128xf32>
    %238 = arith.addf %236, %237 : vector<8x128xf32>
    %239 = vector.extract_strided_slice %8 {offsets = [0, 6], sizes = [8, 1], strides = [1, 1]} : vector<8x16xi32> to vector<8x1xi32>
    %240 = vector.broadcast %239 : vector<8x1xi32> to vector<8x32xi32>
    %241 = vector.broadcast %9 : vector<1x32xi32> to vector<8x32xi32>
    %242 = arith.cmpi eq, %240, %241 : vector<8x32xi32>
    %243 = arith.extui %242 : vector<8x32xi1> to vector<8x32xi32>
    %244 = arith.sitofp %243 : vector<8x32xi32> to vector<8x32xf32>
    %245 = arith.truncf %244 : vector<8x32xf32> to vector<8x32xbf16>
    %cst_47 = arith.constant dense<0.000000e+00> : vector<8x384xf32>
    %246 = tpu.matmul %245, %0, %cst_47 {dimension_numbers = #tpu.dot_dimension_numbers<[1], [0], [0], [1], [0, 0, 1, 1], [], []>} : vector<8x32xbf16>, vector<32x384xbf16>, vector<8x384xf32> -> vector<8x384xf32>
    %247 = arith.truncf %238 : vector<8x128xf32> to vector<8x128xbf16>
    %cst_48 = arith.constant dense<0.000000e+00> : vector<8x384xf32>
    %248 = tpu.matmul %247, %1, %cst_48 {dimension_numbers = #tpu.dot_dimension_numbers<[1], [0], [0], [1], [0, 0, 1, 1], [], []>} : vector<8x128xbf16>, vector<128x384xbf16>, vector<8x384xf32> -> vector<8x384xf32>
    %249 = vector.extract_strided_slice %246 {offsets = [0, 0], sizes = [8, 128], strides = [1, 1]} : vector<8x384xf32> to vector<8x128xf32>
    %250 = vector.extract_strided_slice %248 {offsets = [0, 0], sizes = [8, 128], strides = [1, 1]} : vector<8x384xf32> to vector<8x128xf32>
    %251 = arith.addf %249, %250 : vector<8x128xf32>
    %252 = arith.negf %251 : vector<8x128xf32>
    %253 = math.exp %252 : vector<8x128xf32>
    %cst_49 = arith.constant 1.000000e+00 : f32
    %254 = vector.broadcast %cst_49 : f32 to vector<8x128xf32>
    %255 = arith.addf %254, %253 : vector<8x128xf32>
    %256 = arith.divf %254, %255 : vector<8x128xf32>
    %257 = vector.extract_strided_slice %246 {offsets = [0, 128], sizes = [8, 128], strides = [1, 1]} : vector<8x384xf32> to vector<8x128xf32>
    %258 = vector.extract_strided_slice %248 {offsets = [0, 128], sizes = [8, 128], strides = [1, 1]} : vector<8x384xf32> to vector<8x128xf32>
    %259 = arith.addf %257, %258 : vector<8x128xf32>
    %260 = arith.negf %259 : vector<8x128xf32>
    %261 = math.exp %260 : vector<8x128xf32>
    %cst_50 = arith.constant 1.000000e+00 : f32
    %262 = vector.broadcast %cst_50 : f32 to vector<8x128xf32>
    %263 = arith.addf %262, %261 : vector<8x128xf32>
    %264 = arith.divf %262, %263 : vector<8x128xf32>
    %265 = vector.extract_strided_slice %246 {offsets = [0, 256], sizes = [8, 128], strides = [1, 1]} : vector<8x384xf32> to vector<8x128xf32>
    %266 = vector.extract_strided_slice %248 {offsets = [0, 256], sizes = [8, 128], strides = [1, 1]} : vector<8x384xf32> to vector<8x128xf32>
    %267 = vector.broadcast %2 : vector<1x128xf32> to vector<8x128xf32>
    %268 = arith.addf %266, %267 : vector<8x128xf32>
    %269 = arith.mulf %256, %268 : vector<8x128xf32>
    %270 = arith.addf %265, %269 : vector<8x128xf32>
    %271 = math.tanh %270 : vector<8x128xf32>
    %cst_51 = arith.constant 1.000000e+00 : f32
    %272 = vector.broadcast %cst_51 : f32 to vector<8x128xf32>
    %273 = arith.subf %272, %264 : vector<8x128xf32>
    %274 = arith.mulf %273, %271 : vector<8x128xf32>
    %275 = arith.mulf %264, %238 : vector<8x128xf32>
    %276 = arith.addf %274, %275 : vector<8x128xf32>
    %277 = vector.extract_strided_slice %8 {offsets = [0, 7], sizes = [8, 1], strides = [1, 1]} : vector<8x16xi32> to vector<8x1xi32>
    %278 = vector.broadcast %277 : vector<8x1xi32> to vector<8x32xi32>
    %279 = vector.broadcast %9 : vector<1x32xi32> to vector<8x32xi32>
    %280 = arith.cmpi eq, %278, %279 : vector<8x32xi32>
    %281 = arith.extui %280 : vector<8x32xi1> to vector<8x32xi32>
    %282 = arith.sitofp %281 : vector<8x32xi32> to vector<8x32xf32>
    %283 = arith.truncf %282 : vector<8x32xf32> to vector<8x32xbf16>
    %cst_52 = arith.constant dense<0.000000e+00> : vector<8x384xf32>
    %284 = tpu.matmul %283, %0, %cst_52 {dimension_numbers = #tpu.dot_dimension_numbers<[1], [0], [0], [1], [0, 0, 1, 1], [], []>} : vector<8x32xbf16>, vector<32x384xbf16>, vector<8x384xf32> -> vector<8x384xf32>
    %285 = arith.truncf %276 : vector<8x128xf32> to vector<8x128xbf16>
    %cst_53 = arith.constant dense<0.000000e+00> : vector<8x384xf32>
    %286 = tpu.matmul %285, %1, %cst_53 {dimension_numbers = #tpu.dot_dimension_numbers<[1], [0], [0], [1], [0, 0, 1, 1], [], []>} : vector<8x128xbf16>, vector<128x384xbf16>, vector<8x384xf32> -> vector<8x384xf32>
    %287 = vector.extract_strided_slice %284 {offsets = [0, 0], sizes = [8, 128], strides = [1, 1]} : vector<8x384xf32> to vector<8x128xf32>
    %288 = vector.extract_strided_slice %286 {offsets = [0, 0], sizes = [8, 128], strides = [1, 1]} : vector<8x384xf32> to vector<8x128xf32>
    %289 = arith.addf %287, %288 : vector<8x128xf32>
    %290 = arith.negf %289 : vector<8x128xf32>
    %291 = math.exp %290 : vector<8x128xf32>
    %cst_54 = arith.constant 1.000000e+00 : f32
    %292 = vector.broadcast %cst_54 : f32 to vector<8x128xf32>
    %293 = arith.addf %292, %291 : vector<8x128xf32>
    %294 = arith.divf %292, %293 : vector<8x128xf32>
    %295 = vector.extract_strided_slice %284 {offsets = [0, 128], sizes = [8, 128], strides = [1, 1]} : vector<8x384xf32> to vector<8x128xf32>
    %296 = vector.extract_strided_slice %286 {offsets = [0, 128], sizes = [8, 128], strides = [1, 1]} : vector<8x384xf32> to vector<8x128xf32>
    %297 = arith.addf %295, %296 : vector<8x128xf32>
    %298 = arith.negf %297 : vector<8x128xf32>
    %299 = math.exp %298 : vector<8x128xf32>
    %cst_55 = arith.constant 1.000000e+00 : f32
    %300 = vector.broadcast %cst_55 : f32 to vector<8x128xf32>
    %301 = arith.addf %300, %299 : vector<8x128xf32>
    %302 = arith.divf %300, %301 : vector<8x128xf32>
    %303 = vector.extract_strided_slice %284 {offsets = [0, 256], sizes = [8, 128], strides = [1, 1]} : vector<8x384xf32> to vector<8x128xf32>
    %304 = vector.extract_strided_slice %286 {offsets = [0, 256], sizes = [8, 128], strides = [1, 1]} : vector<8x384xf32> to vector<8x128xf32>
    %305 = vector.broadcast %2 : vector<1x128xf32> to vector<8x128xf32>
    %306 = arith.addf %304, %305 : vector<8x128xf32>
    %307 = arith.mulf %294, %306 : vector<8x128xf32>
    %308 = arith.addf %303, %307 : vector<8x128xf32>
    %309 = math.tanh %308 : vector<8x128xf32>
    %cst_56 = arith.constant 1.000000e+00 : f32
    %310 = vector.broadcast %cst_56 : f32 to vector<8x128xf32>
    %311 = arith.subf %310, %302 : vector<8x128xf32>
    %312 = arith.mulf %311, %309 : vector<8x128xf32>
    %313 = arith.mulf %302, %276 : vector<8x128xf32>
    %314 = arith.addf %312, %313 : vector<8x128xf32>
    %315 = vector.extract_strided_slice %8 {offsets = [0, 8], sizes = [8, 1], strides = [1, 1]} : vector<8x16xi32> to vector<8x1xi32>
    %316 = vector.broadcast %315 : vector<8x1xi32> to vector<8x32xi32>
    %317 = vector.broadcast %9 : vector<1x32xi32> to vector<8x32xi32>
    %318 = arith.cmpi eq, %316, %317 : vector<8x32xi32>
    %319 = arith.extui %318 : vector<8x32xi1> to vector<8x32xi32>
    %320 = arith.sitofp %319 : vector<8x32xi32> to vector<8x32xf32>
    %321 = arith.truncf %320 : vector<8x32xf32> to vector<8x32xbf16>
    %cst_57 = arith.constant dense<0.000000e+00> : vector<8x384xf32>
    %322 = tpu.matmul %321, %0, %cst_57 {dimension_numbers = #tpu.dot_dimension_numbers<[1], [0], [0], [1], [0, 0, 1, 1], [], []>} : vector<8x32xbf16>, vector<32x384xbf16>, vector<8x384xf32> -> vector<8x384xf32>
    %323 = arith.truncf %314 : vector<8x128xf32> to vector<8x128xbf16>
    %cst_58 = arith.constant dense<0.000000e+00> : vector<8x384xf32>
    %324 = tpu.matmul %323, %1, %cst_58 {dimension_numbers = #tpu.dot_dimension_numbers<[1], [0], [0], [1], [0, 0, 1, 1], [], []>} : vector<8x128xbf16>, vector<128x384xbf16>, vector<8x384xf32> -> vector<8x384xf32>
    %325 = vector.extract_strided_slice %322 {offsets = [0, 0], sizes = [8, 128], strides = [1, 1]} : vector<8x384xf32> to vector<8x128xf32>
    %326 = vector.extract_strided_slice %324 {offsets = [0, 0], sizes = [8, 128], strides = [1, 1]} : vector<8x384xf32> to vector<8x128xf32>
    %327 = arith.addf %325, %326 : vector<8x128xf32>
    %328 = arith.negf %327 : vector<8x128xf32>
    %329 = math.exp %328 : vector<8x128xf32>
    %cst_59 = arith.constant 1.000000e+00 : f32
    %330 = vector.broadcast %cst_59 : f32 to vector<8x128xf32>
    %331 = arith.addf %330, %329 : vector<8x128xf32>
    %332 = arith.divf %330, %331 : vector<8x128xf32>
    %333 = vector.extract_strided_slice %322 {offsets = [0, 128], sizes = [8, 128], strides = [1, 1]} : vector<8x384xf32> to vector<8x128xf32>
    %334 = vector.extract_strided_slice %324 {offsets = [0, 128], sizes = [8, 128], strides = [1, 1]} : vector<8x384xf32> to vector<8x128xf32>
    %335 = arith.addf %333, %334 : vector<8x128xf32>
    %336 = arith.negf %335 : vector<8x128xf32>
    %337 = math.exp %336 : vector<8x128xf32>
    %cst_60 = arith.constant 1.000000e+00 : f32
    %338 = vector.broadcast %cst_60 : f32 to vector<8x128xf32>
    %339 = arith.addf %338, %337 : vector<8x128xf32>
    %340 = arith.divf %338, %339 : vector<8x128xf32>
    %341 = vector.extract_strided_slice %322 {offsets = [0, 256], sizes = [8, 128], strides = [1, 1]} : vector<8x384xf32> to vector<8x128xf32>
    %342 = vector.extract_strided_slice %324 {offsets = [0, 256], sizes = [8, 128], strides = [1, 1]} : vector<8x384xf32> to vector<8x128xf32>
    %343 = vector.broadcast %2 : vector<1x128xf32> to vector<8x128xf32>
    %344 = arith.addf %342, %343 : vector<8x128xf32>
    %345 = arith.mulf %332, %344 : vector<8x128xf32>
    %346 = arith.addf %341, %345 : vector<8x128xf32>
    %347 = math.tanh %346 : vector<8x128xf32>
    %cst_61 = arith.constant 1.000000e+00 : f32
    %348 = vector.broadcast %cst_61 : f32 to vector<8x128xf32>
    %349 = arith.subf %348, %340 : vector<8x128xf32>
    %350 = arith.mulf %349, %347 : vector<8x128xf32>
    %351 = arith.mulf %340, %314 : vector<8x128xf32>
    %352 = arith.addf %350, %351 : vector<8x128xf32>
    %353 = vector.extract_strided_slice %8 {offsets = [0, 9], sizes = [8, 1], strides = [1, 1]} : vector<8x16xi32> to vector<8x1xi32>
    %354 = vector.broadcast %353 : vector<8x1xi32> to vector<8x32xi32>
    %355 = vector.broadcast %9 : vector<1x32xi32> to vector<8x32xi32>
    %356 = arith.cmpi eq, %354, %355 : vector<8x32xi32>
    %357 = arith.extui %356 : vector<8x32xi1> to vector<8x32xi32>
    %358 = arith.sitofp %357 : vector<8x32xi32> to vector<8x32xf32>
    %359 = arith.truncf %358 : vector<8x32xf32> to vector<8x32xbf16>
    %cst_62 = arith.constant dense<0.000000e+00> : vector<8x384xf32>
    %360 = tpu.matmul %359, %0, %cst_62 {dimension_numbers = #tpu.dot_dimension_numbers<[1], [0], [0], [1], [0, 0, 1, 1], [], []>} : vector<8x32xbf16>, vector<32x384xbf16>, vector<8x384xf32> -> vector<8x384xf32>
    %361 = arith.truncf %352 : vector<8x128xf32> to vector<8x128xbf16>
    %cst_63 = arith.constant dense<0.000000e+00> : vector<8x384xf32>
    %362 = tpu.matmul %361, %1, %cst_63 {dimension_numbers = #tpu.dot_dimension_numbers<[1], [0], [0], [1], [0, 0, 1, 1], [], []>} : vector<8x128xbf16>, vector<128x384xbf16>, vector<8x384xf32> -> vector<8x384xf32>
    %363 = vector.extract_strided_slice %360 {offsets = [0, 0], sizes = [8, 128], strides = [1, 1]} : vector<8x384xf32> to vector<8x128xf32>
    %364 = vector.extract_strided_slice %362 {offsets = [0, 0], sizes = [8, 128], strides = [1, 1]} : vector<8x384xf32> to vector<8x128xf32>
    %365 = arith.addf %363, %364 : vector<8x128xf32>
    %366 = arith.negf %365 : vector<8x128xf32>
    %367 = math.exp %366 : vector<8x128xf32>
    %cst_64 = arith.constant 1.000000e+00 : f32
    %368 = vector.broadcast %cst_64 : f32 to vector<8x128xf32>
    %369 = arith.addf %368, %367 : vector<8x128xf32>
    %370 = arith.divf %368, %369 : vector<8x128xf32>
    %371 = vector.extract_strided_slice %360 {offsets = [0, 128], sizes = [8, 128], strides = [1, 1]} : vector<8x384xf32> to vector<8x128xf32>
    %372 = vector.extract_strided_slice %362 {offsets = [0, 128], sizes = [8, 128], strides = [1, 1]} : vector<8x384xf32> to vector<8x128xf32>
    %373 = arith.addf %371, %372 : vector<8x128xf32>
    %374 = arith.negf %373 : vector<8x128xf32>
    %375 = math.exp %374 : vector<8x128xf32>
    %cst_65 = arith.constant 1.000000e+00 : f32
    %376 = vector.broadcast %cst_65 : f32 to vector<8x128xf32>
    %377 = arith.addf %376, %375 : vector<8x128xf32>
    %378 = arith.divf %376, %377 : vector<8x128xf32>
    %379 = vector.extract_strided_slice %360 {offsets = [0, 256], sizes = [8, 128], strides = [1, 1]} : vector<8x384xf32> to vector<8x128xf32>
    %380 = vector.extract_strided_slice %362 {offsets = [0, 256], sizes = [8, 128], strides = [1, 1]} : vector<8x384xf32> to vector<8x128xf32>
    %381 = vector.broadcast %2 : vector<1x128xf32> to vector<8x128xf32>
    %382 = arith.addf %380, %381 : vector<8x128xf32>
    %383 = arith.mulf %370, %382 : vector<8x128xf32>
    %384 = arith.addf %379, %383 : vector<8x128xf32>
    %385 = math.tanh %384 : vector<8x128xf32>
    %cst_66 = arith.constant 1.000000e+00 : f32
    %386 = vector.broadcast %cst_66 : f32 to vector<8x128xf32>
    %387 = arith.subf %386, %378 : vector<8x128xf32>
    %388 = arith.mulf %387, %385 : vector<8x128xf32>
    %389 = arith.mulf %378, %352 : vector<8x128xf32>
    %390 = arith.addf %388, %389 : vector<8x128xf32>
    %391 = vector.extract_strided_slice %8 {offsets = [0, 10], sizes = [8, 1], strides = [1, 1]} : vector<8x16xi32> to vector<8x1xi32>
    %392 = vector.broadcast %391 : vector<8x1xi32> to vector<8x32xi32>
    %393 = vector.broadcast %9 : vector<1x32xi32> to vector<8x32xi32>
    %394 = arith.cmpi eq, %392, %393 : vector<8x32xi32>
    %395 = arith.extui %394 : vector<8x32xi1> to vector<8x32xi32>
    %396 = arith.sitofp %395 : vector<8x32xi32> to vector<8x32xf32>
    %397 = arith.truncf %396 : vector<8x32xf32> to vector<8x32xbf16>
    %cst_67 = arith.constant dense<0.000000e+00> : vector<8x384xf32>
    %398 = tpu.matmul %397, %0, %cst_67 {dimension_numbers = #tpu.dot_dimension_numbers<[1], [0], [0], [1], [0, 0, 1, 1], [], []>} : vector<8x32xbf16>, vector<32x384xbf16>, vector<8x384xf32> -> vector<8x384xf32>
    %399 = arith.truncf %390 : vector<8x128xf32> to vector<8x128xbf16>
    %cst_68 = arith.constant dense<0.000000e+00> : vector<8x384xf32>
    %400 = tpu.matmul %399, %1, %cst_68 {dimension_numbers = #tpu.dot_dimension_numbers<[1], [0], [0], [1], [0, 0, 1, 1], [], []>} : vector<8x128xbf16>, vector<128x384xbf16>, vector<8x384xf32> -> vector<8x384xf32>
    %401 = vector.extract_strided_slice %398 {offsets = [0, 0], sizes = [8, 128], strides = [1, 1]} : vector<8x384xf32> to vector<8x128xf32>
    %402 = vector.extract_strided_slice %400 {offsets = [0, 0], sizes = [8, 128], strides = [1, 1]} : vector<8x384xf32> to vector<8x128xf32>
    %403 = arith.addf %401, %402 : vector<8x128xf32>
    %404 = arith.negf %403 : vector<8x128xf32>
    %405 = math.exp %404 : vector<8x128xf32>
    %cst_69 = arith.constant 1.000000e+00 : f32
    %406 = vector.broadcast %cst_69 : f32 to vector<8x128xf32>
    %407 = arith.addf %406, %405 : vector<8x128xf32>
    %408 = arith.divf %406, %407 : vector<8x128xf32>
    %409 = vector.extract_strided_slice %398 {offsets = [0, 128], sizes = [8, 128], strides = [1, 1]} : vector<8x384xf32> to vector<8x128xf32>
    %410 = vector.extract_strided_slice %400 {offsets = [0, 128], sizes = [8, 128], strides = [1, 1]} : vector<8x384xf32> to vector<8x128xf32>
    %411 = arith.addf %409, %410 : vector<8x128xf32>
    %412 = arith.negf %411 : vector<8x128xf32>
    %413 = math.exp %412 : vector<8x128xf32>
    %cst_70 = arith.constant 1.000000e+00 : f32
    %414 = vector.broadcast %cst_70 : f32 to vector<8x128xf32>
    %415 = arith.addf %414, %413 : vector<8x128xf32>
    %416 = arith.divf %414, %415 : vector<8x128xf32>
    %417 = vector.extract_strided_slice %398 {offsets = [0, 256], sizes = [8, 128], strides = [1, 1]} : vector<8x384xf32> to vector<8x128xf32>
    %418 = vector.extract_strided_slice %400 {offsets = [0, 256], sizes = [8, 128], strides = [1, 1]} : vector<8x384xf32> to vector<8x128xf32>
    %419 = vector.broadcast %2 : vector<1x128xf32> to vector<8x128xf32>
    %420 = arith.addf %418, %419 : vector<8x128xf32>
    %421 = arith.mulf %408, %420 : vector<8x128xf32>
    %422 = arith.addf %417, %421 : vector<8x128xf32>
    %423 = math.tanh %422 : vector<8x128xf32>
    %cst_71 = arith.constant 1.000000e+00 : f32
    %424 = vector.broadcast %cst_71 : f32 to vector<8x128xf32>
    %425 = arith.subf %424, %416 : vector<8x128xf32>
    %426 = arith.mulf %425, %423 : vector<8x128xf32>
    %427 = arith.mulf %416, %390 : vector<8x128xf32>
    %428 = arith.addf %426, %427 : vector<8x128xf32>
    %429 = vector.extract_strided_slice %8 {offsets = [0, 11], sizes = [8, 1], strides = [1, 1]} : vector<8x16xi32> to vector<8x1xi32>
    %430 = vector.broadcast %429 : vector<8x1xi32> to vector<8x32xi32>
    %431 = vector.broadcast %9 : vector<1x32xi32> to vector<8x32xi32>
    %432 = arith.cmpi eq, %430, %431 : vector<8x32xi32>
    %433 = arith.extui %432 : vector<8x32xi1> to vector<8x32xi32>
    %434 = arith.sitofp %433 : vector<8x32xi32> to vector<8x32xf32>
    %435 = arith.truncf %434 : vector<8x32xf32> to vector<8x32xbf16>
    %cst_72 = arith.constant dense<0.000000e+00> : vector<8x384xf32>
    %436 = tpu.matmul %435, %0, %cst_72 {dimension_numbers = #tpu.dot_dimension_numbers<[1], [0], [0], [1], [0, 0, 1, 1], [], []>} : vector<8x32xbf16>, vector<32x384xbf16>, vector<8x384xf32> -> vector<8x384xf32>
    %437 = arith.truncf %428 : vector<8x128xf32> to vector<8x128xbf16>
    %cst_73 = arith.constant dense<0.000000e+00> : vector<8x384xf32>
    %438 = tpu.matmul %437, %1, %cst_73 {dimension_numbers = #tpu.dot_dimension_numbers<[1], [0], [0], [1], [0, 0, 1, 1], [], []>} : vector<8x128xbf16>, vector<128x384xbf16>, vector<8x384xf32> -> vector<8x384xf32>
    %439 = vector.extract_strided_slice %436 {offsets = [0, 0], sizes = [8, 128], strides = [1, 1]} : vector<8x384xf32> to vector<8x128xf32>
    %440 = vector.extract_strided_slice %438 {offsets = [0, 0], sizes = [8, 128], strides = [1, 1]} : vector<8x384xf32> to vector<8x128xf32>
    %441 = arith.addf %439, %440 : vector<8x128xf32>
    %442 = arith.negf %441 : vector<8x128xf32>
    %443 = math.exp %442 : vector<8x128xf32>
    %cst_74 = arith.constant 1.000000e+00 : f32
    %444 = vector.broadcast %cst_74 : f32 to vector<8x128xf32>
    %445 = arith.addf %444, %443 : vector<8x128xf32>
    %446 = arith.divf %444, %445 : vector<8x128xf32>
    %447 = vector.extract_strided_slice %436 {offsets = [0, 128], sizes = [8, 128], strides = [1, 1]} : vector<8x384xf32> to vector<8x128xf32>
    %448 = vector.extract_strided_slice %438 {offsets = [0, 128], sizes = [8, 128], strides = [1, 1]} : vector<8x384xf32> to vector<8x128xf32>
    %449 = arith.addf %447, %448 : vector<8x128xf32>
    %450 = arith.negf %449 : vector<8x128xf32>
    %451 = math.exp %450 : vector<8x128xf32>
    %cst_75 = arith.constant 1.000000e+00 : f32
    %452 = vector.broadcast %cst_75 : f32 to vector<8x128xf32>
    %453 = arith.addf %452, %451 : vector<8x128xf32>
    %454 = arith.divf %452, %453 : vector<8x128xf32>
    %455 = vector.extract_strided_slice %436 {offsets = [0, 256], sizes = [8, 128], strides = [1, 1]} : vector<8x384xf32> to vector<8x128xf32>
    %456 = vector.extract_strided_slice %438 {offsets = [0, 256], sizes = [8, 128], strides = [1, 1]} : vector<8x384xf32> to vector<8x128xf32>
    %457 = vector.broadcast %2 : vector<1x128xf32> to vector<8x128xf32>
    %458 = arith.addf %456, %457 : vector<8x128xf32>
    %459 = arith.mulf %446, %458 : vector<8x128xf32>
    %460 = arith.addf %455, %459 : vector<8x128xf32>
    %461 = math.tanh %460 : vector<8x128xf32>
    %cst_76 = arith.constant 1.000000e+00 : f32
    %462 = vector.broadcast %cst_76 : f32 to vector<8x128xf32>
    %463 = arith.subf %462, %454 : vector<8x128xf32>
    %464 = arith.mulf %463, %461 : vector<8x128xf32>
    %465 = arith.mulf %454, %428 : vector<8x128xf32>
    %466 = arith.addf %464, %465 : vector<8x128xf32>
    %467 = vector.extract_strided_slice %8 {offsets = [0, 12], sizes = [8, 1], strides = [1, 1]} : vector<8x16xi32> to vector<8x1xi32>
    %468 = vector.broadcast %467 : vector<8x1xi32> to vector<8x32xi32>
    %469 = vector.broadcast %9 : vector<1x32xi32> to vector<8x32xi32>
    %470 = arith.cmpi eq, %468, %469 : vector<8x32xi32>
    %471 = arith.extui %470 : vector<8x32xi1> to vector<8x32xi32>
    %472 = arith.sitofp %471 : vector<8x32xi32> to vector<8x32xf32>
    %473 = arith.truncf %472 : vector<8x32xf32> to vector<8x32xbf16>
    %cst_77 = arith.constant dense<0.000000e+00> : vector<8x384xf32>
    %474 = tpu.matmul %473, %0, %cst_77 {dimension_numbers = #tpu.dot_dimension_numbers<[1], [0], [0], [1], [0, 0, 1, 1], [], []>} : vector<8x32xbf16>, vector<32x384xbf16>, vector<8x384xf32> -> vector<8x384xf32>
    %475 = arith.truncf %466 : vector<8x128xf32> to vector<8x128xbf16>
    %cst_78 = arith.constant dense<0.000000e+00> : vector<8x384xf32>
    %476 = tpu.matmul %475, %1, %cst_78 {dimension_numbers = #tpu.dot_dimension_numbers<[1], [0], [0], [1], [0, 0, 1, 1], [], []>} : vector<8x128xbf16>, vector<128x384xbf16>, vector<8x384xf32> -> vector<8x384xf32>
    %477 = vector.extract_strided_slice %474 {offsets = [0, 0], sizes = [8, 128], strides = [1, 1]} : vector<8x384xf32> to vector<8x128xf32>
    %478 = vector.extract_strided_slice %476 {offsets = [0, 0], sizes = [8, 128], strides = [1, 1]} : vector<8x384xf32> to vector<8x128xf32>
    %479 = arith.addf %477, %478 : vector<8x128xf32>
    %480 = arith.negf %479 : vector<8x128xf32>
    %481 = math.exp %480 : vector<8x128xf32>
    %cst_79 = arith.constant 1.000000e+00 : f32
    %482 = vector.broadcast %cst_79 : f32 to vector<8x128xf32>
    %483 = arith.addf %482, %481 : vector<8x128xf32>
    %484 = arith.divf %482, %483 : vector<8x128xf32>
    %485 = vector.extract_strided_slice %474 {offsets = [0, 128], sizes = [8, 128], strides = [1, 1]} : vector<8x384xf32> to vector<8x128xf32>
    %486 = vector.extract_strided_slice %476 {offsets = [0, 128], sizes = [8, 128], strides = [1, 1]} : vector<8x384xf32> to vector<8x128xf32>
    %487 = arith.addf %485, %486 : vector<8x128xf32>
    %488 = arith.negf %487 : vector<8x128xf32>
    %489 = math.exp %488 : vector<8x128xf32>
    %cst_80 = arith.constant 1.000000e+00 : f32
    %490 = vector.broadcast %cst_80 : f32 to vector<8x128xf32>
    %491 = arith.addf %490, %489 : vector<8x128xf32>
    %492 = arith.divf %490, %491 : vector<8x128xf32>
    %493 = vector.extract_strided_slice %474 {offsets = [0, 256], sizes = [8, 128], strides = [1, 1]} : vector<8x384xf32> to vector<8x128xf32>
    %494 = vector.extract_strided_slice %476 {offsets = [0, 256], sizes = [8, 128], strides = [1, 1]} : vector<8x384xf32> to vector<8x128xf32>
    %495 = vector.broadcast %2 : vector<1x128xf32> to vector<8x128xf32>
    %496 = arith.addf %494, %495 : vector<8x128xf32>
    %497 = arith.mulf %484, %496 : vector<8x128xf32>
    %498 = arith.addf %493, %497 : vector<8x128xf32>
    %499 = math.tanh %498 : vector<8x128xf32>
    %cst_81 = arith.constant 1.000000e+00 : f32
    %500 = vector.broadcast %cst_81 : f32 to vector<8x128xf32>
    %501 = arith.subf %500, %492 : vector<8x128xf32>
    %502 = arith.mulf %501, %499 : vector<8x128xf32>
    %503 = arith.mulf %492, %466 : vector<8x128xf32>
    %504 = arith.addf %502, %503 : vector<8x128xf32>
    %505 = vector.extract_strided_slice %8 {offsets = [0, 13], sizes = [8, 1], strides = [1, 1]} : vector<8x16xi32> to vector<8x1xi32>
    %506 = vector.broadcast %505 : vector<8x1xi32> to vector<8x32xi32>
    %507 = vector.broadcast %9 : vector<1x32xi32> to vector<8x32xi32>
    %508 = arith.cmpi eq, %506, %507 : vector<8x32xi32>
    %509 = arith.extui %508 : vector<8x32xi1> to vector<8x32xi32>
    %510 = arith.sitofp %509 : vector<8x32xi32> to vector<8x32xf32>
    %511 = arith.truncf %510 : vector<8x32xf32> to vector<8x32xbf16>
    %cst_82 = arith.constant dense<0.000000e+00> : vector<8x384xf32>
    %512 = tpu.matmul %511, %0, %cst_82 {dimension_numbers = #tpu.dot_dimension_numbers<[1], [0], [0], [1], [0, 0, 1, 1], [], []>} : vector<8x32xbf16>, vector<32x384xbf16>, vector<8x384xf32> -> vector<8x384xf32>
    %513 = arith.truncf %504 : vector<8x128xf32> to vector<8x128xbf16>
    %cst_83 = arith.constant dense<0.000000e+00> : vector<8x384xf32>
    %514 = tpu.matmul %513, %1, %cst_83 {dimension_numbers = #tpu.dot_dimension_numbers<[1], [0], [0], [1], [0, 0, 1, 1], [], []>} : vector<8x128xbf16>, vector<128x384xbf16>, vector<8x384xf32> -> vector<8x384xf32>
    %515 = vector.extract_strided_slice %512 {offsets = [0, 0], sizes = [8, 128], strides = [1, 1]} : vector<8x384xf32> to vector<8x128xf32>
    %516 = vector.extract_strided_slice %514 {offsets = [0, 0], sizes = [8, 128], strides = [1, 1]} : vector<8x384xf32> to vector<8x128xf32>
    %517 = arith.addf %515, %516 : vector<8x128xf32>
    %518 = arith.negf %517 : vector<8x128xf32>
    %519 = math.exp %518 : vector<8x128xf32>
    %cst_84 = arith.constant 1.000000e+00 : f32
    %520 = vector.broadcast %cst_84 : f32 to vector<8x128xf32>
    %521 = arith.addf %520, %519 : vector<8x128xf32>
    %522 = arith.divf %520, %521 : vector<8x128xf32>
    %523 = vector.extract_strided_slice %512 {offsets = [0, 128], sizes = [8, 128], strides = [1, 1]} : vector<8x384xf32> to vector<8x128xf32>
    %524 = vector.extract_strided_slice %514 {offsets = [0, 128], sizes = [8, 128], strides = [1, 1]} : vector<8x384xf32> to vector<8x128xf32>
    %525 = arith.addf %523, %524 : vector<8x128xf32>
    %526 = arith.negf %525 : vector<8x128xf32>
    %527 = math.exp %526 : vector<8x128xf32>
    %cst_85 = arith.constant 1.000000e+00 : f32
    %528 = vector.broadcast %cst_85 : f32 to vector<8x128xf32>
    %529 = arith.addf %528, %527 : vector<8x128xf32>
    %530 = arith.divf %528, %529 : vector<8x128xf32>
    %531 = vector.extract_strided_slice %512 {offsets = [0, 256], sizes = [8, 128], strides = [1, 1]} : vector<8x384xf32> to vector<8x128xf32>
    %532 = vector.extract_strided_slice %514 {offsets = [0, 256], sizes = [8, 128], strides = [1, 1]} : vector<8x384xf32> to vector<8x128xf32>
    %533 = vector.broadcast %2 : vector<1x128xf32> to vector<8x128xf32>
    %534 = arith.addf %532, %533 : vector<8x128xf32>
    %535 = arith.mulf %522, %534 : vector<8x128xf32>
    %536 = arith.addf %531, %535 : vector<8x128xf32>
    %537 = math.tanh %536 : vector<8x128xf32>
    %cst_86 = arith.constant 1.000000e+00 : f32
    %538 = vector.broadcast %cst_86 : f32 to vector<8x128xf32>
    %539 = arith.subf %538, %530 : vector<8x128xf32>
    %540 = arith.mulf %539, %537 : vector<8x128xf32>
    %541 = arith.mulf %530, %504 : vector<8x128xf32>
    %542 = arith.addf %540, %541 : vector<8x128xf32>
    %543 = vector.extract_strided_slice %8 {offsets = [0, 14], sizes = [8, 1], strides = [1, 1]} : vector<8x16xi32> to vector<8x1xi32>
    %544 = vector.broadcast %543 : vector<8x1xi32> to vector<8x32xi32>
    %545 = vector.broadcast %9 : vector<1x32xi32> to vector<8x32xi32>
    %546 = arith.cmpi eq, %544, %545 : vector<8x32xi32>
    %547 = arith.extui %546 : vector<8x32xi1> to vector<8x32xi32>
    %548 = arith.sitofp %547 : vector<8x32xi32> to vector<8x32xf32>
    %549 = arith.truncf %548 : vector<8x32xf32> to vector<8x32xbf16>
    %cst_87 = arith.constant dense<0.000000e+00> : vector<8x384xf32>
    %550 = tpu.matmul %549, %0, %cst_87 {dimension_numbers = #tpu.dot_dimension_numbers<[1], [0], [0], [1], [0, 0, 1, 1], [], []>} : vector<8x32xbf16>, vector<32x384xbf16>, vector<8x384xf32> -> vector<8x384xf32>
    %551 = arith.truncf %542 : vector<8x128xf32> to vector<8x128xbf16>
    %cst_88 = arith.constant dense<0.000000e+00> : vector<8x384xf32>
    %552 = tpu.matmul %551, %1, %cst_88 {dimension_numbers = #tpu.dot_dimension_numbers<[1], [0], [0], [1], [0, 0, 1, 1], [], []>} : vector<8x128xbf16>, vector<128x384xbf16>, vector<8x384xf32> -> vector<8x384xf32>
    %553 = vector.extract_strided_slice %550 {offsets = [0, 0], sizes = [8, 128], strides = [1, 1]} : vector<8x384xf32> to vector<8x128xf32>
    %554 = vector.extract_strided_slice %552 {offsets = [0, 0], sizes = [8, 128], strides = [1, 1]} : vector<8x384xf32> to vector<8x128xf32>
    %555 = arith.addf %553, %554 : vector<8x128xf32>
    %556 = arith.negf %555 : vector<8x128xf32>
    %557 = math.exp %556 : vector<8x128xf32>
    %cst_89 = arith.constant 1.000000e+00 : f32
    %558 = vector.broadcast %cst_89 : f32 to vector<8x128xf32>
    %559 = arith.addf %558, %557 : vector<8x128xf32>
    %560 = arith.divf %558, %559 : vector<8x128xf32>
    %561 = vector.extract_strided_slice %550 {offsets = [0, 128], sizes = [8, 128], strides = [1, 1]} : vector<8x384xf32> to vector<8x128xf32>
    %562 = vector.extract_strided_slice %552 {offsets = [0, 128], sizes = [8, 128], strides = [1, 1]} : vector<8x384xf32> to vector<8x128xf32>
    %563 = arith.addf %561, %562 : vector<8x128xf32>
    %564 = arith.negf %563 : vector<8x128xf32>
    %565 = math.exp %564 : vector<8x128xf32>
    %cst_90 = arith.constant 1.000000e+00 : f32
    %566 = vector.broadcast %cst_90 : f32 to vector<8x128xf32>
    %567 = arith.addf %566, %565 : vector<8x128xf32>
    %568 = arith.divf %566, %567 : vector<8x128xf32>
    %569 = vector.extract_strided_slice %550 {offsets = [0, 256], sizes = [8, 128], strides = [1, 1]} : vector<8x384xf32> to vector<8x128xf32>
    %570 = vector.extract_strided_slice %552 {offsets = [0, 256], sizes = [8, 128], strides = [1, 1]} : vector<8x384xf32> to vector<8x128xf32>
    %571 = vector.broadcast %2 : vector<1x128xf32> to vector<8x128xf32>
    %572 = arith.addf %570, %571 : vector<8x128xf32>
    %573 = arith.mulf %560, %572 : vector<8x128xf32>
    %574 = arith.addf %569, %573 : vector<8x128xf32>
    %575 = math.tanh %574 : vector<8x128xf32>
    %cst_91 = arith.constant 1.000000e+00 : f32
    %576 = vector.broadcast %cst_91 : f32 to vector<8x128xf32>
    %577 = arith.subf %576, %568 : vector<8x128xf32>
    %578 = arith.mulf %577, %575 : vector<8x128xf32>
    %579 = arith.mulf %568, %542 : vector<8x128xf32>
    %580 = arith.addf %578, %579 : vector<8x128xf32>
    %581 = vector.extract_strided_slice %8 {offsets = [0, 15], sizes = [8, 1], strides = [1, 1]} : vector<8x16xi32> to vector<8x1xi32>
    %582 = vector.broadcast %581 : vector<8x1xi32> to vector<8x32xi32>
    %583 = vector.broadcast %9 : vector<1x32xi32> to vector<8x32xi32>
    %584 = arith.cmpi eq, %582, %583 : vector<8x32xi32>
    %585 = arith.extui %584 : vector<8x32xi1> to vector<8x32xi32>
    %586 = arith.sitofp %585 : vector<8x32xi32> to vector<8x32xf32>
    %587 = arith.truncf %586 : vector<8x32xf32> to vector<8x32xbf16>
    %cst_92 = arith.constant dense<0.000000e+00> : vector<8x384xf32>
    %588 = tpu.matmul %587, %0, %cst_92 {dimension_numbers = #tpu.dot_dimension_numbers<[1], [0], [0], [1], [0, 0, 1, 1], [], []>} : vector<8x32xbf16>, vector<32x384xbf16>, vector<8x384xf32> -> vector<8x384xf32>
    %589 = arith.truncf %580 : vector<8x128xf32> to vector<8x128xbf16>
    %cst_93 = arith.constant dense<0.000000e+00> : vector<8x384xf32>
    %590 = tpu.matmul %589, %1, %cst_93 {dimension_numbers = #tpu.dot_dimension_numbers<[1], [0], [0], [1], [0, 0, 1, 1], [], []>} : vector<8x128xbf16>, vector<128x384xbf16>, vector<8x384xf32> -> vector<8x384xf32>
    %591 = vector.extract_strided_slice %588 {offsets = [0, 0], sizes = [8, 128], strides = [1, 1]} : vector<8x384xf32> to vector<8x128xf32>
    %592 = vector.extract_strided_slice %590 {offsets = [0, 0], sizes = [8, 128], strides = [1, 1]} : vector<8x384xf32> to vector<8x128xf32>
    %593 = arith.addf %591, %592 : vector<8x128xf32>
    %594 = arith.negf %593 : vector<8x128xf32>
    %595 = math.exp %594 : vector<8x128xf32>
    %cst_94 = arith.constant 1.000000e+00 : f32
    %596 = vector.broadcast %cst_94 : f32 to vector<8x128xf32>
    %597 = arith.addf %596, %595 : vector<8x128xf32>
    %598 = arith.divf %596, %597 : vector<8x128xf32>
    %599 = vector.extract_strided_slice %588 {offsets = [0, 128], sizes = [8, 128], strides = [1, 1]} : vector<8x384xf32> to vector<8x128xf32>
    %600 = vector.extract_strided_slice %590 {offsets = [0, 128], sizes = [8, 128], strides = [1, 1]} : vector<8x384xf32> to vector<8x128xf32>
    %601 = arith.addf %599, %600 : vector<8x128xf32>
    %602 = arith.negf %601 : vector<8x128xf32>
    %603 = math.exp %602 : vector<8x128xf32>
    %cst_95 = arith.constant 1.000000e+00 : f32
    %604 = vector.broadcast %cst_95 : f32 to vector<8x128xf32>
    %605 = arith.addf %604, %603 : vector<8x128xf32>
    %606 = arith.divf %604, %605 : vector<8x128xf32>
    %607 = vector.extract_strided_slice %588 {offsets = [0, 256], sizes = [8, 128], strides = [1, 1]} : vector<8x384xf32> to vector<8x128xf32>
    %608 = vector.extract_strided_slice %590 {offsets = [0, 256], sizes = [8, 128], strides = [1, 1]} : vector<8x384xf32> to vector<8x128xf32>
    %609 = vector.broadcast %2 : vector<1x128xf32> to vector<8x128xf32>
    %610 = arith.addf %608, %609 : vector<8x128xf32>
    %611 = arith.mulf %598, %610 : vector<8x128xf32>
    %612 = arith.addf %607, %611 : vector<8x128xf32>
    %613 = math.tanh %612 : vector<8x128xf32>
    %cst_96 = arith.constant 1.000000e+00 : f32
    %614 = vector.broadcast %cst_96 : f32 to vector<8x128xf32>
    %615 = arith.subf %614, %606 : vector<8x128xf32>
    %616 = arith.mulf %615, %613 : vector<8x128xf32>
    %617 = arith.mulf %606, %580 : vector<8x128xf32>
    %618 = arith.addf %616, %617 : vector<8x128xf32>
    %619 = tpu.iota {dimensions = array<i32: 1>} : vector<1x128xi32>
    %620 = tpu.iota {dimensions = array<i32: 1>} : vector<1x16xi32>
    %c2_i32 = arith.constant 2 : i32
    %621 = vector.broadcast %c2_i32 : i32 to vector<1x128xi32>
    %622 = arith.cmpi eq, %619, %621 : vector<1x128xi32>
    %623 = vector.shape_cast %622 : vector<1x128xi1> to vector<1x128xi1>
    %624 = vector.broadcast %623 : vector<1x128xi1> to vector<8x128xi1>
    %625 = arith.extui %624 : vector<8x128xi1> to vector<8x128xi32>
    %626 = arith.sitofp %625 : vector<8x128xi32> to vector<8x128xf32>
    %627 = arith.truncf %626 : vector<8x128xf32> to vector<8x128xbf16>
    %c0_i32 = arith.constant 0 : i32
    %628 = vector.broadcast %c0_i32 : i32 to vector<8x16xi32>
    %cst_97 = arith.constant dense<0.000000e+00> : vector<8x384xf32>
    %629 = tpu.matmul %627, %3, %cst_97 {dimension_numbers = #tpu.dot_dimension_numbers<[1], [0], [0], [1], [0, 0, 1, 1], [], []>} : vector<8x128xbf16>, vector<128x384xbf16>, vector<8x384xf32> -> vector<8x384xf32>
    %630 = arith.truncf %618 : vector<8x128xf32> to vector<8x128xbf16>
    %cst_98 = arith.constant dense<0.000000e+00> : vector<8x384xf32>
    %631 = tpu.matmul %630, %4, %cst_98 {dimension_numbers = #tpu.dot_dimension_numbers<[1], [0], [0], [1], [0, 0, 1, 1], [], []>} : vector<8x128xbf16>, vector<128x384xbf16>, vector<8x384xf32> -> vector<8x384xf32>
    %632 = vector.extract_strided_slice %629 {offsets = [0, 0], sizes = [8, 128], strides = [1, 1]} : vector<8x384xf32> to vector<8x128xf32>
    %633 = vector.extract_strided_slice %631 {offsets = [0, 0], sizes = [8, 128], strides = [1, 1]} : vector<8x384xf32> to vector<8x128xf32>
    %634 = arith.addf %632, %633 : vector<8x128xf32>
    %635 = arith.negf %634 : vector<8x128xf32>
    %636 = math.exp %635 : vector<8x128xf32>
    %cst_99 = arith.constant 1.000000e+00 : f32
    %637 = vector.broadcast %cst_99 : f32 to vector<8x128xf32>
    %638 = arith.addf %637, %636 : vector<8x128xf32>
    %639 = arith.divf %637, %638 : vector<8x128xf32>
    %640 = vector.extract_strided_slice %629 {offsets = [0, 128], sizes = [8, 128], strides = [1, 1]} : vector<8x384xf32> to vector<8x128xf32>
    %641 = vector.extract_strided_slice %631 {offsets = [0, 128], sizes = [8, 128], strides = [1, 1]} : vector<8x384xf32> to vector<8x128xf32>
    %642 = arith.addf %640, %641 : vector<8x128xf32>
    %643 = arith.negf %642 : vector<8x128xf32>
    %644 = math.exp %643 : vector<8x128xf32>
    %cst_100 = arith.constant 1.000000e+00 : f32
    %645 = vector.broadcast %cst_100 : f32 to vector<8x128xf32>
    %646 = arith.addf %645, %644 : vector<8x128xf32>
    %647 = arith.divf %645, %646 : vector<8x128xf32>
    %648 = vector.extract_strided_slice %629 {offsets = [0, 256], sizes = [8, 128], strides = [1, 1]} : vector<8x384xf32> to vector<8x128xf32>
    %649 = vector.extract_strided_slice %631 {offsets = [0, 256], sizes = [8, 128], strides = [1, 1]} : vector<8x384xf32> to vector<8x128xf32>
    %650 = vector.broadcast %5 : vector<1x128xf32> to vector<8x128xf32>
    %651 = arith.addf %649, %650 : vector<8x128xf32>
    %652 = arith.mulf %639, %651 : vector<8x128xf32>
    %653 = arith.addf %648, %652 : vector<8x128xf32>
    %654 = math.tanh %653 : vector<8x128xf32>
    %cst_101 = arith.constant 1.000000e+00 : f32
    %655 = vector.broadcast %cst_101 : f32 to vector<8x128xf32>
    %656 = arith.subf %655, %647 : vector<8x128xf32>
    %657 = arith.mulf %656, %654 : vector<8x128xf32>
    %658 = arith.mulf %647, %618 : vector<8x128xf32>
    %659 = arith.addf %657, %658 : vector<8x128xf32>
    %660 = arith.truncf %659 : vector<8x128xf32> to vector<8x128xbf16>
    %cst_102 = arith.constant dense<0.000000e+00> : vector<8x128xf32>
    %661 = tpu.matmul %660, %6, %cst_102 {dimension_numbers = #tpu.dot_dimension_numbers<[1], [0], [0], [1], [0, 0, 1, 1], [], []>} : vector<8x128xbf16>, vector<128x128xbf16>, vector<8x128xf32> -> vector<8x128xf32>
    %662 = vector.broadcast %7 : vector<1x128xf32> to vector<8x128xf32>
    %663 = arith.addf %661, %662 : vector<8x128xf32>
    %cst_103 = arith.constant dense<0xFF800000> : vector<8xf32>
    %664 = vector.multi_reduction <maximumf>, %663, %cst_103 [1] : vector<8x128xf32> to vector<8xf32>
    %665 = vector.shape_cast %664 : vector<8xf32> to vector<8x1xf32>
    %666 = vector.broadcast %665 : vector<8x1xf32> to vector<8x128xf32>
    %667 = arith.cmpf oge, %663, %666 : vector<8x128xf32>
    %c128_i32 = arith.constant 128 : i32
    %668 = vector.shape_cast %619 : vector<1x128xi32> to vector<1x128xi32>
    %669 = vector.broadcast %668 : vector<1x128xi32> to vector<8x128xi32>
    %670 = vector.broadcast %c128_i32 : i32 to vector<8x128xi32>
    %671 = arith.select %667, %669, %670 : vector<8x128xi1>, vector<8x128xi32>
    %cst_104 = arith.constant dense<2147483647> : vector<8xi32>
    %672 = vector.multi_reduction <minsi>, %671, %cst_104 [1] : vector<8x128xi32> to vector<8xi32>
    %673 = vector.shape_cast %672 : vector<8xi32> to vector<8x1xi32>
    %c127_i32 = arith.constant 127 : i32
    %674 = vector.broadcast %c127_i32 : i32 to vector<8x1xi32>
    %675 = arith.minsi %673, %674 : vector<8x1xi32>
    %676 = vector.broadcast %619 : vector<1x128xi32> to vector<8x128xi32>
    %677 = vector.broadcast %675 : vector<8x1xi32> to vector<8x128xi32>
    %678 = arith.cmpi eq, %676, %677 : vector<8x128xi32>
    %679 = arith.extui %678 : vector<8x128xi1> to vector<8x128xi32>
    %680 = arith.sitofp %679 : vector<8x128xi32> to vector<8x128xf32>
    %681 = arith.truncf %680 : vector<8x128xf32> to vector<8x128xbf16>
    %c0_i32_105 = arith.constant 0 : i32
    %682 = vector.broadcast %c0_i32_105 : i32 to vector<1x16xi32>
    %683 = arith.cmpi eq, %620, %682 : vector<1x16xi32>
    %684 = vector.shape_cast %683 : vector<1x16xi1> to vector<1x16xi1>
    %685 = vector.broadcast %684 : vector<1x16xi1> to vector<8x16xi1>
    %686 = vector.shape_cast %675 : vector<8x1xi32> to vector<8x1xi32>
    %687 = vector.broadcast %686 : vector<8x1xi32> to vector<8x16xi32>
    %688 = arith.select %685, %687, %628 : vector<8x16xi1>, vector<8x16xi32>
    %cst_106 = arith.constant dense<0.000000e+00> : vector<8x384xf32>
    %689 = tpu.matmul %681, %3, %cst_106 {dimension_numbers = #tpu.dot_dimension_numbers<[1], [0], [0], [1], [0, 0, 1, 1], [], []>} : vector<8x128xbf16>, vector<128x384xbf16>, vector<8x384xf32> -> vector<8x384xf32>
    %690 = arith.truncf %659 : vector<8x128xf32> to vector<8x128xbf16>
    %cst_107 = arith.constant dense<0.000000e+00> : vector<8x384xf32>
    %691 = tpu.matmul %690, %4, %cst_107 {dimension_numbers = #tpu.dot_dimension_numbers<[1], [0], [0], [1], [0, 0, 1, 1], [], []>} : vector<8x128xbf16>, vector<128x384xbf16>, vector<8x384xf32> -> vector<8x384xf32>
    %692 = vector.extract_strided_slice %689 {offsets = [0, 0], sizes = [8, 128], strides = [1, 1]} : vector<8x384xf32> to vector<8x128xf32>
    %693 = vector.extract_strided_slice %691 {offsets = [0, 0], sizes = [8, 128], strides = [1, 1]} : vector<8x384xf32> to vector<8x128xf32>
    %694 = arith.addf %692, %693 : vector<8x128xf32>
    %695 = arith.negf %694 : vector<8x128xf32>
    %696 = math.exp %695 : vector<8x128xf32>
    %cst_108 = arith.constant 1.000000e+00 : f32
    %697 = vector.broadcast %cst_108 : f32 to vector<8x128xf32>
    %698 = arith.addf %697, %696 : vector<8x128xf32>
    %699 = arith.divf %697, %698 : vector<8x128xf32>
    %700 = vector.extract_strided_slice %689 {offsets = [0, 128], sizes = [8, 128], strides = [1, 1]} : vector<8x384xf32> to vector<8x128xf32>
    %701 = vector.extract_strided_slice %691 {offsets = [0, 128], sizes = [8, 128], strides = [1, 1]} : vector<8x384xf32> to vector<8x128xf32>
    %702 = arith.addf %700, %701 : vector<8x128xf32>
    %703 = arith.negf %702 : vector<8x128xf32>
    %704 = math.exp %703 : vector<8x128xf32>
    %cst_109 = arith.constant 1.000000e+00 : f32
    %705 = vector.broadcast %cst_109 : f32 to vector<8x128xf32>
    %706 = arith.addf %705, %704 : vector<8x128xf32>
    %707 = arith.divf %705, %706 : vector<8x128xf32>
    %708 = vector.extract_strided_slice %689 {offsets = [0, 256], sizes = [8, 128], strides = [1, 1]} : vector<8x384xf32> to vector<8x128xf32>
    %709 = vector.extract_strided_slice %691 {offsets = [0, 256], sizes = [8, 128], strides = [1, 1]} : vector<8x384xf32> to vector<8x128xf32>
    %710 = vector.broadcast %5 : vector<1x128xf32> to vector<8x128xf32>
    %711 = arith.addf %709, %710 : vector<8x128xf32>
    %712 = arith.mulf %699, %711 : vector<8x128xf32>
    %713 = arith.addf %708, %712 : vector<8x128xf32>
    %714 = math.tanh %713 : vector<8x128xf32>
    %cst_110 = arith.constant 1.000000e+00 : f32
    %715 = vector.broadcast %cst_110 : f32 to vector<8x128xf32>
    %716 = arith.subf %715, %707 : vector<8x128xf32>
    %717 = arith.mulf %716, %714 : vector<8x128xf32>
    %718 = arith.mulf %707, %659 : vector<8x128xf32>
    %719 = arith.addf %717, %718 : vector<8x128xf32>
    %720 = arith.truncf %719 : vector<8x128xf32> to vector<8x128xbf16>
    %cst_111 = arith.constant dense<0.000000e+00> : vector<8x128xf32>
    %721 = tpu.matmul %720, %6, %cst_111 {dimension_numbers = #tpu.dot_dimension_numbers<[1], [0], [0], [1], [0, 0, 1, 1], [], []>} : vector<8x128xbf16>, vector<128x128xbf16>, vector<8x128xf32> -> vector<8x128xf32>
    %722 = vector.broadcast %7 : vector<1x128xf32> to vector<8x128xf32>
    %723 = arith.addf %721, %722 : vector<8x128xf32>
    %cst_112 = arith.constant dense<0xFF800000> : vector<8xf32>
    %724 = vector.multi_reduction <maximumf>, %723, %cst_112 [1] : vector<8x128xf32> to vector<8xf32>
    %725 = vector.shape_cast %724 : vector<8xf32> to vector<8x1xf32>
    %726 = vector.broadcast %725 : vector<8x1xf32> to vector<8x128xf32>
    %727 = arith.cmpf oge, %723, %726 : vector<8x128xf32>
    %c128_i32_113 = arith.constant 128 : i32
    %728 = vector.shape_cast %619 : vector<1x128xi32> to vector<1x128xi32>
    %729 = vector.broadcast %728 : vector<1x128xi32> to vector<8x128xi32>
    %730 = vector.broadcast %c128_i32_113 : i32 to vector<8x128xi32>
    %731 = arith.select %727, %729, %730 : vector<8x128xi1>, vector<8x128xi32>
    %cst_114 = arith.constant dense<2147483647> : vector<8xi32>
    %732 = vector.multi_reduction <minsi>, %731, %cst_114 [1] : vector<8x128xi32> to vector<8xi32>
    %733 = vector.shape_cast %732 : vector<8xi32> to vector<8x1xi32>
    %c127_i32_115 = arith.constant 127 : i32
    %734 = vector.broadcast %c127_i32_115 : i32 to vector<8x1xi32>
    %735 = arith.minsi %733, %734 : vector<8x1xi32>
    %736 = vector.broadcast %619 : vector<1x128xi32> to vector<8x128xi32>
    %737 = vector.broadcast %735 : vector<8x1xi32> to vector<8x128xi32>
    %738 = arith.cmpi eq, %736, %737 : vector<8x128xi32>
    %739 = arith.extui %738 : vector<8x128xi1> to vector<8x128xi32>
    %740 = arith.sitofp %739 : vector<8x128xi32> to vector<8x128xf32>
    %741 = arith.truncf %740 : vector<8x128xf32> to vector<8x128xbf16>
    %c1_i32 = arith.constant 1 : i32
    %742 = vector.broadcast %c1_i32 : i32 to vector<1x16xi32>
    %743 = arith.cmpi eq, %620, %742 : vector<1x16xi32>
    %744 = vector.shape_cast %743 : vector<1x16xi1> to vector<1x16xi1>
    %745 = vector.broadcast %744 : vector<1x16xi1> to vector<8x16xi1>
    %746 = vector.shape_cast %735 : vector<8x1xi32> to vector<8x1xi32>
    %747 = vector.broadcast %746 : vector<8x1xi32> to vector<8x16xi32>
    %748 = arith.select %745, %747, %688 : vector<8x16xi1>, vector<8x16xi32>
    %cst_116 = arith.constant dense<0.000000e+00> : vector<8x384xf32>
    %749 = tpu.matmul %741, %3, %cst_116 {dimension_numbers = #tpu.dot_dimension_numbers<[1], [0], [0], [1], [0, 0, 1, 1], [], []>} : vector<8x128xbf16>, vector<128x384xbf16>, vector<8x384xf32> -> vector<8x384xf32>
    %750 = arith.truncf %719 : vector<8x128xf32> to vector<8x128xbf16>
    %cst_117 = arith.constant dense<0.000000e+00> : vector<8x384xf32>
    %751 = tpu.matmul %750, %4, %cst_117 {dimension_numbers = #tpu.dot_dimension_numbers<[1], [0], [0], [1], [0, 0, 1, 1], [], []>} : vector<8x128xbf16>, vector<128x384xbf16>, vector<8x384xf32> -> vector<8x384xf32>
    %752 = vector.extract_strided_slice %749 {offsets = [0, 0], sizes = [8, 128], strides = [1, 1]} : vector<8x384xf32> to vector<8x128xf32>
    %753 = vector.extract_strided_slice %751 {offsets = [0, 0], sizes = [8, 128], strides = [1, 1]} : vector<8x384xf32> to vector<8x128xf32>
    %754 = arith.addf %752, %753 : vector<8x128xf32>
    %755 = arith.negf %754 : vector<8x128xf32>
    %756 = math.exp %755 : vector<8x128xf32>
    %cst_118 = arith.constant 1.000000e+00 : f32
    %757 = vector.broadcast %cst_118 : f32 to vector<8x128xf32>
    %758 = arith.addf %757, %756 : vector<8x128xf32>
    %759 = arith.divf %757, %758 : vector<8x128xf32>
    %760 = vector.extract_strided_slice %749 {offsets = [0, 128], sizes = [8, 128], strides = [1, 1]} : vector<8x384xf32> to vector<8x128xf32>
    %761 = vector.extract_strided_slice %751 {offsets = [0, 128], sizes = [8, 128], strides = [1, 1]} : vector<8x384xf32> to vector<8x128xf32>
    %762 = arith.addf %760, %761 : vector<8x128xf32>
    %763 = arith.negf %762 : vector<8x128xf32>
    %764 = math.exp %763 : vector<8x128xf32>
    %cst_119 = arith.constant 1.000000e+00 : f32
    %765 = vector.broadcast %cst_119 : f32 to vector<8x128xf32>
    %766 = arith.addf %765, %764 : vector<8x128xf32>
    %767 = arith.divf %765, %766 : vector<8x128xf32>
    %768 = vector.extract_strided_slice %749 {offsets = [0, 256], sizes = [8, 128], strides = [1, 1]} : vector<8x384xf32> to vector<8x128xf32>
    %769 = vector.extract_strided_slice %751 {offsets = [0, 256], sizes = [8, 128], strides = [1, 1]} : vector<8x384xf32> to vector<8x128xf32>
    %770 = vector.broadcast %5 : vector<1x128xf32> to vector<8x128xf32>
    %771 = arith.addf %769, %770 : vector<8x128xf32>
    %772 = arith.mulf %759, %771 : vector<8x128xf32>
    %773 = arith.addf %768, %772 : vector<8x128xf32>
    %774 = math.tanh %773 : vector<8x128xf32>
    %cst_120 = arith.constant 1.000000e+00 : f32
    %775 = vector.broadcast %cst_120 : f32 to vector<8x128xf32>
    %776 = arith.subf %775, %767 : vector<8x128xf32>
    %777 = arith.mulf %776, %774 : vector<8x128xf32>
    %778 = arith.mulf %767, %719 : vector<8x128xf32>
    %779 = arith.addf %777, %778 : vector<8x128xf32>
    %780 = arith.truncf %779 : vector<8x128xf32> to vector<8x128xbf16>
    %cst_121 = arith.constant dense<0.000000e+00> : vector<8x128xf32>
    %781 = tpu.matmul %780, %6, %cst_121 {dimension_numbers = #tpu.dot_dimension_numbers<[1], [0], [0], [1], [0, 0, 1, 1], [], []>} : vector<8x128xbf16>, vector<128x128xbf16>, vector<8x128xf32> -> vector<8x128xf32>
    %782 = vector.broadcast %7 : vector<1x128xf32> to vector<8x128xf32>
    %783 = arith.addf %781, %782 : vector<8x128xf32>
    %cst_122 = arith.constant dense<0xFF800000> : vector<8xf32>
    %784 = vector.multi_reduction <maximumf>, %783, %cst_122 [1] : vector<8x128xf32> to vector<8xf32>
    %785 = vector.shape_cast %784 : vector<8xf32> to vector<8x1xf32>
    %786 = vector.broadcast %785 : vector<8x1xf32> to vector<8x128xf32>
    %787 = arith.cmpf oge, %783, %786 : vector<8x128xf32>
    %c128_i32_123 = arith.constant 128 : i32
    %788 = vector.shape_cast %619 : vector<1x128xi32> to vector<1x128xi32>
    %789 = vector.broadcast %788 : vector<1x128xi32> to vector<8x128xi32>
    %790 = vector.broadcast %c128_i32_123 : i32 to vector<8x128xi32>
    %791 = arith.select %787, %789, %790 : vector<8x128xi1>, vector<8x128xi32>
    %cst_124 = arith.constant dense<2147483647> : vector<8xi32>
    %792 = vector.multi_reduction <minsi>, %791, %cst_124 [1] : vector<8x128xi32> to vector<8xi32>
    %793 = vector.shape_cast %792 : vector<8xi32> to vector<8x1xi32>
    %c127_i32_125 = arith.constant 127 : i32
    %794 = vector.broadcast %c127_i32_125 : i32 to vector<8x1xi32>
    %795 = arith.minsi %793, %794 : vector<8x1xi32>
    %796 = vector.broadcast %619 : vector<1x128xi32> to vector<8x128xi32>
    %797 = vector.broadcast %795 : vector<8x1xi32> to vector<8x128xi32>
    %798 = arith.cmpi eq, %796, %797 : vector<8x128xi32>
    %799 = arith.extui %798 : vector<8x128xi1> to vector<8x128xi32>
    %800 = arith.sitofp %799 : vector<8x128xi32> to vector<8x128xf32>
    %801 = arith.truncf %800 : vector<8x128xf32> to vector<8x128xbf16>
    %c2_i32_126 = arith.constant 2 : i32
    %802 = vector.broadcast %c2_i32_126 : i32 to vector<1x16xi32>
    %803 = arith.cmpi eq, %620, %802 : vector<1x16xi32>
    %804 = vector.shape_cast %803 : vector<1x16xi1> to vector<1x16xi1>
    %805 = vector.broadcast %804 : vector<1x16xi1> to vector<8x16xi1>
    %806 = vector.shape_cast %795 : vector<8x1xi32> to vector<8x1xi32>
    %807 = vector.broadcast %806 : vector<8x1xi32> to vector<8x16xi32>
    %808 = arith.select %805, %807, %748 : vector<8x16xi1>, vector<8x16xi32>
    %cst_127 = arith.constant dense<0.000000e+00> : vector<8x384xf32>
    %809 = tpu.matmul %801, %3, %cst_127 {dimension_numbers = #tpu.dot_dimension_numbers<[1], [0], [0], [1], [0, 0, 1, 1], [], []>} : vector<8x128xbf16>, vector<128x384xbf16>, vector<8x384xf32> -> vector<8x384xf32>
    %810 = arith.truncf %779 : vector<8x128xf32> to vector<8x128xbf16>
    %cst_128 = arith.constant dense<0.000000e+00> : vector<8x384xf32>
    %811 = tpu.matmul %810, %4, %cst_128 {dimension_numbers = #tpu.dot_dimension_numbers<[1], [0], [0], [1], [0, 0, 1, 1], [], []>} : vector<8x128xbf16>, vector<128x384xbf16>, vector<8x384xf32> -> vector<8x384xf32>
    %812 = vector.extract_strided_slice %809 {offsets = [0, 0], sizes = [8, 128], strides = [1, 1]} : vector<8x384xf32> to vector<8x128xf32>
    %813 = vector.extract_strided_slice %811 {offsets = [0, 0], sizes = [8, 128], strides = [1, 1]} : vector<8x384xf32> to vector<8x128xf32>
    %814 = arith.addf %812, %813 : vector<8x128xf32>
    %815 = arith.negf %814 : vector<8x128xf32>
    %816 = math.exp %815 : vector<8x128xf32>
    %cst_129 = arith.constant 1.000000e+00 : f32
    %817 = vector.broadcast %cst_129 : f32 to vector<8x128xf32>
    %818 = arith.addf %817, %816 : vector<8x128xf32>
    %819 = arith.divf %817, %818 : vector<8x128xf32>
    %820 = vector.extract_strided_slice %809 {offsets = [0, 128], sizes = [8, 128], strides = [1, 1]} : vector<8x384xf32> to vector<8x128xf32>
    %821 = vector.extract_strided_slice %811 {offsets = [0, 128], sizes = [8, 128], strides = [1, 1]} : vector<8x384xf32> to vector<8x128xf32>
    %822 = arith.addf %820, %821 : vector<8x128xf32>
    %823 = arith.negf %822 : vector<8x128xf32>
    %824 = math.exp %823 : vector<8x128xf32>
    %cst_130 = arith.constant 1.000000e+00 : f32
    %825 = vector.broadcast %cst_130 : f32 to vector<8x128xf32>
    %826 = arith.addf %825, %824 : vector<8x128xf32>
    %827 = arith.divf %825, %826 : vector<8x128xf32>
    %828 = vector.extract_strided_slice %809 {offsets = [0, 256], sizes = [8, 128], strides = [1, 1]} : vector<8x384xf32> to vector<8x128xf32>
    %829 = vector.extract_strided_slice %811 {offsets = [0, 256], sizes = [8, 128], strides = [1, 1]} : vector<8x384xf32> to vector<8x128xf32>
    %830 = vector.broadcast %5 : vector<1x128xf32> to vector<8x128xf32>
    %831 = arith.addf %829, %830 : vector<8x128xf32>
    %832 = arith.mulf %819, %831 : vector<8x128xf32>
    %833 = arith.addf %828, %832 : vector<8x128xf32>
    %834 = math.tanh %833 : vector<8x128xf32>
    %cst_131 = arith.constant 1.000000e+00 : f32
    %835 = vector.broadcast %cst_131 : f32 to vector<8x128xf32>
    %836 = arith.subf %835, %827 : vector<8x128xf32>
    %837 = arith.mulf %836, %834 : vector<8x128xf32>
    %838 = arith.mulf %827, %779 : vector<8x128xf32>
    %839 = arith.addf %837, %838 : vector<8x128xf32>
    %840 = arith.truncf %839 : vector<8x128xf32> to vector<8x128xbf16>
    %cst_132 = arith.constant dense<0.000000e+00> : vector<8x128xf32>
    %841 = tpu.matmul %840, %6, %cst_132 {dimension_numbers = #tpu.dot_dimension_numbers<[1], [0], [0], [1], [0, 0, 1, 1], [], []>} : vector<8x128xbf16>, vector<128x128xbf16>, vector<8x128xf32> -> vector<8x128xf32>
    %842 = vector.broadcast %7 : vector<1x128xf32> to vector<8x128xf32>
    %843 = arith.addf %841, %842 : vector<8x128xf32>
    %cst_133 = arith.constant dense<0xFF800000> : vector<8xf32>
    %844 = vector.multi_reduction <maximumf>, %843, %cst_133 [1] : vector<8x128xf32> to vector<8xf32>
    %845 = vector.shape_cast %844 : vector<8xf32> to vector<8x1xf32>
    %846 = vector.broadcast %845 : vector<8x1xf32> to vector<8x128xf32>
    %847 = arith.cmpf oge, %843, %846 : vector<8x128xf32>
    %c128_i32_134 = arith.constant 128 : i32
    %848 = vector.shape_cast %619 : vector<1x128xi32> to vector<1x128xi32>
    %849 = vector.broadcast %848 : vector<1x128xi32> to vector<8x128xi32>
    %850 = vector.broadcast %c128_i32_134 : i32 to vector<8x128xi32>
    %851 = arith.select %847, %849, %850 : vector<8x128xi1>, vector<8x128xi32>
    %cst_135 = arith.constant dense<2147483647> : vector<8xi32>
    %852 = vector.multi_reduction <minsi>, %851, %cst_135 [1] : vector<8x128xi32> to vector<8xi32>
    %853 = vector.shape_cast %852 : vector<8xi32> to vector<8x1xi32>
    %c127_i32_136 = arith.constant 127 : i32
    %854 = vector.broadcast %c127_i32_136 : i32 to vector<8x1xi32>
    %855 = arith.minsi %853, %854 : vector<8x1xi32>
    %856 = vector.broadcast %619 : vector<1x128xi32> to vector<8x128xi32>
    %857 = vector.broadcast %855 : vector<8x1xi32> to vector<8x128xi32>
    %858 = arith.cmpi eq, %856, %857 : vector<8x128xi32>
    %859 = arith.extui %858 : vector<8x128xi1> to vector<8x128xi32>
    %860 = arith.sitofp %859 : vector<8x128xi32> to vector<8x128xf32>
    %861 = arith.truncf %860 : vector<8x128xf32> to vector<8x128xbf16>
    %c3_i32 = arith.constant 3 : i32
    %862 = vector.broadcast %c3_i32 : i32 to vector<1x16xi32>
    %863 = arith.cmpi eq, %620, %862 : vector<1x16xi32>
    %864 = vector.shape_cast %863 : vector<1x16xi1> to vector<1x16xi1>
    %865 = vector.broadcast %864 : vector<1x16xi1> to vector<8x16xi1>
    %866 = vector.shape_cast %855 : vector<8x1xi32> to vector<8x1xi32>
    %867 = vector.broadcast %866 : vector<8x1xi32> to vector<8x16xi32>
    %868 = arith.select %865, %867, %808 : vector<8x16xi1>, vector<8x16xi32>
    %cst_137 = arith.constant dense<0.000000e+00> : vector<8x384xf32>
    %869 = tpu.matmul %861, %3, %cst_137 {dimension_numbers = #tpu.dot_dimension_numbers<[1], [0], [0], [1], [0, 0, 1, 1], [], []>} : vector<8x128xbf16>, vector<128x384xbf16>, vector<8x384xf32> -> vector<8x384xf32>
    %870 = arith.truncf %839 : vector<8x128xf32> to vector<8x128xbf16>
    %cst_138 = arith.constant dense<0.000000e+00> : vector<8x384xf32>
    %871 = tpu.matmul %870, %4, %cst_138 {dimension_numbers = #tpu.dot_dimension_numbers<[1], [0], [0], [1], [0, 0, 1, 1], [], []>} : vector<8x128xbf16>, vector<128x384xbf16>, vector<8x384xf32> -> vector<8x384xf32>
    %872 = vector.extract_strided_slice %869 {offsets = [0, 0], sizes = [8, 128], strides = [1, 1]} : vector<8x384xf32> to vector<8x128xf32>
    %873 = vector.extract_strided_slice %871 {offsets = [0, 0], sizes = [8, 128], strides = [1, 1]} : vector<8x384xf32> to vector<8x128xf32>
    %874 = arith.addf %872, %873 : vector<8x128xf32>
    %875 = arith.negf %874 : vector<8x128xf32>
    %876 = math.exp %875 : vector<8x128xf32>
    %cst_139 = arith.constant 1.000000e+00 : f32
    %877 = vector.broadcast %cst_139 : f32 to vector<8x128xf32>
    %878 = arith.addf %877, %876 : vector<8x128xf32>
    %879 = arith.divf %877, %878 : vector<8x128xf32>
    %880 = vector.extract_strided_slice %869 {offsets = [0, 128], sizes = [8, 128], strides = [1, 1]} : vector<8x384xf32> to vector<8x128xf32>
    %881 = vector.extract_strided_slice %871 {offsets = [0, 128], sizes = [8, 128], strides = [1, 1]} : vector<8x384xf32> to vector<8x128xf32>
    %882 = arith.addf %880, %881 : vector<8x128xf32>
    %883 = arith.negf %882 : vector<8x128xf32>
    %884 = math.exp %883 : vector<8x128xf32>
    %cst_140 = arith.constant 1.000000e+00 : f32
    %885 = vector.broadcast %cst_140 : f32 to vector<8x128xf32>
    %886 = arith.addf %885, %884 : vector<8x128xf32>
    %887 = arith.divf %885, %886 : vector<8x128xf32>
    %888 = vector.extract_strided_slice %869 {offsets = [0, 256], sizes = [8, 128], strides = [1, 1]} : vector<8x384xf32> to vector<8x128xf32>
    %889 = vector.extract_strided_slice %871 {offsets = [0, 256], sizes = [8, 128], strides = [1, 1]} : vector<8x384xf32> to vector<8x128xf32>
    %890 = vector.broadcast %5 : vector<1x128xf32> to vector<8x128xf32>
    %891 = arith.addf %889, %890 : vector<8x128xf32>
    %892 = arith.mulf %879, %891 : vector<8x128xf32>
    %893 = arith.addf %888, %892 : vector<8x128xf32>
    %894 = math.tanh %893 : vector<8x128xf32>
    %cst_141 = arith.constant 1.000000e+00 : f32
    %895 = vector.broadcast %cst_141 : f32 to vector<8x128xf32>
    %896 = arith.subf %895, %887 : vector<8x128xf32>
    %897 = arith.mulf %896, %894 : vector<8x128xf32>
    %898 = arith.mulf %887, %839 : vector<8x128xf32>
    %899 = arith.addf %897, %898 : vector<8x128xf32>
    %900 = arith.truncf %899 : vector<8x128xf32> to vector<8x128xbf16>
    %cst_142 = arith.constant dense<0.000000e+00> : vector<8x128xf32>
    %901 = tpu.matmul %900, %6, %cst_142 {dimension_numbers = #tpu.dot_dimension_numbers<[1], [0], [0], [1], [0, 0, 1, 1], [], []>} : vector<8x128xbf16>, vector<128x128xbf16>, vector<8x128xf32> -> vector<8x128xf32>
    %902 = vector.broadcast %7 : vector<1x128xf32> to vector<8x128xf32>
    %903 = arith.addf %901, %902 : vector<8x128xf32>
    %cst_143 = arith.constant dense<0xFF800000> : vector<8xf32>
    %904 = vector.multi_reduction <maximumf>, %903, %cst_143 [1] : vector<8x128xf32> to vector<8xf32>
    %905 = vector.shape_cast %904 : vector<8xf32> to vector<8x1xf32>
    %906 = vector.broadcast %905 : vector<8x1xf32> to vector<8x128xf32>
    %907 = arith.cmpf oge, %903, %906 : vector<8x128xf32>
    %c128_i32_144 = arith.constant 128 : i32
    %908 = vector.shape_cast %619 : vector<1x128xi32> to vector<1x128xi32>
    %909 = vector.broadcast %908 : vector<1x128xi32> to vector<8x128xi32>
    %910 = vector.broadcast %c128_i32_144 : i32 to vector<8x128xi32>
    %911 = arith.select %907, %909, %910 : vector<8x128xi1>, vector<8x128xi32>
    %cst_145 = arith.constant dense<2147483647> : vector<8xi32>
    %912 = vector.multi_reduction <minsi>, %911, %cst_145 [1] : vector<8x128xi32> to vector<8xi32>
    %913 = vector.shape_cast %912 : vector<8xi32> to vector<8x1xi32>
    %c127_i32_146 = arith.constant 127 : i32
    %914 = vector.broadcast %c127_i32_146 : i32 to vector<8x1xi32>
    %915 = arith.minsi %913, %914 : vector<8x1xi32>
    %916 = vector.broadcast %619 : vector<1x128xi32> to vector<8x128xi32>
    %917 = vector.broadcast %915 : vector<8x1xi32> to vector<8x128xi32>
    %918 = arith.cmpi eq, %916, %917 : vector<8x128xi32>
    %919 = arith.extui %918 : vector<8x128xi1> to vector<8x128xi32>
    %920 = arith.sitofp %919 : vector<8x128xi32> to vector<8x128xf32>
    %921 = arith.truncf %920 : vector<8x128xf32> to vector<8x128xbf16>
    %c4_i32 = arith.constant 4 : i32
    %922 = vector.broadcast %c4_i32 : i32 to vector<1x16xi32>
    %923 = arith.cmpi eq, %620, %922 : vector<1x16xi32>
    %924 = vector.shape_cast %923 : vector<1x16xi1> to vector<1x16xi1>
    %925 = vector.broadcast %924 : vector<1x16xi1> to vector<8x16xi1>
    %926 = vector.shape_cast %915 : vector<8x1xi32> to vector<8x1xi32>
    %927 = vector.broadcast %926 : vector<8x1xi32> to vector<8x16xi32>
    %928 = arith.select %925, %927, %868 : vector<8x16xi1>, vector<8x16xi32>
    %cst_147 = arith.constant dense<0.000000e+00> : vector<8x384xf32>
    %929 = tpu.matmul %921, %3, %cst_147 {dimension_numbers = #tpu.dot_dimension_numbers<[1], [0], [0], [1], [0, 0, 1, 1], [], []>} : vector<8x128xbf16>, vector<128x384xbf16>, vector<8x384xf32> -> vector<8x384xf32>
    %930 = arith.truncf %899 : vector<8x128xf32> to vector<8x128xbf16>
    %cst_148 = arith.constant dense<0.000000e+00> : vector<8x384xf32>
    %931 = tpu.matmul %930, %4, %cst_148 {dimension_numbers = #tpu.dot_dimension_numbers<[1], [0], [0], [1], [0, 0, 1, 1], [], []>} : vector<8x128xbf16>, vector<128x384xbf16>, vector<8x384xf32> -> vector<8x384xf32>
    %932 = vector.extract_strided_slice %929 {offsets = [0, 0], sizes = [8, 128], strides = [1, 1]} : vector<8x384xf32> to vector<8x128xf32>
    %933 = vector.extract_strided_slice %931 {offsets = [0, 0], sizes = [8, 128], strides = [1, 1]} : vector<8x384xf32> to vector<8x128xf32>
    %934 = arith.addf %932, %933 : vector<8x128xf32>
    %935 = arith.negf %934 : vector<8x128xf32>
    %936 = math.exp %935 : vector<8x128xf32>
    %cst_149 = arith.constant 1.000000e+00 : f32
    %937 = vector.broadcast %cst_149 : f32 to vector<8x128xf32>
    %938 = arith.addf %937, %936 : vector<8x128xf32>
    %939 = arith.divf %937, %938 : vector<8x128xf32>
    %940 = vector.extract_strided_slice %929 {offsets = [0, 128], sizes = [8, 128], strides = [1, 1]} : vector<8x384xf32> to vector<8x128xf32>
    %941 = vector.extract_strided_slice %931 {offsets = [0, 128], sizes = [8, 128], strides = [1, 1]} : vector<8x384xf32> to vector<8x128xf32>
    %942 = arith.addf %940, %941 : vector<8x128xf32>
    %943 = arith.negf %942 : vector<8x128xf32>
    %944 = math.exp %943 : vector<8x128xf32>
    %cst_150 = arith.constant 1.000000e+00 : f32
    %945 = vector.broadcast %cst_150 : f32 to vector<8x128xf32>
    %946 = arith.addf %945, %944 : vector<8x128xf32>
    %947 = arith.divf %945, %946 : vector<8x128xf32>
    %948 = vector.extract_strided_slice %929 {offsets = [0, 256], sizes = [8, 128], strides = [1, 1]} : vector<8x384xf32> to vector<8x128xf32>
    %949 = vector.extract_strided_slice %931 {offsets = [0, 256], sizes = [8, 128], strides = [1, 1]} : vector<8x384xf32> to vector<8x128xf32>
    %950 = vector.broadcast %5 : vector<1x128xf32> to vector<8x128xf32>
    %951 = arith.addf %949, %950 : vector<8x128xf32>
    %952 = arith.mulf %939, %951 : vector<8x128xf32>
    %953 = arith.addf %948, %952 : vector<8x128xf32>
    %954 = math.tanh %953 : vector<8x128xf32>
    %cst_151 = arith.constant 1.000000e+00 : f32
    %955 = vector.broadcast %cst_151 : f32 to vector<8x128xf32>
    %956 = arith.subf %955, %947 : vector<8x128xf32>
    %957 = arith.mulf %956, %954 : vector<8x128xf32>
    %958 = arith.mulf %947, %899 : vector<8x128xf32>
    %959 = arith.addf %957, %958 : vector<8x128xf32>
    %960 = arith.truncf %959 : vector<8x128xf32> to vector<8x128xbf16>
    %cst_152 = arith.constant dense<0.000000e+00> : vector<8x128xf32>
    %961 = tpu.matmul %960, %6, %cst_152 {dimension_numbers = #tpu.dot_dimension_numbers<[1], [0], [0], [1], [0, 0, 1, 1], [], []>} : vector<8x128xbf16>, vector<128x128xbf16>, vector<8x128xf32> -> vector<8x128xf32>
    %962 = vector.broadcast %7 : vector<1x128xf32> to vector<8x128xf32>
    %963 = arith.addf %961, %962 : vector<8x128xf32>
    %cst_153 = arith.constant dense<0xFF800000> : vector<8xf32>
    %964 = vector.multi_reduction <maximumf>, %963, %cst_153 [1] : vector<8x128xf32> to vector<8xf32>
    %965 = vector.shape_cast %964 : vector<8xf32> to vector<8x1xf32>
    %966 = vector.broadcast %965 : vector<8x1xf32> to vector<8x128xf32>
    %967 = arith.cmpf oge, %963, %966 : vector<8x128xf32>
    %c128_i32_154 = arith.constant 128 : i32
    %968 = vector.shape_cast %619 : vector<1x128xi32> to vector<1x128xi32>
    %969 = vector.broadcast %968 : vector<1x128xi32> to vector<8x128xi32>
    %970 = vector.broadcast %c128_i32_154 : i32 to vector<8x128xi32>
    %971 = arith.select %967, %969, %970 : vector<8x128xi1>, vector<8x128xi32>
    %cst_155 = arith.constant dense<2147483647> : vector<8xi32>
    %972 = vector.multi_reduction <minsi>, %971, %cst_155 [1] : vector<8x128xi32> to vector<8xi32>
    %973 = vector.shape_cast %972 : vector<8xi32> to vector<8x1xi32>
    %c127_i32_156 = arith.constant 127 : i32
    %974 = vector.broadcast %c127_i32_156 : i32 to vector<8x1xi32>
    %975 = arith.minsi %973, %974 : vector<8x1xi32>
    %976 = vector.broadcast %619 : vector<1x128xi32> to vector<8x128xi32>
    %977 = vector.broadcast %975 : vector<8x1xi32> to vector<8x128xi32>
    %978 = arith.cmpi eq, %976, %977 : vector<8x128xi32>
    %979 = arith.extui %978 : vector<8x128xi1> to vector<8x128xi32>
    %980 = arith.sitofp %979 : vector<8x128xi32> to vector<8x128xf32>
    %981 = arith.truncf %980 : vector<8x128xf32> to vector<8x128xbf16>
    %c5_i32 = arith.constant 5 : i32
    %982 = vector.broadcast %c5_i32 : i32 to vector<1x16xi32>
    %983 = arith.cmpi eq, %620, %982 : vector<1x16xi32>
    %984 = vector.shape_cast %983 : vector<1x16xi1> to vector<1x16xi1>
    %985 = vector.broadcast %984 : vector<1x16xi1> to vector<8x16xi1>
    %986 = vector.shape_cast %975 : vector<8x1xi32> to vector<8x1xi32>
    %987 = vector.broadcast %986 : vector<8x1xi32> to vector<8x16xi32>
    %988 = arith.select %985, %987, %928 : vector<8x16xi1>, vector<8x16xi32>
    %cst_157 = arith.constant dense<0.000000e+00> : vector<8x384xf32>
    %989 = tpu.matmul %981, %3, %cst_157 {dimension_numbers = #tpu.dot_dimension_numbers<[1], [0], [0], [1], [0, 0, 1, 1], [], []>} : vector<8x128xbf16>, vector<128x384xbf16>, vector<8x384xf32> -> vector<8x384xf32>
    %990 = arith.truncf %959 : vector<8x128xf32> to vector<8x128xbf16>
    %cst_158 = arith.constant dense<0.000000e+00> : vector<8x384xf32>
    %991 = tpu.matmul %990, %4, %cst_158 {dimension_numbers = #tpu.dot_dimension_numbers<[1], [0], [0], [1], [0, 0, 1, 1], [], []>} : vector<8x128xbf16>, vector<128x384xbf16>, vector<8x384xf32> -> vector<8x384xf32>
    %992 = vector.extract_strided_slice %989 {offsets = [0, 0], sizes = [8, 128], strides = [1, 1]} : vector<8x384xf32> to vector<8x128xf32>
    %993 = vector.extract_strided_slice %991 {offsets = [0, 0], sizes = [8, 128], strides = [1, 1]} : vector<8x384xf32> to vector<8x128xf32>
    %994 = arith.addf %992, %993 : vector<8x128xf32>
    %995 = arith.negf %994 : vector<8x128xf32>
    %996 = math.exp %995 : vector<8x128xf32>
    %cst_159 = arith.constant 1.000000e+00 : f32
    %997 = vector.broadcast %cst_159 : f32 to vector<8x128xf32>
    %998 = arith.addf %997, %996 : vector<8x128xf32>
    %999 = arith.divf %997, %998 : vector<8x128xf32>
    %1000 = vector.extract_strided_slice %989 {offsets = [0, 128], sizes = [8, 128], strides = [1, 1]} : vector<8x384xf32> to vector<8x128xf32>
    %1001 = vector.extract_strided_slice %991 {offsets = [0, 128], sizes = [8, 128], strides = [1, 1]} : vector<8x384xf32> to vector<8x128xf32>
    %1002 = arith.addf %1000, %1001 : vector<8x128xf32>
    %1003 = arith.negf %1002 : vector<8x128xf32>
    %1004 = math.exp %1003 : vector<8x128xf32>
    %cst_160 = arith.constant 1.000000e+00 : f32
    %1005 = vector.broadcast %cst_160 : f32 to vector<8x128xf32>
    %1006 = arith.addf %1005, %1004 : vector<8x128xf32>
    %1007 = arith.divf %1005, %1006 : vector<8x128xf32>
    %1008 = vector.extract_strided_slice %989 {offsets = [0, 256], sizes = [8, 128], strides = [1, 1]} : vector<8x384xf32> to vector<8x128xf32>
    %1009 = vector.extract_strided_slice %991 {offsets = [0, 256], sizes = [8, 128], strides = [1, 1]} : vector<8x384xf32> to vector<8x128xf32>
    %1010 = vector.broadcast %5 : vector<1x128xf32> to vector<8x128xf32>
    %1011 = arith.addf %1009, %1010 : vector<8x128xf32>
    %1012 = arith.mulf %999, %1011 : vector<8x128xf32>
    %1013 = arith.addf %1008, %1012 : vector<8x128xf32>
    %1014 = math.tanh %1013 : vector<8x128xf32>
    %cst_161 = arith.constant 1.000000e+00 : f32
    %1015 = vector.broadcast %cst_161 : f32 to vector<8x128xf32>
    %1016 = arith.subf %1015, %1007 : vector<8x128xf32>
    %1017 = arith.mulf %1016, %1014 : vector<8x128xf32>
    %1018 = arith.mulf %1007, %959 : vector<8x128xf32>
    %1019 = arith.addf %1017, %1018 : vector<8x128xf32>
    %1020 = arith.truncf %1019 : vector<8x128xf32> to vector<8x128xbf16>
    %cst_162 = arith.constant dense<0.000000e+00> : vector<8x128xf32>
    %1021 = tpu.matmul %1020, %6, %cst_162 {dimension_numbers = #tpu.dot_dimension_numbers<[1], [0], [0], [1], [0, 0, 1, 1], [], []>} : vector<8x128xbf16>, vector<128x128xbf16>, vector<8x128xf32> -> vector<8x128xf32>
    %1022 = vector.broadcast %7 : vector<1x128xf32> to vector<8x128xf32>
    %1023 = arith.addf %1021, %1022 : vector<8x128xf32>
    %cst_163 = arith.constant dense<0xFF800000> : vector<8xf32>
    %1024 = vector.multi_reduction <maximumf>, %1023, %cst_163 [1] : vector<8x128xf32> to vector<8xf32>
    %1025 = vector.shape_cast %1024 : vector<8xf32> to vector<8x1xf32>
    %1026 = vector.broadcast %1025 : vector<8x1xf32> to vector<8x128xf32>
    %1027 = arith.cmpf oge, %1023, %1026 : vector<8x128xf32>
    %c128_i32_164 = arith.constant 128 : i32
    %1028 = vector.shape_cast %619 : vector<1x128xi32> to vector<1x128xi32>
    %1029 = vector.broadcast %1028 : vector<1x128xi32> to vector<8x128xi32>
    %1030 = vector.broadcast %c128_i32_164 : i32 to vector<8x128xi32>
    %1031 = arith.select %1027, %1029, %1030 : vector<8x128xi1>, vector<8x128xi32>
    %cst_165 = arith.constant dense<2147483647> : vector<8xi32>
    %1032 = vector.multi_reduction <minsi>, %1031, %cst_165 [1] : vector<8x128xi32> to vector<8xi32>
    %1033 = vector.shape_cast %1032 : vector<8xi32> to vector<8x1xi32>
    %c127_i32_166 = arith.constant 127 : i32
    %1034 = vector.broadcast %c127_i32_166 : i32 to vector<8x1xi32>
    %1035 = arith.minsi %1033, %1034 : vector<8x1xi32>
    %1036 = vector.broadcast %619 : vector<1x128xi32> to vector<8x128xi32>
    %1037 = vector.broadcast %1035 : vector<8x1xi32> to vector<8x128xi32>
    %1038 = arith.cmpi eq, %1036, %1037 : vector<8x128xi32>
    %1039 = arith.extui %1038 : vector<8x128xi1> to vector<8x128xi32>
    %1040 = arith.sitofp %1039 : vector<8x128xi32> to vector<8x128xf32>
    %1041 = arith.truncf %1040 : vector<8x128xf32> to vector<8x128xbf16>
    %c6_i32 = arith.constant 6 : i32
    %1042 = vector.broadcast %c6_i32 : i32 to vector<1x16xi32>
    %1043 = arith.cmpi eq, %620, %1042 : vector<1x16xi32>
    %1044 = vector.shape_cast %1043 : vector<1x16xi1> to vector<1x16xi1>
    %1045 = vector.broadcast %1044 : vector<1x16xi1> to vector<8x16xi1>
    %1046 = vector.shape_cast %1035 : vector<8x1xi32> to vector<8x1xi32>
    %1047 = vector.broadcast %1046 : vector<8x1xi32> to vector<8x16xi32>
    %1048 = arith.select %1045, %1047, %988 : vector<8x16xi1>, vector<8x16xi32>
    %cst_167 = arith.constant dense<0.000000e+00> : vector<8x384xf32>
    %1049 = tpu.matmul %1041, %3, %cst_167 {dimension_numbers = #tpu.dot_dimension_numbers<[1], [0], [0], [1], [0, 0, 1, 1], [], []>} : vector<8x128xbf16>, vector<128x384xbf16>, vector<8x384xf32> -> vector<8x384xf32>
    %1050 = arith.truncf %1019 : vector<8x128xf32> to vector<8x128xbf16>
    %cst_168 = arith.constant dense<0.000000e+00> : vector<8x384xf32>
    %1051 = tpu.matmul %1050, %4, %cst_168 {dimension_numbers = #tpu.dot_dimension_numbers<[1], [0], [0], [1], [0, 0, 1, 1], [], []>} : vector<8x128xbf16>, vector<128x384xbf16>, vector<8x384xf32> -> vector<8x384xf32>
    %1052 = vector.extract_strided_slice %1049 {offsets = [0, 0], sizes = [8, 128], strides = [1, 1]} : vector<8x384xf32> to vector<8x128xf32>
    %1053 = vector.extract_strided_slice %1051 {offsets = [0, 0], sizes = [8, 128], strides = [1, 1]} : vector<8x384xf32> to vector<8x128xf32>
    %1054 = arith.addf %1052, %1053 : vector<8x128xf32>
    %1055 = arith.negf %1054 : vector<8x128xf32>
    %1056 = math.exp %1055 : vector<8x128xf32>
    %cst_169 = arith.constant 1.000000e+00 : f32
    %1057 = vector.broadcast %cst_169 : f32 to vector<8x128xf32>
    %1058 = arith.addf %1057, %1056 : vector<8x128xf32>
    %1059 = arith.divf %1057, %1058 : vector<8x128xf32>
    %1060 = vector.extract_strided_slice %1049 {offsets = [0, 128], sizes = [8, 128], strides = [1, 1]} : vector<8x384xf32> to vector<8x128xf32>
    %1061 = vector.extract_strided_slice %1051 {offsets = [0, 128], sizes = [8, 128], strides = [1, 1]} : vector<8x384xf32> to vector<8x128xf32>
    %1062 = arith.addf %1060, %1061 : vector<8x128xf32>
    %1063 = arith.negf %1062 : vector<8x128xf32>
    %1064 = math.exp %1063 : vector<8x128xf32>
    %cst_170 = arith.constant 1.000000e+00 : f32
    %1065 = vector.broadcast %cst_170 : f32 to vector<8x128xf32>
    %1066 = arith.addf %1065, %1064 : vector<8x128xf32>
    %1067 = arith.divf %1065, %1066 : vector<8x128xf32>
    %1068 = vector.extract_strided_slice %1049 {offsets = [0, 256], sizes = [8, 128], strides = [1, 1]} : vector<8x384xf32> to vector<8x128xf32>
    %1069 = vector.extract_strided_slice %1051 {offsets = [0, 256], sizes = [8, 128], strides = [1, 1]} : vector<8x384xf32> to vector<8x128xf32>
    %1070 = vector.broadcast %5 : vector<1x128xf32> to vector<8x128xf32>
    %1071 = arith.addf %1069, %1070 : vector<8x128xf32>
    %1072 = arith.mulf %1059, %1071 : vector<8x128xf32>
    %1073 = arith.addf %1068, %1072 : vector<8x128xf32>
    %1074 = math.tanh %1073 : vector<8x128xf32>
    %cst_171 = arith.constant 1.000000e+00 : f32
    %1075 = vector.broadcast %cst_171 : f32 to vector<8x128xf32>
    %1076 = arith.subf %1075, %1067 : vector<8x128xf32>
    %1077 = arith.mulf %1076, %1074 : vector<8x128xf32>
    %1078 = arith.mulf %1067, %1019 : vector<8x128xf32>
    %1079 = arith.addf %1077, %1078 : vector<8x128xf32>
    %1080 = arith.truncf %1079 : vector<8x128xf32> to vector<8x128xbf16>
    %cst_172 = arith.constant dense<0.000000e+00> : vector<8x128xf32>
    %1081 = tpu.matmul %1080, %6, %cst_172 {dimension_numbers = #tpu.dot_dimension_numbers<[1], [0], [0], [1], [0, 0, 1, 1], [], []>} : vector<8x128xbf16>, vector<128x128xbf16>, vector<8x128xf32> -> vector<8x128xf32>
    %1082 = vector.broadcast %7 : vector<1x128xf32> to vector<8x128xf32>
    %1083 = arith.addf %1081, %1082 : vector<8x128xf32>
    %cst_173 = arith.constant dense<0xFF800000> : vector<8xf32>
    %1084 = vector.multi_reduction <maximumf>, %1083, %cst_173 [1] : vector<8x128xf32> to vector<8xf32>
    %1085 = vector.shape_cast %1084 : vector<8xf32> to vector<8x1xf32>
    %1086 = vector.broadcast %1085 : vector<8x1xf32> to vector<8x128xf32>
    %1087 = arith.cmpf oge, %1083, %1086 : vector<8x128xf32>
    %c128_i32_174 = arith.constant 128 : i32
    %1088 = vector.shape_cast %619 : vector<1x128xi32> to vector<1x128xi32>
    %1089 = vector.broadcast %1088 : vector<1x128xi32> to vector<8x128xi32>
    %1090 = vector.broadcast %c128_i32_174 : i32 to vector<8x128xi32>
    %1091 = arith.select %1087, %1089, %1090 : vector<8x128xi1>, vector<8x128xi32>
    %cst_175 = arith.constant dense<2147483647> : vector<8xi32>
    %1092 = vector.multi_reduction <minsi>, %1091, %cst_175 [1] : vector<8x128xi32> to vector<8xi32>
    %1093 = vector.shape_cast %1092 : vector<8xi32> to vector<8x1xi32>
    %c127_i32_176 = arith.constant 127 : i32
    %1094 = vector.broadcast %c127_i32_176 : i32 to vector<8x1xi32>
    %1095 = arith.minsi %1093, %1094 : vector<8x1xi32>
    %1096 = vector.broadcast %619 : vector<1x128xi32> to vector<8x128xi32>
    %1097 = vector.broadcast %1095 : vector<8x1xi32> to vector<8x128xi32>
    %1098 = arith.cmpi eq, %1096, %1097 : vector<8x128xi32>
    %1099 = arith.extui %1098 : vector<8x128xi1> to vector<8x128xi32>
    %1100 = arith.sitofp %1099 : vector<8x128xi32> to vector<8x128xf32>
    %1101 = arith.truncf %1100 : vector<8x128xf32> to vector<8x128xbf16>
    %c7_i32 = arith.constant 7 : i32
    %1102 = vector.broadcast %c7_i32 : i32 to vector<1x16xi32>
    %1103 = arith.cmpi eq, %620, %1102 : vector<1x16xi32>
    %1104 = vector.shape_cast %1103 : vector<1x16xi1> to vector<1x16xi1>
    %1105 = vector.broadcast %1104 : vector<1x16xi1> to vector<8x16xi1>
    %1106 = vector.shape_cast %1095 : vector<8x1xi32> to vector<8x1xi32>
    %1107 = vector.broadcast %1106 : vector<8x1xi32> to vector<8x16xi32>
    %1108 = arith.select %1105, %1107, %1048 : vector<8x16xi1>, vector<8x16xi32>
    %cst_177 = arith.constant dense<0.000000e+00> : vector<8x384xf32>
    %1109 = tpu.matmul %1101, %3, %cst_177 {dimension_numbers = #tpu.dot_dimension_numbers<[1], [0], [0], [1], [0, 0, 1, 1], [], []>} : vector<8x128xbf16>, vector<128x384xbf16>, vector<8x384xf32> -> vector<8x384xf32>
    %1110 = arith.truncf %1079 : vector<8x128xf32> to vector<8x128xbf16>
    %cst_178 = arith.constant dense<0.000000e+00> : vector<8x384xf32>
    %1111 = tpu.matmul %1110, %4, %cst_178 {dimension_numbers = #tpu.dot_dimension_numbers<[1], [0], [0], [1], [0, 0, 1, 1], [], []>} : vector<8x128xbf16>, vector<128x384xbf16>, vector<8x384xf32> -> vector<8x384xf32>
    %1112 = vector.extract_strided_slice %1109 {offsets = [0, 0], sizes = [8, 128], strides = [1, 1]} : vector<8x384xf32> to vector<8x128xf32>
    %1113 = vector.extract_strided_slice %1111 {offsets = [0, 0], sizes = [8, 128], strides = [1, 1]} : vector<8x384xf32> to vector<8x128xf32>
    %1114 = arith.addf %1112, %1113 : vector<8x128xf32>
    %1115 = arith.negf %1114 : vector<8x128xf32>
    %1116 = math.exp %1115 : vector<8x128xf32>
    %cst_179 = arith.constant 1.000000e+00 : f32
    %1117 = vector.broadcast %cst_179 : f32 to vector<8x128xf32>
    %1118 = arith.addf %1117, %1116 : vector<8x128xf32>
    %1119 = arith.divf %1117, %1118 : vector<8x128xf32>
    %1120 = vector.extract_strided_slice %1109 {offsets = [0, 128], sizes = [8, 128], strides = [1, 1]} : vector<8x384xf32> to vector<8x128xf32>
    %1121 = vector.extract_strided_slice %1111 {offsets = [0, 128], sizes = [8, 128], strides = [1, 1]} : vector<8x384xf32> to vector<8x128xf32>
    %1122 = arith.addf %1120, %1121 : vector<8x128xf32>
    %1123 = arith.negf %1122 : vector<8x128xf32>
    %1124 = math.exp %1123 : vector<8x128xf32>
    %cst_180 = arith.constant 1.000000e+00 : f32
    %1125 = vector.broadcast %cst_180 : f32 to vector<8x128xf32>
    %1126 = arith.addf %1125, %1124 : vector<8x128xf32>
    %1127 = arith.divf %1125, %1126 : vector<8x128xf32>
    %1128 = vector.extract_strided_slice %1109 {offsets = [0, 256], sizes = [8, 128], strides = [1, 1]} : vector<8x384xf32> to vector<8x128xf32>
    %1129 = vector.extract_strided_slice %1111 {offsets = [0, 256], sizes = [8, 128], strides = [1, 1]} : vector<8x384xf32> to vector<8x128xf32>
    %1130 = vector.broadcast %5 : vector<1x128xf32> to vector<8x128xf32>
    %1131 = arith.addf %1129, %1130 : vector<8x128xf32>
    %1132 = arith.mulf %1119, %1131 : vector<8x128xf32>
    %1133 = arith.addf %1128, %1132 : vector<8x128xf32>
    %1134 = math.tanh %1133 : vector<8x128xf32>
    %cst_181 = arith.constant 1.000000e+00 : f32
    %1135 = vector.broadcast %cst_181 : f32 to vector<8x128xf32>
    %1136 = arith.subf %1135, %1127 : vector<8x128xf32>
    %1137 = arith.mulf %1136, %1134 : vector<8x128xf32>
    %1138 = arith.mulf %1127, %1079 : vector<8x128xf32>
    %1139 = arith.addf %1137, %1138 : vector<8x128xf32>
    %1140 = arith.truncf %1139 : vector<8x128xf32> to vector<8x128xbf16>
    %cst_182 = arith.constant dense<0.000000e+00> : vector<8x128xf32>
    %1141 = tpu.matmul %1140, %6, %cst_182 {dimension_numbers = #tpu.dot_dimension_numbers<[1], [0], [0], [1], [0, 0, 1, 1], [], []>} : vector<8x128xbf16>, vector<128x128xbf16>, vector<8x128xf32> -> vector<8x128xf32>
    %1142 = vector.broadcast %7 : vector<1x128xf32> to vector<8x128xf32>
    %1143 = arith.addf %1141, %1142 : vector<8x128xf32>
    %cst_183 = arith.constant dense<0xFF800000> : vector<8xf32>
    %1144 = vector.multi_reduction <maximumf>, %1143, %cst_183 [1] : vector<8x128xf32> to vector<8xf32>
    %1145 = vector.shape_cast %1144 : vector<8xf32> to vector<8x1xf32>
    %1146 = vector.broadcast %1145 : vector<8x1xf32> to vector<8x128xf32>
    %1147 = arith.cmpf oge, %1143, %1146 : vector<8x128xf32>
    %c128_i32_184 = arith.constant 128 : i32
    %1148 = vector.shape_cast %619 : vector<1x128xi32> to vector<1x128xi32>
    %1149 = vector.broadcast %1148 : vector<1x128xi32> to vector<8x128xi32>
    %1150 = vector.broadcast %c128_i32_184 : i32 to vector<8x128xi32>
    %1151 = arith.select %1147, %1149, %1150 : vector<8x128xi1>, vector<8x128xi32>
    %cst_185 = arith.constant dense<2147483647> : vector<8xi32>
    %1152 = vector.multi_reduction <minsi>, %1151, %cst_185 [1] : vector<8x128xi32> to vector<8xi32>
    %1153 = vector.shape_cast %1152 : vector<8xi32> to vector<8x1xi32>
    %c127_i32_186 = arith.constant 127 : i32
    %1154 = vector.broadcast %c127_i32_186 : i32 to vector<8x1xi32>
    %1155 = arith.minsi %1153, %1154 : vector<8x1xi32>
    %1156 = vector.broadcast %619 : vector<1x128xi32> to vector<8x128xi32>
    %1157 = vector.broadcast %1155 : vector<8x1xi32> to vector<8x128xi32>
    %1158 = arith.cmpi eq, %1156, %1157 : vector<8x128xi32>
    %1159 = arith.extui %1158 : vector<8x128xi1> to vector<8x128xi32>
    %1160 = arith.sitofp %1159 : vector<8x128xi32> to vector<8x128xf32>
    %1161 = arith.truncf %1160 : vector<8x128xf32> to vector<8x128xbf16>
    %c8_i32 = arith.constant 8 : i32
    %1162 = vector.broadcast %c8_i32 : i32 to vector<1x16xi32>
    %1163 = arith.cmpi eq, %620, %1162 : vector<1x16xi32>
    %1164 = vector.shape_cast %1163 : vector<1x16xi1> to vector<1x16xi1>
    %1165 = vector.broadcast %1164 : vector<1x16xi1> to vector<8x16xi1>
    %1166 = vector.shape_cast %1155 : vector<8x1xi32> to vector<8x1xi32>
    %1167 = vector.broadcast %1166 : vector<8x1xi32> to vector<8x16xi32>
    %1168 = arith.select %1165, %1167, %1108 : vector<8x16xi1>, vector<8x16xi32>
    %cst_187 = arith.constant dense<0.000000e+00> : vector<8x384xf32>
    %1169 = tpu.matmul %1161, %3, %cst_187 {dimension_numbers = #tpu.dot_dimension_numbers<[1], [0], [0], [1], [0, 0, 1, 1], [], []>} : vector<8x128xbf16>, vector<128x384xbf16>, vector<8x384xf32> -> vector<8x384xf32>
    %1170 = arith.truncf %1139 : vector<8x128xf32> to vector<8x128xbf16>
    %cst_188 = arith.constant dense<0.000000e+00> : vector<8x384xf32>
    %1171 = tpu.matmul %1170, %4, %cst_188 {dimension_numbers = #tpu.dot_dimension_numbers<[1], [0], [0], [1], [0, 0, 1, 1], [], []>} : vector<8x128xbf16>, vector<128x384xbf16>, vector<8x384xf32> -> vector<8x384xf32>
    %1172 = vector.extract_strided_slice %1169 {offsets = [0, 0], sizes = [8, 128], strides = [1, 1]} : vector<8x384xf32> to vector<8x128xf32>
    %1173 = vector.extract_strided_slice %1171 {offsets = [0, 0], sizes = [8, 128], strides = [1, 1]} : vector<8x384xf32> to vector<8x128xf32>
    %1174 = arith.addf %1172, %1173 : vector<8x128xf32>
    %1175 = arith.negf %1174 : vector<8x128xf32>
    %1176 = math.exp %1175 : vector<8x128xf32>
    %cst_189 = arith.constant 1.000000e+00 : f32
    %1177 = vector.broadcast %cst_189 : f32 to vector<8x128xf32>
    %1178 = arith.addf %1177, %1176 : vector<8x128xf32>
    %1179 = arith.divf %1177, %1178 : vector<8x128xf32>
    %1180 = vector.extract_strided_slice %1169 {offsets = [0, 128], sizes = [8, 128], strides = [1, 1]} : vector<8x384xf32> to vector<8x128xf32>
    %1181 = vector.extract_strided_slice %1171 {offsets = [0, 128], sizes = [8, 128], strides = [1, 1]} : vector<8x384xf32> to vector<8x128xf32>
    %1182 = arith.addf %1180, %1181 : vector<8x128xf32>
    %1183 = arith.negf %1182 : vector<8x128xf32>
    %1184 = math.exp %1183 : vector<8x128xf32>
    %cst_190 = arith.constant 1.000000e+00 : f32
    %1185 = vector.broadcast %cst_190 : f32 to vector<8x128xf32>
    %1186 = arith.addf %1185, %1184 : vector<8x128xf32>
    %1187 = arith.divf %1185, %1186 : vector<8x128xf32>
    %1188 = vector.extract_strided_slice %1169 {offsets = [0, 256], sizes = [8, 128], strides = [1, 1]} : vector<8x384xf32> to vector<8x128xf32>
    %1189 = vector.extract_strided_slice %1171 {offsets = [0, 256], sizes = [8, 128], strides = [1, 1]} : vector<8x384xf32> to vector<8x128xf32>
    %1190 = vector.broadcast %5 : vector<1x128xf32> to vector<8x128xf32>
    %1191 = arith.addf %1189, %1190 : vector<8x128xf32>
    %1192 = arith.mulf %1179, %1191 : vector<8x128xf32>
    %1193 = arith.addf %1188, %1192 : vector<8x128xf32>
    %1194 = math.tanh %1193 : vector<8x128xf32>
    %cst_191 = arith.constant 1.000000e+00 : f32
    %1195 = vector.broadcast %cst_191 : f32 to vector<8x128xf32>
    %1196 = arith.subf %1195, %1187 : vector<8x128xf32>
    %1197 = arith.mulf %1196, %1194 : vector<8x128xf32>
    %1198 = arith.mulf %1187, %1139 : vector<8x128xf32>
    %1199 = arith.addf %1197, %1198 : vector<8x128xf32>
    %1200 = arith.truncf %1199 : vector<8x128xf32> to vector<8x128xbf16>
    %cst_192 = arith.constant dense<0.000000e+00> : vector<8x128xf32>
    %1201 = tpu.matmul %1200, %6, %cst_192 {dimension_numbers = #tpu.dot_dimension_numbers<[1], [0], [0], [1], [0, 0, 1, 1], [], []>} : vector<8x128xbf16>, vector<128x128xbf16>, vector<8x128xf32> -> vector<8x128xf32>
    %1202 = vector.broadcast %7 : vector<1x128xf32> to vector<8x128xf32>
    %1203 = arith.addf %1201, %1202 : vector<8x128xf32>
    %cst_193 = arith.constant dense<0xFF800000> : vector<8xf32>
    %1204 = vector.multi_reduction <maximumf>, %1203, %cst_193 [1] : vector<8x128xf32> to vector<8xf32>
    %1205 = vector.shape_cast %1204 : vector<8xf32> to vector<8x1xf32>
    %1206 = vector.broadcast %1205 : vector<8x1xf32> to vector<8x128xf32>
    %1207 = arith.cmpf oge, %1203, %1206 : vector<8x128xf32>
    %c128_i32_194 = arith.constant 128 : i32
    %1208 = vector.shape_cast %619 : vector<1x128xi32> to vector<1x128xi32>
    %1209 = vector.broadcast %1208 : vector<1x128xi32> to vector<8x128xi32>
    %1210 = vector.broadcast %c128_i32_194 : i32 to vector<8x128xi32>
    %1211 = arith.select %1207, %1209, %1210 : vector<8x128xi1>, vector<8x128xi32>
    %cst_195 = arith.constant dense<2147483647> : vector<8xi32>
    %1212 = vector.multi_reduction <minsi>, %1211, %cst_195 [1] : vector<8x128xi32> to vector<8xi32>
    %1213 = vector.shape_cast %1212 : vector<8xi32> to vector<8x1xi32>
    %c127_i32_196 = arith.constant 127 : i32
    %1214 = vector.broadcast %c127_i32_196 : i32 to vector<8x1xi32>
    %1215 = arith.minsi %1213, %1214 : vector<8x1xi32>
    %1216 = vector.broadcast %619 : vector<1x128xi32> to vector<8x128xi32>
    %1217 = vector.broadcast %1215 : vector<8x1xi32> to vector<8x128xi32>
    %1218 = arith.cmpi eq, %1216, %1217 : vector<8x128xi32>
    %1219 = arith.extui %1218 : vector<8x128xi1> to vector<8x128xi32>
    %1220 = arith.sitofp %1219 : vector<8x128xi32> to vector<8x128xf32>
    %1221 = arith.truncf %1220 : vector<8x128xf32> to vector<8x128xbf16>
    %c9_i32 = arith.constant 9 : i32
    %1222 = vector.broadcast %c9_i32 : i32 to vector<1x16xi32>
    %1223 = arith.cmpi eq, %620, %1222 : vector<1x16xi32>
    %1224 = vector.shape_cast %1223 : vector<1x16xi1> to vector<1x16xi1>
    %1225 = vector.broadcast %1224 : vector<1x16xi1> to vector<8x16xi1>
    %1226 = vector.shape_cast %1215 : vector<8x1xi32> to vector<8x1xi32>
    %1227 = vector.broadcast %1226 : vector<8x1xi32> to vector<8x16xi32>
    %1228 = arith.select %1225, %1227, %1168 : vector<8x16xi1>, vector<8x16xi32>
    %cst_197 = arith.constant dense<0.000000e+00> : vector<8x384xf32>
    %1229 = tpu.matmul %1221, %3, %cst_197 {dimension_numbers = #tpu.dot_dimension_numbers<[1], [0], [0], [1], [0, 0, 1, 1], [], []>} : vector<8x128xbf16>, vector<128x384xbf16>, vector<8x384xf32> -> vector<8x384xf32>
    %1230 = arith.truncf %1199 : vector<8x128xf32> to vector<8x128xbf16>
    %cst_198 = arith.constant dense<0.000000e+00> : vector<8x384xf32>
    %1231 = tpu.matmul %1230, %4, %cst_198 {dimension_numbers = #tpu.dot_dimension_numbers<[1], [0], [0], [1], [0, 0, 1, 1], [], []>} : vector<8x128xbf16>, vector<128x384xbf16>, vector<8x384xf32> -> vector<8x384xf32>
    %1232 = vector.extract_strided_slice %1229 {offsets = [0, 0], sizes = [8, 128], strides = [1, 1]} : vector<8x384xf32> to vector<8x128xf32>
    %1233 = vector.extract_strided_slice %1231 {offsets = [0, 0], sizes = [8, 128], strides = [1, 1]} : vector<8x384xf32> to vector<8x128xf32>
    %1234 = arith.addf %1232, %1233 : vector<8x128xf32>
    %1235 = arith.negf %1234 : vector<8x128xf32>
    %1236 = math.exp %1235 : vector<8x128xf32>
    %cst_199 = arith.constant 1.000000e+00 : f32
    %1237 = vector.broadcast %cst_199 : f32 to vector<8x128xf32>
    %1238 = arith.addf %1237, %1236 : vector<8x128xf32>
    %1239 = arith.divf %1237, %1238 : vector<8x128xf32>
    %1240 = vector.extract_strided_slice %1229 {offsets = [0, 128], sizes = [8, 128], strides = [1, 1]} : vector<8x384xf32> to vector<8x128xf32>
    %1241 = vector.extract_strided_slice %1231 {offsets = [0, 128], sizes = [8, 128], strides = [1, 1]} : vector<8x384xf32> to vector<8x128xf32>
    %1242 = arith.addf %1240, %1241 : vector<8x128xf32>
    %1243 = arith.negf %1242 : vector<8x128xf32>
    %1244 = math.exp %1243 : vector<8x128xf32>
    %cst_200 = arith.constant 1.000000e+00 : f32
    %1245 = vector.broadcast %cst_200 : f32 to vector<8x128xf32>
    %1246 = arith.addf %1245, %1244 : vector<8x128xf32>
    %1247 = arith.divf %1245, %1246 : vector<8x128xf32>
    %1248 = vector.extract_strided_slice %1229 {offsets = [0, 256], sizes = [8, 128], strides = [1, 1]} : vector<8x384xf32> to vector<8x128xf32>
    %1249 = vector.extract_strided_slice %1231 {offsets = [0, 256], sizes = [8, 128], strides = [1, 1]} : vector<8x384xf32> to vector<8x128xf32>
    %1250 = vector.broadcast %5 : vector<1x128xf32> to vector<8x128xf32>
    %1251 = arith.addf %1249, %1250 : vector<8x128xf32>
    %1252 = arith.mulf %1239, %1251 : vector<8x128xf32>
    %1253 = arith.addf %1248, %1252 : vector<8x128xf32>
    %1254 = math.tanh %1253 : vector<8x128xf32>
    %cst_201 = arith.constant 1.000000e+00 : f32
    %1255 = vector.broadcast %cst_201 : f32 to vector<8x128xf32>
    %1256 = arith.subf %1255, %1247 : vector<8x128xf32>
    %1257 = arith.mulf %1256, %1254 : vector<8x128xf32>
    %1258 = arith.mulf %1247, %1199 : vector<8x128xf32>
    %1259 = arith.addf %1257, %1258 : vector<8x128xf32>
    %1260 = arith.truncf %1259 : vector<8x128xf32> to vector<8x128xbf16>
    %cst_202 = arith.constant dense<0.000000e+00> : vector<8x128xf32>
    %1261 = tpu.matmul %1260, %6, %cst_202 {dimension_numbers = #tpu.dot_dimension_numbers<[1], [0], [0], [1], [0, 0, 1, 1], [], []>} : vector<8x128xbf16>, vector<128x128xbf16>, vector<8x128xf32> -> vector<8x128xf32>
    %1262 = vector.broadcast %7 : vector<1x128xf32> to vector<8x128xf32>
    %1263 = arith.addf %1261, %1262 : vector<8x128xf32>
    %cst_203 = arith.constant dense<0xFF800000> : vector<8xf32>
    %1264 = vector.multi_reduction <maximumf>, %1263, %cst_203 [1] : vector<8x128xf32> to vector<8xf32>
    %1265 = vector.shape_cast %1264 : vector<8xf32> to vector<8x1xf32>
    %1266 = vector.broadcast %1265 : vector<8x1xf32> to vector<8x128xf32>
    %1267 = arith.cmpf oge, %1263, %1266 : vector<8x128xf32>
    %c128_i32_204 = arith.constant 128 : i32
    %1268 = vector.shape_cast %619 : vector<1x128xi32> to vector<1x128xi32>
    %1269 = vector.broadcast %1268 : vector<1x128xi32> to vector<8x128xi32>
    %1270 = vector.broadcast %c128_i32_204 : i32 to vector<8x128xi32>
    %1271 = arith.select %1267, %1269, %1270 : vector<8x128xi1>, vector<8x128xi32>
    %cst_205 = arith.constant dense<2147483647> : vector<8xi32>
    %1272 = vector.multi_reduction <minsi>, %1271, %cst_205 [1] : vector<8x128xi32> to vector<8xi32>
    %1273 = vector.shape_cast %1272 : vector<8xi32> to vector<8x1xi32>
    %c127_i32_206 = arith.constant 127 : i32
    %1274 = vector.broadcast %c127_i32_206 : i32 to vector<8x1xi32>
    %1275 = arith.minsi %1273, %1274 : vector<8x1xi32>
    %1276 = vector.broadcast %619 : vector<1x128xi32> to vector<8x128xi32>
    %1277 = vector.broadcast %1275 : vector<8x1xi32> to vector<8x128xi32>
    %1278 = arith.cmpi eq, %1276, %1277 : vector<8x128xi32>
    %1279 = arith.extui %1278 : vector<8x128xi1> to vector<8x128xi32>
    %1280 = arith.sitofp %1279 : vector<8x128xi32> to vector<8x128xf32>
    %1281 = arith.truncf %1280 : vector<8x128xf32> to vector<8x128xbf16>
    %c10_i32 = arith.constant 10 : i32
    %1282 = vector.broadcast %c10_i32 : i32 to vector<1x16xi32>
    %1283 = arith.cmpi eq, %620, %1282 : vector<1x16xi32>
    %1284 = vector.shape_cast %1283 : vector<1x16xi1> to vector<1x16xi1>
    %1285 = vector.broadcast %1284 : vector<1x16xi1> to vector<8x16xi1>
    %1286 = vector.shape_cast %1275 : vector<8x1xi32> to vector<8x1xi32>
    %1287 = vector.broadcast %1286 : vector<8x1xi32> to vector<8x16xi32>
    %1288 = arith.select %1285, %1287, %1228 : vector<8x16xi1>, vector<8x16xi32>
    %cst_207 = arith.constant dense<0.000000e+00> : vector<8x384xf32>
    %1289 = tpu.matmul %1281, %3, %cst_207 {dimension_numbers = #tpu.dot_dimension_numbers<[1], [0], [0], [1], [0, 0, 1, 1], [], []>} : vector<8x128xbf16>, vector<128x384xbf16>, vector<8x384xf32> -> vector<8x384xf32>
    %1290 = arith.truncf %1259 : vector<8x128xf32> to vector<8x128xbf16>
    %cst_208 = arith.constant dense<0.000000e+00> : vector<8x384xf32>
    %1291 = tpu.matmul %1290, %4, %cst_208 {dimension_numbers = #tpu.dot_dimension_numbers<[1], [0], [0], [1], [0, 0, 1, 1], [], []>} : vector<8x128xbf16>, vector<128x384xbf16>, vector<8x384xf32> -> vector<8x384xf32>
    %1292 = vector.extract_strided_slice %1289 {offsets = [0, 0], sizes = [8, 128], strides = [1, 1]} : vector<8x384xf32> to vector<8x128xf32>
    %1293 = vector.extract_strided_slice %1291 {offsets = [0, 0], sizes = [8, 128], strides = [1, 1]} : vector<8x384xf32> to vector<8x128xf32>
    %1294 = arith.addf %1292, %1293 : vector<8x128xf32>
    %1295 = arith.negf %1294 : vector<8x128xf32>
    %1296 = math.exp %1295 : vector<8x128xf32>
    %cst_209 = arith.constant 1.000000e+00 : f32
    %1297 = vector.broadcast %cst_209 : f32 to vector<8x128xf32>
    %1298 = arith.addf %1297, %1296 : vector<8x128xf32>
    %1299 = arith.divf %1297, %1298 : vector<8x128xf32>
    %1300 = vector.extract_strided_slice %1289 {offsets = [0, 128], sizes = [8, 128], strides = [1, 1]} : vector<8x384xf32> to vector<8x128xf32>
    %1301 = vector.extract_strided_slice %1291 {offsets = [0, 128], sizes = [8, 128], strides = [1, 1]} : vector<8x384xf32> to vector<8x128xf32>
    %1302 = arith.addf %1300, %1301 : vector<8x128xf32>
    %1303 = arith.negf %1302 : vector<8x128xf32>
    %1304 = math.exp %1303 : vector<8x128xf32>
    %cst_210 = arith.constant 1.000000e+00 : f32
    %1305 = vector.broadcast %cst_210 : f32 to vector<8x128xf32>
    %1306 = arith.addf %1305, %1304 : vector<8x128xf32>
    %1307 = arith.divf %1305, %1306 : vector<8x128xf32>
    %1308 = vector.extract_strided_slice %1289 {offsets = [0, 256], sizes = [8, 128], strides = [1, 1]} : vector<8x384xf32> to vector<8x128xf32>
    %1309 = vector.extract_strided_slice %1291 {offsets = [0, 256], sizes = [8, 128], strides = [1, 1]} : vector<8x384xf32> to vector<8x128xf32>
    %1310 = vector.broadcast %5 : vector<1x128xf32> to vector<8x128xf32>
    %1311 = arith.addf %1309, %1310 : vector<8x128xf32>
    %1312 = arith.mulf %1299, %1311 : vector<8x128xf32>
    %1313 = arith.addf %1308, %1312 : vector<8x128xf32>
    %1314 = math.tanh %1313 : vector<8x128xf32>
    %cst_211 = arith.constant 1.000000e+00 : f32
    %1315 = vector.broadcast %cst_211 : f32 to vector<8x128xf32>
    %1316 = arith.subf %1315, %1307 : vector<8x128xf32>
    %1317 = arith.mulf %1316, %1314 : vector<8x128xf32>
    %1318 = arith.mulf %1307, %1259 : vector<8x128xf32>
    %1319 = arith.addf %1317, %1318 : vector<8x128xf32>
    %1320 = arith.truncf %1319 : vector<8x128xf32> to vector<8x128xbf16>
    %cst_212 = arith.constant dense<0.000000e+00> : vector<8x128xf32>
    %1321 = tpu.matmul %1320, %6, %cst_212 {dimension_numbers = #tpu.dot_dimension_numbers<[1], [0], [0], [1], [0, 0, 1, 1], [], []>} : vector<8x128xbf16>, vector<128x128xbf16>, vector<8x128xf32> -> vector<8x128xf32>
    %1322 = vector.broadcast %7 : vector<1x128xf32> to vector<8x128xf32>
    %1323 = arith.addf %1321, %1322 : vector<8x128xf32>
    %cst_213 = arith.constant dense<0xFF800000> : vector<8xf32>
    %1324 = vector.multi_reduction <maximumf>, %1323, %cst_213 [1] : vector<8x128xf32> to vector<8xf32>
    %1325 = vector.shape_cast %1324 : vector<8xf32> to vector<8x1xf32>
    %1326 = vector.broadcast %1325 : vector<8x1xf32> to vector<8x128xf32>
    %1327 = arith.cmpf oge, %1323, %1326 : vector<8x128xf32>
    %c128_i32_214 = arith.constant 128 : i32
    %1328 = vector.shape_cast %619 : vector<1x128xi32> to vector<1x128xi32>
    %1329 = vector.broadcast %1328 : vector<1x128xi32> to vector<8x128xi32>
    %1330 = vector.broadcast %c128_i32_214 : i32 to vector<8x128xi32>
    %1331 = arith.select %1327, %1329, %1330 : vector<8x128xi1>, vector<8x128xi32>
    %cst_215 = arith.constant dense<2147483647> : vector<8xi32>
    %1332 = vector.multi_reduction <minsi>, %1331, %cst_215 [1] : vector<8x128xi32> to vector<8xi32>
    %1333 = vector.shape_cast %1332 : vector<8xi32> to vector<8x1xi32>
    %c127_i32_216 = arith.constant 127 : i32
    %1334 = vector.broadcast %c127_i32_216 : i32 to vector<8x1xi32>
    %1335 = arith.minsi %1333, %1334 : vector<8x1xi32>
    %1336 = vector.broadcast %619 : vector<1x128xi32> to vector<8x128xi32>
    %1337 = vector.broadcast %1335 : vector<8x1xi32> to vector<8x128xi32>
    %1338 = arith.cmpi eq, %1336, %1337 : vector<8x128xi32>
    %1339 = arith.extui %1338 : vector<8x128xi1> to vector<8x128xi32>
    %1340 = arith.sitofp %1339 : vector<8x128xi32> to vector<8x128xf32>
    %1341 = arith.truncf %1340 : vector<8x128xf32> to vector<8x128xbf16>
    %c11_i32 = arith.constant 11 : i32
    %1342 = vector.broadcast %c11_i32 : i32 to vector<1x16xi32>
    %1343 = arith.cmpi eq, %620, %1342 : vector<1x16xi32>
    %1344 = vector.shape_cast %1343 : vector<1x16xi1> to vector<1x16xi1>
    %1345 = vector.broadcast %1344 : vector<1x16xi1> to vector<8x16xi1>
    %1346 = vector.shape_cast %1335 : vector<8x1xi32> to vector<8x1xi32>
    %1347 = vector.broadcast %1346 : vector<8x1xi32> to vector<8x16xi32>
    %1348 = arith.select %1345, %1347, %1288 : vector<8x16xi1>, vector<8x16xi32>
    %cst_217 = arith.constant dense<0.000000e+00> : vector<8x384xf32>
    %1349 = tpu.matmul %1341, %3, %cst_217 {dimension_numbers = #tpu.dot_dimension_numbers<[1], [0], [0], [1], [0, 0, 1, 1], [], []>} : vector<8x128xbf16>, vector<128x384xbf16>, vector<8x384xf32> -> vector<8x384xf32>
    %1350 = arith.truncf %1319 : vector<8x128xf32> to vector<8x128xbf16>
    %cst_218 = arith.constant dense<0.000000e+00> : vector<8x384xf32>
    %1351 = tpu.matmul %1350, %4, %cst_218 {dimension_numbers = #tpu.dot_dimension_numbers<[1], [0], [0], [1], [0, 0, 1, 1], [], []>} : vector<8x128xbf16>, vector<128x384xbf16>, vector<8x384xf32> -> vector<8x384xf32>
    %1352 = vector.extract_strided_slice %1349 {offsets = [0, 0], sizes = [8, 128], strides = [1, 1]} : vector<8x384xf32> to vector<8x128xf32>
    %1353 = vector.extract_strided_slice %1351 {offsets = [0, 0], sizes = [8, 128], strides = [1, 1]} : vector<8x384xf32> to vector<8x128xf32>
    %1354 = arith.addf %1352, %1353 : vector<8x128xf32>
    %1355 = arith.negf %1354 : vector<8x128xf32>
    %1356 = math.exp %1355 : vector<8x128xf32>
    %cst_219 = arith.constant 1.000000e+00 : f32
    %1357 = vector.broadcast %cst_219 : f32 to vector<8x128xf32>
    %1358 = arith.addf %1357, %1356 : vector<8x128xf32>
    %1359 = arith.divf %1357, %1358 : vector<8x128xf32>
    %1360 = vector.extract_strided_slice %1349 {offsets = [0, 128], sizes = [8, 128], strides = [1, 1]} : vector<8x384xf32> to vector<8x128xf32>
    %1361 = vector.extract_strided_slice %1351 {offsets = [0, 128], sizes = [8, 128], strides = [1, 1]} : vector<8x384xf32> to vector<8x128xf32>
    %1362 = arith.addf %1360, %1361 : vector<8x128xf32>
    %1363 = arith.negf %1362 : vector<8x128xf32>
    %1364 = math.exp %1363 : vector<8x128xf32>
    %cst_220 = arith.constant 1.000000e+00 : f32
    %1365 = vector.broadcast %cst_220 : f32 to vector<8x128xf32>
    %1366 = arith.addf %1365, %1364 : vector<8x128xf32>
    %1367 = arith.divf %1365, %1366 : vector<8x128xf32>
    %1368 = vector.extract_strided_slice %1349 {offsets = [0, 256], sizes = [8, 128], strides = [1, 1]} : vector<8x384xf32> to vector<8x128xf32>
    %1369 = vector.extract_strided_slice %1351 {offsets = [0, 256], sizes = [8, 128], strides = [1, 1]} : vector<8x384xf32> to vector<8x128xf32>
    %1370 = vector.broadcast %5 : vector<1x128xf32> to vector<8x128xf32>
    %1371 = arith.addf %1369, %1370 : vector<8x128xf32>
    %1372 = arith.mulf %1359, %1371 : vector<8x128xf32>
    %1373 = arith.addf %1368, %1372 : vector<8x128xf32>
    %1374 = math.tanh %1373 : vector<8x128xf32>
    %cst_221 = arith.constant 1.000000e+00 : f32
    %1375 = vector.broadcast %cst_221 : f32 to vector<8x128xf32>
    %1376 = arith.subf %1375, %1367 : vector<8x128xf32>
    %1377 = arith.mulf %1376, %1374 : vector<8x128xf32>
    %1378 = arith.mulf %1367, %1319 : vector<8x128xf32>
    %1379 = arith.addf %1377, %1378 : vector<8x128xf32>
    %1380 = arith.truncf %1379 : vector<8x128xf32> to vector<8x128xbf16>
    %cst_222 = arith.constant dense<0.000000e+00> : vector<8x128xf32>
    %1381 = tpu.matmul %1380, %6, %cst_222 {dimension_numbers = #tpu.dot_dimension_numbers<[1], [0], [0], [1], [0, 0, 1, 1], [], []>} : vector<8x128xbf16>, vector<128x128xbf16>, vector<8x128xf32> -> vector<8x128xf32>
    %1382 = vector.broadcast %7 : vector<1x128xf32> to vector<8x128xf32>
    %1383 = arith.addf %1381, %1382 : vector<8x128xf32>
    %cst_223 = arith.constant dense<0xFF800000> : vector<8xf32>
    %1384 = vector.multi_reduction <maximumf>, %1383, %cst_223 [1] : vector<8x128xf32> to vector<8xf32>
    %1385 = vector.shape_cast %1384 : vector<8xf32> to vector<8x1xf32>
    %1386 = vector.broadcast %1385 : vector<8x1xf32> to vector<8x128xf32>
    %1387 = arith.cmpf oge, %1383, %1386 : vector<8x128xf32>
    %c128_i32_224 = arith.constant 128 : i32
    %1388 = vector.shape_cast %619 : vector<1x128xi32> to vector<1x128xi32>
    %1389 = vector.broadcast %1388 : vector<1x128xi32> to vector<8x128xi32>
    %1390 = vector.broadcast %c128_i32_224 : i32 to vector<8x128xi32>
    %1391 = arith.select %1387, %1389, %1390 : vector<8x128xi1>, vector<8x128xi32>
    %cst_225 = arith.constant dense<2147483647> : vector<8xi32>
    %1392 = vector.multi_reduction <minsi>, %1391, %cst_225 [1] : vector<8x128xi32> to vector<8xi32>
    %1393 = vector.shape_cast %1392 : vector<8xi32> to vector<8x1xi32>
    %c127_i32_226 = arith.constant 127 : i32
    %1394 = vector.broadcast %c127_i32_226 : i32 to vector<8x1xi32>
    %1395 = arith.minsi %1393, %1394 : vector<8x1xi32>
    %1396 = vector.broadcast %619 : vector<1x128xi32> to vector<8x128xi32>
    %1397 = vector.broadcast %1395 : vector<8x1xi32> to vector<8x128xi32>
    %1398 = arith.cmpi eq, %1396, %1397 : vector<8x128xi32>
    %1399 = arith.extui %1398 : vector<8x128xi1> to vector<8x128xi32>
    %1400 = arith.sitofp %1399 : vector<8x128xi32> to vector<8x128xf32>
    %1401 = arith.truncf %1400 : vector<8x128xf32> to vector<8x128xbf16>
    %c12_i32 = arith.constant 12 : i32
    %1402 = vector.broadcast %c12_i32 : i32 to vector<1x16xi32>
    %1403 = arith.cmpi eq, %620, %1402 : vector<1x16xi32>
    %1404 = vector.shape_cast %1403 : vector<1x16xi1> to vector<1x16xi1>
    %1405 = vector.broadcast %1404 : vector<1x16xi1> to vector<8x16xi1>
    %1406 = vector.shape_cast %1395 : vector<8x1xi32> to vector<8x1xi32>
    %1407 = vector.broadcast %1406 : vector<8x1xi32> to vector<8x16xi32>
    %1408 = arith.select %1405, %1407, %1348 : vector<8x16xi1>, vector<8x16xi32>
    %cst_227 = arith.constant dense<0.000000e+00> : vector<8x384xf32>
    %1409 = tpu.matmul %1401, %3, %cst_227 {dimension_numbers = #tpu.dot_dimension_numbers<[1], [0], [0], [1], [0, 0, 1, 1], [], []>} : vector<8x128xbf16>, vector<128x384xbf16>, vector<8x384xf32> -> vector<8x384xf32>
    %1410 = arith.truncf %1379 : vector<8x128xf32> to vector<8x128xbf16>
    %cst_228 = arith.constant dense<0.000000e+00> : vector<8x384xf32>
    %1411 = tpu.matmul %1410, %4, %cst_228 {dimension_numbers = #tpu.dot_dimension_numbers<[1], [0], [0], [1], [0, 0, 1, 1], [], []>} : vector<8x128xbf16>, vector<128x384xbf16>, vector<8x384xf32> -> vector<8x384xf32>
    %1412 = vector.extract_strided_slice %1409 {offsets = [0, 0], sizes = [8, 128], strides = [1, 1]} : vector<8x384xf32> to vector<8x128xf32>
    %1413 = vector.extract_strided_slice %1411 {offsets = [0, 0], sizes = [8, 128], strides = [1, 1]} : vector<8x384xf32> to vector<8x128xf32>
    %1414 = arith.addf %1412, %1413 : vector<8x128xf32>
    %1415 = arith.negf %1414 : vector<8x128xf32>
    %1416 = math.exp %1415 : vector<8x128xf32>
    %cst_229 = arith.constant 1.000000e+00 : f32
    %1417 = vector.broadcast %cst_229 : f32 to vector<8x128xf32>
    %1418 = arith.addf %1417, %1416 : vector<8x128xf32>
    %1419 = arith.divf %1417, %1418 : vector<8x128xf32>
    %1420 = vector.extract_strided_slice %1409 {offsets = [0, 128], sizes = [8, 128], strides = [1, 1]} : vector<8x384xf32> to vector<8x128xf32>
    %1421 = vector.extract_strided_slice %1411 {offsets = [0, 128], sizes = [8, 128], strides = [1, 1]} : vector<8x384xf32> to vector<8x128xf32>
    %1422 = arith.addf %1420, %1421 : vector<8x128xf32>
    %1423 = arith.negf %1422 : vector<8x128xf32>
    %1424 = math.exp %1423 : vector<8x128xf32>
    %cst_230 = arith.constant 1.000000e+00 : f32
    %1425 = vector.broadcast %cst_230 : f32 to vector<8x128xf32>
    %1426 = arith.addf %1425, %1424 : vector<8x128xf32>
    %1427 = arith.divf %1425, %1426 : vector<8x128xf32>
    %1428 = vector.extract_strided_slice %1409 {offsets = [0, 256], sizes = [8, 128], strides = [1, 1]} : vector<8x384xf32> to vector<8x128xf32>
    %1429 = vector.extract_strided_slice %1411 {offsets = [0, 256], sizes = [8, 128], strides = [1, 1]} : vector<8x384xf32> to vector<8x128xf32>
    %1430 = vector.broadcast %5 : vector<1x128xf32> to vector<8x128xf32>
    %1431 = arith.addf %1429, %1430 : vector<8x128xf32>
    %1432 = arith.mulf %1419, %1431 : vector<8x128xf32>
    %1433 = arith.addf %1428, %1432 : vector<8x128xf32>
    %1434 = math.tanh %1433 : vector<8x128xf32>
    %cst_231 = arith.constant 1.000000e+00 : f32
    %1435 = vector.broadcast %cst_231 : f32 to vector<8x128xf32>
    %1436 = arith.subf %1435, %1427 : vector<8x128xf32>
    %1437 = arith.mulf %1436, %1434 : vector<8x128xf32>
    %1438 = arith.mulf %1427, %1379 : vector<8x128xf32>
    %1439 = arith.addf %1437, %1438 : vector<8x128xf32>
    %1440 = arith.truncf %1439 : vector<8x128xf32> to vector<8x128xbf16>
    %cst_232 = arith.constant dense<0.000000e+00> : vector<8x128xf32>
    %1441 = tpu.matmul %1440, %6, %cst_232 {dimension_numbers = #tpu.dot_dimension_numbers<[1], [0], [0], [1], [0, 0, 1, 1], [], []>} : vector<8x128xbf16>, vector<128x128xbf16>, vector<8x128xf32> -> vector<8x128xf32>
    %1442 = vector.broadcast %7 : vector<1x128xf32> to vector<8x128xf32>
    %1443 = arith.addf %1441, %1442 : vector<8x128xf32>
    %cst_233 = arith.constant dense<0xFF800000> : vector<8xf32>
    %1444 = vector.multi_reduction <maximumf>, %1443, %cst_233 [1] : vector<8x128xf32> to vector<8xf32>
    %1445 = vector.shape_cast %1444 : vector<8xf32> to vector<8x1xf32>
    %1446 = vector.broadcast %1445 : vector<8x1xf32> to vector<8x128xf32>
    %1447 = arith.cmpf oge, %1443, %1446 : vector<8x128xf32>
    %c128_i32_234 = arith.constant 128 : i32
    %1448 = vector.shape_cast %619 : vector<1x128xi32> to vector<1x128xi32>
    %1449 = vector.broadcast %1448 : vector<1x128xi32> to vector<8x128xi32>
    %1450 = vector.broadcast %c128_i32_234 : i32 to vector<8x128xi32>
    %1451 = arith.select %1447, %1449, %1450 : vector<8x128xi1>, vector<8x128xi32>
    %cst_235 = arith.constant dense<2147483647> : vector<8xi32>
    %1452 = vector.multi_reduction <minsi>, %1451, %cst_235 [1] : vector<8x128xi32> to vector<8xi32>
    %1453 = vector.shape_cast %1452 : vector<8xi32> to vector<8x1xi32>
    %c127_i32_236 = arith.constant 127 : i32
    %1454 = vector.broadcast %c127_i32_236 : i32 to vector<8x1xi32>
    %1455 = arith.minsi %1453, %1454 : vector<8x1xi32>
    %1456 = vector.broadcast %619 : vector<1x128xi32> to vector<8x128xi32>
    %1457 = vector.broadcast %1455 : vector<8x1xi32> to vector<8x128xi32>
    %1458 = arith.cmpi eq, %1456, %1457 : vector<8x128xi32>
    %1459 = arith.extui %1458 : vector<8x128xi1> to vector<8x128xi32>
    %1460 = arith.sitofp %1459 : vector<8x128xi32> to vector<8x128xf32>
    %1461 = arith.truncf %1460 : vector<8x128xf32> to vector<8x128xbf16>
    %c13_i32 = arith.constant 13 : i32
    %1462 = vector.broadcast %c13_i32 : i32 to vector<1x16xi32>
    %1463 = arith.cmpi eq, %620, %1462 : vector<1x16xi32>
    %1464 = vector.shape_cast %1463 : vector<1x16xi1> to vector<1x16xi1>
    %1465 = vector.broadcast %1464 : vector<1x16xi1> to vector<8x16xi1>
    %1466 = vector.shape_cast %1455 : vector<8x1xi32> to vector<8x1xi32>
    %1467 = vector.broadcast %1466 : vector<8x1xi32> to vector<8x16xi32>
    %1468 = arith.select %1465, %1467, %1408 : vector<8x16xi1>, vector<8x16xi32>
    %cst_237 = arith.constant dense<0.000000e+00> : vector<8x384xf32>
    %1469 = tpu.matmul %1461, %3, %cst_237 {dimension_numbers = #tpu.dot_dimension_numbers<[1], [0], [0], [1], [0, 0, 1, 1], [], []>} : vector<8x128xbf16>, vector<128x384xbf16>, vector<8x384xf32> -> vector<8x384xf32>
    %1470 = arith.truncf %1439 : vector<8x128xf32> to vector<8x128xbf16>
    %cst_238 = arith.constant dense<0.000000e+00> : vector<8x384xf32>
    %1471 = tpu.matmul %1470, %4, %cst_238 {dimension_numbers = #tpu.dot_dimension_numbers<[1], [0], [0], [1], [0, 0, 1, 1], [], []>} : vector<8x128xbf16>, vector<128x384xbf16>, vector<8x384xf32> -> vector<8x384xf32>
    %1472 = vector.extract_strided_slice %1469 {offsets = [0, 0], sizes = [8, 128], strides = [1, 1]} : vector<8x384xf32> to vector<8x128xf32>
    %1473 = vector.extract_strided_slice %1471 {offsets = [0, 0], sizes = [8, 128], strides = [1, 1]} : vector<8x384xf32> to vector<8x128xf32>
    %1474 = arith.addf %1472, %1473 : vector<8x128xf32>
    %1475 = arith.negf %1474 : vector<8x128xf32>
    %1476 = math.exp %1475 : vector<8x128xf32>
    %cst_239 = arith.constant 1.000000e+00 : f32
    %1477 = vector.broadcast %cst_239 : f32 to vector<8x128xf32>
    %1478 = arith.addf %1477, %1476 : vector<8x128xf32>
    %1479 = arith.divf %1477, %1478 : vector<8x128xf32>
    %1480 = vector.extract_strided_slice %1469 {offsets = [0, 128], sizes = [8, 128], strides = [1, 1]} : vector<8x384xf32> to vector<8x128xf32>
    %1481 = vector.extract_strided_slice %1471 {offsets = [0, 128], sizes = [8, 128], strides = [1, 1]} : vector<8x384xf32> to vector<8x128xf32>
    %1482 = arith.addf %1480, %1481 : vector<8x128xf32>
    %1483 = arith.negf %1482 : vector<8x128xf32>
    %1484 = math.exp %1483 : vector<8x128xf32>
    %cst_240 = arith.constant 1.000000e+00 : f32
    %1485 = vector.broadcast %cst_240 : f32 to vector<8x128xf32>
    %1486 = arith.addf %1485, %1484 : vector<8x128xf32>
    %1487 = arith.divf %1485, %1486 : vector<8x128xf32>
    %1488 = vector.extract_strided_slice %1469 {offsets = [0, 256], sizes = [8, 128], strides = [1, 1]} : vector<8x384xf32> to vector<8x128xf32>
    %1489 = vector.extract_strided_slice %1471 {offsets = [0, 256], sizes = [8, 128], strides = [1, 1]} : vector<8x384xf32> to vector<8x128xf32>
    %1490 = vector.broadcast %5 : vector<1x128xf32> to vector<8x128xf32>
    %1491 = arith.addf %1489, %1490 : vector<8x128xf32>
    %1492 = arith.mulf %1479, %1491 : vector<8x128xf32>
    %1493 = arith.addf %1488, %1492 : vector<8x128xf32>
    %1494 = math.tanh %1493 : vector<8x128xf32>
    %cst_241 = arith.constant 1.000000e+00 : f32
    %1495 = vector.broadcast %cst_241 : f32 to vector<8x128xf32>
    %1496 = arith.subf %1495, %1487 : vector<8x128xf32>
    %1497 = arith.mulf %1496, %1494 : vector<8x128xf32>
    %1498 = arith.mulf %1487, %1439 : vector<8x128xf32>
    %1499 = arith.addf %1497, %1498 : vector<8x128xf32>
    %1500 = arith.truncf %1499 : vector<8x128xf32> to vector<8x128xbf16>
    %cst_242 = arith.constant dense<0.000000e+00> : vector<8x128xf32>
    %1501 = tpu.matmul %1500, %6, %cst_242 {dimension_numbers = #tpu.dot_dimension_numbers<[1], [0], [0], [1], [0, 0, 1, 1], [], []>} : vector<8x128xbf16>, vector<128x128xbf16>, vector<8x128xf32> -> vector<8x128xf32>
    %1502 = vector.broadcast %7 : vector<1x128xf32> to vector<8x128xf32>
    %1503 = arith.addf %1501, %1502 : vector<8x128xf32>
    %cst_243 = arith.constant dense<0xFF800000> : vector<8xf32>
    %1504 = vector.multi_reduction <maximumf>, %1503, %cst_243 [1] : vector<8x128xf32> to vector<8xf32>
    %1505 = vector.shape_cast %1504 : vector<8xf32> to vector<8x1xf32>
    %1506 = vector.broadcast %1505 : vector<8x1xf32> to vector<8x128xf32>
    %1507 = arith.cmpf oge, %1503, %1506 : vector<8x128xf32>
    %c128_i32_244 = arith.constant 128 : i32
    %1508 = vector.shape_cast %619 : vector<1x128xi32> to vector<1x128xi32>
    %1509 = vector.broadcast %1508 : vector<1x128xi32> to vector<8x128xi32>
    %1510 = vector.broadcast %c128_i32_244 : i32 to vector<8x128xi32>
    %1511 = arith.select %1507, %1509, %1510 : vector<8x128xi1>, vector<8x128xi32>
    %cst_245 = arith.constant dense<2147483647> : vector<8xi32>
    %1512 = vector.multi_reduction <minsi>, %1511, %cst_245 [1] : vector<8x128xi32> to vector<8xi32>
    %1513 = vector.shape_cast %1512 : vector<8xi32> to vector<8x1xi32>
    %c127_i32_246 = arith.constant 127 : i32
    %1514 = vector.broadcast %c127_i32_246 : i32 to vector<8x1xi32>
    %1515 = arith.minsi %1513, %1514 : vector<8x1xi32>
    %1516 = vector.broadcast %619 : vector<1x128xi32> to vector<8x128xi32>
    %1517 = vector.broadcast %1515 : vector<8x1xi32> to vector<8x128xi32>
    %1518 = arith.cmpi eq, %1516, %1517 : vector<8x128xi32>
    %1519 = arith.extui %1518 : vector<8x128xi1> to vector<8x128xi32>
    %1520 = arith.sitofp %1519 : vector<8x128xi32> to vector<8x128xf32>
    %1521 = arith.truncf %1520 : vector<8x128xf32> to vector<8x128xbf16>
    %c14_i32 = arith.constant 14 : i32
    %1522 = vector.broadcast %c14_i32 : i32 to vector<1x16xi32>
    %1523 = arith.cmpi eq, %620, %1522 : vector<1x16xi32>
    %1524 = vector.shape_cast %1523 : vector<1x16xi1> to vector<1x16xi1>
    %1525 = vector.broadcast %1524 : vector<1x16xi1> to vector<8x16xi1>
    %1526 = vector.shape_cast %1515 : vector<8x1xi32> to vector<8x1xi32>
    %1527 = vector.broadcast %1526 : vector<8x1xi32> to vector<8x16xi32>
    %1528 = arith.select %1525, %1527, %1468 : vector<8x16xi1>, vector<8x16xi32>
    %cst_247 = arith.constant dense<0.000000e+00> : vector<8x384xf32>
    %1529 = tpu.matmul %1521, %3, %cst_247 {dimension_numbers = #tpu.dot_dimension_numbers<[1], [0], [0], [1], [0, 0, 1, 1], [], []>} : vector<8x128xbf16>, vector<128x384xbf16>, vector<8x384xf32> -> vector<8x384xf32>
    %1530 = arith.truncf %1499 : vector<8x128xf32> to vector<8x128xbf16>
    %cst_248 = arith.constant dense<0.000000e+00> : vector<8x384xf32>
    %1531 = tpu.matmul %1530, %4, %cst_248 {dimension_numbers = #tpu.dot_dimension_numbers<[1], [0], [0], [1], [0, 0, 1, 1], [], []>} : vector<8x128xbf16>, vector<128x384xbf16>, vector<8x384xf32> -> vector<8x384xf32>
    %1532 = vector.extract_strided_slice %1529 {offsets = [0, 0], sizes = [8, 128], strides = [1, 1]} : vector<8x384xf32> to vector<8x128xf32>
    %1533 = vector.extract_strided_slice %1531 {offsets = [0, 0], sizes = [8, 128], strides = [1, 1]} : vector<8x384xf32> to vector<8x128xf32>
    %1534 = arith.addf %1532, %1533 : vector<8x128xf32>
    %1535 = arith.negf %1534 : vector<8x128xf32>
    %1536 = math.exp %1535 : vector<8x128xf32>
    %cst_249 = arith.constant 1.000000e+00 : f32
    %1537 = vector.broadcast %cst_249 : f32 to vector<8x128xf32>
    %1538 = arith.addf %1537, %1536 : vector<8x128xf32>
    %1539 = arith.divf %1537, %1538 : vector<8x128xf32>
    %1540 = vector.extract_strided_slice %1529 {offsets = [0, 128], sizes = [8, 128], strides = [1, 1]} : vector<8x384xf32> to vector<8x128xf32>
    %1541 = vector.extract_strided_slice %1531 {offsets = [0, 128], sizes = [8, 128], strides = [1, 1]} : vector<8x384xf32> to vector<8x128xf32>
    %1542 = arith.addf %1540, %1541 : vector<8x128xf32>
    %1543 = arith.negf %1542 : vector<8x128xf32>
    %1544 = math.exp %1543 : vector<8x128xf32>
    %cst_250 = arith.constant 1.000000e+00 : f32
    %1545 = vector.broadcast %cst_250 : f32 to vector<8x128xf32>
    %1546 = arith.addf %1545, %1544 : vector<8x128xf32>
    %1547 = arith.divf %1545, %1546 : vector<8x128xf32>
    %1548 = vector.extract_strided_slice %1529 {offsets = [0, 256], sizes = [8, 128], strides = [1, 1]} : vector<8x384xf32> to vector<8x128xf32>
    %1549 = vector.extract_strided_slice %1531 {offsets = [0, 256], sizes = [8, 128], strides = [1, 1]} : vector<8x384xf32> to vector<8x128xf32>
    %1550 = vector.broadcast %5 : vector<1x128xf32> to vector<8x128xf32>
    %1551 = arith.addf %1549, %1550 : vector<8x128xf32>
    %1552 = arith.mulf %1539, %1551 : vector<8x128xf32>
    %1553 = arith.addf %1548, %1552 : vector<8x128xf32>
    %1554 = math.tanh %1553 : vector<8x128xf32>
    %cst_251 = arith.constant 1.000000e+00 : f32
    %1555 = vector.broadcast %cst_251 : f32 to vector<8x128xf32>
    %1556 = arith.subf %1555, %1547 : vector<8x128xf32>
    %1557 = arith.mulf %1556, %1554 : vector<8x128xf32>
    %1558 = arith.mulf %1547, %1499 : vector<8x128xf32>
    %1559 = arith.addf %1557, %1558 : vector<8x128xf32>
    %1560 = arith.truncf %1559 : vector<8x128xf32> to vector<8x128xbf16>
    %cst_252 = arith.constant dense<0.000000e+00> : vector<8x128xf32>
    %1561 = tpu.matmul %1560, %6, %cst_252 {dimension_numbers = #tpu.dot_dimension_numbers<[1], [0], [0], [1], [0, 0, 1, 1], [], []>} : vector<8x128xbf16>, vector<128x128xbf16>, vector<8x128xf32> -> vector<8x128xf32>
    %1562 = vector.broadcast %7 : vector<1x128xf32> to vector<8x128xf32>
    %1563 = arith.addf %1561, %1562 : vector<8x128xf32>
    %cst_253 = arith.constant dense<0xFF800000> : vector<8xf32>
    %1564 = vector.multi_reduction <maximumf>, %1563, %cst_253 [1] : vector<8x128xf32> to vector<8xf32>
    %1565 = vector.shape_cast %1564 : vector<8xf32> to vector<8x1xf32>
    %1566 = vector.broadcast %1565 : vector<8x1xf32> to vector<8x128xf32>
    %1567 = arith.cmpf oge, %1563, %1566 : vector<8x128xf32>
    %c128_i32_254 = arith.constant 128 : i32
    %1568 = vector.shape_cast %619 : vector<1x128xi32> to vector<1x128xi32>
    %1569 = vector.broadcast %1568 : vector<1x128xi32> to vector<8x128xi32>
    %1570 = vector.broadcast %c128_i32_254 : i32 to vector<8x128xi32>
    %1571 = arith.select %1567, %1569, %1570 : vector<8x128xi1>, vector<8x128xi32>
    %cst_255 = arith.constant dense<2147483647> : vector<8xi32>
    %1572 = vector.multi_reduction <minsi>, %1571, %cst_255 [1] : vector<8x128xi32> to vector<8xi32>
    %1573 = vector.shape_cast %1572 : vector<8xi32> to vector<8x1xi32>
    %c127_i32_256 = arith.constant 127 : i32
    %1574 = vector.broadcast %c127_i32_256 : i32 to vector<8x1xi32>
    %1575 = arith.minsi %1573, %1574 : vector<8x1xi32>
    %c15_i32 = arith.constant 15 : i32
    %1576 = vector.broadcast %c15_i32 : i32 to vector<1x16xi32>
    %1577 = arith.cmpi eq, %620, %1576 : vector<1x16xi32>
    %1578 = vector.shape_cast %1577 : vector<1x16xi1> to vector<1x16xi1>
    %1579 = vector.broadcast %1578 : vector<1x16xi1> to vector<8x16xi1>
    %1580 = vector.shape_cast %1575 : vector<8x1xi32> to vector<8x1xi32>
    %1581 = vector.broadcast %1580 : vector<8x1xi32> to vector<8x16xi32>
    %1582 = arith.select %1579, %1581, %1528 : vector<8x16xi1>, vector<8x16xi32>
    %c5_i32_257 = arith.constant 5 : i32
    %1583 = vector.broadcast %c5_i32_257 : i32 to vector<8x16xi32>
    %1584 = arith.cmpi eq, %1582, %1583 : vector<8x16xi32>
    %c6_i32_258 = arith.constant 6 : i32
    %1585 = vector.broadcast %c6_i32_258 : i32 to vector<8x16xi32>
    %1586 = arith.cmpi eq, %1582, %1585 : vector<8x16xi32>
    %1587 = arith.ori %1584, %1586 : vector<8x16xi1>
    %c7_i32_259 = arith.constant 7 : i32
    %1588 = vector.broadcast %c7_i32_259 : i32 to vector<8x16xi32>
    %1589 = arith.cmpi eq, %1582, %1588 : vector<8x16xi32>
    %1590 = arith.ori %1587, %1589 : vector<8x16xi1>
    %c8_i32_260 = arith.constant 8 : i32
    %1591 = vector.broadcast %c8_i32_260 : i32 to vector<8x16xi32>
    %1592 = arith.cmpi eq, %1582, %1591 : vector<8x16xi32>
    %1593 = arith.ori %1590, %1592 : vector<8x16xi1>
    %c9_i32_261 = arith.constant 9 : i32
    %1594 = vector.broadcast %c9_i32_261 : i32 to vector<8x16xi32>
    %1595 = arith.select %1593, %1594, %1582 : vector<8x16xi1>, vector<8x16xi32>
    %c0_262 = arith.constant 0 : index
    %c0_263 = arith.constant 0 : index
    %1596 = vector.load %arg10[%c0_262, %c0_263] : memref<8x16xi32, #tpu.memory_space<vmem>>, vector<8x16xi32>
    tpu.vector_store %arg10[%c0_262, %c0_263], %1595 {strides = array<i32>} : memref<8x16xi32, #tpu.memory_space<vmem>>, vector<8x16xi32>,
    %c4_i32_264 = arith.constant 4 : i32
    %1597 = vector.broadcast %c4_i32_264 : i32 to vector<8x16xi32>
    %1598 = arith.cmpi ne, %1582, %1597 : vector<8x16xi32>
    %1599 = arith.extui %1598 : vector<8x16xi1> to vector<8x16xi32>
    %c0_265 = arith.constant 0 : index
    %c0_266 = arith.constant 0 : index
    %1600 = vector.load %arg11[%c0_265, %c0_266] : memref<8x16xi32, #tpu.memory_space<vmem>>, vector<8x16xi32>
    tpu.vector_store %arg11[%c0_265, %c0_266], %1599 {strides = array<i32>} : memref<8x16xi32, #tpu.memory_space<vmem>>, vector<8x16xi32>,
    return
  }
  func.func @transform_0(%arg0: i32) -> (i32, i32) {
    %c0_i32 = arith.constant 0 : i32
    %c0_i32_0 = arith.constant 0 : i32
    return %arg0, %c0_i32 : i32, i32
  }
  func.func @transform_1(%arg0: i32) -> (i32, i32) {
    %c0_i32 = arith.constant 0 : i32
    %c0_i32_0 = arith.constant 0 : i32
    %c0_i32_1 = arith.constant 0 : i32
    return %c0_i32, %c0_i32_0 : i32, i32
  }
  func.func @transform_2(%arg0: i32) -> (i32, i32) {
    %c0_i32 = arith.constant 0 : i32
    %c0_i32_0 = arith.constant 0 : i32
    %c0_i32_1 = arith.constant 0 : i32
    return %c0_i32, %c0_i32_0 : i32, i32
  }
  func.func @transform_3(%arg0: i32) -> (i32, i32) {
    %c0_i32 = arith.constant 0 : i32
    %c0_i32_0 = arith.constant 0 : i32
    %c0_i32_1 = arith.constant 0 : i32
    return %c0_i32, %c0_i32_0 : i32, i32
  }
  func.func @transform_4(%arg0: i32) -> (i32, i32) {
    %c0_i32 = arith.constant 0 : i32
    %c0_i32_0 = arith.constant 0 : i32
    %c0_i32_1 = arith.constant 0 : i32
    return %c0_i32, %c0_i32_0 : i32, i32
  }
  func.func @transform_5(%arg0: i32) -> (i32, i32) {
    %c0_i32 = arith.constant 0 : i32
    %c0_i32_0 = arith.constant 0 : i32
    %c0_i32_1 = arith.constant 0 : i32
    return %c0_i32, %c0_i32_0 : i32, i32
  }
  func.func @transform_6(%arg0: i32) -> (i32, i32) {
    %c0_i32 = arith.constant 0 : i32
    %c0_i32_0 = arith.constant 0 : i32
    %c0_i32_1 = arith.constant 0 : i32
    return %c0_i32, %c0_i32_0 : i32, i32
  }
  func.func @transform_7(%arg0: i32) -> (i32, i32) {
    %c0_i32 = arith.constant 0 : i32
    %c0_i32_0 = arith.constant 0 : i32
    %c0_i32_1 = arith.constant 0 : i32
    return %c0_i32, %c0_i32_0 : i32, i32
  }
  func.func @transform_8(%arg0: i32) -> (i32, i32) {
    %c0_i32 = arith.constant 0 : i32
    %c0_i32_0 = arith.constant 0 : i32
    %c0_i32_1 = arith.constant 0 : i32
    return %c0_i32, %c0_i32_0 : i32, i32
  }
  func.func @transform_9(%arg0: i32) -> (i32, i32) {
    %c0_i32 = arith.constant 0 : i32
    %c0_i32_0 = arith.constant 0 : i32
    return %arg0, %c0_i32 : i32, i32
  }
  func.func @transform_10(%arg0: i32) -> (i32, i32) {
    %c0_i32 = arith.constant 0 : i32
    %c0_i32_0 = arith.constant 0 : i32
    return %arg0, %c0_i32 : i32, i32
  }
}

</mosaic_0001>

<bundles_post_ra>
// kernel: _g2p_forward_impl.1
= control target key start
LH: loop header
LB: loop body
LE: loop exit
PB: predicated region body
PF: predicated region fallthrough
CT: control target
= control target key end

     0   :  { %s10298_s0 = inlined_call_operand.hbm [shape: s32[16,16], index: 0, kind: input, shape index: {}]   ;;  %s10299_s1 = inlined_call_operand.hbm [shape: bf16[32,384], index: 1, kind: input, shape index: {}]   ;;  %s10300_s2 = inlined_call_operand.hbm [shape: bf16[128,384], index: 2, kind: input, shape index: {}]   ;;  %s10301_s3 = inlined_call_operand.vmem [shape: f32[1,128], index: 3, kind: input, shape index: {}]   ;;  %s10302_s4 = inlined_call_operand.hbm [shape: bf16[128,384], index: 4, kind: input, shape index: {}]   ;;  %s10303_s5 = inlined_call_operand.hbm [shape: bf16[128,384], index: 5, kind: input, shape index: {}]   ;;  %s10304_s6 = inlined_call_operand.hbm [shape: f32[1,128], index: 6, kind: input, shape index: {}]   ;;  %s10305_s7 = inlined_call_operand.hbm [shape: bf16[128,128], index: 7, kind: input, shape index: {}]   ;;  %s10306_s8 = inlined_call_operand.vmem [shape: f32[1,128], index: 8, kind: input, shape index: {}]   ;;  %s10307_s9 = inlined_call_operand.hbm [shape: s32[16,16], index: 9, kind: output, shape index: {0}]   ;;  %s10308_s10 = inlined_call_operand.hbm [shape: s32[16,16], index: 10, kind: output, shape index: {1}]  }
   0x1   :  { %10416 = sst [smem:[#allocation48_spill]] %s10299_s1 }
   0x2   :  { %10417 = sst [smem:[#allocation49_spill]] %s10300_s2 }
   0x3   :  { %10418 = sst [smem:[#allocation50_spill]] %s10302_s4 }
   0x4   :  { %10419 = sst [smem:[#allocation51_spill]] %s10303_s5 }
   0x5   :  { %10420 = sst [smem:[#allocation52_spill]] %s10304_s6 }
   0x6   :  { %16 = vsyncpa [#allocation3], 0 }
   0x7   :  { %18 = vsyncpa [#allocation3 + $0x1], 0 }
   0x8   :  { %19 = vsyncpa [#allocation6], 0 }
   0x9   :  { %20 = vsyncpa [#allocation9], 0 }
   0xa   :  { %21 = vsyncpa [#allocation12], 0 }
   0xb   :  { %22 = vsyncpa [#allocation4], 0 }
   0xc   :  { %24 = vsyncpa [#allocation4 + $0x1], 0 }
   0xd   :  { %25 = vsyncpa [#allocation16], 0 }
   0xe   :  { %27 = vsyncpa [#allocation16 + $0x1], 0  ;;  %s7785_s13 = smov 0   ;;  %s7787_s14 = smov 0  }
   0xf   :  { %s7789_s15 = smov 0   ;;  %s7791_s16 = smov 0  }
  0x10 LB: > { %s10421_s1 = sld [smem:[#allocation48_spill]]  ;;  %s7809_s20 = sadd.s32 4294967295, %s7700_s16   ;;  %s7700_s16 = sphi %s7791_s16, %s10739_s16   ;;  %s7696_s15 = sphi %s7789_s15, %s10738_s15   ;;  %s7692_s14 = sphi %s7787_s14, %s10737_s14   ;;  %s7688_s13 = sphi %s7785_s13, %s10736_s13  }
  0x11   : > { %p6174_p0 = scmp.ge.s32.totalorder %s7700_s16, 1  ;;  %p54_p1 = scmp.eq.s32.totalorder %s7809_s20, 0 }
  0x12   : > { %p284_p2 = scmp.lt.s32.totalorder %s7700_s16, 3  ;;  %s7702_s22 = smov [#allocation5]  }
  0x13   : > { %s297_s23 = sshll.u32 %s7702_s22, 4  ;;  %s10423_s4 = sld [smem:[#allocation50_spill]]  ;;  %s298_s23 = int_to_ptr.vmem [resolvable:$true] %s297_s23 }
  0x14   : > { %p7814_p3 = pnand %p6174_p0, %p284_p2  ;;  %s10425_s6 = sld [smem:[#allocation52_spill]] }
  0x15   : > { %s7703_s11 = smov [#allocation8]   ;;  %s7704_s17 = smov 192  }
  0x16   : > { %s295_s19 = sshll.u32 %s10421_s1, 4  ;;  %p6900_p4 = pneg %p7814_p3  ;;  %s296_s19 = int_to_ptr.hbm [resolvable:$true] %s295_s19 }
  0x17   : > { %s328_s12 = sshll.u32 %s7703_s11, 4  ;;  %s7705_s18 = smov 12   ;;  %s329_s12 = int_to_ptr.vmem [resolvable:$true] %s328_s12 }
  0x18   : > { %p7826_p6 = pnand %p6900_p4, %p54_p1  ;;  %s10426_s2 = sld [smem:[#allocation49_spill]] }
  0x19   : > { %s326_s26 = sshll.u32 %s10423_s4, 4  ;;  %s7706_s1 = smov [#allocation11]   ;;  %s327_s26 = int_to_ptr.hbm [resolvable:$true] %s326_s26 }
  0x1a   : > { %s355_s30 = sshll.u32 %s10425_s6, 4  ;;  %s357_s4 = sshll.u32 %s7706_s1, 4  ;;  %s356_s30 = int_to_ptr.hbm [resolvable:$true] %s355_s30  ;;  %s358_s4 = int_to_ptr.vmem [resolvable:$true] %s357_s4 }
  0x1b   : > { %6903 = dma.hbm_to_vmem [thread:$0]  (!%p7826_p6), %s296_s19, 768, %s298_s23, [#allocation6], %s7704_s17, %s7704_s17, %s7705_s18  }
  0x1c   : > { %6909 = dma.hbm_to_vmem [thread:$0]  (!%p7826_p6), %s327_s26, 3072, %s329_s12, [#allocation9], %s7704_s17, %s7704_s17, %s7705_s18  }
  0x1d   : > { %6915 = dma.hbm_to_vmem [thread:$0]  (!%p7826_p6), %s356_s30, 16, %s358_s4, [#allocation12]  }
  0x1e   : > { %s309_s25 = sshll.u32 %s10426_s2, 4  ;;  %s7707_s28 = smov [#allocation7]   ;;  %s310_s25 = int_to_ptr.hbm [resolvable:$true] %s309_s25 }
  0x1f   : > { %s311_s29 = sshll.u32 %s7707_s28, 4  ;;  %s10427_s5 = sld [smem:[#allocation51_spill]]  ;;  %s312_s29 = int_to_ptr.vmem [resolvable:$true] %s311_s29 }
  0x20   : > { %6906 = dma.hbm_to_vmem [thread:$0]  (!%p7826_p6), %s310_s25, 3072, %s312_s29, [#allocation6], %s7704_s17, %s7704_s17, %s7705_s18  }
  0x21   : > { %s366_s26 = sshll.u32 %s10305_s7, 4  ;;  %s7708_s4 = smov [#allocation10]   ;;  %s367_s26 = int_to_ptr.hbm [resolvable:$true] %s366_s26 }
  0x22   : > { %s342_s30 = sshll.u32 %s7708_s4, 4  ;;  %s7709_s6 = smov [#allocation13]   ;;  %s343_s30 = int_to_ptr.vmem [resolvable:$true] %s342_s30 }
  0x23   : > { %s368_s12 = sshll.u32 %s7709_s6, 4  ;;  %s7710_s22 = smov 64   ;;  %s369_s12 = int_to_ptr.vmem [resolvable:$true] %s368_s12 }
  0x24   : > { %s7711_s24 = smov 4   ;;  %s6173_s25 = sadd.s32 4294967294, %s7700_s16  }
  0x25   : > { %s340_s19 = sshll.u32 %s10427_s5, 4  ;;  %s7856_s28 = sadd.s32 1, %s7700_s16   ;;  %s341_s19 = int_to_ptr.hbm [resolvable:$true] %s340_s19 }
  0x26   : > { %6912 = dma.hbm_to_vmem [thread:$0]  (!%p7826_p6), %s341_s19, 3072, %s343_s30, [#allocation9], %s7704_s17, %s7704_s17, %s7705_s18  }
  0x27   : > { %6918 = dma.hbm_to_vmem [thread:$0]  (!%p7826_p6), %s367_s26, 1024, %s369_s12, [#allocation12], %s7710_s22, %s7710_s22, %s7711_s24  }
  0x28   : > { %s37_s29 = ssub.s32 %s7700_s16, %s7856_s28  ;;  %s40_s11 = sadd.s32 1, %s7696_s15 }
  0x29   : > { %p38_p7 = scmp.eq.s32.totalorder %s37_s29, 0  ;;  %p47_p8 = scmp.ne.s32.totalorder %s7696_s15, %s7692_s14 }
  0x2a   : > { %p48_p9 = scmp.eq.s32.totalorder %s7700_s16, 0  ;;  %p53_p10 = scmp.ne.s32.totalorder %s7692_s14, %s7688_s13 }
  0x2b   : > { %s7867_s17 = scalar_select %p38_p7, %s7696_s15, %s40_s11  }
  0x2c   : > { %p7869_p11 = por %p48_p9, %p47_p8  ;;  %p7875_p12 = por %p54_p1, %p53_p10 }
  0x2d   : > { %p245_p13 = scmp.eq.s32.totalorder %s7809_s20, 1  ;;  %p251_p0 = scmp.eq.s32.totalorder %s6173_s25, 1 }
  0x2e   : > { %p6936_p2 = scmp.lt.s32.totalorder %s7700_s16, 2  ;;  %s385_s19 = sand.u32 1, %s7696_s15  }
  0x2f   : > { %p7882_p4 = por %p245_p13, %p47_p8  ;;  %p7886_p6 = por %p251_p0, %p53_p10 }
  0x30   : > { %s6182_s26 = sshll.u32 %s385_s19, 3  ;;  %s6183_s4 = sshll.u32 %s7700_s16, 3 }
  0x31   : > { %s393_s12 = scalar_lea.hbm %s10298_s0, %s6183_s4  ;;  %s389_s22 = scalar_lea.vmem [#allocation2], %s6182_s26 }
  0x32   : > { %s397_s24 = sshll.u32 %s389_s22, 4  ;;  %s395_s29 = sshll.u32 %s393_s12, 4  ;;  %s398_s24 = int_to_ptr.vmem [resolvable:$true] %s397_s24  ;;  %s396_s29 = int_to_ptr.hbm [resolvable:$true] %s395_s29 }
  0x33   : > { %p7896_p7 = pnand %p6936_p2, %p7869_p11  ;;  %s386_s11 = scalar_lea.sflag [#allocation3], %s385_s19 }
  0x34   : > { %s7560_s2 = sshra.s32 %s396_s29, 4  ;;  %s7567_s30 = scalar_lea.hbm %s10298_s0, 16  ;;  %s7561_s2 = int_to_ptr.hbm [resolvable:$true] %s7560_s2 }
  0x35   : > { %s7562_s5 = scalar_lea.hbm %s7561_s2, 8  ;;  %p7564_p9 = pneg %p7896_p7 }
  0x36   : > { %p7563_p8 = scmp.ne.s32.totalorder %s7561_s2, %s7562_s5  ;;  %p7568_p11 = scmp.lt.s32.totalorder %s7561_s2, %s10298_s0 }
  0x37   : > { %p7569_p0 = scmp.lt.s32.totalorder %s7567_s30, %s7562_s5 }
  0x38   : > { %p7565_p10 = pnand %p7564_p9, %p7563_p8 }
  0x39   : > { %p7570_p2 = por %p7569_p0, %p7568_p11 }
  0x3a   : > { %p7566_p13 = pneg %p7565_p10 }
  0x3c   : > { %p7571_p5 = pnand %p7570_p2, %p7566_p13 }
  0x3e   : > { %7574 = shalt.err (!%p7571_p5)
}
  0x3f   : > { %6922 = dma.hbm_to_vmem [thread:$0]  (!%p7896_p7), %s396_s29, 128, %s398_s24, %s386_s11  }
  0x40   : > { %406 = sbr.rel (%p7814_p3) target bundleno = 13876 (0x3634), region = 56 }
  0x45   : > { %s7913_s19 = sand.u32 1, %s7692_s14  }
  0x46   : > { %s7916_s12 = sshll.u32 %s7913_s19, 3  ;;  %s409_s2 = scalar_lea.sflag [#allocation3], %s7913_s19 }
  0x47   : > { %s7920_s5 = scalar_lea.vmem [#allocation2], %s7916_s12 }
  0x48   : > { %7663 = dma.done.wait (%p7875_p12), %s409_s2, 128  }
  0x49   : > { %7665 = vsyncadd (%p7875_p12), %s409_s2, 4294967168 }
  0x4a   : > { %7667 = dma.done.wait (%p54_p1), [#allocation6], 3840  }
  0x4b   : > { %7669 = vsyncadd (%p54_p1), [#allocation6], 4294963456 }
  0x4c   : > { %7671 = dma.done.wait (%p54_p1), [#allocation9], 6144  }
  0x4d   : > { %7673 = vsyncadd (%p54_p1), [#allocation9], 4294961152 }
  0x4e   : > { %7675 = dma.done.wait (%p54_p1), [#allocation12], 1040  }
  0x4f   : > { %7677 = vsyncadd (%p54_p1), [#allocation12], 4294966256  ;;  %v10309_v0 = vmov 0   ;;  %v7940_v1 = vld [vmem:[%s7920_s5] sm:$0xff]  ;;  %v6812_v3 = vld [vmem:[#allocation7 + $0xb0] sm:$0xf0] }
  0x50   : > { %7004 = vset.pattern.permute.xlu0 %v10309_v0  ;;  %v6308_v2 = vld [vmem:[#allocation7 + $0xa8] sm:$0xf]  ;;  %v6296_v5 = vld [vmem:[#allocation7 + $0x90] sm:$0xf]  ;;  %v6809_v6 = vld [vmem:[#allocation7 + $0x98] sm:$0xf0] }
  0x51   : > { %613 = vperm.xlu0 %7004, %v7940_v1   ;;  %v7943_v4 = vor.u32 %v6812_v3, %v6308_v2  ;;  %v7946_v7 = vor.u32 %v6809_v6, %v6296_v5  ;;  %v6209_v8 = vld [vmem:[#allocation5 + $0x18] sm:$0xf]  ;;  %v6284_v9 = vld [vmem:[#allocation7 + $0x78] sm:$0xf]  ;;  %v6806_v10 = vld [vmem:[#allocation7 + $0x80] sm:$0xf0] }
  0x52   : > { %v6788_v11 = vld [vmem:[#allocation5 + $0x20] sm:$0xf0]  ;;  %v6197_v13 = vld [vmem:[#allocation5] sm:$0xf]  ;;  %v6785_v14 = vld [vmem:[#allocation5 + $0x8] sm:$0xf0]  ;;  %v7951_v17 = vor.u32 %v6806_v10, %v6284_v9 }
  0x53   : > { %822 = vmatpush.bf16.msra.mxu3 %v7943_v4  ;;  %v7948_v12 = vor.u32 %v6788_v11, %v6209_v8  ;;  %v6811_v15 = vld [vmem:[#allocation7 + $0xac] sm:$0xf]  ;;  %v6310_v16 = vld [vmem:[#allocation7 + $0xb4] sm:$0xf0]  ;;  %v6272_v18 = vld [vmem:[#allocation7 + $0x60] sm:$0xf]  ;;  %v7954_v20 = vor.u32 %v6785_v14, %v6197_v13 }
  0x54   : > { %v6803_v19 = vld [vmem:[#allocation7 + $0x68] sm:$0xf0]  ;;  %v7956_v21 = vor.u32 %v6811_v15, %v6310_v16  ;;  %v6808_v22 = vld [vmem:[#allocation7 + $0x94] sm:$0xf]  ;;  %v6211_v24 = vld [vmem:[#allocation5 + $0x24] sm:$0xf0] }
  0x55   : > { %661 = vmatpush.bf16.msra.mxu0 %v7948_v12  ;;  %v6787_v23 = vld [vmem:[#allocation5 + $0x1c] sm:$0xf]  ;;  %v6298_v25 = vld [vmem:[#allocation7 + $0x9c] sm:$0xf0]  ;;  %v6217_v27 = vld [vmem:[#allocation5 + $0x20] sm:$0xf]  ;;  %v7963_v30 = vor.u32 %v6803_v19, %v6272_v18 }
  0x56   : > { %v7958_v26 = vor.u32 %v6787_v23, %v6211_v24  ;;  %v6789_v28 = vld [vmem:[#allocation5 + $0x28] sm:$0xf0]  ;;  %v6260_v31 = vld [vmem:[#allocation7 + $0x48] sm:$0xf]  ;;  %v6800_v32 = vld [vmem:[#allocation7 + $0x50] sm:$0xf0]  ;;  %v7967_v33 = vor.u32 %v6808_v22, %v6298_v25 }
  0x57   : > { %823 = vmatpush.bf16.msra.mxu3 %v7946_v7  ;;  %v7960_v29 = vor.u32 %v6789_v28, %v6217_v27  ;;  %v6805_v34 = vld [vmem:[#allocation7 + $0x7c] sm:$0xf]  ;;  %v6286_v35 = vld [vmem:[#allocation7 + $0x84] sm:$0xf0]  ;;  %v7972_v36 = vor.u32 %v6800_v32, %v6260_v31  ;;  %v6248_v37 = vld [vmem:[#allocation7 + $0x30] sm:$0xf] }
  0x58   : > { %674 = vmatpush.bf16.msra.mxu1 %v7958_v26  ;;  %v6797_v38 = vld [vmem:[#allocation7 + $0x38] sm:$0xf0]  ;;  %v7975_v39 = vor.u32 %v6805_v34, %v6286_v35  ;;  %v6236_v41 = vld [vmem:[#allocation7 + $0x18] sm:$0xf]  ;;  %v6794_v42 = vld [vmem:[#allocation7 + $0x20] sm:$0xf0] }
  0x59   : > { %662 = vmatpush.bf16.msra.mxu0 %v7954_v20  ;;  %687 = vmatpush.bf16.msra.mxu2 %v7960_v29  ;;  %v7978_v40 = vor.u32 %v6797_v38, %v6248_v37  ;;  %v7982_v43 = vor.u32 %v6794_v42, %v6236_v41  ;;  %v6224_v44 = vld [vmem:[#allocation7] sm:$0xf]  ;;  %v6791_v45 = vld [vmem:[#allocation7 + $0x8] sm:$0xf0]  ;;  %v6784_v47 = vld [vmem:[#allocation5 + $0x4] sm:$0xf] }
  0x5a   : > { %v7985_v46 = vor.u32 %v6791_v45, %v6224_v44  ;;  %v6199_v48 = vld [vmem:[#allocation5 + $0xc] sm:$0xf0]  ;;  %v6316_v50 = vld [vmem:[#allocation7 + $0xb0] sm:$0xf]  ;;  %v6813_v51 = vld [vmem:[#allocation7 + $0xb8] sm:$0xf0]  ;;  %v610_v44 = vlaneseq }
  0x5b   : > { %824 = vmatpush.bf16.msra.mxu3 %v7951_v17  ;;  %v7990_v49 = vor.u32 %v6784_v47, %v6199_v48  ;;  %v7992_v52 = vor.u32 %v6813_v51, %v6316_v50  ;;  %v6205_v53 = vld [vmem:[#allocation5 + $0x8] sm:$0xf]  ;;  %v6786_v54 = vld [vmem:[#allocation5 + $0x10] sm:$0xf0]  ;;  %v6274_v57 = vld [vmem:[#allocation7 + $0x6c] sm:$0xf0] }
  0x5c   : > { %v6802_v55 = vld [vmem:[#allocation7 + $0x64] sm:$0xf]  ;;  %v7995_v56 = vor.u32 %v6786_v54, %v6205_v53  ;;  %v6304_v59 = vld [vmem:[#allocation7 + $0x98] sm:$0xf]  ;;  %v6799_v62 = vld [vmem:[#allocation7 + $0x4c] sm:$0xf] }
  0x5d   : > { %835 = vmatpush.bf16.msrb.mxu0 %v7956_v21  ;;  %675 = vmatpush.bf16.msra.mxu1 %v7990_v49  ;;  %v7998_v58 = vor.u32 %v6802_v55, %v6274_v57  ;;  %v6810_v60 = vld [vmem:[#allocation7 + $0xa0] sm:$0xf0]  ;;  %v6262_v63 = vld [vmem:[#allocation7 + $0x54] sm:$0xf0]  ;;  %v6292_v3 = vld [vmem:[#allocation7 + $0x80] sm:$0xf] }
  0x5e   : > { %688 = vmatpush.bf16.msra.mxu2 %v7995_v56  ;;  %v8004_v61 = vor.u32 %v6810_v60, %v6304_v59  ;;  %v8007_v2 = vor.u32 %v6799_v62, %v6262_v63  ;;  %v6807_v5 = vld [vmem:[#allocation7 + $0x88] sm:$0xf0]  ;;  %v6796_v6 = vld [vmem:[#allocation7 + $0x34] sm:$0xf]  ;;  %v6250_v9 = vld [vmem:[#allocation7 + $0x3c] sm:$0xf0] }
  0x5f   : > { %825 = vmatpush.bf16.msra.mxu3 %v7963_v30  ;;  %v8011_v8 = vor.u32 %v6807_v5, %v6292_v3  ;;  %v6280_v10 = vld [vmem:[#allocation7 + $0x68] sm:$0xf]  ;;  %v6804_v11 = vld [vmem:[#allocation7 + $0x70] sm:$0xf0]  ;;  %v8014_v13 = vor.u32 %v6796_v6, %v6250_v9  ;;  %v6793_v14 = vld [vmem:[#allocation7 + $0x1c] sm:$0xf] }
  0x60   : > { %v6238_v15 = vld [vmem:[#allocation7 + $0x24] sm:$0xf0]  ;;  %v8018_v16 = vor.u32 %v6804_v11, %v6280_v10  ;;  %v6268_v19 = vld [vmem:[#allocation7 + $0x50] sm:$0xf]  ;;  %v6801_v22 = vld [vmem:[#allocation7 + $0x58] sm:$0xf0] }
  0x61   : > { %836 = vmatpush.bf16.msrb.mxu0 %v7967_v33  ;;  %848 = vmatpush.bf16.msrb.mxu1 %v7992_v52  ;;  %v8021_v18 = vor.u32 %v6793_v14, %v6238_v15  ;;  %v6790_v23 = vld [vmem:[#allocation7 + $0x4] sm:$0xf]  ;;  %v6226_v24 = vld [vmem:[#allocation7 + $0xc] sm:$0xf0]  ;;  %v8024_v25 = vor.u32 %v6801_v22, %v6268_v19  ;;  %v6256_v28 = vld [vmem:[#allocation7 + $0x38] sm:$0xf] }
  0x62   : > { %928 = vmatpush.bf16.msrb.mxu2 %v7948_v12  ;;  %v8027_v27 = vor.u32 %v6790_v23, %v6226_v24  ;;  %v6798_v31 = vld [vmem:[#allocation7 + $0x40] sm:$0xf0]  ;;  %v6244_v34 = vld [vmem:[#allocation7 + $0x20] sm:$0xf]  ;;  %v6795_v35 = vld [vmem:[#allocation7 + $0x28] sm:$0xf0] }
  0x63   : > { %826 = vmatpush.bf16.msra.mxu3 %v7972_v36  ;;  %v8031_v32 = vor.u32 %v6798_v31, %v6256_v28  ;;  %v8034_v37 = vor.u32 %v6795_v35, %v6244_v34  ;;  %v7713_v38 = vmov 1   ;;  %v6232_v41 = vld [vmem:[#allocation7 + $0x8] sm:$0xf]  ;;  %v6792_v42 = vld [vmem:[#allocation7 + $0x10] sm:$0xf0]  ;;  %v8040_v47 = vand.u32 127, %v610_v44 }
  0x64   : > { %7005 = vset.pattern.permute.xlu0 %v7713_v38  ;;  %v8038_v45 = vor.u32 %v6792_v42, %v6232_v41  ;;  %v7714_v50 = vmov 0.0   ;;  %vm651_vm1 = vcmask 261120   ;;  %v7715_v44 = vmov 2   ;;  %s6780_s22 = sshll.u32 %s7809_s20, 3  ;;  %s484_s30 = scalar_lea.vmem [#allocation15], %s7916_s12 }
  0x65   : > { %837 = vmatpush.bf16.msrb.mxu0 %v7975_v39  ;;  %849 = vmatpush.bf16.msrb.mxu1 %v8004_v61  ;;  %10433 = vst [vmem:[#allocation23_spill] sm:$0xff] %v8040_v47  ;;  %s6008_s25 = scalar_lea.hbm %s10308_s10, %s6780_s22  ;;  %s5994_s4 = scalar_lea.hbm %s10307_s9, %s6780_s22 }
  0x66   : > { %929 = vmatpush.bf16.msrb.mxu2 %v7954_v20  ;;  %913 = vperm.xlu0 %7005, %v7940_v1   ;;  %s10231_s6 = sshll.u32 %s484_s30, 4  ;;  %s6012_s20 = sshll.u32 %s6008_s25, 4  ;;  %s6011_s6 = int_to_ptr.vmem [resolvable:$true] %s10231_s6  ;;  %s6013_s20 = int_to_ptr.hbm [resolvable:$true] %s6012_s20 }
  0x67   : > { %827 = vmatpush.bf16.msra.mxu3 %v7978_v40  ;;  %7006 = vset.pattern.permute.xlu1 %v7715_v44  ;;  %s477_s18 = scalar_lea.vmem [#allocation14], %s7916_s12  ;;  %s5984_s21 = scalar_lea.sflag [#allocation16], %s7913_s19 }
  0x68   : > { %1050 = vperm.xlu1 %7006, %v7940_v1   ;;  %s10237_s2 = sshll.u32 %s477_s18, 4  ;;  %s7604_s27 = sshra.s32 %s6013_s20, 4  ;;  %s5997_s2 = int_to_ptr.vmem [resolvable:$true] %s10237_s2  ;;  %s7605_s27 = int_to_ptr.hbm [resolvable:$true] %s7604_s27 }
  0x69   : > { %838 = vmatpush.bf16.msrb.mxu0 %v7998_v58  ;;  %850 = vmatpush.bf16.msrb.mxu1 %v8011_v8  ;;  %s7606_s22 = scalar_lea.hbm %s7605_s27, 8  ;;  %s7610_s25 = scalar_lea.hbm %s10308_s10, 16 }
  0x6a   : > { %p7607_p1 = scmp.ne.s32.totalorder %s7605_s27, %s7606_s22  ;;  %p7611_p12 = scmp.lt.s32.totalorder %s7605_s27, %s10308_s10 }
  0x6b   : > { %828 = vmatpush.bf16.msra.mxu3 %v7982_v43  ;;  %p7612_p7 = scmp.lt.s32.totalorder %s7610_s25, %s7606_s22 }
  0x6c   : > { %p7608_p3 = pnand %p7607_p1, %p7882_p4 }
  0x6d   : > { %839 = vmatpush.bf16.msrb.mxu0 %v8007_v2  ;;  %851 = vmatpush.bf16.msrb.mxu1 %v8018_v16  ;;  %p7613_p8 = por %p7612_p7, %p7611_p12 }
  0x6e   : > { %p7609_p5 = pneg %p7608_p3 }
  0x6f   : > { %829 = vmatpush.bf16.msra.mxu3 %v7985_v46 }
  0x70   : > { %p7614_p9 = pnand %p7613_p8, %p7609_p5 }
  0x71   : > { %840 = vmatpush.bf16.msrb.mxu0 %v8014_v13  ;;  %852 = vmatpush.bf16.msrb.mxu1 %v8024_v25 }
  0x72   : > { %830 = vmatmul.bf16.vlgmr.msra.gmra.mxu3 %v10309_v0 }
  0x73   : > { %954 = vmatpush.bf16.msrb.mxu3 %v7960_v29 }
  0x75   : > { %841 = vmatpush.bf16.msrb.mxu0 %v8021_v18  ;;  %853 = vmatpush.bf16.msrb.mxu1 %v8031_v32 }
  0x77   : > { %955 = vmatpush.bf16.msrb.mxu3 %v7995_v56 }
  0x79   : > { %842 = vmatpush.bf16.msrb.mxu0 %v8027_v27  ;;  %854 = vmatpush.bf16.msrb.mxu1 %v8034_v37 }
  0x7b   : > { %1065 = vmatpush.bf16.msra.mxu3 %v7948_v12 }
  0x7d   : > { %855 = vmatpush.bf16.msrb.mxu1 %v8038_v45 }
  0x7f   : > { %1066 = vmatpush.bf16.msra.mxu3 %v7954_v20 }
  0xc3   : > { %v614_v48 = vpop.permute.xlu0 %613 }
  0xc4   : > { %vm615_vm0 = vcmp.eq.s32.totalorder %v614_v48, %v8040_v47 }
  0xc5   : > { %v6194_v51 = vsel %vm615_vm0, 1.0, %v7714_v50 }
  0xc6   : > { %v618_v53 = vpack.c.bf16 %v6194_v51, %v6194_v51  ;;  %v8093_v51 = vld [vmem:[%s10301_s3] ss:$0 sm:$0xff] }
  0xc8   : > { %6219 = vmatmul.msk.bf16.vlgmr.msra.gmra.mxu0 %vm651_vm1, %v618_v53  ;;  %6220 = vmatmul.msk.bf16.vlgmr.msra.gmra.mxu1 %vm651_vm1, %v618_v53 }
  0xc9   : > { %6221 = vmatmul.msk.bf16.vlgmr.msra.gmra.mxu2 %vm651_vm1, %v618_v53  ;;  %962 = vmatpush.bf16.msra.mxu0 %v7943_v4 }
  0xca   : > { %941 = vmatpush.bf16.msra.mxu2 %v7958_v26  ;;  %975 = vmatpush.bf16.msra.mxu1 %v7956_v21 }
  0xcd   : > { %963 = vmatpush.bf16.msra.mxu0 %v7946_v7 }
  0xce   : > { %942 = vmatpush.bf16.msra.mxu2 %v7990_v49  ;;  %976 = vmatpush.bf16.msra.mxu1 %v7967_v33 }
  0xd1   : > { %964 = vmatpush.bf16.msra.mxu0 %v7951_v17 }
  0xd2   : > { %977 = vmatpush.bf16.msra.mxu1 %v7975_v39 }
  0xd5   : > { %965 = vmatpush.bf16.msra.mxu0 %v7963_v30 }
  0xd6   : > { %978 = vmatpush.bf16.msra.mxu1 %v7998_v58 }
  0xd8   : > { %843 = vmatmul.bf16.vlgmr.msrb.gmra.mxu0 %v10309_v0  ;;  %856 = vmatmul.bf16.vlgmr.msrb.gmra.mxu1 %v10309_v0  ;;  %v914_v57 = vpop.permute.xlu0 %913 }
  0xd9   : > { %966 = vmatpush.bf16.msra.mxu0 %v7972_v36  ;;  %vm915_vm2 = vcmp.eq.s32.totalorder %v914_v57, %v8040_v47 }
  0xda   : > { %979 = vmatpush.bf16.msra.mxu1 %v8007_v2  ;;  %v6320_v59 = vsel %vm915_vm2, 1.0, %v7714_v50 }
  0xdb   : > { %v918_v60 = vpack.c.bf16 %v6320_v59, %v6320_v59 }
  0xdd   : > { %967 = vmatpush.bf16.msra.mxu0 %v7978_v40  ;;  %6321 = vmatmul.msk.bf16.vlgmr.msrb.gmra.mxu2 %vm651_vm1, %v918_v60 }
  0xde   : > { %980 = vmatpush.bf16.msra.mxu1 %v8014_v13  ;;  %6323 = vmatmul.msk.bf16.vlgmr.msrb.gmra.mxu3 %vm651_vm1, %v918_v60 }
  0xdf   : > { %988 = vmatpush.bf16.msrb.mxu2 %v7992_v52  ;;  %1078 = vmatpush.bf16.msrb.mxu3 %v7958_v26 }
  0xe1   : > { %968 = vmatpush.bf16.msra.mxu0 %v7982_v43 }
  0xe2   : > { %981 = vmatpush.bf16.msra.mxu1 %v8021_v18 }
  0xe3   : > { %989 = vmatpush.bf16.msrb.mxu2 %v8004_v61  ;;  %1079 = vmatpush.bf16.msrb.mxu3 %v7990_v49 }
  0xe5   : > { %969 = vmatpush.bf16.msra.mxu0 %v7985_v46 }
  0xe6   : > { %982 = vmatpush.bf16.msra.mxu1 %v8027_v27 }
  0xe7   : > { %990 = vmatpush.bf16.msrb.mxu2 %v8011_v8 }
  0xe9   : > { %1202 = vmatpush.bf16.msrb.mxu0 %v7948_v12 }
  0xea   : > { %1091 = vmatpush.bf16.msrb.mxu1 %v7960_v29 }
  0xeb   : > { %991 = vmatpush.bf16.msrb.mxu2 %v8018_v16 }
  0xed   : > { %1203 = vmatpush.bf16.msrb.mxu0 %v7954_v20  ;;  %6322 = vmatmul.msk.bf16.vlgmr.msra.gmra.mxu2 %vm651_vm1, %v918_v60 }
  0xee   : > { %1092 = vmatpush.bf16.msrb.mxu1 %v7995_v56 }
  0xef   : > { %992 = vmatpush.bf16.msrb.mxu2 %v8024_v25 }
  0xf3   : > { %993 = vmatpush.bf16.msrb.mxu2 %v8031_v32 }
  0xf5   : > { %v831_v54 = vpop.f32.mrf.mxu3 }
  0xf7   : > { %994 = vmatpush.bf16.msrb.mxu2 %v8034_v37 }
  0xfb   : > { %995 = vmatpush.bf16.msrb.mxu2 %v8038_v45 }
  0xfd   : > { %v833_v55 = vpop.f32.mrf.mxu3 }
  0xff   : > { %1112 = vmatpush.bf16.msra.mxu2 %v7956_v21 }
 0x103   : > { %1113 = vmatpush.bf16.msra.mxu2 %v7967_v33 }
 0x107   : > { %1114 = vmatpush.bf16.msra.mxu2 %v7975_v39 }
 0x10b   : > { %1115 = vmatpush.bf16.msra.mxu2 %v7998_v58 }
 0x10f   : > { %1116 = vmatpush.bf16.msra.mxu2 %v8007_v2 }
 0x113   : > { %1117 = vmatpush.bf16.msra.mxu2 %v8014_v13 }
 0x117   : > { %1118 = vmatpush.bf16.msra.mxu2 %v8021_v18 }
 0x11b   : > { %1119 = vmatpush.bf16.msra.mxu2 %v8027_v27 }
 0x145   : > { %v664_v62 = vpop.f32.mrf.mxu0  ;;  %v677_v63 = vpop.f32.mrf.mxu1 }
 0x146   : > { %v861_v3 = vadd.f32 %v831_v54, %v664_v62 }
 0x148   : > { %v6318_v5 = vmul.f32 -1.442695, %v861_v3 }
 0x14a   : > { %7024 = vpow2.f32 %v6318_v5 }
 0x14c   : > { %v690_v6 = vpop.f32.mrf.mxu2 }
 0x14d   : > { %v666_v9 = vpop.f32.mrf.mxu0  ;;  %v679_v10 = vpop.f32.mrf.mxu1 }
 0x150   : > { %v7025_v11 = vpop.eup %7024 }
 0x151   : > { %v865_v14 = vadd.f32 1.0, %v7025_v11 }
 0x153   : > { %7026 = vrcp.f32 %v865_v14  ;;  %v877_v42 = vand.u32 2147483648, %v865_v14  ;;  %v875_v48 = vand.u32 2147483647, %v865_v14  ;;  %vm871_vm4 = vweird.f32 %v865_v14 }
 0x154   : > { %v692_v15 = vpop.f32.mrf.mxu2 }
 0x155   : > { %v844_v19 = vpop.f32.mrf.mxu0  ;;  %v857_v22 = vpop.f32.mrf.mxu1  ;;  %v878_v59 = vor.u32 1.1754944e-38, %v877_v42  ;;  %vm876_vm6 = vcmp.eq.f32.partialorder %v875_v48, 8.507059e+37 }
 0x156   : > { %v881_v23 = vadd.f32 %v844_v19, %v677_v63  ;;  %v904_v60 = vadd.f32 %v8093_v51, %v857_v22 }
 0x158   : > { %v6319_v24 = vmul.f32 -1.442695, %v881_v23 }
 0x159   : > { %v7027_v28 = vpop.eup %7026 }
 0x15a   : > { %7028 = vpow2.f32 %v6319_v24  ;;  %v867_v31 = vmul.f32 %v7027_v28, %v865_v14  ;;  %vm872_vm3 = vweird.f32 %v7027_v28 }
 0x15b   : > { %vm873_vm5 = vmor %vm871_vm4, %vm872_vm3 }
 0x15c   : > { %v868_v34 = vsub.f32 1.0, %v867_v31 }
 0x15d   : > { %v846_v35 = vpop.f32.mrf.mxu0  ;;  %v859_v38 = vpop.f32.mrf.mxu1 }
 0x15e   : > { %v869_v41 = vmul.f32 %v7027_v28, %v868_v34 }
 0x160   : > { %v7029_v53 = vpop.eup %7028  ;;  %v870_v54 = vadd.f32 %v7027_v28, %v869_v41  ;;  %v931_v41 = vpop.f32.mrf.mxu2 }
 0x161   : > { %v885_v55 = vadd.f32 1.0, %v7029_v53  ;;  %v8124_v42 = vpop.f32.mrf.mxu3 }
 0x162   : > { %v874_v57 = vsel %vm873_vm5, %v7027_v28, %v870_v54 }
 0x163   : > { %7030 = vrcp.f32 %v885_v55  ;;  %v879_v62 = vsel %vm876_vm6, %v878_v59, %v874_v57  ;;  %v897_v11 = vand.u32 2147483648, %v885_v55  ;;  %v895_v15 = vand.u32 2147483647, %v885_v55 }
 0x164   : > { %v905_v63 = vmul.f32 %v904_v60, %v879_v62  ;;  %vm891_vm8 = vweird.f32 %v885_v55 }
 0x165   : > { %v898_v22 = vor.u32 1.1754944e-38, %v897_v11  ;;  %vm896_vm10 = vcmp.eq.f32.partialorder %v895_v15, 8.507059e+37 }
 0x166   : > { %v906_v9 = vadd.f32 %v905_v63, %v690_v6 }
 0x168   : > { %7032 = vtanh.f32 %v906_v9  ;;  %v933_v44 = vpop.f32.mrf.mxu2 }
 0x169   : > { %v7031_v3 = vpop.eup %7030  ;;  %v959_v48 = vpop.f32.mrf.mxu3 }
 0x16a   : > { %v887_v5 = vmul.f32 %v7031_v3, %v885_v55  ;;  %vm892_vm7 = vweird.f32 %v7031_v3  ;;  %v1051_v55 = vpop.permute.xlu1 %1050 }
 0x16b   : > { %vm893_vm9 = vmor %vm891_vm8, %vm892_vm7  ;;  %vm1052_vm11 = vcmp.eq.s32.totalorder %v1051_v55, %v8040_v47 }
 0x16c   : > { %v888_v10 = vsub.f32 1.0, %v887_v5  ;;  %v6326_v57 = vsel %vm1052_vm11, 1.0, %v7714_v50 }
 0x16d   : > { %v1055_v59 = vpack.c.bf16 %v6326_v57, %v6326_v57 }
 0x16e   : > { %v889_v14 = vmul.f32 %v7031_v3, %v888_v10  ;;  %v7033_v31 = vpop.eup %7032 }
 0x16f   : > { %6327 = vmatmul.msk.bf16.vlgmr.msra.gmra.mxu3 %vm651_vm1, %v1055_v59 }
 0x170   : > { %v890_v19 = vadd.f32 %v7031_v3, %v889_v14  ;;  %v944_v53 = vpop.f32.mrf.mxu2  ;;  %1125 = vmatpush.bf16.msra.mxu3 %v7992_v52 }
 0x172   : > { %v894_v23 = vsel %vm893_vm9, %v7031_v3, %v890_v19 }
 0x173   : > { %v899_v24 = vsel %vm896_vm10, %v898_v22, %v894_v23 }
 0x174   : > { %v908_v28 = vsub.f32 1.0, %v899_v24  ;;  %v910_v34 = vmul.f32 0.0, %v899_v24  ;;  %1126 = vmatpush.bf16.msra.mxu3 %v8004_v61 }
 0x176   : > { %v909_v6 = vmul.f32 %v7033_v31, %v908_v28  ;;  %v7716_v28 = vmov 3  }
 0x177   : > { %7007 = vset.pattern.permute.xlu1 %v7716_v28 }
 0x178   : > { %v8102_v35 = vadd.f32 %v910_v34, %v909_v6  ;;  %v946_v54 = vpop.f32.mrf.mxu2  ;;  %1127 = vmatpush.bf16.msra.mxu3 %v8011_v8  ;;  %1187 = vperm.xlu1 %7007, %v7940_v1  }
 0x17a   : > { %v961_v38 = vpack.c.bf16 %v8102_v35, %v8102_v35 }
 0x17c   : > { %970 = vmatmul.bf16.vlgmr.msra.gmra.mxu0 %v961_v38  ;;  %983 = vmatmul.bf16.vlgmr.msra.gmra.mxu1 %v961_v38 }
 0x17d   : > { %996 = vmatmul.bf16.vlgmr.msrb.gmra.mxu2 %v961_v38  ;;  %1099 = vmatpush.bf16.msra.mxu1 %v7943_v4 }
 0x17e   : > { %1215 = vmatpush.bf16.msra.mxu0 %v7958_v26  ;;  %1236 = vmatpush.bf16.msrb.mxu2 %v7943_v4 }
 0x17f   : > { %1128 = vmatpush.bf16.msra.mxu3 %v8018_v16 }
 0x180   : > { %6328 = vmatmul.msk.bf16.vlgmr.msrb.gmra.mxu3 %vm651_vm1, %v1055_v59 }
 0x181   : > { %1100 = vmatpush.bf16.msra.mxu1 %v7946_v7 }
 0x182   : > { %1216 = vmatpush.bf16.msra.mxu0 %v7990_v49  ;;  %1237 = vmatpush.bf16.msrb.mxu2 %v7946_v7 }
 0x183   : > { %1129 = vmatpush.bf16.msra.mxu3 %v8024_v25 }
 0x185   : > { %1101 = vmatpush.bf16.msra.mxu1 %v7951_v17 }
 0x186   : > { %1238 = vmatpush.bf16.msrb.mxu2 %v7951_v17 }
 0x187   : > { %1130 = vmatpush.bf16.msra.mxu3 %v8031_v32 }
 0x189   : > { %1102 = vmatpush.bf16.msra.mxu1 %v7963_v30 }
 0x18a   : > { %1239 = vmatpush.bf16.msrb.mxu2 %v7963_v30 }
 0x18b   : > { %1131 = vmatpush.bf16.msra.mxu3 %v8034_v37 }
 0x18c   : > { %6329 = vmatmul.msk.bf16.vlgmr.msrb.gmra.mxu1 %vm651_vm1, %v1055_v59 }
 0x18d   : > { %1103 = vmatpush.bf16.msra.mxu1 %v7972_v36 }
 0x18e   : > { %1240 = vmatpush.bf16.msrb.mxu2 %v7972_v36 }
 0x18f   : > { %1132 = vmatpush.bf16.msra.mxu3 %v8038_v45 }
 0x191   : > { %1104 = vmatpush.bf16.msra.mxu1 %v7978_v40 }
 0x192   : > { %1241 = vmatpush.bf16.msrb.mxu2 %v7978_v40 }
 0x193   : > { %1249 = vmatpush.bf16.msrb.mxu3 %v7956_v21 }
 0x195   : > { %1105 = vmatpush.bf16.msra.mxu1 %v7982_v43 }
 0x196   : > { %1242 = vmatpush.bf16.msrb.mxu2 %v7982_v43 }
 0x197   : > { %1250 = vmatpush.bf16.msrb.mxu3 %v7967_v33 }
 0x199   : > { %1106 = vmatpush.bf16.msra.mxu1 %v7985_v46 }
 0x19a   : > { %1243 = vmatpush.bf16.msrb.mxu2 %v7985_v46 }
 0x19b   : > { %1251 = vmatpush.bf16.msrb.mxu3 %v7975_v39 }
 0x19d   : > { %1228 = vmatpush.bf16.msrb.mxu1 %v7960_v29 }
 0x19f   : > { %1252 = vmatpush.bf16.msrb.mxu3 %v7998_v58 }
 0x1a1   : > { %1229 = vmatpush.bf16.msrb.mxu1 %v7995_v56 }
 0x1a3   : > { %1253 = vmatpush.bf16.msrb.mxu3 %v8007_v2 }
 0x1a7   : > { %1254 = vmatpush.bf16.msrb.mxu3 %v8014_v13 }
 0x1ab   : > { %1255 = vmatpush.bf16.msrb.mxu3 %v8021_v18 }
 0x1af   : > { %1256 = vmatpush.bf16.msrb.mxu3 %v8027_v27 }
 0x1f9   : > { %v971_v60 = vpop.f32.mrf.mxu0  ;;  %v984_v62 = vpop.f32.mrf.mxu1 }
 0x1fa   : > { %v1001_v63 = vadd.f32 %v971_v60, %v931_v41  ;;  %v1021_v3 = vadd.f32 %v984_v62, %v944_v53 }
 0x1fc   : > { %v6324_v5 = vmul.f32 -1.442695, %v1001_v63  ;;  %v6325_v9 = vmul.f32 -1.442695, %v1021_v3 }
 0x1fe   : > { %7034 = vpow2.f32 %v6324_v5 }
 0x1ff   : > { %7036 = vpow2.f32 %v6325_v9 }
 0x200   : > { %v997_v10 = vpop.f32.mrf.mxu2 }
 0x201   : > { %v973_v11 = vpop.f32.mrf.mxu0  ;;  %v986_v14 = vpop.f32.mrf.mxu1  ;;  %v1041_v62 = vadd.f32 %v8093_v51, %v997_v10 }
 0x204   : > { %v7035_v15 = vpop.eup %7034 }
 0x205   : > { %v7037_v19 = vpop.eup %7036  ;;  %v1005_v22 = vadd.f32 1.0, %v7035_v15 }
 0x206   : > { %v1025_v23 = vadd.f32 1.0, %v7037_v19 }
 0x207   : > { %7038 = vrcp.f32 %v1005_v22  ;;  %v1017_v48 = vand.u32 2147483648, %v1005_v22  ;;  %v1015_v54 = vand.u32 2147483647, %v1005_v22  ;;  %vm1011_vm13 = vweird.f32 %v1005_v22 }
 0x208   : > { %7040 = vrcp.f32 %v1025_v23  ;;  %v999_v24 = vpop.f32.mrf.mxu2  ;;  %v1037_v5 = vand.u32 2147483648, %v1025_v23  ;;  %vm1031_vm2 = vweird.f32 %v1025_v23  ;;  %v1035_v11 = vand.u32 2147483647, %v1025_v23 }
 0x209   : > { %v1018_v59 = vor.u32 1.1754944e-38, %v1017_v48  ;;  %vm1016_vm15 = vcmp.eq.f32.partialorder %v1015_v54, 8.507059e+37  ;;  %v1188_v48 = vpop.permute.xlu1 %1187 }
 0x20a   : > { %v1038_v19 = vor.u32 1.1754944e-38, %v1037_v5  ;;  %vm1036_vm4 = vcmp.eq.f32.partialorder %v1035_v11, 8.507059e+37  ;;  %vm1189_vm5 = vcmp.eq.s32.totalorder %v1188_v48, %v8040_v47 }
 0x20d   : > { %v7039_v31 = vpop.eup %7038 }
 0x20e   : > { %v7041_v6 = vpop.eup %7040  ;;  %v1007_v34 = vmul.f32 %v7039_v31, %v1005_v22  ;;  %vm1012_vm12 = vweird.f32 %v7039_v31 }
 0x20f   : > { %v1027_v38 = vmul.f32 %v7041_v6, %v1025_v23  ;;  %vm1013_vm14 = vmor %vm1011_vm13, %vm1012_vm12  ;;  %vm1032_vm0 = vweird.f32 %v7041_v6 }
 0x210   : > { %v1008_v41 = vsub.f32 1.0, %v1007_v34  ;;  %vm1033_vm3 = vmor %vm1031_vm2, %vm1032_vm0 }
 0x211   : > { %v1028_v44 = vsub.f32 1.0, %v1027_v38 }
 0x212   : > { %v1009_v53 = vmul.f32 %v7039_v31, %v1008_v41 }
 0x213   : > { %v1029_v55 = vmul.f32 %v7041_v6, %v1028_v44 }
 0x214   : > { %v1010_v57 = vadd.f32 %v7039_v31, %v1009_v53  ;;  %v6332_v53 = vsel %vm1189_vm5, 1.0, %v7714_v50 }
 0x215   : > { %v1030_v3 = vadd.f32 %v7041_v6, %v1029_v55  ;;  %v1192_v54 = vpack.c.bf16 %v6332_v53, %v6332_v53 }
 0x216   : > { %v1014_v60 = vsel %vm1013_vm14, %v7039_v31, %v1010_v57 }
 0x217   : > { %v1019_v63 = vsel %vm1016_vm15, %v1018_v59, %v1014_v60  ;;  %v1034_v15 = vsel %vm1033_vm3, %v7041_v6, %v1030_v3  ;;  %6333 = vmatmul.msk.bf16.vlgmr.msrb.gmra.mxu0 %vm651_vm1, %v1192_v54 }
 0x218   : > { %v1042_v9 = vmul.f32 %v1041_v62, %v1019_v63  ;;  %v1039_v22 = vsel %vm1036_vm4, %v1038_v19, %v1034_v15  ;;  %1262 = vmatpush.bf16.msrb.mxu0 %v7992_v52 }
 0x219   : > { %v1045_v10 = vsub.f32 1.0, %v1039_v22  ;;  %v1047_v31 = vmul.f32 %v1039_v22, %v8102_v35  ;;  %v8169_v35 = vpop.f32.mrf.mxu1 }
 0x21a   : > { %v1043_v14 = vadd.f32 %v1042_v9, %v8124_v42  ;;  %v1068_v42 = vpop.f32.mrf.mxu3 }
 0x21c   : > { %7042 = vtanh.f32 %v1043_v14  ;;  %1263 = vmatpush.bf16.msrb.mxu0 %v8004_v61 }
 0x220   : > { %1264 = vmatpush.bf16.msrb.mxu0 %v8011_v8 }
 0x221   : > { %v1096_v6 = vpop.f32.mrf.mxu1 }
 0x222   : > { %v7043_v24 = vpop.eup %7042  ;;  %v1070_v38 = vpop.f32.mrf.mxu3 }
 0x223   : > { %v1046_v28 = vmul.f32 %v7043_v24, %v1045_v10  ;;  %v7717_v10 = vmov 4  }
 0x224   : > { %1265 = vmatpush.bf16.msrb.mxu0 %v8018_v16  ;;  %7008 = vset.pattern.permute.xlu2 %v7717_v10 }
 0x225   : > { %v8153_v34 = vadd.f32 %v1047_v31, %v1046_v28  ;;  %1324 = vperm.xlu2 %7008, %v7940_v1  }
 0x227   : > { %v1098_v23 = vpack.c.bf16 %v8153_v34, %v8153_v34  ;;  %6334 = vmatmul.msk.bf16.vlgmr.msra.gmra.mxu0 %vm651_vm1, %v1192_v54 }
 0x228   : > { %1266 = vmatpush.bf16.msrb.mxu0 %v8024_v25 }
 0x229   : > { %1107 = vmatmul.bf16.vlgmr.msra.gmra.mxu1 %v1098_v23  ;;  %1120 = vmatmul.bf16.vlgmr.msra.gmra.mxu2 %v1098_v23 }
 0x22a   : > { %1133 = vmatmul.bf16.vlgmr.msra.gmra.mxu3 %v1098_v23  ;;  %1339 = vmatpush.bf16.msra.mxu1 %v7948_v12  ;;  %v1081_v41 = vpop.f32.mrf.mxu3 }
 0x22b   : > { %1373 = vmatpush.bf16.msra.mxu3 %v7943_v4  ;;  %1365 = vmatpush.bf16.msra.mxu2 %v7960_v29 }
 0x22c   : > { %1267 = vmatpush.bf16.msrb.mxu0 %v8031_v32 }
 0x22e   : > { %1340 = vmatpush.bf16.msra.mxu1 %v7954_v20 }
 0x22f   : > { %1374 = vmatpush.bf16.msra.mxu3 %v7946_v7  ;;  %1366 = vmatpush.bf16.msra.mxu2 %v7995_v56 }
 0x230   : > { %1268 = vmatpush.bf16.msrb.mxu0 %v8034_v37 }
 0x232   : > { %v1083_v44 = vpop.f32.mrf.mxu3 }
 0x233   : > { %1375 = vmatpush.bf16.msra.mxu3 %v7951_v17 }
 0x234   : > { %1269 = vmatpush.bf16.msrb.mxu0 %v8038_v45 }
 0x237   : > { %1376 = vmatpush.bf16.msra.mxu3 %v7963_v30 }
 0x238   : > { %1386 = vmatpush.bf16.msra.mxu0 %v7956_v21 }
 0x239   : > { %6335 = vmatmul.msk.bf16.vlgmr.msrb.gmra.mxu1 %vm651_vm1, %v1192_v54 }
 0x23a   : > { %1352 = vmatpush.bf16.msrb.mxu1 %v7958_v26 }
 0x23b   : > { %1377 = vmatpush.bf16.msra.mxu3 %v7972_v36 }
 0x23c   : > { %1387 = vmatpush.bf16.msra.mxu0 %v7967_v33 }
 0x23e   : > { %1353 = vmatpush.bf16.msrb.mxu1 %v7990_v49 }
 0x23f   : > { %1378 = vmatpush.bf16.msra.mxu3 %v7978_v40 }
 0x240   : > { %1388 = vmatpush.bf16.msra.mxu0 %v7975_v39 }
 0x243   : > { %1379 = vmatpush.bf16.msra.mxu3 %v7982_v43 }
 0x244   : > { %1389 = vmatpush.bf16.msra.mxu0 %v7998_v58 }
 0x247   : > { %1380 = vmatpush.bf16.msra.mxu3 %v7985_v46 }
 0x248   : > { %1390 = vmatpush.bf16.msra.mxu0 %v8007_v2 }
 0x24c   : > { %1391 = vmatpush.bf16.msra.mxu0 %v8014_v13 }
 0x250   : > { %1392 = vmatpush.bf16.msra.mxu0 %v8021_v18 }
 0x254   : > { %1393 = vmatpush.bf16.msra.mxu0 %v8027_v27 }
 0x2a6   : > { %v1108_v55 = vpop.f32.mrf.mxu1 }
 0x2a7   : > { %v1138_v57 = vadd.f32 %v1108_v55, %v1068_v42 }
 0x2a9   : > { %v6330_v59 = vmul.f32 -1.442695, %v1138_v57 }
 0x2ab   : > { %7044 = vpow2.f32 %v6330_v59 }
 0x2ac   : > { %v1121_v60 = vpop.f32.mrf.mxu2 }
 0x2ad   : > { %v1158_v62 = vadd.f32 %v1121_v60, %v1081_v41  ;;  %v1134_v63 = vpop.f32.mrf.mxu3 }
 0x2ae   : > { %v1110_v3 = vpop.f32.mrf.mxu1  ;;  %v1178_v54 = vadd.f32 %v8093_v51, %v1134_v63 }
 0x2af   : > { %v6331_v5 = vmul.f32 -1.442695, %v1158_v62 }
 0x2b1   : > { %v7045_v9 = vpop.eup %7044  ;;  %7046 = vpow2.f32 %v6331_v5 }
 0x2b2   : > { %v1142_v11 = vadd.f32 1.0, %v7045_v9 }
 0x2b4   : > { %7048 = vrcp.f32 %v1142_v11  ;;  %v1123_v14 = vpop.f32.mrf.mxu2  ;;  %v1154_v23 = vand.u32 2147483648, %v1142_v11  ;;  %v1152_v6 = vand.u32 2147483647, %v1142_v11  ;;  %vm1148_vm7 = vweird.f32 %v1142_v11 }
 0x2b5   : > { %v1136_v15 = vpop.f32.mrf.mxu3 }
 0x2b6   : > { %v1155_v1 = vor.u32 1.1754944e-38, %v1154_v23  ;;  %vm1153_vm9 = vcmp.eq.f32.partialorder %v1152_v6, 8.507059e+37  ;;  %v1325_v6 = vpop.permute.xlu2 %1324 }
 0x2b7   : > { %v7047_v19 = vpop.eup %7046  ;;  %vm1326_vm14 = vcmp.eq.s32.totalorder %v1325_v6, %v8040_v47 }
 0x2b8   : > { %v1162_v22 = vadd.f32 1.0, %v7047_v19 }
 0x2ba   : > { %v7049_v24 = vpop.eup %7048  ;;  %7050 = vrcp.f32 %v1162_v22  ;;  %v1174_v59 = vand.u32 2147483648, %v1162_v22  ;;  %v1172_v62 = vand.u32 2147483647, %v1162_v22  ;;  %vm1168_vm11 = vweird.f32 %v1162_v22 }
 0x2bb   : > { %v1144_v28 = vmul.f32 %v7049_v24, %v1142_v11  ;;  %vm1149_vm6 = vweird.f32 %v7049_v24 }
 0x2bc   : > { %vm1150_vm8 = vmor %vm1148_vm7, %vm1149_vm6  ;;  %v1175_v9 = vor.u32 1.1754944e-38, %v1174_v59  ;;  %vm1173_vm13 = vcmp.eq.f32.partialorder %v1172_v62, 8.507059e+37 }
 0x2bd   : > { %v1145_v31 = vsub.f32 1.0, %v1144_v28 }
 0x2bf   : > { %v1146_v42 = vmul.f32 %v7049_v24, %v1145_v31 }
 0x2c0   : > { %v7051_v38 = vpop.eup %7050 }
 0x2c1   : > { %v1164_v41 = vmul.f32 %v7051_v38, %v1162_v22  ;;  %v1147_v44 = vadd.f32 %v7049_v24, %v1146_v42  ;;  %vm1169_vm10 = vweird.f32 %v7051_v38 }
 0x2c2   : > { %vm1170_vm12 = vmor %vm1168_vm11, %vm1169_vm10 }
 0x2c3   : > { %v1165_v48 = vsub.f32 1.0, %v1164_v41  ;;  %v1151_v53 = vsel %vm1150_vm8, %v7049_v24, %v1147_v44  ;;  %v8214_v24 = vpop.f32.mrf.mxu1 }
 0x2c4   : > { %v1156_v55 = vsel %vm1153_vm9, %v1155_v1, %v1151_v53 }
 0x2c5   : > { %v1166_v57 = vmul.f32 %v7051_v38, %v1165_v48  ;;  %v1179_v60 = vmul.f32 %v1178_v54, %v1156_v55 }
 0x2c7   : > { %v1180_v3 = vadd.f32 %v1179_v60, %v8169_v35  ;;  %v1167_v5 = vadd.f32 %v7051_v38, %v1166_v57 }
 0x2c9   : > { %7052 = vtanh.f32 %v1180_v3  ;;  %v1171_v11 = vsel %vm1170_vm12, %v7051_v38, %v1167_v5  ;;  %v6338_v38 = vsel %vm1326_vm14, 1.0, %v7714_v50 }
 0x2ca   : > { %v1176_v63 = vsel %vm1173_vm13, %v1175_v9, %v1171_v11  ;;  %v1329_v41 = vpack.c.bf16 %v6338_v38, %v6338_v38 }
 0x2cb   : > { %v1182_v14 = vsub.f32 1.0, %v1176_v63  ;;  %v1184_v10 = vmul.f32 %v1176_v63, %v8153_v34  ;;  %v1205_v34 = vpop.f32.mrf.mxu0  ;;  %v1233_v31 = vpop.f32.mrf.mxu1  ;;  %v7718_v63 = vmov 5  }
 0x2cc   : > { %6339 = vmatmul.msk.bf16.vlgmr.msra.gmra.mxu1 %vm651_vm1, %v1329_v41  ;;  %7009 = vset.pattern.permute.xlu2 %v7718_v63 }
 0x2cd   : > { %1399 = vmatpush.bf16.msra.mxu1 %v7992_v52 }
 0x2cf   : > { %v7053_v15 = vpop.eup %7052 }
 0x2d0   : > { %v1183_v19 = vmul.f32 %v7053_v15, %v1182_v14  ;;  %v8233_v14 = vld [vmem:[%s7920_s5] sm:$0xff] }
 0x2d1   : > { %1400 = vmatpush.bf16.msra.mxu1 %v8004_v61  ;;  %1461 = vperm.xlu2 %7009, %v8233_v14  }
 0x2d2   : > { %v8198_v22 = vadd.f32 %v1184_v10, %v1183_v19 }
 0x2d3   : > { %v1207_v28 = vpop.f32.mrf.mxu0 }
 0x2d4   : > { %v1235_v35 = vpack.c.bf16 %v8198_v22, %v8198_v22 }
 0x2d5   : > { %1401 = vmatpush.bf16.msra.mxu1 %v8011_v8 }
 0x2d6   : > { %1244 = vmatmul.bf16.vlgmr.msrb.gmra.mxu2 %v1235_v35  ;;  %1257 = vmatmul.bf16.vlgmr.msrb.gmra.mxu3 %v1235_v35 }
 0x2d7   : > { %1270 = vmatmul.bf16.vlgmr.msrb.gmra.mxu0 %v1235_v35  ;;  %1476 = vmatpush.bf16.msrb.mxu2 %v7948_v12 }
 0x2d8   : > { %1510 = vmatpush.bf16.msrb.mxu0 %v7943_v4  ;;  %1502 = vmatpush.bf16.msrb.mxu3 %v7960_v29 }
 0x2d9   : > { %1402 = vmatpush.bf16.msra.mxu1 %v8018_v16 }
 0x2db   : > { %1477 = vmatpush.bf16.msrb.mxu2 %v7954_v20  ;;  %v1218_v23 = vpop.f32.mrf.mxu0 }
 0x2dc   : > { %1511 = vmatpush.bf16.msrb.mxu0 %v7946_v7  ;;  %1503 = vmatpush.bf16.msrb.mxu3 %v7995_v56 }
 0x2dd   : > { %6340 = vmatmul.msk.bf16.vlgmr.msrb.gmra.mxu1 %vm651_vm1, %v1329_v41 }
 0x2de   : > { %1403 = vmatpush.bf16.msra.mxu1 %v8024_v25 }
 0x2e0   : > { %1512 = vmatpush.bf16.msrb.mxu0 %v7951_v17 }
 0x2e2   : > { %1404 = vmatpush.bf16.msra.mxu1 %v8031_v32 }
 0x2e3   : > { %v1220_v42 = vpop.f32.mrf.mxu0 }
 0x2e4   : > { %1513 = vmatpush.bf16.msrb.mxu0 %v7963_v30 }
 0x2e6   : > { %6341 = vmatmul.msk.bf16.vlgmr.msra.gmra.mxu2 %vm651_vm1, %v1329_v41  ;;  %1405 = vmatpush.bf16.msra.mxu1 %v8034_v37 }
 0x2e7   : > { %1489 = vmatpush.bf16.msra.mxu2 %v7958_v26 }
 0x2e8   : > { %1514 = vmatpush.bf16.msrb.mxu0 %v7972_v36 }
 0x2ea   : > { %1406 = vmatpush.bf16.msra.mxu1 %v8038_v45 }
 0x2eb   : > { %1490 = vmatpush.bf16.msra.mxu2 %v7990_v49 }
 0x2ec   : > { %1515 = vmatpush.bf16.msrb.mxu0 %v7978_v40 }
 0x2ee   : > { %1523 = vmatpush.bf16.msrb.mxu1 %v7956_v21 }
 0x2f0   : > { %1516 = vmatpush.bf16.msrb.mxu0 %v7982_v43 }
 0x2f2   : > { %1524 = vmatpush.bf16.msrb.mxu1 %v7967_v33 }
 0x2f4   : > { %1517 = vmatpush.bf16.msrb.mxu0 %v7985_v46 }
 0x2f6   : > { %1525 = vmatpush.bf16.msrb.mxu1 %v7975_v39 }
 0x2fa   : > { %1526 = vmatpush.bf16.msrb.mxu1 %v7998_v58 }
 0x2fe   : > { %1527 = vmatpush.bf16.msrb.mxu1 %v8007_v2 }
 0x302   : > { %1528 = vmatpush.bf16.msrb.mxu1 %v8014_v13 }
 0x306   : > { %1529 = vmatpush.bf16.msrb.mxu1 %v8021_v18 }
 0x30a   : > { %1530 = vmatpush.bf16.msrb.mxu1 %v8027_v27 }
 0x354   : > { %v1271_v44 = vpop.f32.mrf.mxu0 }
 0x359   : > { %v1245_v1 = vpop.f32.mrf.mxu2  ;;  %v1258_v48 = vpop.f32.mrf.mxu3 }
 0x35a   : > { %v1275_v53 = vadd.f32 %v1245_v1, %v1205_v34  ;;  %v1295_v54 = vadd.f32 %v1258_v48, %v1218_v23  ;;  %v1315_v1 = vadd.f32 %v8093_v51, %v1271_v44 }
 0x35c   : > { %v6336_v55 = vmul.f32 -1.442695, %v1275_v53  ;;  %v6337_v57 = vmul.f32 -1.442695, %v1295_v54  ;;  %v1273_v59 = vpop.f32.mrf.mxu0 }
 0x35e   : > { %7054 = vpow2.f32 %v6336_v55 }
 0x35f   : > { %7056 = vpow2.f32 %v6337_v57 }
 0x361   : > { %v1247_v60 = vpop.f32.mrf.mxu2  ;;  %v1260_v62 = vpop.f32.mrf.mxu3 }
 0x364   : > { %v7055_v3 = vpop.eup %7054 }
 0x365   : > { %v7057_v5 = vpop.eup %7056  ;;  %v1279_v9 = vadd.f32 1.0, %v7055_v3 }
 0x366   : > { %v1299_v11 = vadd.f32 1.0, %v7057_v5 }
 0x367   : > { %7058 = vrcp.f32 %v1279_v9  ;;  %v1291_v28 = vand.u32 2147483648, %v1279_v9  ;;  %v1289_v42 = vand.u32 2147483647, %v1279_v9  ;;  %vm1285_vm0 = vweird.f32 %v1279_v9 }
 0x368   : > { %7060 = vrcp.f32 %v1299_v11  ;;  %v1311_v57 = vand.u32 2147483648, %v1299_v11  ;;  %vm1305_vm5 = vweird.f32 %v1299_v11  ;;  %v1309_v59 = vand.u32 2147483647, %v1299_v11 }
 0x369   : > { %v1292_v41 = vor.u32 1.1754944e-38, %v1291_v28  ;;  %vm1290_vm3 = vcmp.eq.f32.partialorder %v1289_v42, 8.507059e+37 }
 0x36a   : > { %v1312_v3 = vor.u32 1.1754944e-38, %v1311_v57  ;;  %vm1310_vm7 = vcmp.eq.f32.partialorder %v1309_v59, 8.507059e+37 }
 0x36d   : > { %v7059_v15 = vpop.eup %7058 }
 0x36e   : > { %v7061_v19 = vpop.eup %7060  ;;  %v1281_v10 = vmul.f32 %v7059_v15, %v1279_v9  ;;  %vm1286_vm15 = vweird.f32 %v7059_v15 }
 0x36f   : > { %v1301_v35 = vmul.f32 %v7061_v19, %v1299_v11  ;;  %vm1287_vm2 = vmor %vm1285_vm0, %vm1286_vm15  ;;  %vm1306_vm4 = vweird.f32 %v7061_v19 }
 0x370   : > { %v1282_v34 = vsub.f32 1.0, %v1281_v10  ;;  %vm1307_vm6 = vmor %vm1305_vm5, %vm1306_vm4 }
 0x371   : > { %v1302_v31 = vsub.f32 1.0, %v1301_v35 }
 0x372   : > { %v1283_v23 = vmul.f32 %v7059_v15, %v1282_v34 }
 0x373   : > { %v1303_v6 = vmul.f32 %v7061_v19, %v1302_v31  ;;  %v1462_v31 = vpop.permute.xlu2 %1461 }
 0x374   : > { %v1284_v38 = vadd.f32 %v7059_v15, %v1283_v23  ;;  %vm1463_vm8 = vcmp.eq.s32.totalorder %v1462_v31, %v8040_v47 }
 0x375   : > { %v1304_v54 = vadd.f32 %v7061_v19, %v1303_v6  ;;  %v6344_v23 = vsel %vm1463_vm8, 1.0, %v7714_v50 }
 0x376   : > { %v1288_v48 = vsel %vm1287_vm2, %v7059_v15, %v1284_v38  ;;  %v1466_v42 = vpack.c.bf16 %v6344_v23, %v6344_v23 }
 0x377   : > { %v1293_v53 = vsel %vm1290_vm3, %v1292_v41, %v1288_v48  ;;  %v1308_v62 = vsel %vm1307_vm6, %v7061_v19, %v1304_v54  ;;  %v8262_v19 = vpop.f32.mrf.mxu2 }
 0x378   : > { %v1316_v55 = vmul.f32 %v1315_v1, %v1293_v53  ;;  %v1313_v44 = vsel %vm1310_vm7, %v1312_v3, %v1308_v62  ;;  %6345 = vmatmul.msk.bf16.vlgmr.msrb.gmra.mxu2 %vm651_vm1, %v1466_v42 }
 0x379   : > { %v1319_v5 = vsub.f32 1.0, %v1313_v44  ;;  %v1321_v15 = vmul.f32 %v1313_v44, %v8198_v22  ;;  %v1342_v22 = vpop.f32.mrf.mxu1  ;;  %1536 = vmatpush.bf16.msrb.mxu2 %v7992_v52 }
 0x37a   : > { %v1317_v60 = vadd.f32 %v1316_v55, %v8214_v24 }
 0x37c   : > { %7062 = vtanh.f32 %v1317_v60 }
 0x37d   : > { %1537 = vmatpush.bf16.msrb.mxu2 %v8004_v61 }
 0x37f   : > { %v1370_v35 = vpop.f32.mrf.mxu2 }
 0x381   : > { %v1344_v10 = vpop.f32.mrf.mxu1  ;;  %1538 = vmatpush.bf16.msrb.mxu2 %v8011_v8 }
 0x382   : > { %v7063_v9 = vpop.eup %7062 }
 0x383   : > { %v1320_v63 = vmul.f32 %v7063_v9, %v1319_v5 }
 0x385   : > { %v8246_v11 = vadd.f32 %v1321_v15, %v1320_v63  ;;  %1539 = vmatpush.bf16.msrb.mxu2 %v8018_v16  ;;  %v7719_v63 = vmov 6  }
 0x386   : > { %7010 = vset.pattern.permute.xlu1 %v7719_v63 }
 0x387   : > { %v1372_v24 = vpack.c.bf16 %v8246_v11, %v8246_v11  ;;  %1598 = vperm.xlu1 %7010, %v8233_v14  }
 0x388   : > { %6346 = vmatmul.msk.bf16.vlgmr.msra.gmra.mxu2 %vm651_vm1, %v1466_v42 }
 0x389   : > { %1381 = vmatmul.bf16.vlgmr.msra.gmra.mxu3 %v1372_v24  ;;  %1394 = vmatmul.bf16.vlgmr.msra.gmra.mxu0 %v1372_v24  ;;  %v1355_v34 = vpop.f32.mrf.mxu1 }
 0x38a   : > { %1407 = vmatmul.bf16.vlgmr.msra.gmra.mxu1 %v1372_v24  ;;  %1613 = vmatpush.bf16.msra.mxu3 %v7948_v12 }
 0x38b   : > { %1647 = vmatpush.bf16.msra.mxu1 %v7943_v4  ;;  %1639 = vmatpush.bf16.msra.mxu0 %v7960_v29 }
 0x38c   : > { %1540 = vmatpush.bf16.msrb.mxu2 %v8024_v25 }
 0x38e   : > { %1614 = vmatpush.bf16.msra.mxu3 %v7954_v20 }
 0x38f   : > { %1648 = vmatpush.bf16.msra.mxu1 %v7946_v7  ;;  %1640 = vmatpush.bf16.msra.mxu0 %v7995_v56 }
 0x390   : > { %1541 = vmatpush.bf16.msrb.mxu2 %v8031_v32 }
 0x391   : > { %v1357_v28 = vpop.f32.mrf.mxu1 }
 0x393   : > { %1649 = vmatpush.bf16.msra.mxu1 %v7951_v17 }
 0x394   : > { %1542 = vmatpush.bf16.msrb.mxu2 %v8034_v37 }
 0x397   : > { %1650 = vmatpush.bf16.msra.mxu1 %v7963_v30 }
 0x398   : > { %1543 = vmatpush.bf16.msrb.mxu2 %v8038_v45 }
 0x399   : > { %6347 = vmatmul.msk.bf16.vlgmr.msrb.gmra.mxu3 %vm651_vm1, %v1466_v42 }
 0x39a   : > { %1626 = vmatpush.bf16.msrb.mxu3 %v7958_v26 }
 0x39b   : > { %1651 = vmatpush.bf16.msra.mxu1 %v7972_v36 }
 0x39c   : > { %1660 = vmatpush.bf16.msra.mxu2 %v7956_v21 }
 0x39e   : > { %1627 = vmatpush.bf16.msrb.mxu3 %v7990_v49 }
 0x39f   : > { %1652 = vmatpush.bf16.msra.mxu1 %v7978_v40 }
 0x3a0   : > { %1661 = vmatpush.bf16.msra.mxu2 %v7967_v33 }
 0x3a3   : > { %1653 = vmatpush.bf16.msra.mxu1 %v7982_v43 }
 0x3a4   : > { %1662 = vmatpush.bf16.msra.mxu2 %v7975_v39 }
 0x3a7   : > { %1654 = vmatpush.bf16.msra.mxu1 %v7985_v46 }
 0x3a8   : > { %1663 = vmatpush.bf16.msra.mxu2 %v7998_v58 }
 0x3ac   : > { %1664 = vmatpush.bf16.msra.mxu2 %v8007_v2 }
 0x3b0   : > { %1665 = vmatpush.bf16.msra.mxu2 %v8014_v13 }
 0x3b4   : > { %1666 = vmatpush.bf16.msra.mxu2 %v8021_v18 }
 0x3b8   : > { %1667 = vmatpush.bf16.msra.mxu2 %v8027_v27 }
 0x406   : > { %v1395_v6 = vpop.f32.mrf.mxu0 }
 0x407   : > { %v1432_v38 = vadd.f32 %v1395_v6, %v1355_v34  ;;  %v1408_v41 = vpop.f32.mrf.mxu1 }
 0x408   : > { %v1452_v6 = vadd.f32 %v8093_v51, %v1408_v41 }
 0x409   : > { %v6343_v1 = vmul.f32 -1.442695, %v1432_v38 }
 0x40b   : > { %7064 = vpow2.f32 %v6343_v1 }
 0x40c   : > { %v1382_v48 = vpop.f32.mrf.mxu3 }
 0x40d   : > { %v1412_v53 = vadd.f32 %v1382_v48, %v1342_v22 }
 0x40e   : > { %v1397_v54 = vpop.f32.mrf.mxu0 }
 0x40f   : > { %v6342_v55 = vmul.f32 -1.442695, %v1412_v53  ;;  %v1410_v57 = vpop.f32.mrf.mxu1 }
 0x411   : > { %v7065_v59 = vpop.eup %7064  ;;  %7066 = vpow2.f32 %v6342_v55 }
 0x412   : > { %v1436_v60 = vadd.f32 1.0, %v7065_v59 }
 0x414   : > { %v1384_v62 = vpop.f32.mrf.mxu3  ;;  %7068 = vrcp.f32 %v1436_v60  ;;  %v1448_v53 = vand.u32 2147483648, %v1436_v60  ;;  %vm1442_vm14 = vweird.f32 %v1436_v60  ;;  %v1446_v55 = vand.u32 2147483647, %v1436_v60 }
 0x416   : > { %v1449_v62 = vor.u32 1.1754944e-38, %v1448_v53  ;;  %vm1447_vm0 = vcmp.eq.f32.partialorder %v1446_v55, 8.507059e+37 }
 0x417   : > { %v7067_v3 = vpop.eup %7066 }
 0x418   : > { %v1416_v44 = vadd.f32 1.0, %v7067_v3 }
 0x41a   : > { %7070 = vrcp.f32 %v1416_v44  ;;  %v7069_v5 = vpop.eup %7068  ;;  %v1428_v35 = vand.u32 2147483648, %v1416_v44  ;;  %v1426_v28 = vand.u32 2147483647, %v1416_v44  ;;  %vm1422_vm10 = vweird.f32 %v1416_v44 }
 0x41b   : > { %v1438_v9 = vmul.f32 %v7069_v5, %v1436_v60  ;;  %vm1443_vm13 = vweird.f32 %v7069_v5 }
 0x41c   : > { %v1429_v42 = vor.u32 1.1754944e-38, %v1428_v35  ;;  %vm1427_vm12 = vcmp.eq.f32.partialorder %v1426_v28, 8.507059e+37  ;;  %vm1444_vm15 = vmor %vm1442_vm14, %vm1443_vm13 }
 0x41d   : > { %v1439_v22 = vsub.f32 1.0, %v1438_v9 }
 0x41f   : > { %v1440_v31 = vmul.f32 %v7069_v5, %v1439_v22 }
 0x420   : > { %v7071_v15 = vpop.eup %7070 }
 0x421   : > { %v1418_v24 = vmul.f32 %v7071_v15, %v1416_v44  ;;  %vm1423_vm9 = vweird.f32 %v7071_v15  ;;  %v1441_v48 = vadd.f32 %v7069_v5, %v1440_v31 }
 0x422   : > { %vm1424_vm11 = vmor %vm1422_vm10, %vm1423_vm9 }
 0x423   : > { %v1419_v10 = vsub.f32 1.0, %v1418_v24  ;;  %v1445_v59 = vsel %vm1444_vm15, %v7069_v5, %v1441_v48 }
 0x424   : > { %v1450_v51 = vsel %vm1447_vm0, %v1449_v62, %v1445_v59 }
 0x425   : > { %v1420_v34 = vmul.f32 %v7071_v15, %v1419_v10  ;;  %v1456_v41 = vsub.f32 1.0, %v1450_v51  ;;  %v1458_v9 = vmul.f32 %v1450_v51, %v8246_v11  ;;  %v1479_v11 = vpop.f32.mrf.mxu2  ;;  %v1599_v10 = vpop.permute.xlu1 %1598  ;;  %v7720_v51 = vmov 7  }
 0x426   : > { %vm1600_vm2 = vcmp.eq.s32.totalorder %v1599_v10, %v8040_v47  ;;  %7011 = vset.pattern.permute.xlu2 %v7720_v51 }
 0x427   : > { %v1421_v23 = vadd.f32 %v7071_v15, %v1420_v34  ;;  %v6350_v35 = vsel %vm1600_vm2, 1.0, %v7714_v50  ;;  %1735 = vperm.xlu2 %7011, %v8233_v14  }
 0x428   : > { %v1603_v34 = vpack.c.bf16 %v6350_v35, %v6350_v35 }
 0x429   : > { %v1425_v38 = vsel %vm1424_vm11, %v7071_v15, %v1421_v23 }
 0x42a   : > { %v1430_v1 = vsel %vm1427_vm12, %v1429_v42, %v1425_v38  ;;  %6351 = vmatmul.msk.bf16.vlgmr.msra.gmra.mxu3 %vm651_vm1, %v1603_v34 }
 0x42b   : > { %v1453_v54 = vmul.f32 %v1452_v6, %v1430_v1  ;;  %1673 = vmatpush.bf16.msra.mxu3 %v7992_v52 }
 0x42d   : > { %v1454_v57 = vadd.f32 %v1453_v54, %v8262_v19  ;;  %v8307_v19 = vpop.f32.mrf.mxu3  ;;  %v1481_v5 = vpop.f32.mrf.mxu2 }
 0x42f   : > { %7072 = vtanh.f32 %v1454_v57  ;;  %1674 = vmatpush.bf16.msra.mxu3 %v8004_v61 }
 0x433   : > { %1675 = vmatpush.bf16.msra.mxu3 %v8011_v8 }
 0x435   : > { %v7073_v3 = vpop.eup %7072  ;;  %v1507_v15 = vpop.f32.mrf.mxu3 }
 0x436   : > { %v1457_v44 = vmul.f32 %v7073_v3, %v1456_v41  ;;  %v1492_v24 = vpop.f32.mrf.mxu2 }
 0x437   : > { %1676 = vmatpush.bf16.msra.mxu3 %v8018_v16 }
 0x438   : > { %v8291_v63 = vadd.f32 %v1458_v9, %v1457_v44 }
 0x43a   : > { %v1509_v60 = vpack.c.bf16 %v8291_v63, %v8291_v63  ;;  %6352 = vmatmul.msk.bf16.vlgmr.msrb.gmra.mxu3 %vm651_vm1, %v1603_v34 }
 0x43b   : > { %1677 = vmatpush.bf16.msra.mxu3 %v8024_v25 }
 0x43c   : > { %1518 = vmatmul.bf16.vlgmr.msrb.gmra.mxu0 %v1509_v60  ;;  %1531 = vmatmul.bf16.vlgmr.msrb.gmra.mxu1 %v1509_v60 }
 0x43d   : > { %1544 = vmatmul.bf16.vlgmr.msrb.gmra.mxu2 %v1509_v60  ;;  %1750 = vmatpush.bf16.msrb.mxu0 %v7948_v12 }
 0x43e   : > { %1784 = vmatpush.bf16.msrb.mxu2 %v7943_v4  ;;  %1776 = vmatpush.bf16.msrb.mxu1 %v7960_v29  ;;  %v1494_v22 = vpop.f32.mrf.mxu2 }
 0x43f   : > { %1678 = vmatpush.bf16.msra.mxu3 %v8031_v32 }
 0x441   : > { %1751 = vmatpush.bf16.msrb.mxu0 %v7954_v20 }
 0x442   : > { %1785 = vmatpush.bf16.msrb.mxu2 %v7946_v7  ;;  %1777 = vmatpush.bf16.msrb.mxu1 %v7995_v56 }
 0x443   : > { %1679 = vmatpush.bf16.msra.mxu3 %v8034_v37 }
 0x446   : > { %1786 = vmatpush.bf16.msrb.mxu2 %v7951_v17 }
 0x447   : > { %1680 = vmatpush.bf16.msra.mxu3 %v8038_v45 }
 0x44a   : > { %1787 = vmatpush.bf16.msrb.mxu2 %v7963_v30 }
 0x44b   : > { %1797 = vmatpush.bf16.msrb.mxu3 %v7956_v21 }
 0x44c   : > { %6353 = vmatmul.msk.bf16.vlgmr.msra.gmra.mxu0 %vm651_vm1, %v1603_v34 }
 0x44d   : > { %1763 = vmatpush.bf16.msra.mxu0 %v7958_v26 }
 0x44e   : > { %1788 = vmatpush.bf16.msrb.mxu2 %v7972_v36 }
 0x44f   : > { %1798 = vmatpush.bf16.msrb.mxu3 %v7967_v33 }
 0x451   : > { %1764 = vmatpush.bf16.msra.mxu0 %v7990_v49 }
 0x452   : > { %1789 = vmatpush.bf16.msrb.mxu2 %v7978_v40 }
 0x453   : > { %1799 = vmatpush.bf16.msrb.mxu3 %v7975_v39 }
 0x456   : > { %1790 = vmatpush.bf16.msrb.mxu2 %v7982_v43 }
 0x457   : > { %1800 = vmatpush.bf16.msrb.mxu3 %v7998_v58 }
 0x45a   : > { %1791 = vmatpush.bf16.msrb.mxu2 %v7985_v46 }
 0x45b   : > { %1801 = vmatpush.bf16.msrb.mxu3 %v8007_v2 }
 0x45f   : > { %1802 = vmatpush.bf16.msrb.mxu3 %v8014_v13 }
 0x463   : > { %1803 = vmatpush.bf16.msrb.mxu3 %v8021_v18 }
 0x467   : > { %1804 = vmatpush.bf16.msrb.mxu3 %v8027_v27 }
 0x4b9   : > { %v1519_v28 = vpop.f32.mrf.mxu0  ;;  %v1532_v31 = vpop.f32.mrf.mxu1 }
 0x4ba   : > { %v1549_v23 = vadd.f32 %v1519_v28, %v1479_v11  ;;  %v1569_v42 = vadd.f32 %v1532_v31, %v1492_v24  ;;  %v8333_v28 = vld [vmem:[%s10301_s3] ss:$0 sm:$0xff] }
 0x4bc   : > { %v6348_v6 = vmul.f32 -1.442695, %v1549_v23  ;;  %v6349_v38 = vmul.f32 -1.442695, %v1569_v42 }
 0x4be   : > { %7074 = vpow2.f32 %v6348_v6 }
 0x4bf   : > { %7076 = vpow2.f32 %v6349_v38 }
 0x4c0   : > { %v1545_v1 = vpop.f32.mrf.mxu2 }
 0x4c1   : > { %v1521_v48 = vpop.f32.mrf.mxu0  ;;  %v1534_v53 = vpop.f32.mrf.mxu1  ;;  %v1589_v31 = vadd.f32 %v8333_v28, %v1545_v1 }
 0x4c4   : > { %v7075_v54 = vpop.eup %7074 }
 0x4c5   : > { %v7077_v55 = vpop.eup %7076  ;;  %v1553_v57 = vadd.f32 1.0, %v7075_v54 }
 0x4c6   : > { %v1573_v59 = vadd.f32 1.0, %v7077_v55 }
 0x4c7   : > { %7078 = vrcp.f32 %v1553_v57  ;;  %v1565_v5 = vand.u32 2147483648, %v1553_v57  ;;  %v1563_v24 = vand.u32 2147483647, %v1553_v57  ;;  %vm1559_vm4 = vweird.f32 %v1553_v57 }
 0x4c8   : > { %7080 = vrcp.f32 %v1573_v59  ;;  %v1547_v62 = vpop.f32.mrf.mxu2  ;;  %v1585_v6 = vand.u32 2147483648, %v1573_v59  ;;  %vm1579_vm8 = vweird.f32 %v1573_v59  ;;  %v1583_v48 = vand.u32 2147483647, %v1573_v59 }
 0x4c9   : > { %v1566_v35 = vor.u32 1.1754944e-38, %v1565_v5  ;;  %vm1564_vm6 = vcmp.eq.f32.partialorder %v1563_v24, 8.507059e+37  ;;  %v1736_v5 = vpop.permute.xlu2 %1735 }
 0x4ca   : > { %v1586_v55 = vor.u32 1.1754944e-38, %v1585_v6  ;;  %vm1584_vm10 = vcmp.eq.f32.partialorder %v1583_v48, 8.507059e+37  ;;  %vm1737_vm11 = vcmp.eq.s32.totalorder %v1736_v5, %v8040_v47 }
 0x4cd   : > { %v7079_v41 = vpop.eup %7078 }
 0x4ce   : > { %v7081_v3 = vpop.eup %7080  ;;  %v1555_v44 = vmul.f32 %v7079_v41, %v1553_v57  ;;  %vm1560_vm3 = vweird.f32 %v7079_v41 }
 0x4cf   : > { %v1575_v9 = vmul.f32 %v7081_v3, %v1573_v59  ;;  %vm1561_vm5 = vmor %vm1559_vm4, %vm1560_vm3  ;;  %vm1580_vm7 = vweird.f32 %v7081_v3 }
 0x4d0   : > { %v1556_v60 = vsub.f32 1.0, %v1555_v44  ;;  %vm1581_vm9 = vmor %vm1579_vm8, %vm1580_vm7 }
 0x4d1   : > { %v1576_v11 = vsub.f32 1.0, %v1575_v9 }
 0x4d2   : > { %v1557_v15 = vmul.f32 %v7079_v41, %v1556_v60 }
 0x4d3   : > { %v1577_v22 = vmul.f32 %v7081_v3, %v1576_v11 }
 0x4d4   : > { %v1558_v10 = vadd.f32 %v7079_v41, %v1557_v15  ;;  %v6356_v15 = vsel %vm1737_vm11, 1.0, %v7714_v50 }
 0x4d5   : > { %v1578_v42 = vadd.f32 %v7081_v3, %v1577_v22  ;;  %v1740_v24 = vpack.c.bf16 %v6356_v15, %v6356_v15 }
 0x4d6   : > { %v1562_v34 = vsel %vm1561_vm5, %v7079_v41, %v1558_v10 }
 0x4d7   : > { %v1567_v23 = vsel %vm1564_vm6, %v1566_v35, %v1562_v34  ;;  %v1582_v54 = vsel %vm1581_vm9, %v7081_v3, %v1578_v42  ;;  %6357 = vmatmul.msk.bf16.vlgmr.msrb.gmra.mxu0 %vm651_vm1, %v1740_v24 }
 0x4d8   : > { %v1590_v38 = vmul.f32 %v1589_v31, %v1567_v23  ;;  %v1587_v57 = vsel %vm1584_vm10, %v1586_v55, %v1582_v54  ;;  %1810 = vmatpush.bf16.msrb.mxu0 %v7992_v52 }
 0x4d9   : > { %v1593_v1 = vsub.f32 1.0, %v1587_v57  ;;  %v1595_v41 = vmul.f32 %v1587_v57, %v8291_v63  ;;  %v8357_v63 = vpop.f32.mrf.mxu0 }
 0x4da   : > { %v1591_v53 = vadd.f32 %v1590_v38, %v8307_v19  ;;  %v1616_v19 = vpop.f32.mrf.mxu3 }
 0x4dc   : > { %7082 = vtanh.f32 %v1591_v53  ;;  %1811 = vmatpush.bf16.msrb.mxu0 %v8004_v61 }
 0x4e0   : > { %1812 = vmatpush.bf16.msrb.mxu0 %v8011_v8 }
 0x4e1   : > { %v1644_v3 = vpop.f32.mrf.mxu0 }
 0x4e2   : > { %v7083_v62 = vpop.eup %7082  ;;  %v1618_v9 = vpop.f32.mrf.mxu3 }
 0x4e3   : > { %v1594_v51 = vmul.f32 %v7083_v62, %v1593_v1  ;;  %v7721_v1 = vmov 8  }
 0x4e4   : > { %1813 = vmatpush.bf16.msrb.mxu0 %v8018_v16  ;;  %7012 = vset.pattern.permute.xlu0 %v7721_v1 }
 0x4e5   : > { %v8341_v44 = vadd.f32 %v1595_v41, %v1594_v51  ;;  %1872 = vperm.xlu0 %7012, %v8233_v14  }
 0x4e7   : > { %v1646_v59 = vpack.c.bf16 %v8341_v44, %v8341_v44  ;;  %6358 = vmatmul.msk.bf16.vlgmr.msra.gmra.mxu0 %vm651_vm1, %v1740_v24 }
 0x4e8   : > { %1814 = vmatpush.bf16.msrb.mxu0 %v8024_v25 }
 0x4e9   : > { %1655 = vmatmul.bf16.vlgmr.msra.gmra.mxu1 %v1646_v59  ;;  %1668 = vmatmul.bf16.vlgmr.msra.gmra.mxu2 %v1646_v59 }
 0x4ea   : > { %1681 = vmatmul.bf16.vlgmr.msra.gmra.mxu3 %v1646_v59  ;;  %1887 = vmatpush.bf16.msra.mxu1 %v7948_v12  ;;  %v1629_v60 = vpop.f32.mrf.mxu3 }
 0x4eb   : > { %1921 = vmatpush.bf16.msra.mxu3 %v7943_v4  ;;  %1913 = vmatpush.bf16.msra.mxu2 %v7960_v29 }
 0x4ec   : > { %1815 = vmatpush.bf16.msrb.mxu0 %v8031_v32 }
 0x4ee   : > { %1888 = vmatpush.bf16.msra.mxu1 %v7954_v20 }
 0x4ef   : > { %1922 = vmatpush.bf16.msra.mxu3 %v7946_v7  ;;  %1914 = vmatpush.bf16.msra.mxu2 %v7995_v56 }
 0x4f0   : > { %1816 = vmatpush.bf16.msrb.mxu0 %v8034_v37 }
 0x4f2   : > { %v1631_v11 = vpop.f32.mrf.mxu3 }
 0x4f3   : > { %1923 = vmatpush.bf16.msra.mxu3 %v7951_v17 }
 0x4f4   : > { %1817 = vmatpush.bf16.msrb.mxu0 %v8038_v45 }
 0x4f7   : > { %1924 = vmatpush.bf16.msra.mxu3 %v7963_v30 }
 0x4f8   : > { %1934 = vmatpush.bf16.msra.mxu0 %v7956_v21 }
 0x4f9   : > { %6359 = vmatmul.msk.bf16.vlgmr.msrb.gmra.mxu1 %vm651_vm1, %v1740_v24 }
 0x4fa   : > { %1900 = vmatpush.bf16.msrb.mxu1 %v7958_v26 }
 0x4fb   : > { %1925 = vmatpush.bf16.msra.mxu3 %v7972_v36 }
 0x4fc   : > { %1935 = vmatpush.bf16.msra.mxu0 %v7967_v33 }
 0x4fe   : > { %1901 = vmatpush.bf16.msrb.mxu1 %v7990_v49 }
 0x4ff   : > { %1926 = vmatpush.bf16.msra.mxu3 %v7978_v40 }
 0x500   : > { %1936 = vmatpush.bf16.msra.mxu0 %v7975_v39 }
 0x503   : > { %1927 = vmatpush.bf16.msra.mxu3 %v7982_v43 }
 0x504   : > { %1937 = vmatpush.bf16.msra.mxu0 %v7998_v58 }
 0x507   : > { %1928 = vmatpush.bf16.msra.mxu3 %v7985_v46 }
 0x508   : > { %1938 = vmatpush.bf16.msra.mxu0 %v8007_v2 }
 0x50c   : > { %1939 = vmatpush.bf16.msra.mxu0 %v8014_v13 }
 0x510   : > { %1940 = vmatpush.bf16.msra.mxu0 %v8021_v18 }
 0x514   : > { %1941 = vmatpush.bf16.msra.mxu0 %v8027_v27 }
 0x566   : > { %v1656_v22 = vpop.f32.mrf.mxu1 }
 0x567   : > { %v1686_v10 = vadd.f32 %v1656_v22, %v1616_v19 }
 0x569   : > { %v6354_v35 = vmul.f32 -1.442695, %v1686_v10 }
 0x56b   : > { %7084 = vpow2.f32 %v6354_v35 }
 0x56c   : > { %v1669_v34 = vpop.f32.mrf.mxu2 }
 0x56d   : > { %v1706_v31 = vadd.f32 %v1669_v34, %v1629_v60  ;;  %v1682_v23 = vpop.f32.mrf.mxu3 }
 0x56e   : > { %v1658_v42 = vpop.f32.mrf.mxu1  ;;  %v1726_v22 = vadd.f32 %v8333_v28, %v1682_v23 }
 0x56f   : > { %v6355_v6 = vmul.f32 -1.442695, %v1706_v31 }
 0x571   : > { %v7085_v38 = vpop.eup %7084  ;;  %7086 = vpow2.f32 %v6355_v6 }
 0x572   : > { %v1690_v48 = vadd.f32 1.0, %v7085_v38 }
 0x574   : > { %7088 = vrcp.f32 %v1690_v48  ;;  %v1671_v53 = vpop.f32.mrf.mxu2  ;;  %v1702_v59 = vand.u32 2147483648, %v1690_v48  ;;  %v1700_v3 = vand.u32 2147483647, %v1690_v48  ;;  %vm1696_vm13 = vweird.f32 %v1690_v48 }
 0x575   : > { %v1684_v54 = vpop.f32.mrf.mxu3 }
 0x576   : > { %v1703_v5 = vor.u32 1.1754944e-38, %v1702_v59  ;;  %vm1701_vm15 = vcmp.eq.f32.partialorder %v1700_v3, 8.507059e+37 }
 0x577   : > { %v7087_v55 = vpop.eup %7086 }
 0x578   : > { %v1710_v57 = vadd.f32 1.0, %v7087_v55 }
 0x57a   : > { %v7089_v62 = vpop.eup %7088  ;;  %7090 = vrcp.f32 %v1710_v57  ;;  %v1722_v34 = vand.u32 2147483648, %v1710_v57  ;;  %v1720_v42 = vand.u32 2147483647, %v1710_v57  ;;  %vm1716_vm2 = vweird.f32 %v1710_v57 }
 0x57b   : > { %v1692_v51 = vmul.f32 %v7089_v62, %v1690_v48  ;;  %vm1697_vm12 = vweird.f32 %v7089_v62 }
 0x57c   : > { %vm1698_vm14 = vmor %vm1696_vm13, %vm1697_vm12  ;;  %v1723_v48 = vor.u32 1.1754944e-38, %v1722_v34  ;;  %vm1721_vm4 = vcmp.eq.f32.partialorder %v1720_v42, 8.507059e+37 }
 0x57d   : > { %v1693_v41 = vsub.f32 1.0, %v1692_v51  ;;  %v8402_v51 = vpop.f32.mrf.mxu1 }
 0x57f   : > { %v1694_v19 = vmul.f32 %v7089_v62, %v1693_v41 }
 0x580   : > { %v7091_v9 = vpop.eup %7090 }
 0x581   : > { %v1712_v60 = vmul.f32 %v7091_v9, %v1710_v57  ;;  %v1695_v11 = vadd.f32 %v7089_v62, %v1694_v19  ;;  %vm1717_vm0 = vweird.f32 %v7091_v9 }
 0x582   : > { %vm1718_vm3 = vmor %vm1716_vm2, %vm1717_vm0 }
 0x583   : > { %v1713_v15 = vsub.f32 1.0, %v1712_v60  ;;  %v1699_v24 = vsel %vm1698_vm14, %v7089_v62, %v1695_v11 }
 0x584   : > { %v1704_v10 = vsel %vm1701_vm15, %v1703_v5, %v1699_v24 }
 0x585   : > { %v1714_v35 = vmul.f32 %v7091_v9, %v1713_v15  ;;  %v1727_v31 = vmul.f32 %v1726_v22, %v1704_v10  ;;  %v1781_v59 = vpop.f32.mrf.mxu1 }
 0x587   : > { %v1728_v6 = vadd.f32 %v1727_v31, %v8357_v63  ;;  %v1715_v38 = vadd.f32 %v7091_v9, %v1714_v35 }
 0x589   : > { %7092 = vtanh.f32 %v1728_v6  ;;  %v1719_v53 = vsel %vm1718_vm3, %v7091_v9, %v1715_v38  ;;  %v1873_v9 = vpop.permute.xlu0 %1872 }
 0x58a   : > { %v1724_v23 = vsel %vm1721_vm4, %v1723_v48, %v1719_v53  ;;  %vm1874_vm5 = vcmp.eq.s32.totalorder %v1873_v9, %v8040_v47 }
 0x58b   : > { %v1730_v54 = vsub.f32 1.0, %v1724_v23  ;;  %v1732_v62 = vmul.f32 %v1724_v23, %v8341_v44  ;;  %v1753_v44 = vpop.f32.mrf.mxu0  ;;  %v6362_v60 = vsel %vm1874_vm5, 1.0, %v7714_v50 }
 0x58c   : > { %v1877_v11 = vpack.c.bf16 %v6362_v60, %v6362_v60 }
 0x58e   : > { %6363 = vmatmul.msk.bf16.vlgmr.msra.gmra.mxu1 %vm651_vm1, %v1877_v11 }
 0x58f   : > { %v7093_v55 = vpop.eup %7092  ;;  %1947 = vmatpush.bf16.msra.mxu1 %v7992_v52 }
 0x590   : > { %v1731_v1 = vmul.f32 %v7093_v55, %v1730_v54  ;;  %v7722_v54 = vmov 9  }
 0x591   : > { %7013 = vset.pattern.permute.xlu1 %v7722_v54 }
 0x592   : > { %v8386_v57 = vadd.f32 %v1732_v62, %v1731_v1  ;;  %2009 = vperm.xlu1 %7013, %v8233_v14  }
 0x593   : > { %v1755_v41 = vpop.f32.mrf.mxu0  ;;  %1948 = vmatpush.bf16.msra.mxu1 %v8004_v61 }
 0x594   : > { %v1783_v63 = vpack.c.bf16 %v8386_v57, %v8386_v57 }
 0x596   : > { %1792 = vmatmul.bf16.vlgmr.msrb.gmra.mxu2 %v1783_v63  ;;  %1805 = vmatmul.bf16.vlgmr.msrb.gmra.mxu3 %v1783_v63 }
 0x597   : > { %1818 = vmatmul.bf16.vlgmr.msrb.gmra.mxu0 %v1783_v63  ;;  %2024 = vmatpush.bf16.msrb.mxu2 %v7948_v12 }
 0x598   : > { %2058 = vmatpush.bf16.msrb.mxu0 %v7943_v4  ;;  %2050 = vmatpush.bf16.msrb.mxu3 %v7960_v29 }
 0x599   : > { %1949 = vmatpush.bf16.msra.mxu1 %v8011_v8 }
 0x59b   : > { %2025 = vmatpush.bf16.msrb.mxu2 %v7954_v20  ;;  %v1766_v19 = vpop.f32.mrf.mxu0 }
 0x59c   : > { %2059 = vmatpush.bf16.msrb.mxu0 %v7946_v7  ;;  %2051 = vmatpush.bf16.msrb.mxu3 %v7995_v56 }
 0x59d   : > { %1950 = vmatpush.bf16.msra.mxu1 %v8018_v16 }
 0x59e   : > { %6364 = vmatmul.msk.bf16.vlgmr.msrb.gmra.mxu1 %vm651_vm1, %v1877_v11 }
 0x5a0   : > { %2060 = vmatpush.bf16.msrb.mxu0 %v7951_v17 }
 0x5a1   : > { %1951 = vmatpush.bf16.msra.mxu1 %v8024_v25 }
 0x5a3   : > { %v1768_v3 = vpop.f32.mrf.mxu0 }
 0x5a4   : > { %2061 = vmatpush.bf16.msrb.mxu0 %v7963_v30 }
 0x5a5   : > { %1952 = vmatpush.bf16.msra.mxu1 %v8031_v32 }
 0x5a6   : > { %6365 = vmatmul.msk.bf16.vlgmr.msra.gmra.mxu2 %vm651_vm1, %v1877_v11 }
 0x5a7   : > { %2037 = vmatpush.bf16.msra.mxu2 %v7958_v26 }
 0x5a8   : > { %2062 = vmatpush.bf16.msrb.mxu0 %v7972_v36 }
 0x5a9   : > { %1953 = vmatpush.bf16.msra.mxu1 %v8034_v37 }
 0x5ab   : > { %2038 = vmatpush.bf16.msra.mxu2 %v7990_v49 }
 0x5ac   : > { %2063 = vmatpush.bf16.msrb.mxu0 %v7978_v40 }
 0x5ad   : > { %1954 = vmatpush.bf16.msra.mxu1 %v8038_v45 }
 0x5b0   : > { %2064 = vmatpush.bf16.msrb.mxu0 %v7982_v43 }
 0x5b1   : > { %2071 = vmatpush.bf16.msrb.mxu1 %v7956_v21 }
 0x5b4   : > { %2065 = vmatpush.bf16.msrb.mxu0 %v7985_v46 }
 0x5b5   : > { %2072 = vmatpush.bf16.msrb.mxu1 %v7967_v33 }
 0x5b9   : > { %2073 = vmatpush.bf16.msrb.mxu1 %v7975_v39 }
 0x5bd   : > { %2074 = vmatpush.bf16.msrb.mxu1 %v7998_v58 }
 0x5c1   : > { %2075 = vmatpush.bf16.msrb.mxu1 %v8007_v2 }
 0x5c5   : > { %2076 = vmatpush.bf16.msrb.mxu1 %v8014_v13 }
 0x5c9   : > { %2077 = vmatpush.bf16.msrb.mxu1 %v8021_v18 }
 0x5cd   : > { %2078 = vmatpush.bf16.msrb.mxu1 %v8027_v27 }
 0x614   : > { %v1819_v5 = vpop.f32.mrf.mxu0 }
 0x615   : > { %v1863_v11 = vadd.f32 %v8333_v28, %v1819_v5 }
 0x619   : > { %v1793_v15 = vpop.f32.mrf.mxu2  ;;  %v1806_v24 = vpop.f32.mrf.mxu3 }
 0x61a   : > { %v1823_v22 = vadd.f32 %v1793_v15, %v1753_v44  ;;  %v1843_v10 = vadd.f32 %v1806_v24, %v1766_v19 }
 0x61c   : > { %v6360_v35 = vmul.f32 -1.442695, %v1823_v22  ;;  %v6361_v34 = vmul.f32 -1.442695, %v1843_v10  ;;  %v1821_v31 = vpop.f32.mrf.mxu0 }
 0x61e   : > { %7094 = vpow2.f32 %v6360_v35 }
 0x61f   : > { %7096 = vpow2.f32 %v6361_v34 }
 0x621   : > { %v1795_v42 = vpop.f32.mrf.mxu2  ;;  %v1808_v6 = vpop.f32.mrf.mxu3 }
 0x624   : > { %v7095_v38 = vpop.eup %7094 }
 0x625   : > { %v7097_v48 = vpop.eup %7096  ;;  %v1827_v53 = vadd.f32 1.0, %v7095_v38 }
 0x626   : > { %v1847_v23 = vadd.f32 1.0, %v7097_v48 }
 0x627   : > { %7098 = vrcp.f32 %v1827_v53  ;;  %v1839_v41 = vand.u32 2147483648, %v1827_v53  ;;  %v1837_v3 = vand.u32 2147483647, %v1827_v53  ;;  %vm1833_vm7 = vweird.f32 %v1827_v53 }
 0x628   : > { %7100 = vrcp.f32 %v1847_v23  ;;  %v1859_v35 = vand.u32 2147483648, %v1847_v23  ;;  %vm1853_vm11 = vweird.f32 %v1847_v23  ;;  %v1857_v34 = vand.u32 2147483647, %v1847_v23 }
 0x629   : > { %v1840_v14 = vor.u32 1.1754944e-38, %v1839_v41  ;;  %vm1838_vm9 = vcmp.eq.f32.partialorder %v1837_v3, 8.507059e+37  ;;  %v2010_v41 = vpop.permute.xlu1 %2009 }
 0x62a   : > { %v1860_v6 = vor.u32 1.1754944e-38, %v1859_v35  ;;  %vm1858_vm13 = vcmp.eq.f32.partialorder %v1857_v34, 8.507059e+37  ;;  %vm2011_vm14 = vcmp.eq.s32.totalorder %v2010_v41, %v8040_v47 }
 0x62d   : > { %v7099_v55 = vpop.eup %7098 }
 0x62e   : > { %v7101_v1 = vpop.eup %7100  ;;  %v1829_v62 = vmul.f32 %v7099_v55, %v1827_v53  ;;  %vm1834_vm6 = vweird.f32 %v7099_v55 }
 0x62f   : > { %v1849_v63 = vmul.f32 %v7101_v1, %v1847_v23  ;;  %vm1835_vm8 = vmor %vm1833_vm7, %vm1834_vm6  ;;  %vm1854_vm10 = vweird.f32 %v7101_v1 }
 0x630   : > { %v1830_v44 = vsub.f32 1.0, %v1829_v62  ;;  %vm1855_vm12 = vmor %vm1853_vm11, %vm1854_vm10 }
 0x631   : > { %v1850_v59 = vsub.f32 1.0, %v1849_v63 }
 0x632   : > { %v1831_v19 = vmul.f32 %v7099_v55, %v1830_v44 }
 0x633   : > { %v1851_v9 = vmul.f32 %v7101_v1, %v1850_v59  ;;  %v6368_v59 = vsel %vm2011_vm14, 1.0, %v7714_v50 }
 0x634   : > { %v1832_v60 = vadd.f32 %v7099_v55, %v1831_v19  ;;  %v2014_v19 = vpack.c.bf16 %v6368_v59, %v6368_v59 }
 0x635   : > { %v1852_v22 = vadd.f32 %v7101_v1, %v1851_v9 }
 0x636   : > { %v1836_v15 = vsel %vm1835_vm8, %v7099_v55, %v1832_v60  ;;  %v8447_v55 = vpop.f32.mrf.mxu2  ;;  %6369 = vmatmul.msk.bf16.vlgmr.msrb.gmra.mxu2 %vm651_vm1, %v2014_v19 }
 0x637   : > { %v1841_v24 = vsel %vm1838_vm9, %v1840_v14, %v1836_v15  ;;  %v1856_v42 = vsel %vm1855_vm12, %v7101_v1, %v1852_v22  ;;  %2084 = vmatpush.bf16.msrb.mxu2 %v7992_v52 }
 0x638   : > { %v1864_v10 = vmul.f32 %v1863_v11, %v1841_v24  ;;  %v1861_v5 = vsel %vm1858_vm13, %v1860_v6, %v1856_v42 }
 0x639   : > { %v1867_v38 = vsub.f32 1.0, %v1861_v5  ;;  %v1869_v54 = vmul.f32 %v1861_v5, %v8386_v57  ;;  %v1890_v57 = vpop.f32.mrf.mxu1 }
 0x63a   : > { %v1865_v31 = vadd.f32 %v1864_v10, %v8402_v51 }
 0x63b   : > { %2085 = vmatpush.bf16.msrb.mxu2 %v8004_v61 }
 0x63c   : > { %7102 = vtanh.f32 %v1865_v31 }
 0x63e   : > { %v1918_v62 = vpop.f32.mrf.mxu2 }
 0x63f   : > { %2086 = vmatpush.bf16.msrb.mxu2 %v8011_v8 }
 0x641   : > { %v1892_v1 = vpop.f32.mrf.mxu1 }
 0x642   : > { %v7103_v48 = vpop.eup %7102 }
 0x643   : > { %v1868_v53 = vmul.f32 %v7103_v48, %v1867_v38  ;;  %2087 = vmatpush.bf16.msrb.mxu2 %v8018_v16  ;;  %v7723_v48 = vmov 10  }
 0x644   : > { %7014 = vset.pattern.permute.xlu2 %v7723_v48 }
 0x645   : > { %v8431_v23 = vadd.f32 %v1869_v54, %v1868_v53  ;;  %v8468_v53 = vld [vmem:[%s7920_s5] sm:$0xff] }
 0x646   : > { %6370 = vmatmul.msk.bf16.vlgmr.msra.gmra.mxu2 %vm651_vm1, %v2014_v19  ;;  %2146 = vperm.xlu2 %7014, %v8468_v53  }
 0x647   : > { %v1920_v51 = vpack.c.bf16 %v8431_v23, %v8431_v23  ;;  %2088 = vmatpush.bf16.msrb.mxu2 %v8024_v25 }
 0x649   : > { %1929 = vmatmul.bf16.vlgmr.msra.gmra.mxu3 %v1920_v51  ;;  %1942 = vmatmul.bf16.vlgmr.msra.gmra.mxu0 %v1920_v51  ;;  %v1903_v63 = vpop.f32.mrf.mxu1 }
 0x64a   : > { %1955 = vmatmul.bf16.vlgmr.msra.gmra.mxu1 %v1920_v51  ;;  %2161 = vmatpush.bf16.msra.mxu3 %v7948_v12 }
 0x64b   : > { %2195 = vmatpush.bf16.msra.mxu1 %v7943_v4  ;;  %2187 = vmatpush.bf16.msra.mxu0 %v7960_v29 }
 0x64c   : > { %2089 = vmatpush.bf16.msrb.mxu2 %v8031_v32 }
 0x64e   : > { %2162 = vmatpush.bf16.msra.mxu3 %v7954_v20 }
 0x64f   : > { %2196 = vmatpush.bf16.msra.mxu1 %v7946_v7  ;;  %2188 = vmatpush.bf16.msra.mxu0 %v7995_v56 }
 0x650   : > { %2090 = vmatpush.bf16.msrb.mxu2 %v8034_v37 }
 0x651   : > { %v1905_v44 = vpop.f32.mrf.mxu1 }
 0x653   : > { %2197 = vmatpush.bf16.msra.mxu1 %v7951_v17 }
 0x654   : > { %2091 = vmatpush.bf16.msrb.mxu2 %v8038_v45 }
 0x657   : > { %2198 = vmatpush.bf16.msra.mxu1 %v7963_v30 }
 0x658   : > { %2208 = vmatpush.bf16.msra.mxu2 %v7956_v21 }
 0x659   : > { %6371 = vmatmul.msk.bf16.vlgmr.msrb.gmra.mxu3 %vm651_vm1, %v2014_v19 }
 0x65a   : > { %2174 = vmatpush.bf16.msrb.mxu3 %v7958_v26 }
 0x65b   : > { %2199 = vmatpush.bf16.msra.mxu1 %v7972_v36 }
 0x65c   : > { %2209 = vmatpush.bf16.msra.mxu2 %v7967_v33 }
 0x65e   : > { %2175 = vmatpush.bf16.msrb.mxu3 %v7990_v49 }
 0x65f   : > { %2200 = vmatpush.bf16.msra.mxu1 %v7978_v40 }
 0x660   : > { %2210 = vmatpush.bf16.msra.mxu2 %v7975_v39 }
 0x663   : > { %2201 = vmatpush.bf16.msra.mxu1 %v7982_v43 }
 0x664   : > { %2211 = vmatpush.bf16.msra.mxu2 %v7998_v58 }
 0x667   : > { %2202 = vmatpush.bf16.msra.mxu1 %v7985_v46 }
 0x668   : > { %2212 = vmatpush.bf16.msra.mxu2 %v8007_v2 }
 0x66c   : > { %2213 = vmatpush.bf16.msra.mxu2 %v8014_v13 }
 0x670   : > { %2214 = vmatpush.bf16.msra.mxu2 %v8021_v18 }
 0x674   : > { %2215 = vmatpush.bf16.msra.mxu2 %v8027_v27 }
 0x6c6   : > { %v1943_v3 = vpop.f32.mrf.mxu0 }
 0x6c7   : > { %v1980_v9 = vadd.f32 %v1943_v3, %v1903_v63  ;;  %v1956_v60 = vpop.f32.mrf.mxu1 }
 0x6c8   : > { %v2000_v3 = vadd.f32 %v8333_v28, %v1956_v60 }
 0x6c9   : > { %v6367_v14 = vmul.f32 -1.442695, %v1980_v9 }
 0x6cb   : > { %7104 = vpow2.f32 %v6367_v14 }
 0x6cc   : > { %v1930_v11 = vpop.f32.mrf.mxu3 }
 0x6cd   : > { %v1960_v15 = vadd.f32 %v1930_v11, %v1890_v57 }
 0x6ce   : > { %v1945_v24 = vpop.f32.mrf.mxu0 }
 0x6cf   : > { %v6366_v22 = vmul.f32 -1.442695, %v1960_v15  ;;  %v1958_v10 = vpop.f32.mrf.mxu1 }
 0x6d1   : > { %v7105_v35 = vpop.eup %7104  ;;  %7106 = vpow2.f32 %v6366_v22 }
 0x6d2   : > { %v1984_v34 = vadd.f32 1.0, %v7105_v35 }
 0x6d4   : > { %v1932_v31 = vpop.f32.mrf.mxu3  ;;  %7108 = vrcp.f32 %v1984_v34  ;;  %v1996_v15 = vand.u32 2147483648, %v1984_v34  ;;  %vm1990_vm5 = vweird.f32 %v1984_v34  ;;  %v1994_v22 = vand.u32 2147483647, %v1984_v34 }
 0x6d6   : > { %v1997_v31 = vor.u32 1.1754944e-38, %v1996_v15  ;;  %vm1995_vm7 = vcmp.eq.f32.partialorder %v1994_v22, 8.507059e+37 }
 0x6d7   : > { %v7107_v42 = vpop.eup %7106 }
 0x6d8   : > { %v1964_v6 = vadd.f32 1.0, %v7107_v42 }
 0x6da   : > { %7110 = vrcp.f32 %v1964_v6  ;;  %v7109_v5 = vpop.eup %7108  ;;  %v1976_v62 = vand.u32 2147483648, %v1964_v6  ;;  %v1974_v44 = vand.u32 2147483647, %v1964_v6  ;;  %vm1970_vm0 = vweird.f32 %v1964_v6 }
 0x6db   : > { %v1986_v38 = vmul.f32 %v7109_v5, %v1984_v34  ;;  %vm1991_vm4 = vweird.f32 %v7109_v5 }
 0x6dc   : > { %v1977_v19 = vor.u32 1.1754944e-38, %v1976_v62  ;;  %vm1975_vm3 = vcmp.eq.f32.partialorder %v1974_v44, 8.507059e+37  ;;  %vm1992_vm6 = vmor %vm1990_vm5, %vm1991_vm4  ;;  %v2147_v62 = vpop.permute.xlu2 %2146 }
 0x6dd   : > { %v1987_v57 = vsub.f32 1.0, %v1986_v38  ;;  %vm2148_vm8 = vcmp.eq.s32.totalorder %v2147_v62, %v8040_v47 }
 0x6df   : > { %v1988_v41 = vmul.f32 %v7109_v5, %v1987_v57 }
 0x6e0   : > { %v7111_v54 = vpop.eup %7110 }
 0x6e1   : > { %v1966_v51 = vmul.f32 %v7111_v54, %v1964_v6  ;;  %vm1971_vm15 = vweird.f32 %v7111_v54  ;;  %v1989_v14 = vadd.f32 %v7109_v5, %v1988_v41 }
 0x6e2   : > { %vm1972_vm2 = vmor %vm1970_vm0, %vm1971_vm15 }
 0x6e3   : > { %v1967_v1 = vsub.f32 1.0, %v1966_v51  ;;  %v1993_v35 = vsel %vm1992_vm6, %v7109_v5, %v1989_v14 }
 0x6e4   : > { %v1998_v60 = vsel %vm1995_vm7, %v1997_v31, %v1993_v35 }
 0x6e5   : > { %v1968_v63 = vmul.f32 %v7111_v54, %v1967_v1  ;;  %v2004_v42 = vsub.f32 1.0, %v1998_v60  ;;  %v2006_v48 = vmul.f32 %v1998_v60, %v8431_v23  ;;  %v2027_v23 = vpop.f32.mrf.mxu2 }
 0x6e7   : > { %v1969_v59 = vadd.f32 %v7111_v54, %v1968_v63  ;;  %v6374_v63 = vsel %vm2148_vm8, 1.0, %v7714_v50 }
 0x6e8   : > { %v2151_v44 = vpack.c.bf16 %v6374_v63, %v6374_v63 }
 0x6e9   : > { %v1973_v9 = vsel %vm1972_vm2, %v7111_v54, %v1969_v59 }
 0x6ea   : > { %v1978_v11 = vsel %vm1975_vm3, %v1977_v19, %v1973_v9  ;;  %6375 = vmatmul.msk.bf16.vlgmr.msra.gmra.mxu3 %vm651_vm1, %v2151_v44 }
 0x6eb   : > { %v2001_v24 = vmul.f32 %v2000_v3, %v1978_v11  ;;  %2221 = vmatpush.bf16.msra.mxu3 %v7992_v52 }
 0x6ed   : > { %v2002_v10 = vadd.f32 %v2001_v24, %v8447_v55  ;;  %v8495_v55 = vpop.f32.mrf.mxu3  ;;  %v2029_v5 = vpop.f32.mrf.mxu2 }
 0x6ef   : > { %7112 = vtanh.f32 %v2002_v10  ;;  %2222 = vmatpush.bf16.msra.mxu3 %v8004_v61 }
 0x6f3   : > { %2223 = vmatpush.bf16.msra.mxu3 %v8011_v8 }
 0x6f5   : > { %v7113_v6 = vpop.eup %7112  ;;  %v2055_v51 = vpop.f32.mrf.mxu3 }
 0x6f6   : > { %v2005_v38 = vmul.f32 %v7113_v6, %v2004_v42  ;;  %v2040_v57 = vpop.f32.mrf.mxu2  ;;  %v7724_v42 = vmov 11  }
 0x6f7   : > { %2224 = vmatpush.bf16.msra.mxu3 %v8018_v16  ;;  %7015 = vset.pattern.permute.xlu1 %v7724_v42 }
 0x6f8   : > { %v8479_v54 = vadd.f32 %v2006_v48, %v2005_v38  ;;  %2283 = vperm.xlu1 %7015, %v8468_v53  }
 0x6fa   : > { %v2057_v34 = vpack.c.bf16 %v8479_v54, %v8479_v54  ;;  %6376 = vmatmul.msk.bf16.vlgmr.msrb.gmra.mxu3 %vm651_vm1, %v2151_v44 }
 0x6fb   : > { %2225 = vmatpush.bf16.msra.mxu3 %v8024_v25 }
 0x6fc   : > { %2066 = vmatmul.bf16.vlgmr.msrb.gmra.mxu0 %v2057_v34  ;;  %2079 = vmatmul.bf16.vlgmr.msrb.gmra.mxu1 %v2057_v34 }
 0x6fd   : > { %2092 = vmatmul.bf16.vlgmr.msrb.gmra.mxu2 %v2057_v34  ;;  %2298 = vmatpush.bf16.msrb.mxu0 %v7948_v12 }
 0x6fe   : > { %2332 = vmatpush.bf16.msrb.mxu2 %v7943_v4  ;;  %2324 = vmatpush.bf16.msrb.mxu1 %v7960_v29  ;;  %v2042_v1 = vpop.f32.mrf.mxu2 }
 0x6ff   : > { %2226 = vmatpush.bf16.msra.mxu3 %v8031_v32 }
 0x701   : > { %2299 = vmatpush.bf16.msrb.mxu0 %v7954_v20 }
 0x702   : > { %2333 = vmatpush.bf16.msrb.mxu2 %v7946_v7  ;;  %2325 = vmatpush.bf16.msrb.mxu1 %v7995_v56 }
 0x703   : > { %2227 = vmatpush.bf16.msra.mxu3 %v8034_v37 }
 0x706   : > { %2334 = vmatpush.bf16.msrb.mxu2 %v7951_v17 }
 0x707   : > { %2228 = vmatpush.bf16.msra.mxu3 %v8038_v45 }
 0x70a   : > { %2335 = vmatpush.bf16.msrb.mxu2 %v7963_v30 }
 0x70b   : > { %2345 = vmatpush.bf16.msrb.mxu3 %v7956_v21 }
 0x70c   : > { %6377 = vmatmul.msk.bf16.vlgmr.msra.gmra.mxu0 %vm651_vm1, %v2151_v44 }
 0x70d   : > { %2311 = vmatpush.bf16.msra.mxu0 %v7958_v26 }
 0x70e   : > { %2336 = vmatpush.bf16.msrb.mxu2 %v7972_v36 }
 0x70f   : > { %2346 = vmatpush.bf16.msrb.mxu3 %v7967_v33 }
 0x711   : > { %2312 = vmatpush.bf16.msra.mxu0 %v7990_v49 }
 0x712   : > { %2337 = vmatpush.bf16.msrb.mxu2 %v7978_v40 }
 0x713   : > { %2347 = vmatpush.bf16.msrb.mxu3 %v7975_v39 }
 0x716   : > { %2338 = vmatpush.bf16.msrb.mxu2 %v7982_v43 }
 0x717   : > { %2348 = vmatpush.bf16.msrb.mxu3 %v7998_v58 }
 0x71a   : > { %2339 = vmatpush.bf16.msrb.mxu2 %v7985_v46 }
 0x71b   : > { %2349 = vmatpush.bf16.msrb.mxu3 %v8007_v2 }
 0x71f   : > { %2350 = vmatpush.bf16.msrb.mxu3 %v8014_v13 }
 0x723   : > { %2351 = vmatpush.bf16.msrb.mxu3 %v8021_v18 }
 0x727   : > { %2352 = vmatpush.bf16.msrb.mxu3 %v8027_v27 }
 0x779   : > { %v2067_v41 = vpop.f32.mrf.mxu0  ;;  %v2080_v59 = vpop.f32.mrf.mxu1 }
 0x77a   : > { %v2097_v19 = vadd.f32 %v2067_v41, %v2027_v23  ;;  %v2117_v3 = vadd.f32 %v2080_v59, %v2040_v57 }
 0x77c   : > { %v6372_v9 = vmul.f32 -1.442695, %v2097_v19  ;;  %v6373_v14 = vmul.f32 -1.442695, %v2117_v3 }
 0x77e   : > { %7114 = vpow2.f32 %v6372_v9 }
 0x77f   : > { %7116 = vpow2.f32 %v6373_v14 }
 0x780   : > { %v2093_v11 = vpop.f32.mrf.mxu2 }
 0x781   : > { %v2069_v15 = vpop.f32.mrf.mxu0  ;;  %v2082_v24 = vpop.f32.mrf.mxu1  ;;  %v2137_v59 = vadd.f32 %v8333_v28, %v2093_v11 }
 0x784   : > { %v7115_v22 = vpop.eup %7114 }
 0x785   : > { %v7117_v10 = vpop.eup %7116  ;;  %v2101_v35 = vadd.f32 1.0, %v7115_v22 }
 0x786   : > { %v2121_v31 = vadd.f32 1.0, %v7117_v10 }
 0x787   : > { %7118 = vrcp.f32 %v2101_v35  ;;  %v2113_v51 = vand.u32 2147483648, %v2101_v35  ;;  %v2111_v1 = vand.u32 2147483647, %v2101_v35  ;;  %vm2107_vm10 = vweird.f32 %v2101_v35 }
 0x788   : > { %7120 = vrcp.f32 %v2121_v31  ;;  %v2095_v60 = vpop.f32.mrf.mxu2  ;;  %v2133_v9 = vand.u32 2147483648, %v2121_v31  ;;  %vm2127_vm14 = vweird.f32 %v2121_v31  ;;  %v2131_v15 = vand.u32 2147483647, %v2121_v31 }
 0x789   : > { %v2114_v44 = vor.u32 1.1754944e-38, %v2113_v51  ;;  %vm2112_vm12 = vcmp.eq.f32.partialorder %v2111_v1, 8.507059e+37 }
 0x78a   : > { %v2134_v10 = vor.u32 1.1754944e-38, %v2133_v9  ;;  %vm2132_vm0 = vcmp.eq.f32.partialorder %v2131_v15, 8.507059e+37 }
 0x78d   : > { %v7119_v6 = vpop.eup %7118 }
 0x78e   : > { %v7121_v38 = vpop.eup %7120  ;;  %v2103_v48 = vmul.f32 %v7119_v6, %v2101_v35  ;;  %vm2108_vm9 = vweird.f32 %v7119_v6 }
 0x78f   : > { %v2123_v34 = vmul.f32 %v7121_v38, %v2121_v31  ;;  %vm2109_vm11 = vmor %vm2107_vm10, %vm2108_vm9  ;;  %vm2128_vm13 = vweird.f32 %v7121_v38 }
 0x790   : > { %v2104_v23 = vsub.f32 1.0, %v2103_v48  ;;  %vm2129_vm15 = vmor %vm2127_vm14, %vm2128_vm13 }
 0x791   : > { %v2124_v5 = vsub.f32 1.0, %v2123_v34 }
 0x792   : > { %v2105_v57 = vmul.f32 %v7119_v6, %v2104_v23 }
 0x793   : > { %v2125_v62 = vmul.f32 %v7121_v38, %v2124_v5  ;;  %v2284_v5 = vpop.permute.xlu1 %2283 }
 0x794   : > { %v2106_v63 = vadd.f32 %v7119_v6, %v2105_v57  ;;  %vm2285_vm2 = vcmp.eq.s32.totalorder %v2284_v5, %v8040_v47 }
 0x795   : > { %v2126_v19 = vadd.f32 %v7121_v38, %v2125_v62  ;;  %v6380_v51 = vsel %vm2285_vm2, 1.0, %v7714_v50 }
 0x796   : > { %v2110_v41 = vsel %vm2109_vm11, %v7119_v6, %v2106_v63  ;;  %v2288_v57 = vpack.c.bf16 %v6380_v51, %v6380_v51 }
 0x797   : > { %v2115_v3 = vsel %vm2112_vm12, %v2114_v44, %v2110_v41  ;;  %v2130_v22 = vsel %vm2129_vm15, %v7121_v38, %v2126_v19 }
 0x798   : > { %v2138_v14 = vmul.f32 %v2137_v59, %v2115_v3  ;;  %v2135_v35 = vsel %vm2132_vm0, %v2134_v10, %v2130_v22  ;;  %6381 = vmatmul.msk.bf16.vlgmr.msrb.gmra.mxu0 %vm651_vm1, %v2288_v57 }
 0x799   : > { %v2141_v28 = vsub.f32 1.0, %v2135_v35  ;;  %v2143_v42 = vmul.f32 %v2135_v35, %v8479_v54  ;;  %v8540_v54 = vpop.f32.mrf.mxu0  ;;  %2358 = vmatpush.bf16.msrb.mxu0 %v7992_v52  ;;  %v7725_v35 = vmov 12  }
 0x79a   : > { %v2139_v24 = vadd.f32 %v2138_v14, %v8495_v55  ;;  %v2164_v55 = vpop.f32.mrf.mxu3  ;;  %7016 = vset.pattern.permute.xlu2 %v7725_v35 }
 0x79b   : > { %2420 = vperm.xlu2 %7016, %v8468_v53  }
 0x79c   : > { %7122 = vtanh.f32 %v2139_v24 }
 0x79d   : > { %2359 = vmatpush.bf16.msrb.mxu0 %v8004_v61 }
 0x7a1   : > { %v2192_v38 = vpop.f32.mrf.mxu0  ;;  %2360 = vmatpush.bf16.msrb.mxu0 %v8011_v8 }
 0x7a2   : > { %v7123_v11 = vpop.eup %7122  ;;  %v2166_v48 = vpop.f32.mrf.mxu3 }
 0x7a3   : > { %v2142_v60 = vmul.f32 %v7123_v11, %v2141_v28 }
 0x7a5   : > { %v8524_v6 = vadd.f32 %v2143_v42, %v2142_v60  ;;  %2361 = vmatpush.bf16.msrb.mxu0 %v8018_v16 }
 0x7a7   : > { %v2194_v31 = vpack.c.bf16 %v8524_v6, %v8524_v6 }
 0x7a8   : > { %6382 = vmatmul.msk.bf16.vlgmr.msra.gmra.mxu0 %vm651_vm1, %v2288_v57 }
 0x7a9   : > { %2203 = vmatmul.bf16.vlgmr.msra.gmra.mxu1 %v2194_v31  ;;  %2216 = vmatmul.bf16.vlgmr.msra.gmra.mxu2 %v2194_v31 }
 0x7aa   : > { %2229 = vmatmul.bf16.vlgmr.msra.gmra.mxu3 %v2194_v31  ;;  %2435 = vmatpush.bf16.msra.mxu1 %v7948_v12  ;;  %v2177_v34 = vpop.f32.mrf.mxu3 }
 0x7ab   : > { %2469 = vmatpush.bf16.msra.mxu3 %v7943_v4  ;;  %2461 = vmatpush.bf16.msra.mxu2 %v7960_v29 }
 0x7ac   : > { %2362 = vmatpush.bf16.msrb.mxu0 %v8024_v25 }
 0x7ae   : > { %2436 = vmatpush.bf16.msra.mxu1 %v7954_v20 }
 0x7af   : > { %2470 = vmatpush.bf16.msra.mxu3 %v7946_v7  ;;  %2462 = vmatpush.bf16.msra.mxu2 %v7995_v56 }
 0x7b0   : > { %2363 = vmatpush.bf16.msrb.mxu0 %v8031_v32 }
 0x7b2   : > { %v2179_v23 = vpop.f32.mrf.mxu3 }
 0x7b3   : > { %2471 = vmatpush.bf16.msra.mxu3 %v7951_v17 }
 0x7b4   : > { %2364 = vmatpush.bf16.msrb.mxu0 %v8034_v37 }
 0x7b7   : > { %2472 = vmatpush.bf16.msra.mxu3 %v7963_v30 }
 0x7b8   : > { %2365 = vmatpush.bf16.msrb.mxu0 %v8038_v45 }
 0x7b9   : > { %6383 = vmatmul.msk.bf16.vlgmr.msrb.gmra.mxu1 %vm651_vm1, %v2288_v57  ;;  %v8565_v57 = vld [vmem:[%s10301_s3] ss:$0 sm:$0xff] }
 0x7ba   : > { %2448 = vmatpush.bf16.msrb.mxu1 %v7958_v26 }
 0x7bb   : > { %2473 = vmatpush.bf16.msra.mxu3 %v7972_v36 }
 0x7bc   : > { %2482 = vmatpush.bf16.msra.mxu0 %v7956_v21 }
 0x7be   : > { %2449 = vmatpush.bf16.msrb.mxu1 %v7990_v49 }
 0x7bf   : > { %2474 = vmatpush.bf16.msra.mxu3 %v7978_v40 }
 0x7c0   : > { %2483 = vmatpush.bf16.msra.mxu0 %v7967_v33 }
 0x7c3   : > { %2475 = vmatpush.bf16.msra.mxu3 %v7982_v43 }
 0x7c4   : > { %2484 = vmatpush.bf16.msra.mxu0 %v7975_v39 }
 0x7c7   : > { %2476 = vmatpush.bf16.msra.mxu3 %v7985_v46 }
 0x7c8   : > { %2485 = vmatpush.bf16.msra.mxu0 %v7998_v58 }
 0x7cc   : > { %2486 = vmatpush.bf16.msra.mxu0 %v8007_v2 }
 0x7d0   : > { %2487 = vmatpush.bf16.msra.mxu0 %v8014_v13 }
 0x7d4   : > { %2488 = vmatpush.bf16.msra.mxu0 %v8021_v18 }
 0x7d8   : > { %2489 = vmatpush.bf16.msra.mxu0 %v8027_v27 }
 0x826   : > { %v2204_v1 = vpop.f32.mrf.mxu1 }
 0x827   : > { %v2234_v62 = vadd.f32 %v2204_v1, %v2164_v55 }
 0x829   : > { %v6378_v63 = vmul.f32 -1.442695, %v2234_v62 }
 0x82b   : > { %7124 = vpow2.f32 %v6378_v63 }
 0x82c   : > { %v2217_v44 = vpop.f32.mrf.mxu2 }
 0x82d   : > { %v2254_v41 = vadd.f32 %v2217_v44, %v2177_v34  ;;  %v2230_v59 = vpop.f32.mrf.mxu3 }
 0x82e   : > { %v2206_v19 = vpop.f32.mrf.mxu1  ;;  %v2274_v1 = vadd.f32 %v8565_v57, %v2230_v59 }
 0x82f   : > { %v6379_v3 = vmul.f32 -1.442695, %v2254_v41 }
 0x831   : > { %v7125_v9 = vpop.eup %7124  ;;  %7126 = vpow2.f32 %v6379_v3 }
 0x832   : > { %v2238_v14 = vadd.f32 1.0, %v7125_v9 }
 0x834   : > { %7128 = vrcp.f32 %v2238_v14  ;;  %v2219_v15 = vpop.f32.mrf.mxu2  ;;  %v2250_v42 = vand.u32 2147483648, %v2238_v14  ;;  %v2248_v55 = vand.u32 2147483647, %v2238_v14  ;;  %vm2244_vm4 = vweird.f32 %v2238_v14 }
 0x835   : > { %v2232_v24 = vpop.f32.mrf.mxu3 }
 0x836   : > { %v2251_v23 = vor.u32 1.1754944e-38, %v2250_v42  ;;  %vm2249_vm6 = vcmp.eq.f32.partialorder %v2248_v55, 8.507059e+37 }
 0x837   : > { %v7127_v22 = vpop.eup %7126 }
 0x838   : > { %v2258_v10 = vadd.f32 1.0, %v7127_v22 }
 0x83a   : > { %v7129_v28 = vpop.eup %7128  ;;  %7130 = vrcp.f32 %v2258_v10  ;;  %v2270_v44 = vand.u32 2147483648, %v2258_v10  ;;  %v2268_v19 = vand.u32 2147483647, %v2258_v10  ;;  %vm2264_vm8 = vweird.f32 %v2258_v10 }
 0x83b   : > { %v2240_v11 = vmul.f32 %v7129_v28, %v2238_v14  ;;  %vm2245_vm3 = vweird.f32 %v7129_v28 }
 0x83c   : > { %vm2246_vm5 = vmor %vm2244_vm4, %vm2245_vm3  ;;  %v2271_v14 = vor.u32 1.1754944e-38, %v2270_v44  ;;  %vm2269_vm10 = vcmp.eq.f32.partialorder %v2268_v19, 8.507059e+37 }
 0x83d   : > { %v2241_v60 = vsub.f32 1.0, %v2240_v11  ;;  %v8590_v11 = vpop.f32.mrf.mxu1 }
 0x83f   : > { %v2242_v31 = vmul.f32 %v7129_v28, %v2241_v60 }
 0x840   : > { %v7131_v38 = vpop.eup %7130 }
 0x841   : > { %v2260_v48 = vmul.f32 %v7131_v38, %v2258_v10  ;;  %v2243_v34 = vadd.f32 %v7129_v28, %v2242_v31  ;;  %vm2265_vm7 = vweird.f32 %v7131_v38 }
 0x842   : > { %vm2266_vm9 = vmor %vm2264_vm8, %vm2265_vm7 }
 0x843   : > { %v2261_v5 = vsub.f32 1.0, %v2260_v48  ;;  %v2247_v51 = vsel %vm2246_vm5, %v7129_v28, %v2243_v34 }
 0x844   : > { %v2252_v62 = vsel %vm2249_vm6, %v2251_v23, %v2247_v51 }
 0x845   : > { %v2262_v63 = vmul.f32 %v7131_v38, %v2261_v5  ;;  %v2275_v41 = vmul.f32 %v2274_v1, %v2252_v62  ;;  %v2329_v42 = vpop.f32.mrf.mxu1 }
 0x847   : > { %v2263_v3 = vadd.f32 %v7131_v38, %v2262_v63  ;;  %v2276_v9 = vadd.f32 %v2275_v41, %v8540_v54 }
 0x849   : > { %v2267_v15 = vsel %vm2266_vm9, %v7131_v38, %v2263_v3  ;;  %7132 = vtanh.f32 %v2276_v9  ;;  %v2421_v38 = vpop.permute.xlu2 %2420 }
 0x84a   : > { %v2272_v59 = vsel %vm2269_vm10, %v2271_v14, %v2267_v15  ;;  %vm2422_vm11 = vcmp.eq.s32.totalorder %v2421_v38, %v8040_v47 }
 0x84b   : > { %v2278_v24 = vsub.f32 1.0, %v2272_v59  ;;  %v2280_v28 = vmul.f32 %v2272_v59, %v8524_v6  ;;  %v2301_v6 = vpop.f32.mrf.mxu0  ;;  %v6386_v48 = vsel %vm2422_vm11, 1.0, %v7714_v50 }
 0x84c   : > { %v2425_v34 = vpack.c.bf16 %v6386_v48, %v6386_v48 }
 0x84e   : > { %6387 = vmatmul.msk.bf16.vlgmr.msra.gmra.mxu1 %vm651_vm1, %v2425_v34 }
 0x84f   : > { %v7133_v22 = vpop.eup %7132  ;;  %2495 = vmatpush.bf16.msra.mxu1 %v7992_v52 }
 0x850   : > { %v2279_v35 = vmul.f32 %v7133_v22, %v2278_v24  ;;  %v7726_v24 = vmov 13  }
 0x851   : > { %7017 = vset.pattern.permute.xlu0 %v7726_v24 }
 0x852   : > { %v8574_v10 = vadd.f32 %v2280_v28, %v2279_v35  ;;  %2557 = vperm.xlu0 %7017, %v8468_v53  }
 0x853   : > { %v2303_v60 = vpop.f32.mrf.mxu0  ;;  %2496 = vmatpush.bf16.msra.mxu1 %v8004_v61 }
 0x854   : > { %v2331_v54 = vpack.c.bf16 %v8574_v10, %v8574_v10 }
 0x856   : > { %2340 = vmatmul.bf16.vlgmr.msrb.gmra.mxu2 %v2331_v54  ;;  %2353 = vmatmul.bf16.vlgmr.msrb.gmra.mxu3 %v2331_v54 }
 0x857   : > { %2366 = vmatmul.bf16.vlgmr.msrb.gmra.mxu0 %v2331_v54  ;;  %2572 = vmatpush.bf16.msrb.mxu2 %v7948_v12 }
 0x858   : > { %2606 = vmatpush.bf16.msrb.mxu0 %v7943_v4  ;;  %2598 = vmatpush.bf16.msrb.mxu3 %v7960_v29 }
 0x859   : > { %2497 = vmatpush.bf16.msra.mxu1 %v8011_v8 }
 0x85b   : > { %2573 = vmatpush.bf16.msrb.mxu2 %v7954_v20  ;;  %v2314_v31 = vpop.f32.mrf.mxu0 }
 0x85c   : > { %2607 = vmatpush.bf16.msrb.mxu0 %v7946_v7  ;;  %2599 = vmatpush.bf16.msrb.mxu3 %v7995_v56 }
 0x85d   : > { %2498 = vmatpush.bf16.msra.mxu1 %v8018_v16 }
 0x85e   : > { %6388 = vmatmul.msk.bf16.vlgmr.msrb.gmra.mxu1 %vm651_vm1, %v2425_v34 }
 0x860   : > { %2608 = vmatpush.bf16.msrb.mxu0 %v7951_v17 }
 0x861   : > { %2499 = vmatpush.bf16.msra.mxu1 %v8024_v25 }
 0x863   : > { %v2316_v55 = vpop.f32.mrf.mxu0 }
 0x864   : > { %2609 = vmatpush.bf16.msrb.mxu0 %v7963_v30 }
 0x865   : > { %2500 = vmatpush.bf16.msra.mxu1 %v8031_v32 }
 0x866   : > { %6389 = vmatmul.msk.bf16.vlgmr.msra.gmra.mxu2 %vm651_vm1, %v2425_v34 }
 0x867   : > { %2585 = vmatpush.bf16.msra.mxu2 %v7958_v26 }
 0x868   : > { %2610 = vmatpush.bf16.msrb.mxu0 %v7972_v36 }
 0x869   : > { %2501 = vmatpush.bf16.msra.mxu1 %v8034_v37 }
 0x86b   : > { %2586 = vmatpush.bf16.msra.mxu2 %v7990_v49 }
 0x86c   : > { %2611 = vmatpush.bf16.msrb.mxu0 %v7978_v40 }
 0x86d   : > { %2502 = vmatpush.bf16.msra.mxu1 %v8038_v45 }
 0x870   : > { %2612 = vmatpush.bf16.msrb.mxu0 %v7982_v43 }
 0x871   : > { %2619 = vmatpush.bf16.msrb.mxu1 %v7956_v21 }
 0x874   : > { %2613 = vmatpush.bf16.msrb.mxu0 %v7985_v46 }
 0x875   : > { %2620 = vmatpush.bf16.msrb.mxu1 %v7967_v33 }
 0x879   : > { %2621 = vmatpush.bf16.msrb.mxu1 %v7975_v39 }
 0x87d   : > { %2622 = vmatpush.bf16.msrb.mxu1 %v7998_v58 }
 0x881   : > { %2623 = vmatpush.bf16.msrb.mxu1 %v8007_v2 }
 0x885   : > { %2624 = vmatpush.bf16.msrb.mxu1 %v8014_v13 }
 0x889   : > { %2625 = vmatpush.bf16.msrb.mxu1 %v8021_v18 }
 0x88d   : > { %2626 = vmatpush.bf16.msrb.mxu1 %v8027_v27 }
 0x8d4   : > { %v2367_v23 = vpop.f32.mrf.mxu0 }
 0x8d9   : > { %v2341_v5 = vpop.f32.mrf.mxu2  ;;  %v2354_v51 = vpop.f32.mrf.mxu3 }
 0x8da   : > { %v2371_v1 = vadd.f32 %v2341_v5, %v2301_v6  ;;  %v2391_v62 = vadd.f32 %v2354_v51, %v2314_v31  ;;  %v2411_v5 = vadd.f32 %v8565_v57, %v2367_v23 }
 0x8dc   : > { %v6384_v63 = vmul.f32 -1.442695, %v2371_v1  ;;  %v6385_v44 = vmul.f32 -1.442695, %v2391_v62  ;;  %v2369_v41 = vpop.f32.mrf.mxu0 }
 0x8de   : > { %7134 = vpow2.f32 %v6384_v63 }
 0x8df   : > { %7136 = vpow2.f32 %v6385_v44 }
 0x8e1   : > { %v2343_v19 = vpop.f32.mrf.mxu2  ;;  %v2356_v3 = vpop.f32.mrf.mxu3 }
 0x8e4   : > { %v7135_v9 = vpop.eup %7134 }
 0x8e5   : > { %v7137_v14 = vpop.eup %7136  ;;  %v2375_v15 = vadd.f32 1.0, %v7135_v9 }
 0x8e6   : > { %v2395_v59 = vadd.f32 1.0, %v7137_v14 }
 0x8e7   : > { %7138 = vrcp.f32 %v2375_v15  ;;  %v2387_v60 = vand.u32 2147483648, %v2375_v15  ;;  %v2385_v55 = vand.u32 2147483647, %v2375_v15  ;;  %vm2381_vm13 = vweird.f32 %v2375_v15 }
 0x8e8   : > { %7140 = vrcp.f32 %v2395_v59  ;;  %v2407_v44 = vand.u32 2147483648, %v2395_v59  ;;  %vm2401_vm2 = vweird.f32 %v2395_v59  ;;  %v2405_v41 = vand.u32 2147483647, %v2395_v59 }
 0x8e9   : > { %v2388_v34 = vor.u32 1.1754944e-38, %v2387_v60  ;;  %vm2386_vm15 = vcmp.eq.f32.partialorder %v2385_v55, 8.507059e+37 }
 0x8ea   : > { %v2408_v9 = vor.u32 1.1754944e-38, %v2407_v44  ;;  %vm2406_vm4 = vcmp.eq.f32.partialorder %v2405_v41, 8.507059e+37 }
 0x8ed   : > { %v7139_v22 = vpop.eup %7138 }
 0x8ee   : > { %v7141_v35 = vpop.eup %7140  ;;  %v2377_v28 = vmul.f32 %v7139_v22, %v2375_v15  ;;  %vm2382_vm12 = vweird.f32 %v7139_v22 }
 0x8ef   : > { %v2397_v54 = vmul.f32 %v7141_v35, %v2395_v59  ;;  %vm2383_vm14 = vmor %vm2381_vm13, %vm2382_vm12  ;;  %vm2402_vm0 = vweird.f32 %v7141_v35 }
 0x8f0   : > { %v2378_v6 = vsub.f32 1.0, %v2377_v28  ;;  %vm2403_vm3 = vmor %vm2401_vm2, %vm2402_vm0 }
 0x8f1   : > { %v2398_v42 = vsub.f32 1.0, %v2397_v54 }
 0x8f2   : > { %v2379_v31 = vmul.f32 %v7139_v22, %v2378_v6 }
 0x8f3   : > { %v2399_v38 = vmul.f32 %v7141_v35, %v2398_v42  ;;  %v2558_v42 = vpop.permute.xlu0 %2557 }
 0x8f4   : > { %v2380_v48 = vadd.f32 %v7139_v22, %v2379_v31  ;;  %vm2559_vm5 = vcmp.eq.s32.totalorder %v2558_v42, %v8040_v47 }
 0x8f5   : > { %v2400_v62 = vadd.f32 %v7141_v35, %v2399_v38  ;;  %v6392_v31 = vsel %vm2559_vm5, 1.0, %v7714_v50 }
 0x8f6   : > { %v2384_v51 = vsel %vm2383_vm14, %v7139_v22, %v2380_v48  ;;  %v2562_v55 = vpack.c.bf16 %v6392_v31, %v6392_v31 }
 0x8f7   : > { %v2389_v1 = vsel %vm2386_vm15, %v2388_v34, %v2384_v51  ;;  %v2404_v3 = vsel %vm2403_vm3, %v7141_v35, %v2400_v62  ;;  %v8635_v35 = vpop.f32.mrf.mxu2 }
 0x8f8   : > { %v2412_v63 = vmul.f32 %v2411_v5, %v2389_v1  ;;  %v2409_v23 = vsel %vm2406_vm4, %v2408_v9, %v2404_v3  ;;  %6393 = vmatmul.msk.bf16.vlgmr.msrb.gmra.mxu2 %vm651_vm1, %v2562_v55 }
 0x8f9   : > { %v2415_v14 = vsub.f32 1.0, %v2409_v23  ;;  %v2417_v22 = vmul.f32 %v2409_v23, %v8574_v10  ;;  %v2438_v10 = vpop.f32.mrf.mxu1  ;;  %2632 = vmatpush.bf16.msrb.mxu2 %v7992_v52 }
 0x8fa   : > { %v2413_v19 = vadd.f32 %v2412_v63, %v8590_v11 }
 0x8fc   : > { %7142 = vtanh.f32 %v2413_v19 }
 0x8fd   : > { %2633 = vmatpush.bf16.msrb.mxu2 %v8004_v61 }
 0x8ff   : > { %v2466_v54 = vpop.f32.mrf.mxu2 }
 0x901   : > { %v2440_v28 = vpop.f32.mrf.mxu1  ;;  %2634 = vmatpush.bf16.msrb.mxu2 %v8011_v8 }
 0x902   : > { %v7143_v15 = vpop.eup %7142 }
 0x903   : > { %v2416_v24 = vmul.f32 %v7143_v15, %v2415_v14 }
 0x905   : > { %v8619_v59 = vadd.f32 %v2417_v22, %v2416_v24  ;;  %2635 = vmatpush.bf16.msrb.mxu2 %v8018_v16  ;;  %v7727_v24 = vmov 14  }
 0x906   : > { %7018 = vset.pattern.permute.xlu1 %v7727_v24 }
 0x907   : > { %v2468_v11 = vpack.c.bf16 %v8619_v59, %v8619_v59  ;;  %2694 = vperm.xlu1 %7018, %v8468_v53  }
 0x908   : > { %6394 = vmatmul.msk.bf16.vlgmr.msra.gmra.mxu2 %vm651_vm1, %v2562_v55 }
 0x909   : > { %2477 = vmatmul.bf16.vlgmr.msra.gmra.mxu3 %v2468_v11  ;;  %2490 = vmatmul.bf16.vlgmr.msra.gmra.mxu0 %v2468_v11  ;;  %v2451_v6 = vpop.f32.mrf.mxu1 }
 0x90a   : > { %2503 = vmatmul.bf16.vlgmr.msra.gmra.mxu1 %v2468_v11  ;;  %2709 = vmatpush.bf16.msra.mxu3 %v7948_v12 }
 0x90b   : > { %2743 = vmatpush.bf16.msra.mxu1 %v7943_v4  ;;  %2735 = vmatpush.bf16.msra.mxu0 %v7960_v29 }
 0x90c   : > { %2636 = vmatpush.bf16.msrb.mxu2 %v8024_v25 }
 0x90e   : > { %2710 = vmatpush.bf16.msra.mxu3 %v7954_v20 }
 0x90f   : > { %2744 = vmatpush.bf16.msra.mxu1 %v7946_v7  ;;  %2736 = vmatpush.bf16.msra.mxu0 %v7995_v56 }
 0x910   : > { %2637 = vmatpush.bf16.msrb.mxu2 %v8031_v32 }
 0x911   : > { %v2453_v60 = vpop.f32.mrf.mxu1 }
 0x913   : > { %2745 = vmatpush.bf16.msra.mxu1 %v7951_v17 }
 0x914   : > { %2638 = vmatpush.bf16.msrb.mxu2 %v8034_v37 }
 0x917   : > { %2746 = vmatpush.bf16.msra.mxu1 %v7963_v30 }
 0x918   : > { %2639 = vmatpush.bf16.msrb.mxu2 %v8038_v45 }
 0x919   : > { %6395 = vmatmul.msk.bf16.vlgmr.msrb.gmra.mxu3 %vm651_vm1, %v2562_v55 }
 0x91a   : > { %2722 = vmatpush.bf16.msrb.mxu3 %v7958_v26 }
 0x91b   : > { %2747 = vmatpush.bf16.msra.mxu1 %v7972_v36 }
 0x91c   : > { %2756 = vmatpush.bf16.msra.mxu2 %v7956_v21 }
 0x91e   : > { %2723 = vmatpush.bf16.msrb.mxu3 %v7990_v49 }
 0x91f   : > { %2748 = vmatpush.bf16.msra.mxu1 %v7978_v40 }
 0x920   : > { %2757 = vmatpush.bf16.msra.mxu2 %v7967_v33 }
 0x923   : > { %2749 = vmatpush.bf16.msra.mxu1 %v7982_v43 }
 0x924   : > { %2758 = vmatpush.bf16.msra.mxu2 %v7975_v39 }
 0x927   : > { %2750 = vmatpush.bf16.msra.mxu1 %v7985_v46 }
 0x928   : > { %2759 = vmatpush.bf16.msra.mxu2 %v7998_v58 }
 0x92c   : > { %2760 = vmatpush.bf16.msra.mxu2 %v8007_v2 }
 0x930   : > { %2761 = vmatpush.bf16.msra.mxu2 %v8014_v13 }
 0x934   : > { %2762 = vmatpush.bf16.msra.mxu2 %v8021_v18 }
 0x938   : > { %2763 = vmatpush.bf16.msra.mxu2 %v8027_v27 }
 0x986   : > { %v2491_v38 = vpop.f32.mrf.mxu0 }
 0x987   : > { %v2528_v48 = vadd.f32 %v2491_v38, %v2451_v6  ;;  %v2504_v34 = vpop.f32.mrf.mxu1 }
 0x988   : > { %v2548_v38 = vadd.f32 %v8565_v57, %v2504_v34 }
 0x989   : > { %v6391_v5 = vmul.f32 -1.442695, %v2528_v48 }
 0x98b   : > { %7144 = vpow2.f32 %v6391_v5 }
 0x98c   : > { %v2478_v51 = vpop.f32.mrf.mxu3 }
 0x98d   : > { %v2508_v1 = vadd.f32 %v2478_v51, %v2438_v10 }
 0x98e   : > { %v2493_v62 = vpop.f32.mrf.mxu0 }
 0x98f   : > { %v6390_v63 = vmul.f32 -1.442695, %v2508_v1  ;;  %v2506_v44 = vpop.f32.mrf.mxu1 }
 0x991   : > { %v7145_v41 = vpop.eup %7144  ;;  %7146 = vpow2.f32 %v6390_v63 }
 0x992   : > { %v2532_v19 = vadd.f32 1.0, %v7145_v41 }
 0x994   : > { %v2480_v3 = vpop.f32.mrf.mxu3  ;;  %7148 = vrcp.f32 %v2532_v19  ;;  %v2544_v51 = vand.u32 2147483648, %v2532_v19  ;;  %vm2538_vm11 = vweird.f32 %v2532_v19  ;;  %v2542_v62 = vand.u32 2147483647, %v2532_v19 }
 0x996   : > { %v2545_v41 = vor.u32 1.1754944e-38, %v2544_v51  ;;  %vm2543_vm13 = vcmp.eq.f32.partialorder %v2542_v62, 8.507059e+37 }
 0x997   : > { %v7147_v9 = vpop.eup %7146 }
 0x998   : > { %v2512_v23 = vadd.f32 1.0, %v7147_v9 }
 0x99a   : > { %7150 = vrcp.f32 %v2512_v23  ;;  %v7149_v14 = vpop.eup %7148  ;;  %v2524_v54 = vand.u32 2147483648, %v2512_v23  ;;  %v2522_v60 = vand.u32 2147483647, %v2512_v23  ;;  %vm2518_vm7 = vweird.f32 %v2512_v23 }
 0x99b   : > { %v2534_v15 = vmul.f32 %v7149_v14, %v2532_v19  ;;  %vm2539_vm10 = vweird.f32 %v7149_v14 }
 0x99c   : > { %v2525_v55 = vor.u32 1.1754944e-38, %v2524_v54  ;;  %vm2523_vm9 = vcmp.eq.f32.partialorder %v2522_v60, 8.507059e+37  ;;  %vm2540_vm12 = vmor %vm2538_vm11, %vm2539_vm10  ;;  %v7728_v60 = vmov 15  }
 0x99d   : > { %v2535_v10 = vsub.f32 1.0, %v2534_v15  ;;  %7019 = vset.pattern.permute.xlu2 %v7728_v60  ;;  %7020 = vset.pattern.permute.xlu0 %v7728_v60 }
 0x99f   : > { %v2536_v42 = vmul.f32 %v7149_v14, %v2535_v10 }
 0x9a0   : > { %v7151_v22 = vpop.eup %7150 }
 0x9a1   : > { %v2514_v11 = vmul.f32 %v7151_v22, %v2512_v23  ;;  %vm2519_vm6 = vweird.f32 %v7151_v22  ;;  %v2537_v48 = vadd.f32 %v7149_v14, %v2536_v42  ;;  %v7348_v42 = vld [vmem:[%s7920_s5] sm:$0xff]  ;;  %s5998_s5 = sshll.u32 %s5994_s4, 4  ;;  %s10246_s5 = int_to_ptr.hbm [resolvable:$true] %s5998_s5 }
 0x9a2   : > { %vm2520_vm8 = vmor %vm2518_vm7, %vm2519_vm6  ;;  %2831 = vperm.xlu2 %7019, %v7348_v42  }
 0x9a3   : > { %v2515_v28 = vsub.f32 1.0, %v2514_v11  ;;  %v2541_v44 = vsel %vm2540_vm12, %v7149_v14, %v2537_v48 }
 0x9a4   : > { %v2546_v34 = vsel %vm2543_vm13, %v2545_v41, %v2541_v44 }
 0x9a5   : > { %v2516_v6 = vmul.f32 %v7151_v22, %v2515_v28  ;;  %v2552_v3 = vsub.f32 1.0, %v2546_v34  ;;  %v2554_v15 = vmul.f32 %v2546_v34, %v8619_v59 }
 0x9a7   : > { %v2517_v31 = vadd.f32 %v7151_v22, %v2516_v6 }
 0x9a9   : > { %v2521_v53 = vsel %vm2520_vm8, %v7151_v22, %v2517_v31 }
 0x9aa   : > { %v2526_v5 = vsel %vm2523_vm9, %v2525_v55, %v2521_v53 }
 0x9ab   : > { %v2549_v1 = vmul.f32 %v2548_v38, %v2526_v5 }
 0x9ad   : > { %v2550_v63 = vadd.f32 %v2549_v1, %v8635_v35 }
 0x9af   : > { %7152 = vtanh.f32 %v2550_v63 }
 0x9b5   : > { %v7153_v9 = vpop.eup %7152 }
 0x9b6   : > { %v2553_v23 = vmul.f32 %v7153_v9, %v2552_v3 }
 0x9b8   : > { %v8664_v24 = vadd.f32 %v2554_v15, %v2553_v23 }
 0x9ba   : > { %v2605_v19 = vpack.c.bf16 %v8664_v24, %v8664_v24 }
 0x9bc   : > { %2614 = vmatmul.bf16.vlgmr.msrb.gmra.mxu0 %v2605_v19  ;;  %2627 = vmatmul.bf16.vlgmr.msrb.gmra.mxu1 %v2605_v19 }
 0x9bd   : > { %2640 = vmatmul.bf16.vlgmr.msrb.gmra.mxu2 %v2605_v19  ;;  %2846 = vmatpush.bf16.msrb.mxu0 %v7948_v12  ;;  %v8680_v12 = vpop.f32.mrf.mxu3 }
 0x9be   : > { %2880 = vmatpush.bf16.msrb.mxu2 %v7943_v4  ;;  %2872 = vmatpush.bf16.msrb.mxu1 %v7960_v29  ;;  %v2575_v4 = vpop.f32.mrf.mxu2 }
 0x9c1   : > { %2847 = vmatpush.bf16.msrb.mxu0 %v7954_v20 }
 0x9c2   : > { %2881 = vmatpush.bf16.msrb.mxu2 %v7946_v7  ;;  %2873 = vmatpush.bf16.msrb.mxu1 %v7995_v56  ;;  %v2695_v56 = vpop.permute.xlu1 %2694 }
 0x9c3   : > { %vm2696_vm14 = vcmp.eq.s32.totalorder %v2695_v56, %v8040_v47 }
 0x9c5   : > { %v2603_v29 = vpop.f32.mrf.mxu3 }
 0x9c6   : > { %2882 = vmatpush.bf16.msrb.mxu2 %v7951_v17  ;;  %v2577_v20 = vpop.f32.mrf.mxu2  ;;  %v6398_v17 = vsel %vm2696_vm14, 1.0, %v7714_v50 }
 0x9ca   : > { %2883 = vmatpush.bf16.msrb.mxu2 %v7963_v30  ;;  %v2699_v30 = vpack.c.bf16 %v6398_v17, %v6398_v17 }
 0x9cc   : > { %6399 = vmatmul.msk.bf16.vlgmr.msra.gmra.mxu3 %vm651_vm1, %v2699_v30  ;;  %6401 = vmatmul.msk.bf16.vlgmr.msra.gmra.mxu0 %vm651_vm1, %v2699_v30 }
 0x9cd   : > { %2769 = vmatpush.bf16.msra.mxu3 %v7992_v52  ;;  %2859 = vmatpush.bf16.msra.mxu0 %v7958_v26 }
 0x9ce   : > { %2884 = vmatpush.bf16.msrb.mxu2 %v7972_v36  ;;  %v2588_v7 = vpop.f32.mrf.mxu2 }
 0x9d1   : > { %2770 = vmatpush.bf16.msra.mxu3 %v8004_v61  ;;  %2860 = vmatpush.bf16.msra.mxu0 %v7990_v49 }
 0x9d2   : > { %2885 = vmatpush.bf16.msrb.mxu2 %v7978_v40 }
 0x9d5   : > { %2771 = vmatpush.bf16.msra.mxu3 %v8011_v8 }
 0x9d6   : > { %2886 = vmatpush.bf16.msrb.mxu2 %v7982_v43  ;;  %v2590_v59 = vpop.f32.mrf.mxu2 }
 0x9d9   : > { %2772 = vmatpush.bf16.msra.mxu3 %v8018_v16 }
 0x9da   : > { %2887 = vmatpush.bf16.msrb.mxu2 %v7985_v46 }
 0x9dc   : > { %6400 = vmatmul.msk.bf16.vlgmr.msrb.gmra.mxu3 %vm651_vm1, %v2699_v30 }
 0x9dd   : > { %2773 = vmatpush.bf16.msra.mxu3 %v8024_v25 }
 0x9e1   : > { %2774 = vmatpush.bf16.msra.mxu3 %v8031_v32 }
 0x9e5   : > { %2775 = vmatpush.bf16.msra.mxu3 %v8034_v37 }
 0x9e9   : > { %2776 = vmatpush.bf16.msra.mxu3 %v8038_v45 }
 0x9ed   : > { %2893 = vmatpush.bf16.msrb.mxu3 %v7956_v21 }
 0x9f1   : > { %2894 = vmatpush.bf16.msrb.mxu3 %v7967_v33 }
 0x9f5   : > { %2895 = vmatpush.bf16.msrb.mxu3 %v7975_v39 }
 0x9f9   : > { %2896 = vmatpush.bf16.msrb.mxu3 %v7998_v58 }
 0x9fd   : > { %2897 = vmatpush.bf16.msrb.mxu3 %v8007_v2 }
 0xa01   : > { %2898 = vmatpush.bf16.msrb.mxu3 %v8014_v13 }
 0xa05   : > { %2899 = vmatpush.bf16.msrb.mxu3 %v8021_v18 }
 0xa09   : > { %2900 = vmatpush.bf16.msrb.mxu3 %v8027_v27 }
 0xa39   : > { %v2615_v36 = vpop.f32.mrf.mxu0  ;;  %v2628_v40 = vpop.f32.mrf.mxu1 }
 0xa3a   : > { %v2645_v43 = vadd.f32 %v2615_v36, %v2575_v4  ;;  %v2665_v46 = vadd.f32 %v2628_v40, %v2588_v7  ;;  %v2832_v36 = vpop.permute.xlu2 %2831 }
 0xa3b   : > { %vm2833_vm8 = vcmp.eq.s32.totalorder %v2832_v36, %v8040_v47 }
 0xa3c   : > { %v6396_v35 = vmul.f32 -1.442695, %v2645_v43  ;;  %v6397_v26 = vmul.f32 -1.442695, %v2665_v46 }
 0xa3e   : > { %7154 = vpow2.f32 %v6396_v35 }
 0xa3f   : > { %7156 = vpow2.f32 %v6397_v26 }
 0xa40   : > { %v2641_v49 = vpop.f32.mrf.mxu2 }
 0xa41   : > { %v2617_v14 = vpop.f32.mrf.mxu0  ;;  %v2630_v22 = vpop.f32.mrf.mxu1  ;;  %v2685_v44 = vadd.f32 %v8565_v57, %v2641_v49 }
 0xa44   : > { %v7155_v11 = vpop.eup %7154 }
 0xa45   : > { %v7157_v10 = vpop.eup %7156  ;;  %v2649_v28 = vadd.f32 1.0, %v7155_v11 }
 0xa46   : > { %v2669_v54 = vadd.f32 1.0, %v7157_v10 }
 0xa47   : > { %7158 = vrcp.f32 %v2649_v28  ;;  %v2661_v5 = vand.u32 2147483648, %v2649_v28  ;;  %v2659_v33 = vand.u32 2147483647, %v2649_v28  ;;  %vm2655_vm0 = vweird.f32 %v2649_v28 }
 0xa48   : > { %7160 = vrcp.f32 %v2669_v54  ;;  %v2643_v6 = vpop.f32.mrf.mxu2  ;;  %v2681_v34 = vand.u32 2147483648, %v2669_v54  ;;  %vm2675_vm5 = vweird.f32 %v2669_v54  ;;  %v2679_v9 = vand.u32 2147483647, %v2669_v54 }
 0xa49   : > { %v2662_v39 = vor.u32 1.1754944e-38, %v2661_v5  ;;  %vm2660_vm3 = vcmp.eq.f32.partialorder %v2659_v33, 8.507059e+37  ;;  %v8713_v18 = vpop.f32.mrf.mxu0 }
 0xa4a   : > { %v2682_v15 = vor.u32 1.1754944e-38, %v2681_v34  ;;  %vm2680_vm7 = vcmp.eq.f32.partialorder %v2679_v9, 8.507059e+37 }
 0xa4d   : > { %v7159_v31 = vpop.eup %7158 }
 0xa4e   : > { %v7161_v55 = vpop.eup %7160  ;;  %v2651_v38 = vmul.f32 %v7159_v31, %v2649_v28  ;;  %vm2656_vm15 = vweird.f32 %v7159_v31 }
 0xa4f   : > { %v2671_v21 = vmul.f32 %v7161_v55, %v2669_v54  ;;  %vm2657_vm2 = vmor %vm2655_vm0, %vm2656_vm15  ;;  %vm2676_vm4 = vweird.f32 %v7161_v55  ;;  %vm2967_vm0 = vcmp.eq.s32.totalorder %v8040_v47, 2  ;;  %v6816_v47 = vld [vmem:[#allocation8 + $0x10] sm:$0xf0] }
 0xa50   : > { %v2652_v53 = vsub.f32 1.0, %v2651_v38  ;;  %vm2677_vm6 = vmor %vm2675_vm5, %vm2676_vm4 }
 0xa51   : > { %v2672_v48 = vsub.f32 1.0, %v2671_v21  ;;  %v2740_v56 = vpop.f32.mrf.mxu0 }
 0xa52   : > { %v2653_v51 = vmul.f32 %v7159_v31, %v2652_v53 }
 0xa53   : > { %v2673_v1 = vmul.f32 %v7161_v55, %v2672_v48 }
 0xa54   : > { %v2654_v62 = vadd.f32 %v7159_v31, %v2653_v51 }
 0xa55   : > { %v2674_v41 = vadd.f32 %v7161_v55, %v2673_v1 }
 0xa56   : > { %v2658_v63 = vsel %vm2657_vm2, %v7159_v31, %v2654_v62  ;;  %vm8831_vm2 = vmpackc.low %vm2967_vm0, %vm2967_vm0 }
 0xa57   : > { %v2663_v58 = vsel %vm2660_vm3, %v2662_v39, %v2658_v63  ;;  %v2678_v23 = vsel %vm2677_vm6, %v7161_v55, %v2674_v41 }
 0xa58   : > { %v2686_v3 = vmul.f32 %v2685_v44, %v2663_v58  ;;  %v2683_v19 = vsel %vm2680_vm7, %v2682_v15, %v2678_v23  ;;  %v6836_v23 = vld [vmem:[#allocation8 + $0xb0] sm:$0xf0]  ;;  %v6835_v15 = vld [vmem:[#allocation8 + $0xac] sm:$0xf] }
 0xa59   : > { %v2689_v4 = vsub.f32 1.0, %v2683_v19  ;;  %v2691_v13 = vmul.f32 %v2683_v19, %v8664_v24  ;;  %v6404_v24 = vsel %vm2833_vm8, 1.0, %v7714_v50 }
 0xa5a   : > { %v2687_v2 = vadd.f32 %v2686_v3, %v8680_v12  ;;  %v2712_v12 = vpop.f32.mrf.mxu3  ;;  %v2836_v40 = vpack.c.bf16 %v6404_v24, %v6404_v24 }
 0xa5c   : > { %7162 = vtanh.f32 %v2687_v2  ;;  %6405 = vmatmul.msk.bf16.vlgmr.msrb.gmra.mxu0 %vm651_vm1, %v2836_v40  ;;  %v6497_v2 = vld [vmem:[#allocation8 + $0xa8] sm:$0xf] }
 0xa5d   : > { %2906 = vmatpush.bf16.msrb.mxu0 %v7992_v52  ;;  %v8735_v19 = vor.u32 %v6836_v23, %v6497_v2  ;;  %v6861_v2 = vld [vmem:[#allocation10 + $0xb8] sm:$0xf0] }
 0xa61   : > { %2907 = vmatpush.bf16.msrb.mxu0 %v8004_v61 }
 0xa62   : > { %v7163_v20 = vpop.eup %7162  ;;  %v2714_v17 = vpop.f32.mrf.mxu3 }
 0xa63   : > { %v2690_v29 = vmul.f32 %v7163_v20, %v2689_v4  ;;  %v6499_v4 = vld [vmem:[#allocation8 + $0xb4] sm:$0xf0]  ;;  %v6485_v20 = vld [vmem:[#allocation8 + $0x90] sm:$0xf] }
 0xa65   : > { %v8709_v7 = vadd.f32 %v2691_v13, %v2690_v29  ;;  %2908 = vmatpush.bf16.msrb.mxu0 %v8011_v8  ;;  %v6833_v29 = vld [vmem:[#allocation8 + $0x98] sm:$0xf0]  ;;  %v8737_v13 = vor.u32 %v6835_v15, %v6499_v4  ;;  %v6587_v15 = vld [vmem:[#allocation10 + $0x90] sm:$0xf] }
 0xa66   : > { %v6857_v4 = vld [vmem:[#allocation10 + $0x98] sm:$0xf0] }
 0xa67   : > { %v2742_v59 = vpack.c.bf16 %v8709_v7, %v8709_v7  ;;  %10434 = vst [vmem:[#allocation24_spill] sm:$0xff] %v8737_v13 }
 0xa69   : > { %2751 = vmatmul.bf16.vlgmr.msra.gmra.mxu1 %v2742_v59  ;;  %2764 = vmatmul.bf16.vlgmr.msra.gmra.mxu2 %v2742_v59 }
 0xa6a   : > { %2777 = vmatmul.bf16.vlgmr.msra.gmra.mxu3 %v2742_v59  ;;  %v2725_v30 = vpop.f32.mrf.mxu3  ;;  %2909 = vmatpush.bf16.msrb.mxu0 %v8018_v16  ;;  %v6832_v59 = vld [vmem:[#allocation8 + $0x94] sm:$0xf] }
 0xa6b   : > { %3101 = vmatpush.bf16.msra.mxu1 %v8735_v19  ;;  %3114 = vmatpush.bf16.msra.mxu2 %v8737_v13 }
 0xa6c   : > { %6406 = vmatmul.msk.bf16.vlgmr.msra.gmra.mxu0 %vm651_vm1, %v2836_v40 }
 0xa6e   : > { %2910 = vmatpush.bf16.msrb.mxu0 %v8024_v25 }
 0xa72   : > { %v2727_v27 = vpop.f32.mrf.mxu3  ;;  %2911 = vmatpush.bf16.msrb.mxu0 %v8031_v32 }
 0xa76   : > { %2912 = vmatpush.bf16.msrb.mxu0 %v8034_v37 }
 0xa79   : > { %6407 = vmatmul.msk.bf16.vlgmr.msrb.gmra.mxu1 %vm651_vm1, %v2836_v40  ;;  %v6473_v40 = vld [vmem:[#allocation8 + $0x78] sm:$0xf] }
 0xa7a   : > { %2913 = vmatpush.bf16.msrb.mxu0 %v8038_v45 }
 0xad9   : > { %v8746_v56 = vpop.f32.mrf.mxu0 }
 0xae6   : > { %v2752_v43 = vpop.f32.mrf.mxu1 }
 0xae7   : > { %v2782_v46 = vadd.f32 %v2752_v43, %v2712_v12  ;;  %v6830_v43 = vld [vmem:[#allocation8 + $0x80] sm:$0xf0] }
 0xae9   : > { %v6402_v50 = vmul.f32 -1.442695, %v2782_v46  ;;  %v6829_v46 = vld [vmem:[#allocation8 + $0x7c] sm:$0xf] }
 0xaeb   : > { %7164 = vpow2.f32 %v6402_v50  ;;  %v8753_v50 = vor.u32 %v6830_v43, %v6473_v40  ;;  %v6575_v40 = vld [vmem:[#allocation10 + $0x78] sm:$0xf]  ;;  %v6854_v43 = vld [vmem:[#allocation10 + $0x80] sm:$0xf0] }
 0xaec   : > { %v2765_v35 = vpop.f32.mrf.mxu2 }
 0xaed   : > { %v2802_v26 = vadd.f32 %v2765_v35, %v2725_v30  ;;  %v2778_v49 = vpop.f32.mrf.mxu3  ;;  %v2851_v30 = vpop.f32.mrf.mxu0  ;;  %v6475_v35 = vld [vmem:[#allocation8 + $0x84] sm:$0xf0] }
 0xaee   : > { %v2754_v52 = vpop.f32.mrf.mxu1  ;;  %v2822_v45 = vadd.f32 %v8565_v57, %v2778_v49  ;;  %v6461_v49 = vld [vmem:[#allocation8 + $0x60] sm:$0xf]  ;;  %v6858_v30 = vld [vmem:[#allocation10 + $0xa0] sm:$0xf0] }
 0xaef   : > { %v6403_v14 = vmul.f32 -1.442695, %v2802_v26  ;;  %v8755_v26 = vor.u32 %v6829_v46, %v6475_v35  ;;  %v6827_v52 = vld [vmem:[#allocation8 + $0x68] sm:$0xf0]  ;;  %v6853_v46 = vld [vmem:[#allocation10 + $0x7c] sm:$0xf]  ;;  %v8807_v35 = vor.u32 %v6854_v43, %v6575_v40 }
 0xaf1   : > { %v7165_v61 = vpop.eup %7164  ;;  %7166 = vpow2.f32 %v6403_v14  ;;  %v6826_v14 = vld [vmem:[#allocation8 + $0x64] sm:$0xf] }
 0xaf2   : > { %v2786_v8 = vadd.f32 1.0, %v7165_v61  ;;  %v8759_v61 = vor.u32 %v6827_v52, %v6461_v49  ;;  %v6577_v49 = vld [vmem:[#allocation10 + $0x84] sm:$0xf0]  ;;  %v6583_v52 = vld [vmem:[#allocation10 + $0x80] sm:$0xf] }
 0xaf4   : > { %7168 = vrcp.f32 %v2786_v8  ;;  %v2767_v16 = vpop.f32.mrf.mxu2  ;;  %v2798_v54 = vand.u32 2147483648, %v2786_v8  ;;  %v2796_v60 = vand.u32 2147483647, %v2786_v8  ;;  %vm2792_vm9 = vweird.f32 %v2786_v8 }
 0xaf5   : > { %v2780_v22 = vpop.f32.mrf.mxu3  ;;  %v8751_v36 = vpop.f32.mrf.mxu0 }
 0xaf6   : > { %v2799_v55 = vor.u32 1.1754944e-38, %v2798_v54  ;;  %vm2797_vm11 = vcmp.eq.f32.partialorder %v2796_v60, 8.507059e+37  ;;  %v8748_v17 = vpop.f32.mrf.mxu1  ;;  %v6449_v22 = vld [vmem:[#allocation8 + $0x48] sm:$0xf]  ;;  %v6437_v54 = vld [vmem:[#allocation8 + $0x30] sm:$0xf] }
 0xaf7   : > { %v7167_v25 = vpop.eup %7166  ;;  %v6820_v60 = vld [vmem:[#allocation8 + $0x34] sm:$0xf] }
 0xaf8   : > { %v2806_v11 = vadd.f32 1.0, %v7167_v25  ;;  %v6824_v25 = vld [vmem:[#allocation8 + $0x50] sm:$0xf0] }
 0xafa   : > { %v7169_v10 = vpop.eup %7168  ;;  %7170 = vrcp.f32 %v2806_v11  ;;  %v2818_v5 = vand.u32 2147483648, %v2806_v11  ;;  %v2816_v33 = vand.u32 2147483647, %v2806_v11  ;;  %vm2812_vm13 = vweird.f32 %v2806_v11 }
 0xafb   : > { %v2788_v28 = vmul.f32 %v7169_v10, %v2786_v8  ;;  %vm2793_vm1 = vweird.f32 %v7169_v10  ;;  %v6463_v8 = vld [vmem:[#allocation8 + $0x6c] sm:$0xf0] }
 0xafc   : > { %vm2794_vm10 = vmor %vm2792_vm9, %vm2793_vm1  ;;  %v2819_v39 = vor.u32 1.1754944e-38, %v2818_v5  ;;  %vm2817_vm15 = vcmp.eq.f32.partialorder %v2816_v33, 8.507059e+37  ;;  %v8761_v16 = vor.u32 %v6826_v14, %v6463_v8  ;;  %v6413_v5 = vld [vmem:[#allocation8] sm:$0xf]  ;;  %v6814_v33 = vld [vmem:[#allocation8 + $0x4] sm:$0xf]  ;;  %v8809_v8 = vor.u32 %v6853_v46, %v6577_v49 }
 0xafd   : > { %v2789_v32 = vsub.f32 1.0, %v2788_v28  ;;  %v2864_v24 = vpop.f32.mrf.mxu0  ;;  %v6451_v28 = vld [vmem:[#allocation8 + $0x54] sm:$0xf0]  ;;  %v6855_v14 = vld [vmem:[#allocation10 + $0x88] sm:$0xf0] }
 0xafe   : > { %v2877_v27 = vpop.f32.mrf.mxu1  ;;  %v6539_v46 = vld [vmem:[#allocation10 + $0x30] sm:$0xf]  ;;  %v6845_v49 = vld [vmem:[#allocation10 + $0x38] sm:$0xf0] }
 0xaff   : > { %v2790_v6 = vmul.f32 %v7169_v10, %v2789_v32 }
 0xb00   : > { %v7171_v42 = vpop.eup %7170 }
 0xb01   : > { %v2808_v37 = vmul.f32 %v7171_v42, %v2806_v11  ;;  %v2791_v31 = vadd.f32 %v7169_v10, %v2790_v6  ;;  %vm2813_vm12 = vweird.f32 %v7171_v42  ;;  %v6823_v11 = vld [vmem:[#allocation8 + $0x4c] sm:$0xf]  ;;  %v6821_v6 = vld [vmem:[#allocation8 + $0x38] sm:$0xf0] }
 0xb02   : > { %vm2814_vm14 = vmor %vm2812_vm13, %vm2813_vm12  ;;  %v8767_v32 = vor.u32 %v6823_v11, %v6451_v28  ;;  %v6563_v11 = vld [vmem:[#allocation10 + $0x60] sm:$0xf]  ;;  %v6851_v28 = vld [vmem:[#allocation10 + $0x68] sm:$0xf0] }
 0xb03   : > { %v2809_v38 = vsub.f32 1.0, %v2808_v37  ;;  %v2795_v21 = vsel %vm2794_vm10, %v7169_v10, %v2791_v31  ;;  %v8765_v10 = vor.u32 %v6824_v25, %v6449_v22  ;;  %v6439_v37 = vld [vmem:[#allocation8 + $0x3c] sm:$0xf0]  ;;  %v8811_v22 = vor.u32 %v6855_v14, %v6583_v52  ;;  %v6844_v52 = vld [vmem:[#allocation10 + $0x34] sm:$0xf] }
 0xb04   : > { %v2800_v53 = vsel %vm2797_vm11, %v2799_v55, %v2795_v21  ;;  %v8773_v31 = vor.u32 %v6820_v60, %v6439_v37  ;;  %v6425_v55 = vld [vmem:[#allocation8 + $0x18] sm:$0xf]  ;;  %v6817_v21 = vld [vmem:[#allocation8 + $0x1c] sm:$0xf]  ;;  %v6565_v60 = vld [vmem:[#allocation10 + $0x6c] sm:$0xf0] }
 0xb05   : > { %v2810_v48 = vmul.f32 %v7171_v42, %v2809_v38  ;;  %v2823_v51 = vmul.f32 %v2822_v45, %v2800_v53  ;;  %v6818_v38 = vld [vmem:[#allocation8 + $0x20] sm:$0xf0]  ;;  %v6427_v53 = vld [vmem:[#allocation8 + $0x24] sm:$0xf0]  ;;  %10439 = vst [vmem:[#allocation29_spill] sm:$0xff] %v8811_v22 }
 0xb06   : > { %v8777_v45 = vor.u32 %v6818_v38, %v6425_v55  ;;  %v6571_v37 = vld [vmem:[#allocation10 + $0x68] sm:$0xf]  ;;  %v6852_v55 = vld [vmem:[#allocation10 + $0x70] sm:$0xf0]  ;;  %v6541_v14 = vld [vmem:[#allocation10 + $0x3c] sm:$0xf0] }
 0xb07   : > { %v2811_v1 = vadd.f32 %v7171_v42, %v2810_v48  ;;  %v2824_v62 = vadd.f32 %v2823_v51, %v8713_v18  ;;  %v8740_v18 = vor.u32 %v6833_v29, %v6485_v20  ;;  %v8779_v48 = vor.u32 %v6817_v21, %v6427_v53  ;;  %v6815_v51 = vld [vmem:[#allocation8 + $0x8] sm:$0xf0]  ;;  %v6856_v20 = vld [vmem:[#allocation10 + $0x94] sm:$0xf]  ;;  %v6551_v53 = vld [vmem:[#allocation10 + $0x48] sm:$0xf] }
 0xb08   : > { %v8798_v29 = vor.u32 %v6857_v4, %v6587_v15  ;;  %v8822_v21 = vor.u32 %v6852_v55, %v6571_v37  ;;  %v6559_v4 = vld [vmem:[#allocation10 + $0x50] sm:$0xf]  ;;  %v6493_v37 = vld [vmem:[#allocation8 + $0x98] sm:$0xf] }
 0xb09   : > { %v2815_v63 = vsel %vm2814_vm14, %v7171_v42, %v2811_v1  ;;  %7172 = vtanh.f32 %v2824_v62  ;;  %3102 = vmatpush.bf16.msra.mxu1 %v8740_v18  ;;  %v8771_v42 = vor.u32 %v6821_v6, %v6437_v54  ;;  %v8783_v1 = vor.u32 %v6815_v51, %v6413_v5  ;;  %v6415_v62 = vld [vmem:[#allocation8 + $0xc] sm:$0xf0]  ;;  %v6850_v54 = vld [vmem:[#allocation10 + $0x64] sm:$0xf]  ;;  %v6848_v5 = vld [vmem:[#allocation10 + $0x50] sm:$0xf0] }
 0xb0a   : > { %v2820_v44 = vsel %vm2817_vm15, %v2819_v39, %v2815_v63  ;;  %v6599_v39 = vld [vmem:[#allocation10 + $0xa8] sm:$0xf]  ;;  %v6860_v63 = vld [vmem:[#allocation10 + $0xb0] sm:$0xf0]  ;;  %v8818_v6 = vor.u32 %v6851_v28, %v6563_v11  ;;  %v8820_v38 = vor.u32 %v6850_v54, %v6565_v60  ;;  %10440 = vst [vmem:[#allocation30_spill] sm:$0xff] %v8822_v21  ;;  %v8855_v11 = vor.u32 %v6845_v49, %v6539_v46 }
 0xb0b   : > { %v2826_v41 = vsub.f32 1.0, %v2820_v44  ;;  %v2828_v57 = vmul.f32 %v2820_v44, %v8709_v7  ;;  %v6487_v7 = vld [vmem:[#allocation8 + $0x9c] sm:$0xf0]  ;;  %v8785_v44 = vor.u32 %v6814_v33, %v6415_v62  ;;  %v8857_v28 = vor.u32 %v6844_v52, %v6541_v14  ;;  %v6547_v54 = vld [vmem:[#allocation10 + $0x38] sm:$0xf] }
 0xb0c   : > { %v8743_v12 = vor.u32 %v6832_v59, %v6487_v7  ;;  %v6589_v59 = vld [vmem:[#allocation10 + $0x9c] sm:$0xf0]  ;;  %v6595_v7 = vld [vmem:[#allocation10 + $0x98] sm:$0xf]  ;;  %v6846_v60 = vld [vmem:[#allocation10 + $0x40] sm:$0xf0] }
 0xb0d   : > { %3103 = vmatpush.bf16.msra.mxu1 %v8753_v50  ;;  %10436 = vst [vmem:[#allocation26_spill] sm:$0xff] %v8785_v44  ;;  %v8800_v27 = vor.u32 %v6856_v20, %v6589_v59  ;;  %v8802_v24 = vor.u32 %v6858_v30, %v6595_v7  ;;  %v6849_v20 = vld [vmem:[#allocation10 + $0x58] sm:$0xf0]  ;;  %v6505_v59 = vld [vmem:[#allocation8 + $0xb0] sm:$0xf]  ;;  %v8859_v55 = vor.u32 %v6846_v60, %v6547_v54 }
 0xb0e   : > { %10435 = vst [vmem:[#allocation25_spill] sm:$0xff] %v8743_v12  ;;  %3115 = vmatpush.bf16.msra.mxu2 %v8743_v12  ;;  %v8848_v7 = vor.u32 %v6849_v20, %v6559_v4  ;;  %v6515_v49 = vld [vmem:[#allocation10] sm:$0xf]  ;;  %v6839_v52 = vld [vmem:[#allocation10 + $0x8] sm:$0xf0] }
 0xb0f   : > { %v7173_v58 = vpop.eup %7172  ;;  %10438 = vst [vmem:[#allocation28_spill] sm:$0xff] %v8802_v24  ;;  %v6838_v14 = vld [vmem:[#allocation10 + $0x4] sm:$0xf]  ;;  %v6517_v54 = vld [vmem:[#allocation10 + $0xc] sm:$0xf0] }
 0xb10   : > { %v2827_v34 = vmul.f32 %v7173_v58, %v2826_v41  ;;  %v8787_v41 = vor.u32 %v6860_v63, %v6599_v39  ;;  %v6859_v58 = vld [vmem:[#allocation10 + $0xac] sm:$0xf]  ;;  %v8835_v39 = vor.u32 %v6848_v5, %v6551_v53  ;;  %10443 = vst [vmem:[#allocation31_spill] sm:$0xff] %v8848_v7  ;;  %v6834_v53 = vld [vmem:[#allocation8 + $0xa0] sm:$0xf0] }
 0xb11   : > { %3104 = vmatpush.bf16.msra.mxu1 %v8759_v61  ;;  %v6847_v63 = vld [vmem:[#allocation10 + $0x4c] sm:$0xf]  ;;  %10445 = vst [vmem:[#allocation33_spill] sm:$0xff] %v8859_v55  ;;  %v6527_v5 = vld [vmem:[#allocation10 + $0x18] sm:$0xf] }
 0xb12   : > { %v8731_v3 = vadd.f32 %v2828_v57, %v2827_v34  ;;  %3116 = vmatpush.bf16.msra.mxu2 %v8755_v26  ;;  %v6601_v34 = vld [vmem:[#allocation10 + $0xb4] sm:$0xf0]  ;;  %v6607_v57 = vld [vmem:[#allocation10 + $0xb0] sm:$0xf]  ;;  %3269 = vmatpush.bf16.msra.mxu0 %v8787_v41  ;;  %v6523_v60 = vld [vmem:[#allocation10 + $0x8] sm:$0xf] }
 0xb13   : > { %v8794_v23 = vor.u32 %v6861_v2, %v6607_v57  ;;  %v10310_v2 = vmov 1.0|1.0  }
 0xb14   : > { %v2879_v9 = vpack.c.bf16 %v8731_v3, %v8731_v3 }
 0xb15   : > { %3105 = vmatpush.bf16.msra.mxu1 %v8765_v10  ;;  %10437 = vst [vmem:[#allocation27_spill] sm:$0xff] %v8794_v23 }
 0xb16   : > { %2888 = vmatmul.bf16.vlgmr.msrb.gmra.mxu2 %v2879_v9  ;;  %2901 = vmatmul.bf16.vlgmr.msrb.gmra.mxu3 %v2879_v9 }
 0xb17   : > { %2914 = vmatmul.bf16.vlgmr.msrb.gmra.mxu0 %v2879_v9  ;;  %3117 = vmatpush.bf16.msra.mxu2 %v8761_v16  ;;  %v8790_v9 = vor.u32 %v6859_v58, %v6601_v34  ;;  %v6553_v58 = vld [vmem:[#allocation10 + $0x54] sm:$0xf0] }
 0xb18   : > { %3270 = vmatpush.bf16.msra.mxu0 %v8798_v29  ;;  %v8845_v15 = vor.u32 %v6847_v63, %v6553_v58  ;;  %v6841_v58 = vld [vmem:[#allocation10 + $0x1c] sm:$0xf] }
 0xb19   : > { %3106 = vmatpush.bf16.msra.mxu1 %v8771_v42 }
 0xb1b   : > { %3118 = vmatpush.bf16.msra.mxu2 %v8767_v32 }
 0xb1c   : > { %3271 = vmatpush.bf16.msra.mxu0 %v8807_v35 }
 0xb1d   : > { %3107 = vmatpush.bf16.msra.mxu1 %v8777_v45 }
 0xb1f   : > { %3119 = vmatpush.bf16.msra.mxu2 %v8773_v31 }
 0xb20   : > { %3272 = vmatpush.bf16.msra.mxu0 %v8818_v6 }
 0xb21   : > { %3108 = vmatpush.bf16.msra.mxu1 %v8783_v1 }
 0xb23   : > { %3120 = vmatpush.bf16.msra.mxu2 %v8779_v48 }
 0xb24   : > { %6508 = vmatmul.msk.bf16.vlgmr.msra.gmra.mxu1 %vm8831_vm2, %v10310_v2  ;;  %3273 = vmatpush.bf16.msra.mxu0 %v8835_v39 }
 0xb25   : > { %3282 = vmatpush.bf16.msrb.mxu1 %v8790_v9 }
 0xb27   : > { %3121 = vmatpush.bf16.msra.mxu2 %v8785_v44 }
 0xb28   : > { %3274 = vmatpush.bf16.msra.mxu0 %v8855_v11 }
 0xb29   : > { %3283 = vmatpush.bf16.msrb.mxu1 %v8800_v27 }
 0xb2a   : > { %6510 = vmatmul.msk.bf16.vlgmr.msra.gmra.mxu2 %vm8831_vm2, %v10310_v2 }
 0xb2b   : > { %3295 = vmatpush.bf16.msrb.mxu2 %v8794_v23 }
 0xb2d   : > { %3284 = vmatpush.bf16.msrb.mxu1 %v8809_v8 }
 0xb2f   : > { %3296 = vmatpush.bf16.msrb.mxu2 %v8802_v24 }
 0xb31   : > { %3285 = vmatpush.bf16.msrb.mxu1 %v8820_v38 }
 0xb33   : > { %3297 = vmatpush.bf16.msrb.mxu2 %v8811_v22 }
 0xb35   : > { %3286 = vmatpush.bf16.msrb.mxu1 %v8845_v15 }
 0xb37   : > { %3298 = vmatpush.bf16.msrb.mxu2 %v8822_v21 }
 0xb39   : > { %3287 = vmatpush.bf16.msrb.mxu1 %v8857_v28 }
 0xb3b   : > { %3299 = vmatpush.bf16.msrb.mxu2 %v8848_v7 }
 0xb3f   : > { %3300 = vmatpush.bf16.msrb.mxu2 %v8859_v55 }
 0xb94   : > { %v8814_v25 = vpop.f32.mrf.mxu0 }
 0xb99   : > { %v2889_v51 = vpop.f32.mrf.mxu2  ;;  %v2902_v33 = vpop.f32.mrf.mxu3 }
 0xb9a   : > { %v2919_v34 = vadd.f32 %v2889_v51, %v8746_v56  ;;  %v2939_v57 = vadd.f32 %v2902_v33, %v8751_v36  ;;  %v6837_v56 = vld [vmem:[#allocation8 + $0xb8] sm:$0xf0]  ;;  %v6842_v51 = vld [vmem:[#allocation10 + $0x20] sm:$0xf0]  ;;  %v8863_v33 = vor.u32 %v6834_v53, %v6493_v37  ;;  %v6840_v37 = vld [vmem:[#allocation10 + $0x10] sm:$0xf0] }
 0xb9b   : > { %v8851_v43 = vor.u32 %v6837_v56, %v6505_v59  ;;  %v8865_v63 = vor.u32 %v6842_v51, %v6527_v5  ;;  %v6843_v56 = vld [vmem:[#allocation10 + $0x28] sm:$0xf0]  ;;  %v8877_v5 = vor.u32 %v6839_v52, %v6515_v49  ;;  %v8879_v51 = vor.u32 %v6838_v14, %v6517_v54  ;;  %v6825_v49 = vld [vmem:[#allocation8 + $0x58] sm:$0xf0]  ;;  %v6445_v14 = vld [vmem:[#allocation8 + $0x38] sm:$0xf] }
 0xb9c   : > { %v6408_v36 = vmul.f32 -1.442695, %v2919_v34  ;;  %v6409_v30 = vmul.f32 -1.442695, %v2939_v57  ;;  %v2917_v40 = vpop.f32.mrf.mxu0  ;;  %10446 = vst [vmem:[#allocation34_spill] sm:$0xff] %v8863_v33 }
 0xb9d   : > { %10444 = vst [vmem:[#allocation32_spill] sm:$0xff] %v8851_v43  ;;  %3127 = vmatpush.bf16.msra.mxu3 %v8851_v43  ;;  %v6529_v34 = vld [vmem:[#allocation10 + $0x24] sm:$0xf0]  ;;  %v6535_v57 = vld [vmem:[#allocation10 + $0x20] sm:$0xf]  ;;  %3275 = vmatpush.bf16.msra.mxu0 %v8865_v63 }
 0xb9e   : > { %7174 = vpow2.f32 %v6408_v36  ;;  %v8868_v59 = vor.u32 %v6841_v58, %v6529_v34  ;;  %v6481_v36 = vld [vmem:[#allocation8 + $0x80] sm:$0xf]  ;;  %v8871_v40 = vor.u32 %v6843_v56, %v6535_v57  ;;  %10448 = vst [vmem:[#allocation36_spill] sm:$0xff] %v8877_v5  ;;  %v6469_v58 = vld [vmem:[#allocation8 + $0x68] sm:$0xf] }
 0xb9f   : > { %7176 = vpow2.f32 %v6409_v30  ;;  %v6831_v30 = vld [vmem:[#allocation8 + $0x88] sm:$0xf0]  ;;  %v6828_v34 = vld [vmem:[#allocation8 + $0x70] sm:$0xf0]  ;;  %v6822_v54 = vld [vmem:[#allocation8 + $0x40] sm:$0xf0] }
 0xba0   : > { %10447 = vst [vmem:[#allocation35_spill] sm:$0xff] %v8871_v40  ;;  %v8873_v46 = vor.u32 %v6831_v30, %v6481_v36  ;;  %3288 = vmatpush.bf16.msrb.mxu1 %v8868_v59  ;;  %3301 = vmatpush.bf16.msrb.mxu2 %v8871_v40  ;;  %v8887_v36 = vor.u32 %v6828_v34, %v6469_v58  ;;  %v6457_v30 = vld [vmem:[#allocation8 + $0x50] sm:$0xf] }
 0xba1   : > { %v2891_v4 = vpop.f32.mrf.mxu2  ;;  %v2904_v20 = vpop.f32.mrf.mxu3  ;;  %3128 = vmatpush.bf16.msra.mxu3 %v8863_v33  ;;  %3276 = vmatpush.bf16.msra.mxu0 %v8877_v5  ;;  %v8896_v52 = vor.u32 %v6825_v49, %v6457_v30  ;;  %v8901_v58 = vor.u32 %v6822_v54, %v6445_v14  ;;  %v6819_v30 = vld [vmem:[#allocation8 + $0x28] sm:$0xf0] }
 0xba2   : > { %v8882_v20 = vor.u32 %v6840_v37, %v6523_v60 }
 0xba4   : > { %v7175_v53 = vpop.eup %7174  ;;  %10449 = vst [vmem:[#allocation37_spill] sm:$0xff] %v8882_v20  ;;  %3289 = vmatpush.bf16.msrb.mxu1 %v8879_v51  ;;  %3302 = vmatpush.bf16.msrb.mxu2 %v8882_v20 }
 0xba5   : > { %v7177_v57 = vpop.eup %7176  ;;  %v2923_v4 = vadd.f32 1.0, %v7175_v53  ;;  %3129 = vmatpush.bf16.msra.mxu3 %v8873_v46  ;;  %3452 = vmatpush.bf16.msrb.mxu0 %v8735_v19 }
 0xba6   : > { %v8884_v56 = vadd.f32 1.0, %v7177_v57  ;;  %v6433_v57 = vld [vmem:[#allocation8 + $0x20] sm:$0xf] }
 0xba7   : > { %7178 = vrcp.f32 %v2923_v4  ;;  %v2935_v0 = vand.u32 2147483648, %v2923_v4  ;;  %v8908_v14 = vor.u32 %v6819_v30, %v6433_v57  ;;  %vm2929_vm4 = vweird.f32 %v2923_v4 }
 0xba8   : > { %7180 = vrcp.f32 %v8884_v56  ;;  %3465 = vmatpush.bf16.msra.mxu1 %v8737_v13  ;;  %3478 = vmatpush.bf16.msra.mxu2 %v8851_v43  ;;  %v2933_v13 = vand.u32 2147483647, %v2923_v4  ;;  %vm2949_vm8 = vweird.f32 %v8884_v56 }
 0xba9   : > { %3130 = vmatpush.bf16.msra.mxu3 %v8887_v36  ;;  %3453 = vmatpush.bf16.msrb.mxu0 %v8740_v18  ;;  %10450 = vst [vmem:[#allocation38_spill] sm:$0xff] %v8908_v14 }
 0xbaa   : > { %vm2934_vm6 = vcmp.eq.f32.partialorder %v2933_v13, 8.507059e+37 }
 0xbac   : > { %3466 = vmatpush.bf16.msra.mxu1 %v8743_v12  ;;  %3479 = vmatpush.bf16.msra.mxu2 %v8863_v33  ;;  %v6421_v12 = vld [vmem:[#allocation8 + $0x8] sm:$0xf] }
 0xbad   : > { %v7179_v60 = vpop.eup %7178  ;;  %3131 = vmatpush.bf16.msra.mxu3 %v8896_v52  ;;  %3454 = vmatpush.bf16.msrb.mxu0 %v8753_v50 }
 0xbae   : > { %v7181_v37 = vpop.eup %7180  ;;  %v2925_v53 = vmul.f32 %v7179_v60, %v2923_v4  ;;  %vm2930_vm3 = vweird.f32 %v7179_v60 }
 0xbaf   : > { %v2945_v34 = vmul.f32 %v7181_v37, %v8884_v56  ;;  %vm2931_vm5 = vmor %vm2929_vm4, %vm2930_vm3  ;;  %vm2950_vm7 = vweird.f32 %v7181_v37 }
 0xbb0   : > { %v2926_v49 = vsub.f32 1.0, %v2925_v53  ;;  %3467 = vmatpush.bf16.msra.mxu1 %v8755_v26  ;;  %3480 = vmatpush.bf16.msra.mxu2 %v8873_v46  ;;  %v2936_v53 = vor.u32 1.1754944e-38, %v2935_v0  ;;  %vm2951_vm1 = vmor %vm2949_vm8, %vm2950_vm7 }
 0xbb1   : > { %v2946_v2 = vsub.f32 1.0, %v2945_v34  ;;  %3132 = vmatpush.bf16.msra.mxu3 %v8901_v58  ;;  %3455 = vmatpush.bf16.msrb.mxu0 %v8759_v61  ;;  %v7349_v34 = vld [vmem:[%s10301_s3] ss:$0 sm:$0xff] }
 0xbb2   : > { %v2927_v43 = vmul.f32 %v7179_v60, %v2926_v49  ;;  %v2959_v57 = vadd.f32 %v7349_v34, %v8814_v25  ;;  %v2955_v49 = vand.u32 2147483648, %v8884_v56  ;;  %v2953_v25 = vand.u32 2147483647, %v8884_v56  ;;  %v3123_v34 = vpop.f32.mrf.mxu2 }
 0xbb3   : > { %v2947_v54 = vmul.f32 %v7181_v37, %v2946_v2  ;;  %v8918_v2 = vor.u32 %v6816_v47, %v6421_v12 }
 0xbb4   : > { %v2928_v33 = vadd.f32 %v7179_v60, %v2927_v43  ;;  %3468 = vmatpush.bf16.msra.mxu1 %v8761_v16  ;;  %3481 = vmatpush.bf16.msra.mxu2 %v8887_v36  ;;  %v2956_v12 = vor.u32 1.1754944e-38, %v2955_v49  ;;  %vm2954_vm9 = vcmp.eq.f32.partialorder %v2953_v25, 8.507059e+37  ;;  %v8975_v49 = vld [vmem:[#allocation13 + $0x20] sm:$0xff]  ;;  %v8979_v25 = vld [vmem:[#allocation13 + $0x18] sm:$0xff] }
 0xbb5   : > { %3133 = vmatpush.bf16.msra.mxu3 %v8908_v14  ;;  %10451 = vst [vmem:[#allocation39_spill] sm:$0xff] %v8918_v2  ;;  %v2948_v4 = vadd.f32 %v7181_v37, %v2947_v54  ;;  %3456 = vmatpush.bf16.msrb.mxu0 %v8765_v10 }
 0xbb6   : > { %v2932_v30 = vsel %vm2931_vm5, %v7179_v60, %v2928_v33  ;;  %v10452_v33 = vmov 1.0|1.0   ;;  %10456 = vst [vmem:[#allocation43_spill] sm:$0xff] %v8975_v49 }
 0xbb7   : > { %v2937_v43 = vsel %vm2934_vm6, %v2936_v53, %v2932_v30  ;;  %v2952_v47 = vsel %vm2951_vm1, %v7181_v37, %v2948_v4  ;;  %v8967_v4 = vld [vmem:[#allocation13 + $0x30] sm:$0xff]  ;;  %10457 = vst [vmem:[#allocation44_spill] sm:$0xff] %v8979_v25 }
 0xbb8   : > { %v2960_v0 = vmul.f32 %v2959_v57, %v2937_v43  ;;  %3469 = vmatpush.bf16.msra.mxu1 %v8767_v32  ;;  %3482 = vmatpush.bf16.msra.mxu2 %v8896_v52  ;;  %v2957_v56 = vsel %vm2954_vm9, %v2956_v12, %v2952_v47  ;;  %v8963_v43 = vld [vmem:[#allocation13 + $0x38] sm:$0xff]  ;;  %10454 = vst [vmem:[#allocation41_spill] sm:$0xff] %v8967_v4  ;;  %v8987_v12 = vld [vmem:[#allocation13 + $0x8] sm:$0xff] }
 0xbb9   : > { %3134 = vmatpush.bf16.msra.mxu3 %v8918_v2  ;;  %3457 = vmatpush.bf16.msrb.mxu0 %v8771_v42  ;;  %v2965_v54 = vmul.f32 %v2957_v56, %v8731_v3  ;;  %v3110_v3 = vpop.f32.mrf.mxu1  ;;  %10453 = vst [vmem:[#allocation40_spill] sm:$0xff] %v8963_v43 }
 0xbba   : > { %v2961_v13 = vadd.f32 %v2960_v0, %v8748_v17  ;;  %v2963_v17 = vsub.f32 1.0, %v2957_v56  ;;  %v3125_v30 = vpop.f32.mrf.mxu2  ;;  %v8971_v0 = vld [vmem:[#allocation13 + $0x28] sm:$0xff]  ;;  %10459 = vst [vmem:[#allocation46_spill] sm:$0xff] %v8987_v12  ;;  %v8991_v56 = vld [vmem:[#allocation13] sm:$0xff] }
 0xbbb   : > { %10455 = vst [vmem:[#allocation42_spill] sm:$0xff] %v8971_v0 }
 0xbbc   : > { %7182 = vtanh.f32 %v2961_v13  ;;  %6512 = vmatmul.msk.bf16.vlgmr.msra.gmra.mxu3 %vm8831_vm2, %v10452_v33  ;;  %3470 = vmatpush.bf16.msra.mxu1 %v8773_v31  ;;  %v8983_v13 = vld [vmem:[#allocation13 + $0x10] sm:$0xff]  ;;  %10460 = vst [vmem:[#allocation47_spill] sm:$0xff] %v8991_v56 }
 0xbbd   : > { %3483 = vmatpush.bf16.msra.mxu2 %v8901_v58  ;;  %3458 = vmatpush.bf16.msrb.mxu0 %v8777_v45  ;;  %10458 = vst [vmem:[#allocation45_spill] sm:$0xff] %v8983_v13 }
 0xbbe   : > { %3411 = vmatpush.bf16.msrb.mxu3 %v8963_v43 }
 0xbc0   : > { %3471 = vmatpush.bf16.msra.mxu1 %v8779_v48 }
 0xbc1   : > { %3484 = vmatpush.bf16.msra.mxu2 %v8908_v14  ;;  %3459 = vmatpush.bf16.msrb.mxu0 %v8783_v1  ;;  %v3112_v57 = vpop.f32.mrf.mxu1 }
 0xbc2   : > { %v7183_v60 = vpop.eup %7182  ;;  %3412 = vmatpush.bf16.msrb.mxu3 %v8967_v4 }
 0xbc3   : > { %v2964_v37 = vmul.f32 %v7183_v60, %v2963_v17 }
 0xbc4   : > { %3472 = vmatpush.bf16.msra.mxu1 %v8785_v44 }
 0xbc5   : > { %v8940_v62 = vadd.f32 %v2965_v54, %v2964_v37  ;;  %3485 = vmatpush.bf16.msra.mxu2 %v8918_v2 }
 0xbc6   : > { %3413 = vmatpush.bf16.msrb.mxu3 %v8971_v0 }
 0xbc7   : > { %v3140_v53 = vpack.c.bf16 %v8940_v62, %v8940_v62 }
 0xbc9   : > { %3277 = vmatmul.bf16.vlgmr.msra.gmra.mxu0 %v3140_v53  ;;  %3290 = vmatmul.bf16.vlgmr.msrb.gmra.mxu1 %v3140_v53 }
 0xbca   : > { %3303 = vmatmul.bf16.vlgmr.msrb.gmra.mxu2 %v3140_v53  ;;  %3504 = vmatpush.bf16.msra.mxu0 %v8790_v9 }
 0xbcb   : > { %3517 = vmatpush.bf16.msrb.mxu1 %v8794_v23  ;;  %3579 = vmatpush.bf16.msrb.mxu2 %v8963_v43 }
 0xbcc   : > { %3414 = vmatpush.bf16.msrb.mxu3 %v8975_v49 }
 0xbce   : > { %3505 = vmatpush.bf16.msra.mxu0 %v8800_v27 }
 0xbcf   : > { %3518 = vmatpush.bf16.msrb.mxu1 %v8802_v24  ;;  %3580 = vmatpush.bf16.msrb.mxu2 %v8967_v4 }
 0xbd0   : > { %3415 = vmatpush.bf16.msrb.mxu3 %v8979_v25 }
 0xbd2   : > { %3506 = vmatpush.bf16.msra.mxu0 %v8809_v8 }
 0xbd3   : > { %3519 = vmatpush.bf16.msrb.mxu1 %v8811_v22  ;;  %3581 = vmatpush.bf16.msrb.mxu2 %v8971_v0 }
 0xbd4   : > { %3416 = vmatpush.bf16.msrb.mxu3 %v8983_v13 }
 0xbd6   : > { %3507 = vmatpush.bf16.msra.mxu0 %v8820_v38 }
 0xbd7   : > { %3520 = vmatpush.bf16.msrb.mxu1 %v8822_v21  ;;  %3582 = vmatpush.bf16.msrb.mxu2 %v8975_v49 }
 0xbd8   : > { %3417 = vmatpush.bf16.msrb.mxu3 %v8987_v12 }
 0xbda   : > { %3508 = vmatpush.bf16.msra.mxu0 %v8845_v15 }
 0xbdb   : > { %3521 = vmatpush.bf16.msrb.mxu1 %v8848_v7  ;;  %3583 = vmatpush.bf16.msrb.mxu2 %v8979_v25 }
 0xbdc   : > { %3418 = vmatpush.bf16.msrb.mxu3 %v8991_v56 }
 0xbde   : > { %3509 = vmatpush.bf16.msra.mxu0 %v8857_v28 }
 0xbdf   : > { %3522 = vmatpush.bf16.msrb.mxu1 %v8859_v55  ;;  %3584 = vmatpush.bf16.msrb.mxu2 %v8983_v13  ;;  %v9001_v13 = vld [vmem:[#allocation11] ss:$0 sm:$0xff] }
 0xbe0   : > { %3491 = vmatpush.bf16.msra.mxu3 %v8787_v41 }
 0xbe2   : > { %3510 = vmatpush.bf16.msra.mxu0 %v8868_v59 }
 0xbe3   : > { %3523 = vmatpush.bf16.msrb.mxu1 %v8871_v40  ;;  %3585 = vmatpush.bf16.msrb.mxu2 %v8987_v12 }
 0xbe4   : > { %3492 = vmatpush.bf16.msra.mxu3 %v8798_v29 }
 0xbe6   : > { %3511 = vmatpush.bf16.msra.mxu0 %v8879_v51 }
 0xbe7   : > { %3524 = vmatpush.bf16.msrb.mxu1 %v8882_v20  ;;  %3586 = vmatpush.bf16.msrb.mxu2 %v8991_v56 }
 0xbe8   : > { %3493 = vmatpush.bf16.msra.mxu3 %v8807_v35 }
 0xbec   : > { %3494 = vmatpush.bf16.msra.mxu3 %v8818_v6 }
 0xbf0   : > { %3495 = vmatpush.bf16.msra.mxu3 %v8835_v39 }
 0xbf4   : > { %3496 = vmatpush.bf16.msra.mxu3 %v8855_v11 }
 0xbf8   : > { %3497 = vmatpush.bf16.msra.mxu3 %v8865_v63 }
 0xbfc   : > { %3498 = vmatpush.bf16.msra.mxu3 %v8877_v5 }
 0xc3f   : > { %v3136_v47 = vpop.f32.mrf.mxu3 }
 0xc46   : > { %v3278_v17 = vpop.f32.mrf.mxu0  ;;  %v3291_v60 = vpop.f32.mrf.mxu1 }
 0xc47   : > { %v3308_v37 = vadd.f32 %v3278_v17, %v3110_v3  ;;  %v3328_v54 = vadd.f32 %v3291_v60, %v3123_v34  ;;  %v3138_v53 = vpop.f32.mrf.mxu3 }
 0xc49   : > { %v6609_v57 = vmul.f32 -1.442695, %v3308_v37  ;;  %v6610_v30 = vmul.f32 -1.442695, %v3328_v54 }
 0xc4b   : > { %7184 = vpow2.f32 %v6609_v57 }
 0xc4c   : > { %7186 = vpow2.f32 %v6610_v30 }
 0xc4d   : > { %v3304_v20 = vpop.f32.mrf.mxu2 }
 0xc4e   : > { %v3280_v12 = vpop.f32.mrf.mxu0  ;;  %v3293_v40 = vpop.f32.mrf.mxu1  ;;  %v3351_v7 = vadd.f32 %v9001_v13, %v3304_v20 }
 0xc51   : > { %v7185_v3 = vpop.eup %7184 }
 0xc52   : > { %v7187_v34 = vpop.eup %7186  ;;  %v3312_v17 = vadd.f32 1.0, %v7185_v3 }
 0xc53   : > { %v3332_v60 = vadd.f32 1.0, %v7187_v34 }
 0xc54   : > { %7188 = vrcp.f32 %v3312_v17  ;;  %v3324_v56 = vand.u32 2147483648, %v3312_v17  ;;  %v3322_v34 = vand.u32 2147483647, %v3312_v17  ;;  %vm3318_vm11 = vweird.f32 %v3312_v17 }
 0xc55   : > { %7190 = vrcp.f32 %v3332_v60  ;;  %v3306_v53 = vpop.f32.mrf.mxu2  ;;  %vm3338_vm15 = vweird.f32 %v3332_v60  ;;  %v3342_v0 = vand.u32 2147483647, %v3332_v60 }
 0xc56   : > { %v3325_v25 = vor.u32 1.1754944e-38, %v3324_v56  ;;  %vm3323_vm13 = vcmp.eq.f32.partialorder %v3322_v34, 8.507059e+37 }
 0xc57   : > { %vm3343_vm3 = vcmp.eq.f32.partialorder %v3342_v0, 8.507059e+37 }
 0xc5a   : > { %v7189_v37 = vpop.eup %7188 }
 0xc5b   : > { %v7191_v54 = vpop.eup %7190  ;;  %v3314_v57 = vmul.f32 %v7189_v37, %v3312_v17  ;;  %vm3319_vm10 = vweird.f32 %v7189_v37 }
 0xc5c   : > { %v3334_v30 = vmul.f32 %v7191_v54, %v3332_v60  ;;  %vm3320_vm12 = vmor %vm3318_vm11, %vm3319_vm10  ;;  %vm3339_vm14 = vweird.f32 %v7191_v54 }
 0xc5d   : > { %v3315_v40 = vsub.f32 1.0, %v3314_v57  ;;  %vm3340_vm2 = vmor %vm3338_vm15, %vm3339_vm14 }
 0xc5e   : > { %v3335_v12 = vsub.f32 1.0, %v3334_v30  ;;  %v3344_v30 = vand.u32 2147483648, %v3332_v60 }
 0xc5f   : > { %v3316_v3 = vmul.f32 %v7189_v37, %v3315_v40 }
 0xc60   : > { %v3336_v55 = vmul.f32 %v7191_v54, %v3335_v12 }
 0xc61   : > { %v3317_v53 = vadd.f32 %v7189_v37, %v3316_v3  ;;  %v3345_v3 = vor.u32 1.1754944e-38, %v3344_v30 }
 0xc62   : > { %v3337_v57 = vadd.f32 %v7191_v54, %v3336_v55 }
 0xc63   : > { %v3321_v49 = vsel %vm3320_vm12, %v7189_v37, %v3317_v53 }
 0xc64   : > { %v3326_v21 = vsel %vm3323_vm13, %v3325_v25, %v3321_v49  ;;  %v3341_v22 = vsel %vm3340_vm2, %v7191_v54, %v3337_v57  ;;  %v10461_v54 = vld [vmem:[#allocation23_spill] sm:$0xff] }
 0xc65   : > { %v3352_v40 = vmul.f32 %v3351_v7, %v3326_v21  ;;  %v3346_v56 = vsel %vm3343_vm3, %v3345_v3, %v3341_v22  ;;  %v9030_v22 = vld [vmem:[%s10306_s8] ss:$0 sm:$0xff] }
 0xc66   : > { %v3355_v17 = vsub.f32 1.0, %v3346_v56  ;;  %v3357_v49 = vmul.f32 %v3346_v56, %v8940_v62 }
 0xc67   : > { %v3353_v12 = vadd.f32 %v3352_v40, %v3136_v47 }
 0xc69   : > { %7192 = vtanh.f32 %v3353_v12 }
 0xc6f   : > { %v7193_v20 = vpop.eup %7192 }
 0xc70   : > { %v3356_v37 = vmul.f32 %v7193_v20, %v3355_v17 }
 0xc72   : > { %v9007_v55 = vadd.f32 %v3357_v49, %v3356_v37 }
 0xc74   : > { %v3359_v25 = vpack.c.bf16 %v9007_v55, %v9007_v55 }
 0xc76   : > { %3419 = vmatmul.bf16.vlgmr.msrb.gmra.mxu3 %v3359_v25 }
 0xc77   : > { %3620 = vmatpush.bf16.msrb.mxu3 %v8735_v19 }
 0xc7b   : > { %3621 = vmatpush.bf16.msrb.mxu3 %v8740_v18 }
 0xc7f   : > { %3622 = vmatpush.bf16.msrb.mxu3 %v8753_v50 }
 0xc83   : > { %3623 = vmatpush.bf16.msrb.mxu3 %v8759_v61 }
 0xc86   : > { %3499 = vmatmul.bf16.vlgmr.msra.gmra.mxu3 %v3359_v25 }
 0xc87   : > { %3624 = vmatpush.bf16.msrb.mxu3 %v8765_v10 }
 0xc8b   : > { %3625 = vmatpush.bf16.msrb.mxu3 %v8771_v42 }
 0xc8f   : > { %3626 = vmatpush.bf16.msrb.mxu3 %v8777_v45 }
 0xc93   : > { %3627 = vmatpush.bf16.msrb.mxu3 %v8783_v1 }
 0xc97   : > { %3672 = vmatpush.bf16.msra.mxu3 %v8790_v9 }
 0xc9b   : > { %3673 = vmatpush.bf16.msra.mxu3 %v8800_v27 }
 0xc9f   : > { %3674 = vmatpush.bf16.msra.mxu3 %v8809_v8 }
 0xca3   : > { %3675 = vmatpush.bf16.msra.mxu3 %v8820_v38 }
 0xca7   : > { %3676 = vmatpush.bf16.msra.mxu3 %v8845_v15 }
 0xcab   : > { %3677 = vmatpush.bf16.msra.mxu3 %v8857_v28 }
 0xcaf   : > { %3678 = vmatpush.bf16.msra.mxu3 %v8868_v59 }
 0xcb3   : > { %3679 = vmatpush.bf16.msra.mxu3 %v8879_v51 }
 0xcf9   : > { %v3420_v21 = vpop.f32.mrf.mxu3 }
 0xcfa   : > { %v3421_v7 = vadd.f32 %v9030_v22, %v3420_v21 }
 0xcfc   : > { %3424 = vmax.xlane.f32.xlu1 %v3421_v7 }
 0xd01   : > { %v3422_v62 = vpop.f32.mrf.mxu3 }
 0xd02   : > { %v10463_v62 = vld [vmem:[#allocation32_spill] sm:$0xff] }
 0xd09   : > { %v9033_v0 = vpop.f32.mrf.mxu3 }
 0xd11   : > { %v3502_v47 = vpop.f32.mrf.mxu3 }
 0xd12   : > { %v10464_v47 = vld [vmem:[#allocation25_spill] sm:$0xff] }
 0xd6f   : > { %v3425_v60 = vpop.xlane.xlu1 %3424 }
 0xd70   : > { %vm3426_vm4 = vcmp.ge.f32.partialorder %v3421_v7, %v3425_v60  ;;  %v10462_v7 = vld [vmem:[#allocation24_spill] sm:$0xff]  ;;  %v10465_v60 = vld [vmem:[#allocation34_spill] sm:$0xff] }
 0xd71   : > { %v3427_v34 = vsel %vm3426_vm4, %v10461_v54, 128  ;;  %vm3448_vm4 = vcmp.eq.s32.totalorder %v10461_v54, 0 }
 0xd72   : > { %v3429_v53 = vshra.s32 %v3427_v34, 16  ;;  %v3428_v30 = vand.u32 65535, %v3427_v34  ;;  %v10467_v34 = vld [vmem:[#allocation42_spill] sm:$0xff] }
 0xd74   : > { %v3431_v57 = vcvt.s32.f32 %v3429_v53  ;;  %v3430_v12 = vcvt.s32.f32 %v3428_v30  ;;  %v10468_v53 = vld [vmem:[#allocation30_spill] sm:$0xff]  ;;  %v10470_v30 = vld [vmem:[#allocation31_spill] sm:$0xff] }
 0xd76   : > { %3432 = vmin.xlane.f32.xlu2 %v3431_v57 }
 0xde9   : > { %v3433_v40 = vpop.xlane.xlu2 %3432 }
 0xdea   : > { %vm3434_vm5 = vcmp.eq.f32.partialorder %v3431_v57, %v3433_v40  ;;  %v3439_v56 = vcvt.f32.s32 %v3433_v40  ;;  %v10469_v57 = vld [vmem:[#allocation43_spill] sm:$0xff]  ;;  %v10471_v40 = vld [vmem:[#allocation44_spill] sm:$0xff] }
 0xdeb   : > { %v3435_v3 = vsel %vm3434_vm5, %v3430_v12, inf  ;;  %v10472_v12 = vld [vmem:[#allocation33_spill] sm:$0xff]  ;;  %vm3616_vm5 = vcmp.eq.s32.totalorder %v10461_v54, 1 }
 0xdec   : > { %3436 = vmin.xlane.f32.xlu0 %v3435_v3  ;;  %v3440_v20 = vshll.u32 %v3439_v56, 16  ;;  %v10473_v3 = vld [vmem:[#allocation45_spill] sm:$0xff]  ;;  %v10474_v56 = vld [vmem:[#allocation35_spill] sm:$0xff] }
 0xe5f   : > { %v3437_v17 = vpop.xlane.xlu0 %3436 }
 0xe60   : > { %v3438_v37 = vcvt.f32.s32 %v3437_v17  ;;  %v10475_v17 = vld [vmem:[#allocation46_spill] sm:$0xff] }
 0xe62   : > { %v3441_v49 = vadd.s32 %v3440_v20, %v3438_v37  ;;  %v10476_v20 = vld [vmem:[#allocation37_spill] sm:$0xff]  ;;  %v10477_v37 = vld [vmem:[#allocation47_spill] sm:$0xff] }
 0xe64   : > { %vm3442_vm6 = vcmp.lt.s32.totalorder %v3441_v49, 127 }
 0xe65   : > { %v9036_v21 = vsel %vm3442_vm6, %v3441_v49, 127 }
 0xe66   : > { %vm3444_vm7 = vcmp.eq.s32.totalorder %v10461_v54, %v9036_v21 }
 0xe67   : > { %vm6644_vm8 = vmpackc.low %vm3444_vm7, %vm3444_vm7 }
 0xe68   : > { %6645 = vmatmul.msk.bf16.vlgmr.msrb.gmra.mxu0 %vm6644_vm8, %v10452_v33  ;;  %6647 = vmatmul.msk.bf16.vlgmr.msra.gmra.mxu1 %vm6644_vm8, %v10452_v33 }
 0xe69   : > { %6649 = vmatmul.msk.bf16.vlgmr.msra.gmra.mxu2 %vm6644_vm8, %v10452_v33  ;;  %3633 = vmatpush.bf16.msrb.mxu0 %v10462_v7 }
 0xe6a   : > { %3659 = vmatpush.bf16.msra.mxu2 %v8787_v41  ;;  %3646 = vmatpush.bf16.msra.mxu1 %v10463_v62 }
 0xe6d   : > { %3634 = vmatpush.bf16.msrb.mxu0 %v10464_v47 }
 0xe6e   : > { %3660 = vmatpush.bf16.msra.mxu2 %v8798_v29  ;;  %3647 = vmatpush.bf16.msra.mxu1 %v10465_v60 }
 0xe71   : > { %3635 = vmatpush.bf16.msrb.mxu0 %v8755_v26 }
 0xe72   : > { %3661 = vmatpush.bf16.msra.mxu2 %v8807_v35  ;;  %3648 = vmatpush.bf16.msra.mxu1 %v8873_v46 }
 0xe75   : > { %3636 = vmatpush.bf16.msrb.mxu0 %v8761_v16 }
 0xe76   : > { %3662 = vmatpush.bf16.msra.mxu2 %v8818_v6  ;;  %3649 = vmatpush.bf16.msra.mxu1 %v8887_v36 }
 0xe78   : > { %3512 = vmatmul.bf16.vlgmr.msra.gmra.mxu0 %v3359_v25  ;;  %3525 = vmatmul.bf16.vlgmr.msrb.gmra.mxu1 %v3359_v25  ;;  %v10466_v25 = vld [vmem:[#allocation29_spill] sm:$0xff] }
 0xe79   : > { %3637 = vmatpush.bf16.msrb.mxu0 %v8767_v32 }
 0xe7a   : > { %3663 = vmatpush.bf16.msra.mxu2 %v8835_v39  ;;  %3650 = vmatpush.bf16.msra.mxu1 %v8896_v52 }
 0xe7d   : > { %3638 = vmatpush.bf16.msrb.mxu0 %v8773_v31 }
 0xe7e   : > { %3664 = vmatpush.bf16.msra.mxu2 %v8855_v11  ;;  %3651 = vmatpush.bf16.msra.mxu1 %v8901_v58 }
 0xe81   : > { %3639 = vmatpush.bf16.msrb.mxu0 %v8779_v48 }
 0xe82   : > { %3665 = vmatpush.bf16.msra.mxu2 %v8865_v63  ;;  %3652 = vmatpush.bf16.msra.mxu1 %v8908_v14 }
 0xe85   : > { %3640 = vmatpush.bf16.msrb.mxu0 %v8785_v44 }
 0xe86   : > { %3666 = vmatpush.bf16.msra.mxu2 %v8877_v5  ;;  %3653 = vmatpush.bf16.msra.mxu1 %v8918_v2 }
 0xe89   : > { %3685 = vmatpush.bf16.msra.mxu0 %v8794_v23 }
 0xe8a   : > { %3747 = vmatpush.bf16.msrb.mxu1 %v8963_v43 }
 0xe8d   : > { %3686 = vmatpush.bf16.msra.mxu0 %v8802_v24 }
 0xe8e   : > { %3748 = vmatpush.bf16.msrb.mxu1 %v8967_v4 }
 0xe91   : > { %3687 = vmatpush.bf16.msra.mxu0 %v10466_v25 }
 0xe92   : > { %3749 = vmatpush.bf16.msrb.mxu1 %v10467_v34 }
 0xe95   : > { %3688 = vmatpush.bf16.msra.mxu0 %v10468_v53 }
 0xe96   : > { %3750 = vmatpush.bf16.msrb.mxu1 %v10469_v57 }
 0xe99   : > { %3689 = vmatpush.bf16.msra.mxu0 %v10470_v30 }
 0xe9a   : > { %3751 = vmatpush.bf16.msrb.mxu1 %v10471_v40 }
 0xe9d   : > { %3690 = vmatpush.bf16.msra.mxu0 %v10472_v12 }
 0xe9e   : > { %3752 = vmatpush.bf16.msrb.mxu1 %v10473_v3 }
 0xea1   : > { %3691 = vmatpush.bf16.msra.mxu0 %v10474_v56 }
 0xea2   : > { %3753 = vmatpush.bf16.msrb.mxu1 %v10475_v17 }
 0xea5   : > { %3692 = vmatpush.bf16.msra.mxu0 %v10476_v20 }
 0xea6   : > { %3754 = vmatpush.bf16.msrb.mxu1 %v10477_v37 }
 0xee5   : > { %v3461_v49 = vpop.f32.mrf.mxu0  ;;  %v3474_v53 = vpop.f32.mrf.mxu1 }
 0xee6   : > { %v3530_v57 = vadd.f32 %v9033_v0, %v3461_v49 }
 0xee8   : > { %v6650_v34 = vmul.f32 -1.442695, %v3530_v57 }
 0xeea   : > { %7194 = vpow2.f32 %v6650_v34 }
 0xeec   : > { %v3487_v30 = vpop.f32.mrf.mxu2 }
 0xeed   : > { %v3463_v40 = vpop.f32.mrf.mxu0  ;;  %v3476_v25 = vpop.f32.mrf.mxu1 }
 0xef0   : > { %v7195_v12 = vpop.eup %7194 }
 0xef1   : > { %v3534_v4 = vadd.f32 1.0, %v7195_v12 }
 0xef3   : > { %7196 = vrcp.f32 %v3534_v4  ;;  %v3546_v34 = vand.u32 2147483648, %v3534_v4  ;;  %v3544_v57 = vand.u32 2147483647, %v3534_v4  ;;  %vm3540_vm9 = vweird.f32 %v3534_v4 }
 0xef4   : > { %v3489_v3 = vpop.f32.mrf.mxu2 }
 0xef5   : > { %v3513_v56 = vpop.f32.mrf.mxu0  ;;  %v3526_v24 = vpop.f32.mrf.mxu1  ;;  %v3547_v49 = vor.u32 1.1754944e-38, %v3546_v34  ;;  %vm3545_vm11 = vcmp.eq.f32.partialorder %v3544_v57, 8.507059e+37 }
 0xef6   : > { %v3550_v17 = vadd.f32 %v3513_v56, %v3474_v53 }
 0xef8   : > { %v6651_v43 = vmul.f32 -1.442695, %v3550_v17 }
 0xef9   : > { %v7197_v20 = vpop.eup %7196 }
 0xefa   : > { %7198 = vpow2.f32 %v6651_v43  ;;  %v3536_v37 = vmul.f32 %v7197_v20, %v3534_v4  ;;  %vm3541_vm1 = vweird.f32 %v7197_v20  ;;  %v3570_v43 = vadd.f32 %v9001_v13, %v3526_v24 }
 0xefb   : > { %vm3542_vm10 = vmor %vm3540_vm9, %vm3541_vm1 }
 0xefc   : > { %v3537_v2 = vsub.f32 1.0, %v3536_v37 }
 0xefd   : > { %v3515_v23 = vpop.f32.mrf.mxu0  ;;  %v3528_v5 = vpop.f32.mrf.mxu1 }
 0xefe   : > { %v3538_v0 = vmul.f32 %v7197_v20, %v3537_v2 }
 0xf00   : > { %v7199_v40 = vpop.eup %7198  ;;  %v3539_v25 = vadd.f32 %v7197_v20, %v3538_v0 }
 0xf01   : > { %v3554_v12 = vadd.f32 1.0, %v7199_v40 }
 0xf02   : > { %v3543_v3 = vsel %vm3542_vm10, %v7197_v20, %v3539_v25 }
 0xf03   : > { %7200 = vrcp.f32 %v3554_v12  ;;  %v3548_v53 = vsel %vm3545_vm11, %v3547_v49, %v3543_v3  ;;  %v3566_v37 = vand.u32 2147483648, %v3554_v12  ;;  %v3564_v14 = vand.u32 2147483647, %v3554_v12 }
 0xf04   : > { %v3571_v56 = vmul.f32 %v3570_v43, %v3548_v53  ;;  %vm3560_vm13 = vweird.f32 %v3554_v12 }
 0xf05   : > { %v3567_v20 = vor.u32 1.1754944e-38, %v3566_v37  ;;  %vm3565_vm15 = vcmp.eq.f32.partialorder %v3564_v14, 8.507059e+37 }
 0xf06   : > { %v3572_v5 = vadd.f32 %v3571_v56, %v3487_v30 }
 0xf08   : > { %7202 = vtanh.f32 %v3572_v5 }
 0xf09   : > { %v7201_v17 = vpop.eup %7200 }
 0xf0a   : > { %v3556_v23 = vmul.f32 %v7201_v17, %v3554_v12  ;;  %vm3561_vm12 = vweird.f32 %v7201_v17 }
 0xf0b   : > { %vm3562_vm14 = vmor %vm3560_vm13, %vm3561_vm12 }
 0xf0c   : > { %v3557_v2 = vsub.f32 1.0, %v3556_v23 }
 0xf0e   : > { %v3558_v44 = vmul.f32 %v7201_v17, %v3557_v2  ;;  %v7203_v40 = vpop.eup %7202 }
 0xf10   : > { %v3559_v4 = vadd.f32 %v7201_v17, %v3558_v44 }
 0xf12   : > { %v3563_v0 = vsel %vm3562_vm14, %v7201_v17, %v3559_v4 }
 0xf13   : > { %v3568_v34 = vsel %vm3565_vm15, %v3567_v20, %v3563_v0 }
 0xf14   : > { %v3574_v57 = vsub.f32 1.0, %v3568_v34  ;;  %v3576_v25 = vmul.f32 %v3568_v34, %v9007_v55 }
 0xf16   : > { %v3575_v24 = vmul.f32 %v7203_v40, %v3574_v57  ;;  %v3451_v40 = vsel %vm3448_vm4, %v9036_v21, 0  ;;  %v10478_v21 = vld [vmem:[#allocation38_spill] sm:$0xff] }
 0xf18   : > { %v9086_v3 = vadd.f32 %v3576_v25, %v3575_v24 }
 0xf1a   : > { %v9090_v30 = vpack.c.bf16 %v9086_v3, %v9086_v3 }
 0xf1c   : > { %3587 = vmatmul.bf16.vlgmr.msrb.gmra.mxu2 %v9090_v30 }
 0xf1d   : > { %3785 = vmatpush.bf16.msrb.mxu2 %v8735_v19 }
 0xf21   : > { %3786 = vmatpush.bf16.msrb.mxu2 %v8740_v18 }
 0xf25   : > { %3787 = vmatpush.bf16.msrb.mxu2 %v8753_v50 }
 0xf29   : > { %3788 = vmatpush.bf16.msrb.mxu2 %v8759_v61 }
 0xf2c   : > { %3667 = vmatmul.bf16.vlgmr.msra.gmra.mxu2 %v9090_v30 }
 0xf2d   : > { %3789 = vmatpush.bf16.msrb.mxu2 %v8765_v10 }
 0xf31   : > { %3790 = vmatpush.bf16.msrb.mxu2 %v8771_v42 }
 0xf35   : > { %3791 = vmatpush.bf16.msrb.mxu2 %v8777_v45 }
 0xf39   : > { %3792 = vmatpush.bf16.msrb.mxu2 %v8783_v1 }
 0xf3d   : > { %3837 = vmatpush.bf16.msra.mxu2 %v8790_v9 }
 0xf41   : > { %3838 = vmatpush.bf16.msra.mxu2 %v8800_v27 }
 0xf45   : > { %3839 = vmatpush.bf16.msra.mxu2 %v8809_v8 }
 0xf49   : > { %3840 = vmatpush.bf16.msra.mxu2 %v8820_v38 }
 0xf4d   : > { %3841 = vmatpush.bf16.msra.mxu2 %v8845_v15 }
 0xf51   : > { %3842 = vmatpush.bf16.msra.mxu2 %v8857_v28 }
 0xf55   : > { %3843 = vmatpush.bf16.msra.mxu2 %v8868_v59 }
 0xf59   : > { %3844 = vmatpush.bf16.msra.mxu2 %v8879_v51 }
 0xf9f   : > { %v3588_v44 = vpop.f32.mrf.mxu2 }
 0xfa0   : > { %v3589_v14 = vadd.f32 %v9030_v22, %v3588_v44  ;;  %v10479_v44 = vld [vmem:[#allocation26_spill] sm:$0xff] }
 0xfa2   : > { %3592 = vmax.xlane.f32.xlu2 %v3589_v14 }
 0xfa7   : > { %v3590_v55 = vpop.f32.mrf.mxu2 }
 0xfa8   : > { %v10482_v55 = vld [vmem:[#allocation39_spill] sm:$0xff] }
 0xfaf   : > { %v9111_v12 = vpop.f32.mrf.mxu2 }
 0xfb7   : > { %v3670_v49 = vpop.f32.mrf.mxu2 }
 0xfb8   : > { %v10483_v49 = vld [vmem:[#allocation40_spill] sm:$0xff] }
0x1015   : > { %v3593_v53 = vpop.xlane.xlu2 %3592 }
0x1016   : > { %vm3594_vm2 = vcmp.ge.f32.partialorder %v3589_v14, %v3593_v53  ;;  %v10481_v14 = vld [vmem:[#allocation27_spill] sm:$0xff]  ;;  %v10484_v53 = vld [vmem:[#allocation28_spill] sm:$0xff] }
0x1017   : > { %v3595_v43 = vsel %vm3594_vm2, %v10461_v54, 128 }
0x1018   : > { %v3597_v56 = vshra.s32 %v3595_v43, 16  ;;  %v3596_v23 = vand.u32 65535, %v3595_v43  ;;  %v10485_v43 = vld [vmem:[#allocation41_spill] sm:$0xff] }
0x101a   : > { %v3599_v17 = vcvt.s32.f32 %v3597_v56  ;;  %v3598_v2 = vcvt.s32.f32 %v3596_v23  ;;  %v10486_v56 = vld [vmem:[#allocation29_spill] sm:$0xff]  ;;  %v10488_v23 = vld [vmem:[#allocation30_spill] sm:$0xff] }
0x101c   : > { %3600 = vmin.xlane.f32.xlu1 %v3599_v17 }
0x108f   : > { %v3601_v5 = vpop.xlane.xlu1 %3600 }
0x1090   : > { %vm3602_vm3 = vcmp.eq.f32.partialorder %v3599_v17, %v3601_v5  ;;  %v3607_v4 = vcvt.f32.s32 %v3601_v5  ;;  %v10487_v17 = vld [vmem:[#allocation42_spill] sm:$0xff]  ;;  %v10489_v5 = vld [vmem:[#allocation43_spill] sm:$0xff] }
0x1091   : > { %v3603_v37 = vsel %vm3602_vm3, %v3598_v2, inf  ;;  %v10490_v2 = vld [vmem:[#allocation31_spill] sm:$0xff] }
0x1092   : > { %3604 = vmin.xlane.f32.xlu2 %v3603_v37  ;;  %v3608_v0 = vshll.u32 %v3607_v4, 16  ;;  %v10491_v37 = vld [vmem:[#allocation44_spill] sm:$0xff]  ;;  %v10492_v4 = vld [vmem:[#allocation33_spill] sm:$0xff] }
0x1105   : > { %v3605_v20 = vpop.xlane.xlu2 %3604 }
0x1106   : > { %v3606_v34 = vcvt.f32.s32 %v3605_v20  ;;  %v10493_v20 = vld [vmem:[#allocation45_spill] sm:$0xff] }
0x1108   : > { %v3609_v57 = vadd.s32 %v3608_v0, %v3606_v34  ;;  %v10494_v0 = vld [vmem:[#allocation35_spill] sm:$0xff]  ;;  %v10495_v34 = vld [vmem:[#allocation46_spill] sm:$0xff] }
0x110a   : > { %vm3610_vm6 = vcmp.lt.s32.totalorder %v3609_v57, 127 }
0x110b   : > { %v3611_v24 = vsel %vm3610_vm6, %v3609_v57, 127  ;;  %v10496_v57 = vld [vmem:[#allocation37_spill] sm:$0xff] }
0x110c   : > { %vm3612_vm7 = vcmp.eq.s32.totalorder %v10461_v54, %v3611_v24  ;;  %v9118_v25 = vsel %vm3616_vm5, %v3611_v24, %v3451_v40  ;;  %v10497_v40 = vld [vmem:[#allocation47_spill] sm:$0xff] }
0x110d   : > { %vm6653_vm8 = vmpackc.low %vm3612_vm7, %vm3612_vm7 }
0x110e   : > { %6654 = vmatmul.msk.bf16.vlgmr.msrb.gmra.mxu3 %vm6653_vm8, %v10452_v33  ;;  %6656 = vmatmul.msk.bf16.vlgmr.msrb.gmra.mxu0 %vm6653_vm8, %v10452_v33 }
0x110f   : > { %6658 = vmatmul.msk.bf16.vlgmr.msra.gmra.mxu1 %vm6653_vm8, %v10452_v33  ;;  %3798 = vmatpush.bf16.msrb.mxu3 %v10462_v7 }
0x1110   : > { %3824 = vmatpush.bf16.msra.mxu1 %v8787_v41  ;;  %3811 = vmatpush.bf16.msrb.mxu0 %v10463_v62 }
0x1113   : > { %3799 = vmatpush.bf16.msrb.mxu3 %v10464_v47 }
0x1114   : > { %3825 = vmatpush.bf16.msra.mxu1 %v8798_v29  ;;  %3812 = vmatpush.bf16.msrb.mxu0 %v10465_v60 }
0x1117   : > { %3800 = vmatpush.bf16.msrb.mxu3 %v8755_v26 }
0x1118   : > { %3826 = vmatpush.bf16.msra.mxu1 %v8807_v35  ;;  %3813 = vmatpush.bf16.msrb.mxu0 %v8873_v46 }
0x111b   : > { %3801 = vmatpush.bf16.msrb.mxu3 %v8761_v16 }
0x111c   : > { %3827 = vmatpush.bf16.msra.mxu1 %v8818_v6  ;;  %3814 = vmatpush.bf16.msrb.mxu0 %v8887_v36 }
0x111e   : > { %3680 = vmatmul.bf16.vlgmr.msra.gmra.mxu3 %v9090_v30  ;;  %3693 = vmatmul.bf16.vlgmr.msra.gmra.mxu0 %v9090_v30  ;;  %v10480_v30 = vld [vmem:[#allocation36_spill] sm:$0xff] }
0x111f   : > { %3802 = vmatpush.bf16.msrb.mxu3 %v8767_v32 }
0x1120   : > { %3828 = vmatpush.bf16.msra.mxu1 %v8835_v39  ;;  %3815 = vmatpush.bf16.msrb.mxu0 %v8896_v52 }
0x1123   : > { %3803 = vmatpush.bf16.msrb.mxu3 %v8773_v31 }
0x1124   : > { %3829 = vmatpush.bf16.msra.mxu1 %v8855_v11  ;;  %3816 = vmatpush.bf16.msrb.mxu0 %v8901_v58 }
0x1127   : > { %3804 = vmatpush.bf16.msrb.mxu3 %v8779_v48 }
0x1128   : > { %3830 = vmatpush.bf16.msra.mxu1 %v8865_v63  ;;  %3817 = vmatpush.bf16.msrb.mxu0 %v10478_v21 }
0x112b   : > { %3805 = vmatpush.bf16.msrb.mxu3 %v10479_v44 }
0x112c   : > { %3831 = vmatpush.bf16.msra.mxu1 %v10480_v30  ;;  %3818 = vmatpush.bf16.msrb.mxu0 %v10482_v55 }
0x112f   : > { %3850 = vmatpush.bf16.msra.mxu3 %v10481_v14 }
0x1130   : > { %3912 = vmatpush.bf16.msra.mxu0 %v10483_v49 }
0x1133   : > { %3851 = vmatpush.bf16.msra.mxu3 %v10484_v53 }
0x1134   : > { %3913 = vmatpush.bf16.msra.mxu0 %v10485_v43 }
0x1137   : > { %3852 = vmatpush.bf16.msra.mxu3 %v10486_v56 }
0x1138   : > { %3914 = vmatpush.bf16.msra.mxu0 %v10487_v17 }
0x113b   : > { %3853 = vmatpush.bf16.msra.mxu3 %v10488_v23 }
0x113c   : > { %3915 = vmatpush.bf16.msra.mxu0 %v10489_v5 }
0x113f   : > { %3854 = vmatpush.bf16.msra.mxu3 %v10490_v2 }
0x1140   : > { %3916 = vmatpush.bf16.msra.mxu0 %v10491_v37 }
0x1143   : > { %3855 = vmatpush.bf16.msra.mxu3 %v10492_v4 }
0x1144   : > { %3917 = vmatpush.bf16.msra.mxu0 %v10493_v20 }
0x1147   : > { %3856 = vmatpush.bf16.msra.mxu3 %v10494_v0 }
0x1148   : > { %3918 = vmatpush.bf16.msra.mxu0 %v10495_v34 }
0x114b   : > { %3857 = vmatpush.bf16.msra.mxu3 %v10496_v57 }
0x114c   : > { %3919 = vmatpush.bf16.msra.mxu0 %v10497_v40 }
0x118b   : > { %v3642_v24 = vpop.f32.mrf.mxu0 }
0x118c   : > { %v3655_v23 = vpop.f32.mrf.mxu1 }
0x1191   : > { %v3629_v17 = vpop.f32.mrf.mxu3 }
0x1192   : > { %v3698_v5 = vadd.f32 %v9111_v12, %v3629_v17 }
0x1193   : > { %v3644_v2 = vpop.f32.mrf.mxu0 }
0x1194   : > { %v6659_v56 = vmul.f32 -1.442695, %v3698_v5  ;;  %v3657_v37 = vpop.f32.mrf.mxu1 }
0x1196   : > { %7204 = vpow2.f32 %v6659_v56 }
0x1199   : > { %v3631_v4 = vpop.f32.mrf.mxu3 }
0x119b   : > { %v3694_v43 = vpop.f32.mrf.mxu0 }
0x119c   : > { %v7205_v20 = vpop.eup %7204 }
0x119d   : > { %v3702_v53 = vadd.f32 1.0, %v7205_v20  ;;  %v3738_v20 = vadd.f32 %v9001_v13, %v3694_v43 }
0x119f   : > { %7206 = vrcp.f32 %v3702_v53  ;;  %v3714_v12 = vand.u32 2147483648, %v3702_v53  ;;  %v3712_v17 = vand.u32 2147483647, %v3702_v53  ;;  %vm3708_vm9 = vweird.f32 %v3702_v53 }
0x11a1   : > { %v3681_v0 = vpop.f32.mrf.mxu3  ;;  %v3715_v4 = vor.u32 1.1754944e-38, %v3714_v12  ;;  %vm3713_vm11 = vcmp.eq.f32.partialorder %v3712_v17, 8.507059e+37 }
0x11a2   : > { %v3718_v34 = vadd.f32 %v3681_v0, %v3642_v24 }
0x11a3   : > { %v3696_v49 = vpop.f32.mrf.mxu0 }
0x11a4   : > { %v6660_v57 = vmul.f32 -1.442695, %v3718_v34 }
0x11a5   : > { %v7207_v55 = vpop.eup %7206 }
0x11a6   : > { %v3704_v40 = vmul.f32 %v7207_v55, %v3702_v53  ;;  %7208 = vpow2.f32 %v6660_v57  ;;  %vm3709_vm1 = vweird.f32 %v7207_v55 }
0x11a7   : > { %vm3710_vm10 = vmor %vm3708_vm9, %vm3709_vm1 }
0x11a8   : > { %v3705_v14 = vsub.f32 1.0, %v3704_v40 }
0x11a9   : > { %v3683_v30 = vpop.f32.mrf.mxu3 }
0x11aa   : > { %v3706_v44 = vmul.f32 %v7207_v55, %v3705_v14 }
0x11ac   : > { %v7209_v5 = vpop.eup %7208  ;;  %v3707_v56 = vadd.f32 %v7207_v55, %v3706_v44 }
0x11ad   : > { %v3722_v2 = vadd.f32 1.0, %v7209_v5 }
0x11ae   : > { %v3711_v37 = vsel %vm3710_vm10, %v7207_v55, %v3707_v56 }
0x11af   : > { %7210 = vrcp.f32 %v3722_v2  ;;  %v3716_v49 = vsel %vm3713_vm11, %v3715_v4, %v3711_v37  ;;  %v3734_v40 = vand.u32 2147483648, %v3722_v2  ;;  %v3732_v21 = vand.u32 2147483647, %v3722_v2 }
0x11b0   : > { %v3739_v0 = vmul.f32 %v3738_v20, %v3716_v49  ;;  %vm3728_vm13 = vweird.f32 %v3722_v2 }
0x11b1   : > { %v3735_v55 = vor.u32 1.1754944e-38, %v3734_v40  ;;  %vm3733_vm15 = vcmp.eq.f32.partialorder %v3732_v21, 8.507059e+37 }
0x11b2   : > { %v3740_v30 = vadd.f32 %v3739_v0, %v3655_v23 }
0x11b4   : > { %7212 = vtanh.f32 %v3740_v30 }
0x11b5   : > { %v7211_v34 = vpop.eup %7210 }
0x11b6   : > { %v3724_v57 = vmul.f32 %v7211_v34, %v3722_v2  ;;  %vm3729_vm12 = vweird.f32 %v7211_v34 }
0x11b7   : > { %vm3730_vm14 = vmor %vm3728_vm13, %vm3729_vm12 }
0x11b8   : > { %v3725_v14 = vsub.f32 1.0, %v3724_v57 }
0x11ba   : > { %v3726_v24 = vmul.f32 %v7211_v34, %v3725_v14  ;;  %v7213_v5 = vpop.eup %7212 }
0x11bc   : > { %v3727_v44 = vadd.f32 %v7211_v34, %v3726_v24 }
0x11be   : > { %v3731_v53 = vsel %vm3730_vm14, %v7211_v34, %v3727_v44 }
0x11bf   : > { %v3736_v12 = vsel %vm3733_vm15, %v3735_v55, %v3731_v53  ;;  %vm3949_vm15 = vcmp.eq.s32.totalorder %v10461_v54, 3 }
0x11c0   : > { %v3742_v17 = vsub.f32 1.0, %v3736_v12  ;;  %v3744_v56 = vmul.f32 %v3736_v12, %v9086_v3 }
0x11c2   : > { %v3743_v43 = vmul.f32 %v7213_v5, %v3742_v17 }
0x11c4   : > { %v9168_v37 = vadd.f32 %v3744_v56, %v3743_v43  ;;  %v10499_v56 = vld [vmem:[#allocation26_spill] sm:$0xff] }
0x11c6   : > { %v3746_v23 = vpack.c.bf16 %v9168_v37, %v9168_v37 }
0x11c8   : > { %3755 = vmatmul.bf16.vlgmr.msrb.gmra.mxu1 %v3746_v23 }
0x11c9   : > { %3953 = vmatpush.bf16.msrb.mxu1 %v8735_v19 }
0x11cd   : > { %3954 = vmatpush.bf16.msrb.mxu1 %v8740_v18 }
0x11d1   : > { %3955 = vmatpush.bf16.msrb.mxu1 %v8753_v50 }
0x11d5   : > { %3956 = vmatpush.bf16.msrb.mxu1 %v8759_v61 }
0x11d8   : > { %3832 = vmatmul.bf16.vlgmr.msra.gmra.mxu1 %v3746_v23 }
0x11d9   : > { %3957 = vmatpush.bf16.msrb.mxu1 %v8765_v10 }
0x11dd   : > { %3958 = vmatpush.bf16.msrb.mxu1 %v8771_v42 }
0x11e1   : > { %3959 = vmatpush.bf16.msrb.mxu1 %v8777_v45 }
0x11e5   : > { %3960 = vmatpush.bf16.msrb.mxu1 %v8783_v1 }
0x11e9   : > { %4005 = vmatpush.bf16.msra.mxu1 %v8790_v9 }
0x11ed   : > { %4006 = vmatpush.bf16.msra.mxu1 %v8800_v27 }
0x11f1   : > { %4007 = vmatpush.bf16.msra.mxu1 %v8809_v8 }
0x11f5   : > { %4008 = vmatpush.bf16.msra.mxu1 %v8820_v38 }
0x11f9   : > { %4009 = vmatpush.bf16.msra.mxu1 %v8845_v15 }
0x11fd   : > { %4010 = vmatpush.bf16.msra.mxu1 %v8857_v28 }
0x1201   : > { %4011 = vmatpush.bf16.msra.mxu1 %v8868_v59 }
0x1205   : > { %4012 = vmatpush.bf16.msra.mxu1 %v8879_v51 }
0x1245   : > { %v3756_v3 = vpop.f32.mrf.mxu1 }
0x1246   : > { %v3757_v21 = vadd.f32 %v9030_v22, %v3756_v3  ;;  %v10501_v3 = vld [vmem:[#allocation27_spill] sm:$0xff] }
0x1248   : > { %3760 = vmax.xlane.f32.xlu0 %v3757_v21 }
0x124d   : > { %v3758_v2 = vpop.f32.mrf.mxu1 }
0x124e   : > { %v10503_v2 = vld [vmem:[#allocation40_spill] sm:$0xff] }
0x1255   : > { %v9189_v4 = vpop.f32.mrf.mxu1 }
0x125d   : > { %v3835_v49 = vpop.f32.mrf.mxu1 }
0x125e   : > { %v10504_v49 = vld [vmem:[#allocation28_spill] sm:$0xff] }
0x12bb   : > { %v3761_v20 = vpop.xlane.xlu0 %3760 }
0x12bc   : > { %vm3762_vm2 = vcmp.ge.f32.partialorder %v3757_v21, %v3761_v20  ;;  %v10502_v21 = vld [vmem:[#allocation39_spill] sm:$0xff]  ;;  %v10505_v20 = vld [vmem:[#allocation41_spill] sm:$0xff] }
0x12bd   : > { %v3763_v0 = vsel %vm3762_vm2, %v10461_v54, 128 }
0x12be   : > { %v3765_v34 = vshra.s32 %v3763_v0, 16  ;;  %v3764_v30 = vand.u32 65535, %v3763_v0  ;;  %v10506_v0 = vld [vmem:[#allocation29_spill] sm:$0xff] }
0x12c0   : > { %v3767_v57 = vcvt.s32.f32 %v3765_v34  ;;  %v3766_v40 = vcvt.s32.f32 %v3764_v30  ;;  %v10507_v34 = vld [vmem:[#allocation42_spill] sm:$0xff]  ;;  %v10509_v30 = vld [vmem:[#allocation43_spill] sm:$0xff] }
0x12c2   : > { %3768 = vmin.xlane.f32.xlu1 %v3767_v57 }
0x1335   : > { %v3769_v14 = vpop.xlane.xlu1 %3768 }
0x1336   : > { %vm3770_vm3 = vcmp.eq.f32.partialorder %v3767_v57, %v3769_v14  ;;  %v3775_v44 = vcvt.f32.s32 %v3769_v14  ;;  %v10508_v57 = vld [vmem:[#allocation30_spill] sm:$0xff]  ;;  %v10510_v14 = vld [vmem:[#allocation31_spill] sm:$0xff] }
0x1337   : > { %v3771_v24 = vsel %vm3770_vm3, %v3766_v40, inf  ;;  %v10511_v40 = vld [vmem:[#allocation44_spill] sm:$0xff] }
0x1338   : > { %3772 = vmin.xlane.f32.xlu2 %v3771_v24  ;;  %v3776_v53 = vshll.u32 %v3775_v44, 16  ;;  %v10512_v24 = vld [vmem:[#allocation33_spill] sm:$0xff] }
0x1339   : > { %v10513_v44 = vld [vmem:[#allocation45_spill] sm:$0xff] }
0x13ab   : > { %v3773_v55 = vpop.xlane.xlu2 %3772 }
0x13ac   : > { %v3774_v12 = vcvt.f32.s32 %v3773_v55  ;;  %v10514_v55 = vld [vmem:[#allocation35_spill] sm:$0xff] }
0x13ae   : > { %v3777_v17 = vadd.s32 %v3776_v53, %v3774_v12  ;;  %v10515_v53 = vld [vmem:[#allocation46_spill] sm:$0xff]  ;;  %v10516_v12 = vld [vmem:[#allocation37_spill] sm:$0xff] }
0x13b0   : > { %vm3778_vm4 = vcmp.lt.s32.totalorder %v3777_v17, 127 }
0x13b1   : > { %v3779_v5 = vsel %vm3778_vm4, %v3777_v17, 127  ;;  %v10517_v17 = vld [vmem:[#allocation47_spill] sm:$0xff] }
0x13b2   : > { %vm3780_vm5 = vcmp.eq.s32.totalorder %v10461_v54, %v3779_v5  ;;  %v9196_v43 = vsel %vm2967_vm0, %v3779_v5, %v9118_v25  ;;  %v10498_v25 = vld [vmem:[#allocation38_spill] sm:$0xff] }
0x13b3   : > { %vm6662_vm6 = vmpackc.low %vm3780_vm5, %vm3780_vm5 }
0x13b4   : > { %6663 = vmatmul.msk.bf16.vlgmr.msrb.gmra.mxu2 %vm6662_vm6, %v10452_v33  ;;  %6665 = vmatmul.msk.bf16.vlgmr.msrb.gmra.mxu3 %vm6662_vm6, %v10452_v33 }
0x13b5   : > { %6667 = vmatmul.msk.bf16.vlgmr.msrb.gmra.mxu0 %vm6662_vm6, %v10452_v33  ;;  %3966 = vmatpush.bf16.msrb.mxu2 %v10462_v7 }
0x13b6   : > { %3992 = vmatpush.bf16.msrb.mxu0 %v8787_v41  ;;  %3979 = vmatpush.bf16.msrb.mxu3 %v10463_v62 }
0x13b9   : > { %3967 = vmatpush.bf16.msrb.mxu2 %v10464_v47 }
0x13ba   : > { %3993 = vmatpush.bf16.msrb.mxu0 %v8798_v29  ;;  %3980 = vmatpush.bf16.msrb.mxu3 %v10465_v60 }
0x13bd   : > { %3968 = vmatpush.bf16.msrb.mxu2 %v8755_v26 }
0x13be   : > { %3994 = vmatpush.bf16.msrb.mxu0 %v8807_v35  ;;  %3981 = vmatpush.bf16.msrb.mxu3 %v8873_v46 }
0x13c1   : > { %3969 = vmatpush.bf16.msrb.mxu2 %v8761_v16 }
0x13c2   : > { %3995 = vmatpush.bf16.msrb.mxu0 %v8818_v6  ;;  %3982 = vmatpush.bf16.msrb.mxu3 %v8887_v36 }
0x13c4   : > { %3845 = vmatmul.bf16.vlgmr.msra.gmra.mxu2 %v3746_v23  ;;  %3858 = vmatmul.bf16.vlgmr.msra.gmra.mxu3 %v3746_v23  ;;  %v10500_v23 = vld [vmem:[#allocation36_spill] sm:$0xff] }
0x13c5   : > { %3970 = vmatpush.bf16.msrb.mxu2 %v8767_v32 }
0x13c6   : > { %3996 = vmatpush.bf16.msrb.mxu0 %v8835_v39  ;;  %3983 = vmatpush.bf16.msrb.mxu3 %v8896_v52 }
0x13c9   : > { %3971 = vmatpush.bf16.msrb.mxu2 %v8773_v31 }
0x13ca   : > { %3997 = vmatpush.bf16.msrb.mxu0 %v8855_v11  ;;  %3984 = vmatpush.bf16.msrb.mxu3 %v8901_v58 }
0x13cd   : > { %3972 = vmatpush.bf16.msrb.mxu2 %v8779_v48 }
0x13ce   : > { %3998 = vmatpush.bf16.msrb.mxu0 %v8865_v63  ;;  %3985 = vmatpush.bf16.msrb.mxu3 %v10498_v25 }
0x13d1   : > { %3973 = vmatpush.bf16.msrb.mxu2 %v10499_v56 }
0x13d2   : > { %3999 = vmatpush.bf16.msrb.mxu0 %v10500_v23  ;;  %3986 = vmatpush.bf16.msrb.mxu3 %v10502_v21 }
0x13d5   : > { %4018 = vmatpush.bf16.msra.mxu2 %v10501_v3 }
0x13d6   : > { %4080 = vmatpush.bf16.msra.mxu3 %v10503_v2 }
0x13d9   : > { %4019 = vmatpush.bf16.msra.mxu2 %v10504_v49 }
0x13da   : > { %4081 = vmatpush.bf16.msra.mxu3 %v10505_v20 }
0x13dd   : > { %4020 = vmatpush.bf16.msra.mxu2 %v10506_v0 }
0x13de   : > { %4082 = vmatpush.bf16.msra.mxu3 %v10507_v34 }
0x13e1   : > { %4021 = vmatpush.bf16.msra.mxu2 %v10508_v57 }
0x13e2   : > { %4083 = vmatpush.bf16.msra.mxu3 %v10509_v30 }
0x13e5   : > { %4022 = vmatpush.bf16.msra.mxu2 %v10510_v14 }
0x13e6   : > { %4084 = vmatpush.bf16.msra.mxu3 %v10511_v40 }
0x13e9   : > { %4023 = vmatpush.bf16.msra.mxu2 %v10512_v24 }
0x13ea   : > { %4085 = vmatpush.bf16.msra.mxu3 %v10513_v44 }
0x13ed   : > { %4024 = vmatpush.bf16.msra.mxu2 %v10514_v55 }
0x13ee   : > { %4086 = vmatpush.bf16.msra.mxu3 %v10515_v53 }
0x13f1   : > { %4025 = vmatpush.bf16.msra.mxu2 %v10516_v12 }
0x13f2   : > { %4087 = vmatpush.bf16.msra.mxu3 %v10517_v17 }
0x1432   : > { %v3820_v5 = vpop.f32.mrf.mxu0 }
0x1437   : > { %v3794_v2 = vpop.f32.mrf.mxu2  ;;  %v3807_v20 = vpop.f32.mrf.mxu3 }
0x1438   : > { %v3863_v34 = vadd.f32 %v9189_v4, %v3794_v2 }
0x143a   : > { %v6668_v30 = vmul.f32 -1.442695, %v3863_v34  ;;  %v3822_v14 = vpop.f32.mrf.mxu0 }
0x143c   : > { %7214 = vpow2.f32 %v6668_v30 }
0x143f   : > { %v3796_v40 = vpop.f32.mrf.mxu2  ;;  %v3809_v24 = vpop.f32.mrf.mxu3 }
0x1442   : > { %v7215_v57 = vpop.eup %7214 }
0x1443   : > { %v3867_v44 = vadd.f32 1.0, %v7215_v57 }
0x1445   : > { %7216 = vrcp.f32 %v3867_v44  ;;  %v3879_v4 = vand.u32 2147483648, %v3867_v44  ;;  %v3877_v14 = vand.u32 2147483647, %v3867_v44  ;;  %vm3873_vm7 = vweird.f32 %v3867_v44 }
0x1447   : > { %v3846_v55 = vpop.f32.mrf.mxu2  ;;  %v3859_v0 = vpop.f32.mrf.mxu3  ;;  %v3880_v30 = vor.u32 1.1754944e-38, %v3879_v4  ;;  %vm3878_vm1 = vcmp.eq.f32.partialorder %v3877_v14, 8.507059e+37 }
0x1448   : > { %v3883_v53 = vadd.f32 %v3846_v55, %v3807_v20 }
0x144a   : > { %v6669_v49 = vmul.f32 -1.442695, %v3883_v53 }
0x144b   : > { %v7217_v12 = vpop.eup %7216 }
0x144c   : > { %7218 = vpow2.f32 %v6669_v49  ;;  %v3869_v17 = vmul.f32 %v7217_v12, %v3867_v44  ;;  %vm3874_vm0 = vweird.f32 %v7217_v12  ;;  %v3903_v49 = vadd.f32 %v9001_v13, %v3859_v0 }
0x144d   : > { %vm3875_vm8 = vmor %vm3873_vm7, %vm3874_vm0 }
0x144e   : > { %v3870_v21 = vsub.f32 1.0, %v3869_v17 }
0x144f   : > { %v3848_v3 = vpop.f32.mrf.mxu2  ;;  %v3861_v23 = vpop.f32.mrf.mxu3 }
0x1450   : > { %v3871_v56 = vmul.f32 %v7217_v12, %v3870_v21 }
0x1452   : > { %v7219_v2 = vpop.eup %7218  ;;  %v3872_v34 = vadd.f32 %v7217_v12, %v3871_v56 }
0x1453   : > { %v3887_v24 = vadd.f32 1.0, %v7219_v2 }
0x1454   : > { %v3876_v57 = vsel %vm3875_vm8, %v7217_v12, %v3872_v34 }
0x1455   : > { %7220 = vrcp.f32 %v3887_v24  ;;  %v3881_v55 = vsel %vm3878_vm1, %v3880_v30, %v3876_v57  ;;  %v3899_v53 = vand.u32 2147483648, %v3887_v24  ;;  %v3897_v25 = vand.u32 2147483647, %v3887_v24 }
0x1456   : > { %v3904_v20 = vmul.f32 %v3903_v49, %v3881_v55  ;;  %vm3893_vm10 = vweird.f32 %v3887_v24 }
0x1457   : > { %v3900_v12 = vor.u32 1.1754944e-38, %v3899_v53  ;;  %vm3898_vm12 = vcmp.eq.f32.partialorder %v3897_v25, 8.507059e+37 }
0x1458   : > { %v3905_v23 = vadd.f32 %v3904_v20, %v3820_v5 }
0x145a   : > { %7222 = vtanh.f32 %v3905_v23 }
0x145b   : > { %v7221_v40 = vpop.eup %7220 }
0x145c   : > { %v3889_v3 = vmul.f32 %v7221_v40, %v3887_v24  ;;  %vm3894_vm9 = vweird.f32 %v7221_v40 }
0x145d   : > { %vm3895_vm11 = vmor %vm3893_vm10, %vm3894_vm9 }
0x145e   : > { %v3890_v21 = vsub.f32 1.0, %v3889_v3 }
0x1460   : > { %v3891_v17 = vmul.f32 %v7221_v40, %v3890_v21  ;;  %v7223_v2 = vpop.eup %7222 }
0x1462   : > { %v3892_v56 = vadd.f32 %v7221_v40, %v3891_v17 }
0x1464   : > { %v3896_v44 = vsel %vm3895_vm11, %v7221_v40, %v3892_v56 }
0x1465   : > { %v3901_v4 = vsel %vm3898_vm12, %v3900_v12, %v3896_v44 }
0x1466   : > { %v3907_v14 = vsub.f32 1.0, %v3901_v4  ;;  %v3909_v0 = vmul.f32 %v3901_v4, %v9168_v37 }
0x1468   : > { %v3908_v13 = vmul.f32 %v7223_v2, %v3907_v14  ;;  %v10519_v2 = vld [vmem:[#allocation26_spill] sm:$0xff] }
0x146a   : > { %v9244_v34 = vadd.f32 %v3909_v0, %v3908_v13  ;;  %v10520_v13 = vld [vmem:[#allocation36_spill] sm:$0xff]  ;;  %v10521_v0 = vld [vmem:[#allocation27_spill] sm:$0xff] }
0x146c   : > { %v9248_v5 = vpack.c.bf16 %v9244_v34, %v9244_v34 }
0x146e   : > { %3920 = vmatmul.bf16.vlgmr.msra.gmra.mxu0 %v9248_v5 }
0x146f   : > { %4121 = vmatpush.bf16.msra.mxu0 %v8735_v19 }
0x1473   : > { %4122 = vmatpush.bf16.msra.mxu0 %v8740_v18 }
0x1477   : > { %4123 = vmatpush.bf16.msra.mxu0 %v8753_v50 }
0x147b   : > { %4124 = vmatpush.bf16.msra.mxu0 %v8759_v61 }
0x147e   : > { %4000 = vmatmul.bf16.vlgmr.msrb.gmra.mxu0 %v9248_v5 }
0x147f   : > { %4125 = vmatpush.bf16.msra.mxu0 %v8765_v10 }
0x1483   : > { %4126 = vmatpush.bf16.msra.mxu0 %v8771_v42 }
0x1487   : > { %4127 = vmatpush.bf16.msra.mxu0 %v8777_v45 }
0x148b   : > { %4128 = vmatpush.bf16.msra.mxu0 %v8783_v1 }
0x148f   : > { %4173 = vmatpush.bf16.msrb.mxu0 %v8790_v9 }
0x1493   : > { %4174 = vmatpush.bf16.msrb.mxu0 %v8800_v27 }
0x1497   : > { %4175 = vmatpush.bf16.msrb.mxu0 %v8809_v8 }
0x149b   : > { %4176 = vmatpush.bf16.msrb.mxu0 %v8820_v38 }
0x149f   : > { %4177 = vmatpush.bf16.msrb.mxu0 %v8845_v15 }
0x14a3   : > { %4178 = vmatpush.bf16.msrb.mxu0 %v8857_v28 }
0x14a7   : > { %4179 = vmatpush.bf16.msrb.mxu0 %v8868_v59 }
0x14ab   : > { %4180 = vmatpush.bf16.msrb.mxu0 %v8879_v51 }
0x14eb   : > { %v3921_v37 = vpop.f32.mrf.mxu0 }
0x14ec   : > { %v3922_v25 = vadd.f32 %v9030_v22, %v3921_v37  ;;  %v9307_v37 = vld [vmem:[#allocation13 + $0x38] sm:$0xff] }
0x14ed   : > { %10523 = vst [vmem:[#allocation23_spill] sm:$0xff] %v9307_v37 }
0x14ee   : > { %3925 = vmax.xlane.f32.xlu0 %v3922_v25 }
0x14f3   : > { %v3923_v24 = vpop.f32.mrf.mxu0 }
0x14f4   : > { %v9311_v24 = vld [vmem:[#allocation13 + $0x30] sm:$0xff] }
0x14f5   : > { %10525 = vst [vmem:[#allocation24_spill] sm:$0xff] %v9311_v24 }
0x14fb   : > { %v9269_v57 = vpop.f32.mrf.mxu0 }
0x1503   : > { %v4003_v30 = vpop.f32.mrf.mxu0 }
0x1504   : > { %v10526_v30 = vld [vmem:[#allocation29_spill] sm:$0xff] }
0x1561   : > { %v3926_v55 = vpop.xlane.xlu0 %3925 }
0x1562   : > { %vm3927_vm13 = vcmp.ge.f32.partialorder %v3922_v25, %v3926_v55  ;;  %v10524_v25 = vld [vmem:[#allocation28_spill] sm:$0xff] }
0x1563   : > { %v3928_v49 = vsel %vm3927_vm13, %v10461_v54, 128  ;;  %v9315_v55 = vld [vmem:[#allocation13 + $0x28] sm:$0xff]  ;;  %vm4117_vm13 = vcmp.eq.s32.totalorder %v10461_v54, 4 }
0x1564   : > { %v3930_v20 = vshra.s32 %v3928_v49, 16  ;;  %v3929_v3 = vand.u32 65535, %v3928_v49  ;;  %10527 = vst [vmem:[#allocation32_spill] sm:$0xff] %v9315_v55  ;;  %v10528_v49 = vld [vmem:[#allocation30_spill] sm:$0xff] }
0x1566   : > { %v3932_v40 = vcvt.s32.f32 %v3930_v20  ;;  %v3931_v21 = vcvt.s32.f32 %v3929_v3  ;;  %v9319_v20 = vld [vmem:[#allocation13 + $0x20] sm:$0xff]  ;;  %v9323_v3 = vld [vmem:[#allocation13 + $0x18] sm:$0xff] }
0x1567   : > { %10529 = vst [vmem:[#allocation25_spill] sm:$0xff] %v9319_v20 }
0x1568   : > { %3933 = vmin.xlane.f32.xlu1 %v3932_v40  ;;  %10531 = vst [vmem:[#allocation34_spill] sm:$0xff] %v9323_v3 }
0x15db   : > { %v3934_v23 = vpop.xlane.xlu1 %3933 }
0x15dc   : > { %vm3935_vm14 = vcmp.eq.f32.partialorder %v3932_v40, %v3934_v23  ;;  %v3940_v17 = vcvt.f32.s32 %v3934_v23  ;;  %v10530_v40 = vld [vmem:[#allocation31_spill] sm:$0xff]  ;;  %v10532_v23 = vld [vmem:[#allocation33_spill] sm:$0xff] }
0x15dd   : > { %v3936_v53 = vsel %vm3935_vm14, %v3931_v21, inf  ;;  %v9327_v21 = vld [vmem:[#allocation13 + $0x10] sm:$0xff] }
0x15de   : > { %3937 = vmin.xlane.f32.xlu2 %v3936_v53  ;;  %v3941_v56 = vshll.u32 %v3940_v17, 16  ;;  %10533 = vst [vmem:[#allocation40_spill] sm:$0xff] %v9327_v21  ;;  %v10534_v53 = vld [vmem:[#allocation35_spill] sm:$0xff]  ;;  %v9331_v17 = vld [vmem:[#allocation13 + $0x8] sm:$0xff] }
0x15df   : > { %10535 = vst [vmem:[#allocation41_spill] sm:$0xff] %v9331_v17 }
0x1651   : > { %v3938_v22 = vpop.xlane.xlu2 %3937 }
0x1652   : > { %v3939_v12 = vcvt.f32.s32 %v3938_v22  ;;  %v10536_v22 = vld [vmem:[#allocation37_spill] sm:$0xff] }
0x1654   : > { %v3942_v44 = vadd.s32 %v3941_v56, %v3939_v12  ;;  %v9335_v56 = vld [vmem:[#allocation13] sm:$0xff] }
0x1655   : > { %10537 = vst [vmem:[#allocation42_spill] sm:$0xff] %v9335_v56 }
0x1656   : > { %vm3943_vm2 = vcmp.lt.s32.totalorder %v3942_v44, 127 }
0x1657   : > { %v3944_v4 = vsel %vm3943_vm2, %v3942_v44, 127 }
0x1658   : > { %vm3945_vm3 = vcmp.eq.s32.totalorder %v10461_v54, %v3944_v4  ;;  %v9275_v14 = vsel %vm3949_vm15, %v3944_v4, %v9196_v43  ;;  %v10518_v43 = vld [vmem:[#allocation38_spill] sm:$0xff] }
0x1659   : > { %vm6671_vm4 = vmpackc.low %vm3945_vm3, %vm3945_vm3 }
0x165a   : > { %6672 = vmatmul.msk.bf16.vlgmr.msrb.gmra.mxu1 %vm6671_vm4, %v10452_v33  ;;  %6674 = vmatmul.msk.bf16.vlgmr.msrb.gmra.mxu2 %vm6671_vm4, %v10452_v33 }
0x165b   : > { %6676 = vmatmul.msk.bf16.vlgmr.msrb.gmra.mxu3 %vm6671_vm4, %v10452_v33  ;;  %4134 = vmatpush.bf16.msrb.mxu1 %v10462_v7 }
0x165c   : > { %4160 = vmatpush.bf16.msrb.mxu3 %v8787_v41  ;;  %4147 = vmatpush.bf16.msrb.mxu2 %v10463_v62 }
0x165f   : > { %4135 = vmatpush.bf16.msrb.mxu1 %v10464_v47 }
0x1660   : > { %4161 = vmatpush.bf16.msrb.mxu3 %v8798_v29  ;;  %4148 = vmatpush.bf16.msrb.mxu2 %v10465_v60 }
0x1663   : > { %4136 = vmatpush.bf16.msrb.mxu1 %v8755_v26 }
0x1664   : > { %4162 = vmatpush.bf16.msrb.mxu3 %v8807_v35  ;;  %4149 = vmatpush.bf16.msrb.mxu2 %v8873_v46 }
0x1667   : > { %4137 = vmatpush.bf16.msrb.mxu1 %v8761_v16 }
0x1668   : > { %4163 = vmatpush.bf16.msrb.mxu3 %v8818_v6  ;;  %4150 = vmatpush.bf16.msrb.mxu2 %v8887_v36 }
0x166a   : > { %4013 = vmatmul.bf16.vlgmr.msra.gmra.mxu1 %v9248_v5  ;;  %4026 = vmatmul.bf16.vlgmr.msra.gmra.mxu2 %v9248_v5  ;;  %v10522_v5 = vld [vmem:[#allocation39_spill] sm:$0xff] }
0x166b   : > { %4138 = vmatpush.bf16.msrb.mxu1 %v8767_v32 }
0x166c   : > { %4164 = vmatpush.bf16.msrb.mxu3 %v8835_v39  ;;  %4151 = vmatpush.bf16.msrb.mxu2 %v8896_v52 }
0x166f   : > { %4139 = vmatpush.bf16.msrb.mxu1 %v8773_v31 }
0x1670   : > { %4165 = vmatpush.bf16.msrb.mxu3 %v8855_v11  ;;  %4152 = vmatpush.bf16.msrb.mxu2 %v8901_v58 }
0x1673   : > { %4140 = vmatpush.bf16.msrb.mxu1 %v8779_v48 }
0x1674   : > { %4166 = vmatpush.bf16.msrb.mxu3 %v8865_v63  ;;  %4153 = vmatpush.bf16.msrb.mxu2 %v10518_v43 }
0x1677   : > { %4141 = vmatpush.bf16.msrb.mxu1 %v10519_v2 }
0x1678   : > { %4167 = vmatpush.bf16.msrb.mxu3 %v10520_v13  ;;  %4154 = vmatpush.bf16.msrb.mxu2 %v10522_v5 }
0x167b   : > { %4186 = vmatpush.bf16.msra.mxu1 %v10521_v0 }
0x167c   : > { %4248 = vmatpush.bf16.msra.mxu2 %v9307_v37 }
0x167f   : > { %4187 = vmatpush.bf16.msra.mxu1 %v10524_v25 }
0x1680   : > { %4249 = vmatpush.bf16.msra.mxu2 %v9311_v24 }
0x1683   : > { %4188 = vmatpush.bf16.msra.mxu1 %v10526_v30 }
0x1684   : > { %4250 = vmatpush.bf16.msra.mxu2 %v9315_v55 }
0x1687   : > { %4189 = vmatpush.bf16.msra.mxu1 %v10528_v49 }
0x1688   : > { %4251 = vmatpush.bf16.msra.mxu2 %v9319_v20 }
0x168b   : > { %4190 = vmatpush.bf16.msra.mxu1 %v10530_v40 }
0x168c   : > { %4252 = vmatpush.bf16.msra.mxu2 %v9323_v3 }
0x168f   : > { %4191 = vmatpush.bf16.msra.mxu1 %v10532_v23 }
0x1690   : > { %4253 = vmatpush.bf16.msra.mxu2 %v9327_v21 }
0x1693   : > { %4192 = vmatpush.bf16.msra.mxu1 %v10534_v53 }
0x1694   : > { %4254 = vmatpush.bf16.msra.mxu2 %v9331_v17 }
0x1697   : > { %4193 = vmatpush.bf16.msra.mxu1 %v10536_v22 }
0x1698   : > { %4255 = vmatpush.bf16.msra.mxu2 %v9335_v56 }
0x16d7   : > { %v3962_v12 = vpop.f32.mrf.mxu1 }
0x16d8   : > { %v4031_v44 = vadd.f32 %v9269_v57, %v3962_v12 }
0x16da   : > { %v6677_v4 = vmul.f32 -1.442695, %v4031_v44 }
0x16dc   : > { %7224 = vpow2.f32 %v6677_v4 }
0x16dd   : > { %v3975_v23 = vpop.f32.mrf.mxu2 }
0x16de   : > { %v3988_v3 = vpop.f32.mrf.mxu3 }
0x16df   : > { %v3964_v21 = vpop.f32.mrf.mxu1 }
0x16e2   : > { %v7225_v40 = vpop.eup %7224 }
0x16e3   : > { %v4035_v53 = vadd.f32 1.0, %v7225_v40 }
0x16e5   : > { %7226 = vrcp.f32 %v4035_v53  ;;  %v3977_v20 = vpop.f32.mrf.mxu2  ;;  %v4047_v12 = vand.u32 2147483648, %v4035_v53  ;;  %v4045_v44 = vand.u32 2147483647, %v4035_v53  ;;  %vm4041_vm6 = vweird.f32 %v4035_v53 }
0x16e6   : > { %v3990_v49 = vpop.f32.mrf.mxu3 }
0x16e7   : > { %v4014_v17 = vpop.f32.mrf.mxu1  ;;  %v4048_v49 = vor.u32 1.1754944e-38, %v4047_v12  ;;  %vm4046_vm7 = vcmp.eq.f32.partialorder %v4045_v44, 8.507059e+37 }
0x16e8   : > { %v4051_v55 = vadd.f32 %v4014_v17, %v3975_v23  ;;  %v9339_v17 = vld [vmem:[#allocation11] ss:$0 sm:$0xff] }
0x16ea   : > { %v6678_v22 = vmul.f32 -1.442695, %v4051_v55 }
0x16eb   : > { %v7227_v30 = vpop.eup %7226 }
0x16ec   : > { %7228 = vpow2.f32 %v6678_v22  ;;  %v4037_v24 = vmul.f32 %v7227_v30, %v4035_v53  ;;  %vm4042_vm5 = vweird.f32 %v7227_v30 }
0x16ed   : > { %v4027_v56 = vpop.f32.mrf.mxu2  ;;  %vm4043_vm0 = vmor %vm4041_vm6, %vm4042_vm5 }
0x16ee   : > { %v4038_v25 = vsub.f32 1.0, %v4037_v24  ;;  %v4071_v24 = vadd.f32 %v9339_v17, %v4027_v56 }
0x16ef   : > { %v4016_v37 = vpop.f32.mrf.mxu1 }
0x16f0   : > { %v4039_v57 = vmul.f32 %v7227_v30, %v4038_v25 }
0x16f2   : > { %v7229_v4 = vpop.eup %7228  ;;  %v4040_v21 = vadd.f32 %v7227_v30, %v4039_v57 }
0x16f3   : > { %v4055_v40 = vadd.f32 1.0, %v7229_v4 }
0x16f4   : > { %v4044_v20 = vsel %vm4043_vm0, %v7227_v30, %v4040_v21 }
0x16f5   : > { %7230 = vrcp.f32 %v4055_v40  ;;  %v4029_v55 = vpop.f32.mrf.mxu2  ;;  %v4049_v23 = vsel %vm4046_vm7, %v4048_v49, %v4044_v20  ;;  %v4067_v13 = vand.u32 2147483648, %v4055_v40  ;;  %v4065_v53 = vand.u32 2147483647, %v4055_v40 }
0x16f6   : > { %v4072_v37 = vmul.f32 %v4071_v24, %v4049_v23  ;;  %vm4061_vm1 = vweird.f32 %v4055_v40 }
0x16f7   : > { %v4068_v12 = vor.u32 1.1754944e-38, %v4067_v13  ;;  %vm4066_vm10 = vcmp.eq.f32.partialorder %v4065_v53, 8.507059e+37  ;;  %v9370_v13 = vld [vmem:[%s10306_s8] ss:$0 sm:$0xff] }
0x16f8   : > { %v4073_v5 = vadd.f32 %v4072_v37, %v3988_v3 }
0x16fa   : > { %7232 = vtanh.f32 %v4073_v5 }
0x16fb   : > { %v7231_v25 = vpop.eup %7230 }
0x16fc   : > { %v4057_v22 = vmul.f32 %v7231_v25, %v4055_v40  ;;  %vm4062_vm8 = vweird.f32 %v7231_v25 }
0x16fd   : > { %vm4063_vm9 = vmor %vm4061_vm1, %vm4062_vm8 }
0x16fe   : > { %v4058_v0 = vsub.f32 1.0, %v4057_v22 }
0x1700   : > { %v4059_v57 = vmul.f32 %v7231_v25, %v4058_v0  ;;  %v7233_v20 = vpop.eup %7232 }
0x1702   : > { %v4060_v30 = vadd.f32 %v7231_v25, %v4059_v57 }
0x1704   : > { %v4064_v44 = vsel %vm4063_vm9, %v7231_v25, %v4060_v30 }
0x1705   : > { %v4069_v4 = vsel %vm4066_vm10, %v4068_v12, %v4064_v44 }
0x1706   : > { %v4075_v21 = vsub.f32 1.0, %v4069_v4  ;;  %v4077_v49 = vmul.f32 %v4069_v4, %v9244_v34 }
0x1708   : > { %v4076_v56 = vmul.f32 %v7233_v20, %v4075_v21 }
0x170a   : > { %v9343_v55 = vadd.f32 %v4077_v49, %v4076_v56 }
0x170c   : > { %v9347_v0 = vpack.c.bf16 %v9343_v55, %v9343_v55 }
0x170e   : > { %4088 = vmatmul.bf16.vlgmr.msra.gmra.mxu3 %v9347_v0 }
0x170f   : > { %4289 = vmatpush.bf16.msra.mxu3 %v8735_v19 }
0x1713   : > { %4290 = vmatpush.bf16.msra.mxu3 %v8740_v18 }
0x1717   : > { %4291 = vmatpush.bf16.msra.mxu3 %v8753_v50 }
0x171b   : > { %4292 = vmatpush.bf16.msra.mxu3 %v8759_v61 }
0x171e   : > { %4168 = vmatmul.bf16.vlgmr.msrb.gmra.mxu3 %v9347_v0 }
0x171f   : > { %4293 = vmatpush.bf16.msra.mxu3 %v8765_v10 }
0x1723   : > { %4294 = vmatpush.bf16.msra.mxu3 %v8771_v42 }
0x1727   : > { %4295 = vmatpush.bf16.msra.mxu3 %v8777_v45 }
0x172b   : > { %4296 = vmatpush.bf16.msra.mxu3 %v8783_v1 }
0x172f   : > { %4341 = vmatpush.bf16.msrb.mxu3 %v8790_v9 }
0x1733   : > { %4342 = vmatpush.bf16.msrb.mxu3 %v8800_v27 }
0x1737   : > { %4343 = vmatpush.bf16.msrb.mxu3 %v8809_v8 }
0x173b   : > { %4344 = vmatpush.bf16.msrb.mxu3 %v8820_v38 }
0x173f   : > { %4345 = vmatpush.bf16.msrb.mxu3 %v8845_v15 }
0x1743   : > { %4346 = vmatpush.bf16.msrb.mxu3 %v8857_v28 }
0x1747   : > { %4347 = vmatpush.bf16.msrb.mxu3 %v8868_v59 }
0x174b   : > { %4348 = vmatpush.bf16.msrb.mxu3 %v8879_v51 }
0x1791   : > { %v4089_v34 = vpop.f32.mrf.mxu3 }
0x1792   : > { %v4090_v5 = vadd.f32 %v9370_v13, %v4089_v34 }
0x1794   : > { %4093 = vmax.xlane.f32.xlu0 %v4090_v5 }
0x1799   : > { %v4091_v3 = vpop.f32.mrf.mxu3 }
0x179a   : > { %v10541_v3 = vld [vmem:[#allocation23_spill] sm:$0xff] }
0x17a1   : > { %v9373_v40 = vpop.f32.mrf.mxu3 }
0x17a9   : > { %v4171_v23 = vpop.f32.mrf.mxu3 }
0x17aa   : > { %v10542_v23 = vld [vmem:[#allocation28_spill] sm:$0xff] }
0x1807   : > { %v4094_v24 = vpop.xlane.xlu0 %4093 }
0x1808   : > { %vm4095_vm11 = vcmp.ge.f32.partialorder %v4090_v5, %v4094_v24  ;;  %v10540_v5 = vld [vmem:[#allocation39_spill] sm:$0xff]  ;;  %v10543_v24 = vld [vmem:[#allocation24_spill] sm:$0xff] }
0x1809   : > { %v4096_v37 = vsel %vm4095_vm11, %v10461_v54, 128  ;;  %vm4285_vm11 = vcmp.eq.s32.totalorder %v10461_v54, 5 }
0x180a   : > { %v4098_v25 = vshra.s32 %v4096_v37, 16  ;;  %v4097_v57 = vand.u32 65535, %v4096_v37  ;;  %v10544_v37 = vld [vmem:[#allocation29_spill] sm:$0xff] }
0x180c   : > { %v4100_v22 = vcvt.s32.f32 %v4098_v25  ;;  %v4099_v30 = vcvt.s32.f32 %v4097_v57  ;;  %v10545_v25 = vld [vmem:[#allocation32_spill] sm:$0xff]  ;;  %v10547_v57 = vld [vmem:[#allocation25_spill] sm:$0xff] }
0x180e   : > { %4101 = vmin.xlane.f32.xlu1 %v4100_v22 }
0x1881   : > { %v4102_v53 = vpop.xlane.xlu1 %4101 }
0x1882   : > { %vm4103_vm12 = vcmp.eq.f32.partialorder %v4100_v22, %v4102_v53  ;;  %v4108_v44 = vcvt.f32.s32 %v4102_v53  ;;  %v10546_v22 = vld [vmem:[#allocation30_spill] sm:$0xff]  ;;  %v10548_v53 = vld [vmem:[#allocation31_spill] sm:$0xff] }
0x1883   : > { %v4104_v12 = vsel %vm4103_vm12, %v4099_v30, inf  ;;  %v10549_v30 = vld [vmem:[#allocation34_spill] sm:$0xff] }
0x1884   : > { %4105 = vmin.xlane.f32.xlu2 %v4104_v12  ;;  %v4109_v21 = vshll.u32 %v4108_v44, 16  ;;  %v10550_v12 = vld [vmem:[#allocation33_spill] sm:$0xff]  ;;  %v10551_v44 = vld [vmem:[#allocation40_spill] sm:$0xff] }
0x18f7   : > { %v4106_v4 = vpop.xlane.xlu2 %4105 }
0x18f8   : > { %v4107_v20 = vcvt.f32.s32 %v4106_v4  ;;  %v10552_v4 = vld [vmem:[#allocation35_spill] sm:$0xff] }
0x18fa   : > { %v4110_v56 = vadd.s32 %v4109_v21, %v4107_v20  ;;  %v10553_v21 = vld [vmem:[#allocation41_spill] sm:$0xff] }
0x18fb   : > { %v10554_v20 = vld [vmem:[#allocation37_spill] sm:$0xff] }
0x18fc   : > { %vm4111_vm14 = vcmp.lt.s32.totalorder %v4110_v56, 127 }
0x18fd   : > { %v4112_v49 = vsel %vm4111_vm14, %v4110_v56, 127  ;;  %v10555_v56 = vld [vmem:[#allocation42_spill] sm:$0xff] }
0x18fe   : > { %vm4113_vm15 = vcmp.eq.s32.totalorder %v10461_v54, %v4112_v49  ;;  %v9379_v34 = vsel %vm4117_vm13, %v4112_v49, %v9275_v14  ;;  %v10538_v14 = vld [vmem:[#allocation36_spill] sm:$0xff] }
0x18ff   : > { %vm6680_vm2 = vmpackc.low %vm4113_vm15, %vm4113_vm15 }
0x1900   : > { %6681 = vmatmul.msk.bf16.vlgmr.msra.gmra.mxu0 %vm6680_vm2, %v10452_v33  ;;  %6683 = vmatmul.msk.bf16.vlgmr.msrb.gmra.mxu1 %vm6680_vm2, %v10452_v33 }
0x1901   : > { %6685 = vmatmul.msk.bf16.vlgmr.msrb.gmra.mxu2 %vm6680_vm2, %v10452_v33  ;;  %4302 = vmatpush.bf16.msra.mxu0 %v10462_v7 }
0x1902   : > { %4328 = vmatpush.bf16.msrb.mxu2 %v8787_v41  ;;  %4315 = vmatpush.bf16.msrb.mxu1 %v10463_v62 }
0x1905   : > { %4303 = vmatpush.bf16.msra.mxu0 %v10464_v47 }
0x1906   : > { %4329 = vmatpush.bf16.msrb.mxu2 %v8798_v29  ;;  %4316 = vmatpush.bf16.msrb.mxu1 %v10465_v60 }
0x1909   : > { %4304 = vmatpush.bf16.msra.mxu0 %v8755_v26 }
0x190a   : > { %4330 = vmatpush.bf16.msrb.mxu2 %v8807_v35  ;;  %4317 = vmatpush.bf16.msrb.mxu1 %v8873_v46 }
0x190d   : > { %4305 = vmatpush.bf16.msra.mxu0 %v8761_v16 }
0x190e   : > { %4331 = vmatpush.bf16.msrb.mxu2 %v8818_v6  ;;  %4318 = vmatpush.bf16.msrb.mxu1 %v8887_v36 }
0x1910   : > { %4181 = vmatmul.bf16.vlgmr.msrb.gmra.mxu0 %v9347_v0  ;;  %4194 = vmatmul.bf16.vlgmr.msra.gmra.mxu1 %v9347_v0  ;;  %v10539_v0 = vld [vmem:[#allocation27_spill] sm:$0xff] }
0x1911   : > { %4306 = vmatpush.bf16.msra.mxu0 %v8767_v32 }
0x1912   : > { %4332 = vmatpush.bf16.msrb.mxu2 %v8835_v39  ;;  %4319 = vmatpush.bf16.msrb.mxu1 %v8896_v52 }
0x1915   : > { %4307 = vmatpush.bf16.msra.mxu0 %v8773_v31 }
0x1916   : > { %4333 = vmatpush.bf16.msrb.mxu2 %v8855_v11  ;;  %4320 = vmatpush.bf16.msrb.mxu1 %v8901_v58 }
0x1919   : > { %4308 = vmatpush.bf16.msra.mxu0 %v8779_v48 }
0x191a   : > { %4334 = vmatpush.bf16.msrb.mxu2 %v8865_v63  ;;  %4321 = vmatpush.bf16.msrb.mxu1 %v10518_v43 }
0x191d   : > { %4309 = vmatpush.bf16.msra.mxu0 %v10519_v2 }
0x191e   : > { %4335 = vmatpush.bf16.msrb.mxu2 %v10538_v14  ;;  %4322 = vmatpush.bf16.msrb.mxu1 %v10540_v5 }
0x1921   : > { %4354 = vmatpush.bf16.msrb.mxu0 %v10539_v0 }
0x1922   : > { %4416 = vmatpush.bf16.msra.mxu1 %v10541_v3 }
0x1925   : > { %4355 = vmatpush.bf16.msrb.mxu0 %v10542_v23 }
0x1926   : > { %4417 = vmatpush.bf16.msra.mxu1 %v10543_v24 }
0x1929   : > { %4356 = vmatpush.bf16.msrb.mxu0 %v10544_v37 }
0x192a   : > { %4418 = vmatpush.bf16.msra.mxu1 %v10545_v25 }
0x192d   : > { %4357 = vmatpush.bf16.msrb.mxu0 %v10546_v22 }
0x192e   : > { %4419 = vmatpush.bf16.msra.mxu1 %v10547_v57 }
0x1931   : > { %4358 = vmatpush.bf16.msrb.mxu0 %v10548_v53 }
0x1932   : > { %4420 = vmatpush.bf16.msra.mxu1 %v10549_v30 }
0x1935   : > { %4359 = vmatpush.bf16.msrb.mxu0 %v10550_v12 }
0x1936   : > { %4421 = vmatpush.bf16.msra.mxu1 %v10551_v44 }
0x1939   : > { %4360 = vmatpush.bf16.msrb.mxu0 %v10552_v4 }
0x193a   : > { %4422 = vmatpush.bf16.msra.mxu1 %v10553_v21 }
0x193d   : > { %4361 = vmatpush.bf16.msrb.mxu0 %v10554_v20 }
0x193e   : > { %4423 = vmatpush.bf16.msra.mxu1 %v10555_v56 }
0x197d   : > { %v4130_v49 = vpop.f32.mrf.mxu0  ;;  %v4143_v22 = vpop.f32.mrf.mxu1 }
0x197e   : > { %v4199_v57 = vadd.f32 %v9373_v40, %v4130_v49 }
0x1980   : > { %v6686_v25 = vmul.f32 -1.442695, %v4199_v57 }
0x1982   : > { %7234 = vpow2.f32 %v6686_v25 }
0x1984   : > { %v4156_v53 = vpop.f32.mrf.mxu2 }
0x1985   : > { %v4132_v30 = vpop.f32.mrf.mxu0  ;;  %v4145_v37 = vpop.f32.mrf.mxu1 }
0x1988   : > { %v7235_v12 = vpop.eup %7234 }
0x1989   : > { %v4203_v24 = vadd.f32 1.0, %v7235_v12 }
0x198b   : > { %7236 = vrcp.f32 %v4203_v24  ;;  %v4215_v25 = vand.u32 2147483648, %v4203_v24  ;;  %v4213_v57 = vand.u32 2147483647, %v4203_v24  ;;  %vm4209_vm4 = vweird.f32 %v4203_v24 }
0x198c   : > { %v4158_v44 = vpop.f32.mrf.mxu2 }
0x198d   : > { %v4182_v4 = vpop.f32.mrf.mxu0  ;;  %v4195_v23 = vpop.f32.mrf.mxu1  ;;  %v4216_v49 = vor.u32 1.1754944e-38, %v4215_v25  ;;  %vm4214_vm6 = vcmp.eq.f32.partialorder %v4213_v57, 8.507059e+37 }
0x198e   : > { %v4219_v21 = vadd.f32 %v4182_v4, %v4143_v22 }
0x1990   : > { %v6687_v3 = vmul.f32 -1.442695, %v4219_v21 }
0x1991   : > { %v7237_v20 = vpop.eup %7236 }
0x1992   : > { %7238 = vpow2.f32 %v6687_v3  ;;  %v4205_v56 = vmul.f32 %v7237_v20, %v4203_v24  ;;  %vm4210_vm3 = vweird.f32 %v7237_v20  ;;  %v4239_v3 = vadd.f32 %v9339_v17, %v4195_v23 }
0x1993   : > { %vm4211_vm5 = vmor %vm4209_vm4, %vm4210_vm3 }
0x1994   : > { %v4206_v5 = vsub.f32 1.0, %v4205_v56 }
0x1995   : > { %v4184_v0 = vpop.f32.mrf.mxu0  ;;  %v4197_v14 = vpop.f32.mrf.mxu1 }
0x1996   : > { %v4207_v40 = vmul.f32 %v7237_v20, %v4206_v5 }
0x1998   : > { %v7239_v30 = vpop.eup %7238  ;;  %v4208_v37 = vadd.f32 %v7237_v20, %v4207_v40 }
0x1999   : > { %v4223_v12 = vadd.f32 1.0, %v7239_v30 }
0x199a   : > { %v4212_v44 = vsel %vm4211_vm5, %v7237_v20, %v4208_v37 }
0x199b   : > { %7240 = vrcp.f32 %v4223_v12  ;;  %v4217_v22 = vsel %vm4214_vm6, %v4216_v49, %v4212_v44  ;;  %v4235_v56 = vand.u32 2147483648, %v4223_v12  ;;  %v4233_v43 = vand.u32 2147483647, %v4223_v12 }
0x199c   : > { %v4240_v4 = vmul.f32 %v4239_v3, %v4217_v22  ;;  %vm4229_vm7 = vweird.f32 %v4223_v12 }
0x199d   : > { %v4236_v20 = vor.u32 1.1754944e-38, %v4235_v56  ;;  %vm4234_vm1 = vcmp.eq.f32.partialorder %v4233_v43, 8.507059e+37 }
0x199e   : > { %v4241_v14 = vadd.f32 %v4240_v4, %v4156_v53 }
0x19a0   : > { %7242 = vtanh.f32 %v4241_v14 }
0x19a1   : > { %v7241_v21 = vpop.eup %7240 }
0x19a2   : > { %v4225_v0 = vmul.f32 %v7241_v21, %v4223_v12  ;;  %vm4230_vm0 = vweird.f32 %v7241_v21 }
0x19a3   : > { %vm4231_vm8 = vmor %vm4229_vm7, %vm4230_vm0 }
0x19a4   : > { %v4226_v5 = vsub.f32 1.0, %v4225_v0 }
0x19a6   : > { %v4227_v2 = vmul.f32 %v7241_v21, %v4226_v5  ;;  %v7243_v30 = vpop.eup %7242 }
0x19a8   : > { %v4228_v24 = vadd.f32 %v7241_v21, %v4227_v2 }
0x19aa   : > { %v4232_v40 = vsel %vm4231_vm8, %v7241_v21, %v4228_v24 }
0x19ab   : > { %v4237_v25 = vsel %vm4234_vm1, %v4236_v20, %v4232_v40 }
0x19ac   : > { %v4243_v57 = vsub.f32 1.0, %v4237_v25  ;;  %v4245_v37 = vmul.f32 %v4237_v25, %v9343_v55 }
0x19ae   : > { %v4244_v23 = vmul.f32 %v7243_v30, %v4243_v57 }
0x19b0   : > { %v9429_v44 = vadd.f32 %v4245_v37, %v4244_v23  ;;  %v10557_v37 = vld [vmem:[#allocation26_spill] sm:$0xff] }
0x19b2   : > { %v9433_v53 = vpack.c.bf16 %v9429_v44, %v9429_v44 }
0x19b4   : > { %4256 = vmatmul.bf16.vlgmr.msra.gmra.mxu2 %v9433_v53 }
0x19b5   : > { %4457 = vmatpush.bf16.msra.mxu2 %v8735_v19 }
0x19b9   : > { %4458 = vmatpush.bf16.msra.mxu2 %v8740_v18 }
0x19bd   : > { %4459 = vmatpush.bf16.msra.mxu2 %v8753_v50 }
0x19c1   : > { %4460 = vmatpush.bf16.msra.mxu2 %v8759_v61 }
0x19c4   : > { %4336 = vmatmul.bf16.vlgmr.msrb.gmra.mxu2 %v9433_v53 }
0x19c5   : > { %4461 = vmatpush.bf16.msra.mxu2 %v8765_v10 }
0x19c9   : > { %4462 = vmatpush.bf16.msra.mxu2 %v8771_v42 }
0x19cd   : > { %4463 = vmatpush.bf16.msra.mxu2 %v8777_v45 }
0x19d1   : > { %4464 = vmatpush.bf16.msra.mxu2 %v8783_v1 }
0x19d5   : > { %4509 = vmatpush.bf16.msrb.mxu2 %v8790_v9 }
0x19d9   : > { %4510 = vmatpush.bf16.msrb.mxu2 %v8800_v27 }
0x19dd   : > { %4511 = vmatpush.bf16.msrb.mxu2 %v8809_v8 }
0x19e1   : > { %4512 = vmatpush.bf16.msrb.mxu2 %v8820_v38 }
0x19e5   : > { %4513 = vmatpush.bf16.msrb.mxu2 %v8845_v15 }
0x19e9   : > { %4514 = vmatpush.bf16.msrb.mxu2 %v8857_v28 }
0x19ed   : > { %4515 = vmatpush.bf16.msrb.mxu2 %v8868_v59 }
0x19f1   : > { %4516 = vmatpush.bf16.msrb.mxu2 %v8879_v51 }
0x1a37   : > { %v4257_v43 = vpop.f32.mrf.mxu2 }
0x1a38   : > { %v4258_v2 = vadd.f32 %v9370_v13, %v4257_v43  ;;  %v10559_v43 = vld [vmem:[#allocation27_spill] sm:$0xff] }
0x1a3a   : > { %4261 = vmax.xlane.f32.xlu0 %v4258_v2 }
0x1a3f   : > { %v4259_v55 = vpop.f32.mrf.mxu2 }
0x1a40   : > { %v10561_v55 = vld [vmem:[#allocation23_spill] sm:$0xff] }
0x1a47   : > { %v9454_v12 = vpop.f32.mrf.mxu2 }
0x1a4f   : > { %v4339_v49 = vpop.f32.mrf.mxu2 }
0x1a50   : > { %v10562_v49 = vld [vmem:[#allocation28_spill] sm:$0xff] }
0x1aad   : > { %v4262_v22 = vpop.xlane.xlu0 %4261 }
0x1aae   : > { %vm4263_vm9 = vcmp.ge.f32.partialorder %v4258_v2, %v4262_v22  ;;  %v10560_v2 = vld [vmem:[#allocation39_spill] sm:$0xff]  ;;  %v10563_v22 = vld [vmem:[#allocation24_spill] sm:$0xff] }
0x1aaf   : > { %v4264_v3 = vsel %vm4263_vm9, %v10461_v54, 128  ;;  %vm4453_vm9 = vcmp.eq.s32.totalorder %v10461_v54, 6 }
0x1ab0   : > { %v4266_v4 = vshra.s32 %v4264_v3, 16  ;;  %v4265_v0 = vand.u32 65535, %v4264_v3  ;;  %v10564_v3 = vld [vmem:[#allocation29_spill] sm:$0xff] }
0x1ab2   : > { %v4268_v21 = vcvt.s32.f32 %v4266_v4  ;;  %v4267_v5 = vcvt.s32.f32 %v4265_v0  ;;  %v10565_v4 = vld [vmem:[#allocation32_spill] sm:$0xff]  ;;  %v10567_v0 = vld [vmem:[#allocation25_spill] sm:$0xff] }
0x1ab4   : > { %4269 = vmin.xlane.f32.xlu1 %v4268_v21 }
0x1b27   : > { %v4270_v14 = vpop.xlane.xlu1 %4269 }
0x1b28   : > { %vm4271_vm10 = vcmp.eq.f32.partialorder %v4268_v21, %v4270_v14  ;;  %v4276_v24 = vcvt.f32.s32 %v4270_v14  ;;  %v10566_v21 = vld [vmem:[#allocation30_spill] sm:$0xff]  ;;  %v10568_v14 = vld [vmem:[#allocation31_spill] sm:$0xff] }
0x1b29   : > { %v4272_v56 = vsel %vm4271_vm10, %v4267_v5, inf  ;;  %v10569_v5 = vld [vmem:[#allocation34_spill] sm:$0xff] }
0x1b2a   : > { %4273 = vmin.xlane.f32.xlu2 %v4272_v56  ;;  %v4277_v40 = vshll.u32 %v4276_v24, 16  ;;  %v10570_v56 = vld [vmem:[#allocation33_spill] sm:$0xff]  ;;  %v10571_v24 = vld [vmem:[#allocation40_spill] sm:$0xff] }
0x1b9d   : > { %v4274_v20 = vpop.xlane.xlu2 %4273 }
0x1b9e   : > { %v4275_v25 = vcvt.f32.s32 %v4274_v20  ;;  %v10572_v20 = vld [vmem:[#allocation35_spill] sm:$0xff] }
0x1ba0   : > { %v4278_v57 = vadd.s32 %v4277_v40, %v4275_v25  ;;  %v10573_v40 = vld [vmem:[#allocation41_spill] sm:$0xff] }
0x1ba1   : > { %v10574_v25 = vld [vmem:[#allocation37_spill] sm:$0xff] }
0x1ba2   : > { %vm4279_vm12 = vcmp.lt.s32.totalorder %v4278_v57, 127 }
0x1ba3   : > { %v4280_v30 = vsel %vm4279_vm12, %v4278_v57, 127  ;;  %v10575_v57 = vld [vmem:[#allocation42_spill] sm:$0xff] }
0x1ba4   : > { %vm4281_vm13 = vcmp.eq.s32.totalorder %v10461_v54, %v4280_v30  ;;  %v9460_v23 = vsel %vm4285_vm11, %v4280_v30, %v9379_v34  ;;  %v10556_v34 = vld [vmem:[#allocation38_spill] sm:$0xff] }
0x1ba5   : > { %vm6689_vm14 = vmpackc.low %vm4281_vm13, %vm4281_vm13 }
0x1ba6   : > { %6690 = vmatmul.msk.bf16.vlgmr.msra.gmra.mxu3 %vm6689_vm14, %v10452_v33  ;;  %6692 = vmatmul.msk.bf16.vlgmr.msra.gmra.mxu0 %vm6689_vm14, %v10452_v33 }
0x1ba7   : > { %6694 = vmatmul.msk.bf16.vlgmr.msrb.gmra.mxu1 %vm6689_vm14, %v10452_v33  ;;  %4470 = vmatpush.bf16.msra.mxu3 %v10462_v7 }
0x1ba8   : > { %4496 = vmatpush.bf16.msrb.mxu1 %v8787_v41  ;;  %4483 = vmatpush.bf16.msra.mxu0 %v10463_v62 }
0x1bab   : > { %4471 = vmatpush.bf16.msra.mxu3 %v10464_v47 }
0x1bac   : > { %4497 = vmatpush.bf16.msrb.mxu1 %v8798_v29  ;;  %4484 = vmatpush.bf16.msra.mxu0 %v10465_v60 }
0x1baf   : > { %4472 = vmatpush.bf16.msra.mxu3 %v8755_v26 }
0x1bb0   : > { %4498 = vmatpush.bf16.msrb.mxu1 %v8807_v35  ;;  %4485 = vmatpush.bf16.msra.mxu0 %v8873_v46 }
0x1bb3   : > { %4473 = vmatpush.bf16.msra.mxu3 %v8761_v16 }
0x1bb4   : > { %4499 = vmatpush.bf16.msrb.mxu1 %v8818_v6  ;;  %4486 = vmatpush.bf16.msra.mxu0 %v8887_v36 }
0x1bb6   : > { %4349 = vmatmul.bf16.vlgmr.msrb.gmra.mxu3 %v9433_v53  ;;  %4362 = vmatmul.bf16.vlgmr.msrb.gmra.mxu0 %v9433_v53  ;;  %v10558_v53 = vld [vmem:[#allocation36_spill] sm:$0xff] }
0x1bb7   : > { %4474 = vmatpush.bf16.msra.mxu3 %v8767_v32 }
0x1bb8   : > { %4500 = vmatpush.bf16.msrb.mxu1 %v8835_v39  ;;  %4487 = vmatpush.bf16.msra.mxu0 %v8896_v52 }
0x1bbb   : > { %4475 = vmatpush.bf16.msra.mxu3 %v8773_v31 }
0x1bbc   : > { %4501 = vmatpush.bf16.msrb.mxu1 %v8855_v11  ;;  %4488 = vmatpush.bf16.msra.mxu0 %v8901_v58 }
0x1bbf   : > { %4476 = vmatpush.bf16.msra.mxu3 %v8779_v48 }
0x1bc0   : > { %4502 = vmatpush.bf16.msrb.mxu1 %v8865_v63  ;;  %4489 = vmatpush.bf16.msra.mxu0 %v10556_v34 }
0x1bc3   : > { %4477 = vmatpush.bf16.msra.mxu3 %v10557_v37 }
0x1bc4   : > { %4503 = vmatpush.bf16.msrb.mxu1 %v10558_v53  ;;  %4490 = vmatpush.bf16.msra.mxu0 %v10560_v2 }
0x1bc7   : > { %4522 = vmatpush.bf16.msrb.mxu3 %v10559_v43 }
0x1bc8   : > { %4584 = vmatpush.bf16.msrb.mxu0 %v10561_v55 }
0x1bcb   : > { %4523 = vmatpush.bf16.msrb.mxu3 %v10562_v49 }
0x1bcc   : > { %4585 = vmatpush.bf16.msrb.mxu0 %v10563_v22 }
0x1bcf   : > { %4524 = vmatpush.bf16.msrb.mxu3 %v10564_v3 }
0x1bd0   : > { %4586 = vmatpush.bf16.msrb.mxu0 %v10565_v4 }
0x1bd3   : > { %4525 = vmatpush.bf16.msrb.mxu3 %v10566_v21 }
0x1bd4   : > { %4587 = vmatpush.bf16.msrb.mxu0 %v10567_v0 }
0x1bd7   : > { %4526 = vmatpush.bf16.msrb.mxu3 %v10568_v14 }
0x1bd8   : > { %4588 = vmatpush.bf16.msrb.mxu0 %v10569_v5 }
0x1bdb   : > { %4527 = vmatpush.bf16.msrb.mxu3 %v10570_v56 }
0x1bdc   : > { %4589 = vmatpush.bf16.msrb.mxu0 %v10571_v24 }
0x1bdf   : > { %4528 = vmatpush.bf16.msrb.mxu3 %v10572_v20 }
0x1be0   : > { %4590 = vmatpush.bf16.msrb.mxu0 %v10573_v40 }
0x1be3   : > { %4529 = vmatpush.bf16.msrb.mxu3 %v10574_v25 }
0x1be4   : > { %4591 = vmatpush.bf16.msrb.mxu0 %v10575_v57 }
0x1c23   : > { %v4311_v30 = vpop.f32.mrf.mxu0 }
0x1c24   : > { %v4324_v21 = vpop.f32.mrf.mxu1 }
0x1c29   : > { %v4298_v4 = vpop.f32.mrf.mxu3 }
0x1c2a   : > { %v4367_v0 = vadd.f32 %v9454_v12, %v4298_v4 }
0x1c2b   : > { %v4313_v14 = vpop.f32.mrf.mxu0 }
0x1c2c   : > { %v6695_v3 = vmul.f32 -1.442695, %v4367_v0  ;;  %v4326_v5 = vpop.f32.mrf.mxu1 }
0x1c2e   : > { %7244 = vpow2.f32 %v6695_v3 }
0x1c31   : > { %v4300_v56 = vpop.f32.mrf.mxu3 }
0x1c33   : > { %v4363_v22 = vpop.f32.mrf.mxu0 }
0x1c34   : > { %v7245_v24 = vpop.eup %7244 }
0x1c35   : > { %v4371_v49 = vadd.f32 1.0, %v7245_v24  ;;  %v4407_v24 = vadd.f32 %v9339_v17, %v4363_v22 }
0x1c37   : > { %7246 = vrcp.f32 %v4371_v49  ;;  %v4383_v12 = vand.u32 2147483648, %v4371_v49  ;;  %v4381_v4 = vand.u32 2147483647, %v4371_v49  ;;  %vm4377_vm2 = vweird.f32 %v4371_v49 }
0x1c39   : > { %v4350_v20 = vpop.f32.mrf.mxu3  ;;  %v4384_v56 = vor.u32 1.1754944e-38, %v4383_v12  ;;  %vm4382_vm4 = vcmp.eq.f32.partialorder %v4381_v4, 8.507059e+37 }
0x1c3a   : > { %v4387_v40 = vadd.f32 %v4350_v20, %v4311_v30 }
0x1c3b   : > { %v4365_v55 = vpop.f32.mrf.mxu0 }
0x1c3c   : > { %v6696_v25 = vmul.f32 -1.442695, %v4387_v40 }
0x1c3d   : > { %v7247_v2 = vpop.eup %7246 }
0x1c3e   : > { %v4373_v57 = vmul.f32 %v7247_v2, %v4371_v49  ;;  %7248 = vpow2.f32 %v6696_v25  ;;  %vm4378_vm15 = vweird.f32 %v7247_v2 }
0x1c3f   : > { %vm4379_vm3 = vmor %vm4377_vm2, %vm4378_vm15 }
0x1c40   : > { %v4374_v43 = vsub.f32 1.0, %v4373_v57 }
0x1c41   : > { %v4352_v53 = vpop.f32.mrf.mxu3 }
0x1c42   : > { %v4375_v37 = vmul.f32 %v7247_v2, %v4374_v43 }
0x1c44   : > { %v7249_v0 = vpop.eup %7248  ;;  %v4376_v3 = vadd.f32 %v7247_v2, %v4375_v37 }
0x1c45   : > { %v4391_v14 = vadd.f32 1.0, %v7249_v0 }
0x1c46   : > { %v4380_v5 = vsel %vm4379_vm3, %v7247_v2, %v4376_v3 }
0x1c47   : > { %7250 = vrcp.f32 %v4391_v14  ;;  %v4385_v55 = vsel %vm4382_vm4, %v4384_v56, %v4380_v5  ;;  %v4403_v57 = vand.u32 2147483648, %v4391_v14  ;;  %v4401_v34 = vand.u32 2147483647, %v4391_v14 }
0x1c48   : > { %v4408_v20 = vmul.f32 %v4407_v24, %v4385_v55  ;;  %vm4397_vm6 = vweird.f32 %v4391_v14 }
0x1c49   : > { %v4404_v2 = vor.u32 1.1754944e-38, %v4403_v57  ;;  %vm4402_vm7 = vcmp.eq.f32.partialorder %v4401_v34, 8.507059e+37 }
0x1c4a   : > { %v4409_v53 = vadd.f32 %v4408_v20, %v4324_v21 }
0x1c4c   : > { %7252 = vtanh.f32 %v4409_v53 }
0x1c4d   : > { %v7251_v40 = vpop.eup %7250 }
0x1c4e   : > { %v4393_v25 = vmul.f32 %v7251_v40, %v4391_v14  ;;  %vm4398_vm5 = vweird.f32 %v7251_v40 }
0x1c4f   : > { %vm4399_vm0 = vmor %vm4397_vm6, %vm4398_vm5 }
0x1c50   : > { %v4394_v43 = vsub.f32 1.0, %v4393_v25 }
0x1c52   : > { %v4395_v30 = vmul.f32 %v7251_v40, %v4394_v43  ;;  %v7253_v0 = vpop.eup %7252 }
0x1c54   : > { %v4396_v37 = vadd.f32 %v7251_v40, %v4395_v30 }
0x1c56   : > { %v4400_v49 = vsel %vm4399_vm0, %v7251_v40, %v4396_v37 }
0x1c57   : > { %v4405_v12 = vsel %vm4402_vm7, %v4404_v2, %v4400_v49 }
0x1c58   : > { %v4411_v4 = vsub.f32 1.0, %v4405_v12  ;;  %v4413_v3 = vmul.f32 %v4405_v12, %v9429_v44 }
0x1c5a   : > { %v4412_v22 = vmul.f32 %v7253_v0, %v4411_v4 }
0x1c5c   : > { %v9510_v5 = vadd.f32 %v4413_v3, %v4412_v22  ;;  %v10577_v3 = vld [vmem:[#allocation26_spill] sm:$0xff] }
0x1c5e   : > { %v9514_v21 = vpack.c.bf16 %v9510_v5, %v9510_v5 }
0x1c60   : > { %4424 = vmatmul.bf16.vlgmr.msra.gmra.mxu1 %v9514_v21 }
0x1c61   : > { %4625 = vmatpush.bf16.msra.mxu1 %v8735_v19 }
0x1c65   : > { %4626 = vmatpush.bf16.msra.mxu1 %v8740_v18 }
0x1c69   : > { %4627 = vmatpush.bf16.msra.mxu1 %v8753_v50 }
0x1c6d   : > { %4628 = vmatpush.bf16.msra.mxu1 %v8759_v61 }
0x1c70   : > { %4504 = vmatmul.bf16.vlgmr.msrb.gmra.mxu1 %v9514_v21 }
0x1c71   : > { %4629 = vmatpush.bf16.msra.mxu1 %v8765_v10 }
0x1c75   : > { %4630 = vmatpush.bf16.msra.mxu1 %v8771_v42 }
0x1c79   : > { %4631 = vmatpush.bf16.msra.mxu1 %v8777_v45 }
0x1c7d   : > { %4632 = vmatpush.bf16.msra.mxu1 %v8783_v1 }
0x1c81   : > { %4677 = vmatpush.bf16.msrb.mxu1 %v8790_v9 }
0x1c85   : > { %4678 = vmatpush.bf16.msrb.mxu1 %v8800_v27 }
0x1c89   : > { %4679 = vmatpush.bf16.msrb.mxu1 %v8809_v8 }
0x1c8d   : > { %4680 = vmatpush.bf16.msrb.mxu1 %v8820_v38 }
0x1c91   : > { %4681 = vmatpush.bf16.msrb.mxu1 %v8845_v15 }
0x1c95   : > { %4682 = vmatpush.bf16.msrb.mxu1 %v8857_v28 }
0x1c99   : > { %4683 = vmatpush.bf16.msrb.mxu1 %v8868_v59 }
0x1c9d   : > { %4684 = vmatpush.bf16.msrb.mxu1 %v8879_v51 }
0x1cdd   : > { %v4425_v44 = vpop.f32.mrf.mxu1 }
0x1cde   : > { %v4426_v34 = vadd.f32 %v9370_v13, %v4425_v44  ;;  %v10579_v44 = vld [vmem:[#allocation27_spill] sm:$0xff] }
0x1ce0   : > { %4429 = vmax.xlane.f32.xlu0 %v4426_v34 }
0x1ce5   : > { %v4427_v14 = vpop.f32.mrf.mxu1 }
0x1ce6   : > { %v10581_v14 = vld [vmem:[#allocation23_spill] sm:$0xff] }
0x1ced   : > { %v9535_v56 = vpop.f32.mrf.mxu1 }
0x1cf5   : > { %v4507_v55 = vpop.f32.mrf.mxu1 }
0x1cf6   : > { %v10582_v55 = vld [vmem:[#allocation28_spill] sm:$0xff] }
0x1d53   : > { %v4430_v24 = vpop.xlane.xlu0 %4429 }
0x1d54   : > { %vm4431_vm8 = vcmp.ge.f32.partialorder %v4426_v34, %v4430_v24  ;;  %v10580_v34 = vld [vmem:[#allocation39_spill] sm:$0xff]  ;;  %v10583_v24 = vld [vmem:[#allocation24_spill] sm:$0xff] }
0x1d55   : > { %v4432_v20 = vsel %vm4431_vm8, %v10461_v54, 128  ;;  %vm4621_vm8 = vcmp.eq.s32.totalorder %v10461_v54, 7 }
0x1d56   : > { %v4434_v40 = vshra.s32 %v4432_v20, 16  ;;  %v4433_v53 = vand.u32 65535, %v4432_v20  ;;  %v10584_v20 = vld [vmem:[#allocation29_spill] sm:$0xff] }
0x1d58   : > { %v4436_v25 = vcvt.s32.f32 %v4434_v40  ;;  %v4435_v57 = vcvt.s32.f32 %v4433_v53  ;;  %v10585_v40 = vld [vmem:[#allocation32_spill] sm:$0xff]  ;;  %v10587_v53 = vld [vmem:[#allocation25_spill] sm:$0xff] }
0x1d5a   : > { %4437 = vmin.xlane.f32.xlu1 %v4436_v25 }
0x1dcd   : > { %v4438_v43 = vpop.xlane.xlu1 %4437 }
0x1dce   : > { %vm4439_vm1 = vcmp.eq.f32.partialorder %v4436_v25, %v4438_v43  ;;  %v4444_v37 = vcvt.f32.s32 %v4438_v43  ;;  %v10586_v25 = vld [vmem:[#allocation30_spill] sm:$0xff]  ;;  %v10588_v43 = vld [vmem:[#allocation31_spill] sm:$0xff] }
0x1dcf   : > { %v4440_v30 = vsel %vm4439_vm1, %v4435_v57, inf  ;;  %v10589_v57 = vld [vmem:[#allocation34_spill] sm:$0xff] }
0x1dd0   : > { %4441 = vmin.xlane.f32.xlu2 %v4440_v30  ;;  %v4445_v49 = vshll.u32 %v4444_v37, 16  ;;  %v10590_v30 = vld [vmem:[#allocation33_spill] sm:$0xff]  ;;  %v10591_v37 = vld [vmem:[#allocation40_spill] sm:$0xff] }
0x1e43   : > { %v4442_v2 = vpop.xlane.xlu2 %4441 }
0x1e44   : > { %v4443_v12 = vcvt.f32.s32 %v4442_v2  ;;  %v10592_v2 = vld [vmem:[#allocation35_spill] sm:$0xff] }
0x1e46   : > { %v4446_v4 = vadd.s32 %v4445_v49, %v4443_v12  ;;  %v10593_v49 = vld [vmem:[#allocation41_spill] sm:$0xff] }
0x1e47   : > { %v10594_v12 = vld [vmem:[#allocation37_spill] sm:$0xff] }
0x1e48   : > { %vm4447_vm10 = vcmp.lt.s32.totalorder %v4446_v4, 127 }
0x1e49   : > { %v4448_v0 = vsel %vm4447_vm10, %v4446_v4, 127  ;;  %v10595_v4 = vld [vmem:[#allocation42_spill] sm:$0xff] }
0x1e4a   : > { %vm4449_vm11 = vcmp.eq.s32.totalorder %v10461_v54, %v4448_v0  ;;  %v9541_v22 = vsel %vm4453_vm9, %v4448_v0, %v9460_v23  ;;  %v10576_v23 = vld [vmem:[#allocation38_spill] sm:$0xff] }
0x1e4b   : > { %vm6698_vm12 = vmpackc.low %vm4449_vm11, %vm4449_vm11 }
0x1e4c   : > { %6699 = vmatmul.msk.bf16.vlgmr.msra.gmra.mxu2 %vm6698_vm12, %v10452_v33  ;;  %6701 = vmatmul.msk.bf16.vlgmr.msra.gmra.mxu3 %vm6698_vm12, %v10452_v33 }
0x1e4d   : > { %6703 = vmatmul.msk.bf16.vlgmr.msra.gmra.mxu0 %vm6698_vm12, %v10452_v33  ;;  %4638 = vmatpush.bf16.msra.mxu2 %v10462_v7 }
0x1e4e   : > { %4664 = vmatpush.bf16.msra.mxu0 %v8787_v41  ;;  %4651 = vmatpush.bf16.msra.mxu3 %v10463_v62 }
0x1e51   : > { %4639 = vmatpush.bf16.msra.mxu2 %v10464_v47 }
0x1e52   : > { %4665 = vmatpush.bf16.msra.mxu0 %v8798_v29  ;;  %4652 = vmatpush.bf16.msra.mxu3 %v10465_v60 }
0x1e55   : > { %4640 = vmatpush.bf16.msra.mxu2 %v8755_v26 }
0x1e56   : > { %4666 = vmatpush.bf16.msra.mxu0 %v8807_v35  ;;  %4653 = vmatpush.bf16.msra.mxu3 %v8873_v46 }
0x1e59   : > { %4641 = vmatpush.bf16.msra.mxu2 %v8761_v16 }
0x1e5a   : > { %4667 = vmatpush.bf16.msra.mxu0 %v8818_v6  ;;  %4654 = vmatpush.bf16.msra.mxu3 %v8887_v36 }
0x1e5c   : > { %4517 = vmatmul.bf16.vlgmr.msrb.gmra.mxu2 %v9514_v21  ;;  %4530 = vmatmul.bf16.vlgmr.msrb.gmra.mxu3 %v9514_v21  ;;  %v10578_v21 = vld [vmem:[#allocation36_spill] sm:$0xff] }
0x1e5d   : > { %4642 = vmatpush.bf16.msra.mxu2 %v8767_v32 }
0x1e5e   : > { %4668 = vmatpush.bf16.msra.mxu0 %v8835_v39  ;;  %4655 = vmatpush.bf16.msra.mxu3 %v8896_v52 }
0x1e61   : > { %4643 = vmatpush.bf16.msra.mxu2 %v8773_v31 }
0x1e62   : > { %4669 = vmatpush.bf16.msra.mxu0 %v8855_v11  ;;  %4656 = vmatpush.bf16.msra.mxu3 %v8901_v58 }
0x1e65   : > { %4644 = vmatpush.bf16.msra.mxu2 %v8779_v48 }
0x1e66   : > { %4670 = vmatpush.bf16.msra.mxu0 %v8865_v63  ;;  %4657 = vmatpush.bf16.msra.mxu3 %v10576_v23 }
0x1e69   : > { %4645 = vmatpush.bf16.msra.mxu2 %v10577_v3 }
0x1e6a   : > { %4671 = vmatpush.bf16.msra.mxu0 %v10578_v21  ;;  %4658 = vmatpush.bf16.msra.mxu3 %v10580_v34 }
0x1e6d   : > { %4690 = vmatpush.bf16.msrb.mxu2 %v10579_v44 }
0x1e6e   : > { %4752 = vmatpush.bf16.msrb.mxu3 %v10581_v14 }
0x1e71   : > { %4691 = vmatpush.bf16.msrb.mxu2 %v10582_v55 }
0x1e72   : > { %4753 = vmatpush.bf16.msrb.mxu3 %v10583_v24 }
0x1e75   : > { %4692 = vmatpush.bf16.msrb.mxu2 %v10584_v20 }
0x1e76   : > { %4754 = vmatpush.bf16.msrb.mxu3 %v10585_v40 }
0x1e79   : > { %4693 = vmatpush.bf16.msrb.mxu2 %v10586_v25 }
0x1e7a   : > { %4755 = vmatpush.bf16.msrb.mxu3 %v10587_v53 }
0x1e7d   : > { %4694 = vmatpush.bf16.msrb.mxu2 %v10588_v43 }
0x1e7e   : > { %4756 = vmatpush.bf16.msrb.mxu3 %v10589_v57 }
0x1e81   : > { %4695 = vmatpush.bf16.msrb.mxu2 %v10590_v30 }
0x1e82   : > { %4757 = vmatpush.bf16.msrb.mxu3 %v10591_v37 }
0x1e85   : > { %4696 = vmatpush.bf16.msrb.mxu2 %v10592_v2 }
0x1e86   : > { %4758 = vmatpush.bf16.msrb.mxu3 %v10593_v49 }
0x1e89   : > { %4697 = vmatpush.bf16.msrb.mxu2 %v10594_v12 }
0x1e8a   : > { %4759 = vmatpush.bf16.msrb.mxu3 %v10595_v4 }
0x1eca   : > { %v4492_v0 = vpop.f32.mrf.mxu0 }
0x1ecf   : > { %v4466_v14 = vpop.f32.mrf.mxu2  ;;  %v4479_v24 = vpop.f32.mrf.mxu3 }
0x1ed0   : > { %v4535_v40 = vadd.f32 %v9535_v56, %v4466_v14 }
0x1ed2   : > { %v6704_v53 = vmul.f32 -1.442695, %v4535_v40  ;;  %v4494_v43 = vpop.f32.mrf.mxu0 }
0x1ed4   : > { %7254 = vpow2.f32 %v6704_v53 }
0x1ed7   : > { %v4468_v57 = vpop.f32.mrf.mxu2  ;;  %v4481_v30 = vpop.f32.mrf.mxu3 }
0x1eda   : > { %v7255_v25 = vpop.eup %7254 }
0x1edb   : > { %v4539_v37 = vadd.f32 1.0, %v7255_v25 }
0x1edd   : > { %7256 = vrcp.f32 %v4539_v37  ;;  %v4551_v56 = vand.u32 2147483648, %v4539_v37  ;;  %v4549_v43 = vand.u32 2147483647, %v4539_v37  ;;  %vm4545_vm14 = vweird.f32 %v4539_v37 }
0x1edf   : > { %v4518_v2 = vpop.f32.mrf.mxu2  ;;  %v4531_v20 = vpop.f32.mrf.mxu3  ;;  %v4552_v53 = vor.u32 1.1754944e-38, %v4551_v56  ;;  %vm4550_vm2 = vcmp.eq.f32.partialorder %v4549_v43, 8.507059e+37 }
0x1ee0   : > { %v4555_v49 = vadd.f32 %v4518_v2, %v4479_v24 }
0x1ee2   : > { %v6705_v55 = vmul.f32 -1.442695, %v4555_v49 }
0x1ee3   : > { %v7257_v12 = vpop.eup %7256 }
0x1ee4   : > { %7258 = vpow2.f32 %v6705_v55  ;;  %v4541_v4 = vmul.f32 %v7257_v12, %v4539_v37  ;;  %vm4546_vm13 = vweird.f32 %v7257_v12  ;;  %v4575_v55 = vadd.f32 %v9339_v17, %v4531_v20 }
0x1ee5   : > { %vm4547_vm15 = vmor %vm4545_vm14, %vm4546_vm13 }
0x1ee6   : > { %v4542_v34 = vsub.f32 1.0, %v4541_v4 }
0x1ee7   : > { %v4520_v44 = vpop.f32.mrf.mxu2  ;;  %v4533_v21 = vpop.f32.mrf.mxu3 }
0x1ee8   : > { %v4543_v3 = vmul.f32 %v7257_v12, %v4542_v34 }
0x1eea   : > { %v7259_v14 = vpop.eup %7258  ;;  %v4544_v40 = vadd.f32 %v7257_v12, %v4543_v3 }
0x1eeb   : > { %v4559_v30 = vadd.f32 1.0, %v7259_v14 }
0x1eec   : > { %v4548_v25 = vsel %vm4547_vm15, %v7257_v12, %v4544_v40 }
0x1eed   : > { %7260 = vrcp.f32 %v4559_v30  ;;  %v4553_v2 = vsel %vm4550_vm2, %v4552_v53, %v4548_v25  ;;  %v4571_v49 = vand.u32 2147483648, %v4559_v30  ;;  %v4569_v23 = vand.u32 2147483647, %v4559_v30 }
0x1eee   : > { %v4576_v24 = vmul.f32 %v4575_v55, %v4553_v2  ;;  %vm4565_vm4 = vweird.f32 %v4559_v30 }
0x1eef   : > { %v4572_v12 = vor.u32 1.1754944e-38, %v4571_v49  ;;  %vm4570_vm6 = vcmp.eq.f32.partialorder %v4569_v23, 8.507059e+37 }
0x1ef0   : > { %v4577_v21 = vadd.f32 %v4576_v24, %v4492_v0 }
0x1ef2   : > { %7262 = vtanh.f32 %v4577_v21 }
0x1ef3   : > { %v7261_v57 = vpop.eup %7260 }
0x1ef4   : > { %v4561_v44 = vmul.f32 %v7261_v57, %v4559_v30  ;;  %vm4566_vm3 = vweird.f32 %v7261_v57 }
0x1ef5   : > { %vm4567_vm5 = vmor %vm4565_vm4, %vm4566_vm3 }
0x1ef6   : > { %v4562_v34 = vsub.f32 1.0, %v4561_v44 }
0x1ef8   : > { %v4563_v4 = vmul.f32 %v7261_v57, %v4562_v34  ;;  %v7263_v14 = vpop.eup %7262 }
0x1efa   : > { %v4564_v3 = vadd.f32 %v7261_v57, %v4563_v4 }
0x1efc   : > { %v4568_v37 = vsel %vm4567_vm5, %v7261_v57, %v4564_v3 }
0x1efd   : > { %v4573_v56 = vsel %vm4570_vm6, %v4572_v12, %v4568_v37 }
0x1efe   : > { %v4579_v43 = vsub.f32 1.0, %v4573_v56  ;;  %v4581_v20 = vmul.f32 %v4573_v56, %v9510_v5 }
0x1f00   : > { %v4580_v17 = vmul.f32 %v7263_v14, %v4579_v43  ;;  %v10597_v14 = vld [vmem:[#allocation26_spill] sm:$0xff] }
0x1f02   : > { %v9591_v40 = vadd.f32 %v4581_v20, %v4580_v17  ;;  %v10598_v17 = vld [vmem:[#allocation36_spill] sm:$0xff]  ;;  %v10599_v20 = vld [vmem:[#allocation27_spill] sm:$0xff] }
0x1f04   : > { %v9595_v0 = vpack.c.bf16 %v9591_v40, %v9591_v40 }
0x1f06   : > { %4592 = vmatmul.bf16.vlgmr.msrb.gmra.mxu0 %v9595_v0 }
0x1f07   : > { %4793 = vmatpush.bf16.msrb.mxu0 %v8735_v19 }
0x1f0b   : > { %4794 = vmatpush.bf16.msrb.mxu0 %v8740_v18 }
0x1f0f   : > { %4795 = vmatpush.bf16.msrb.mxu0 %v8753_v50 }
0x1f13   : > { %4796 = vmatpush.bf16.msrb.mxu0 %v8759_v61 }
0x1f16   : > { %4672 = vmatmul.bf16.vlgmr.msra.gmra.mxu0 %v9595_v0 }
0x1f17   : > { %4797 = vmatpush.bf16.msrb.mxu0 %v8765_v10 }
0x1f1b   : > { %4798 = vmatpush.bf16.msrb.mxu0 %v8771_v42 }
0x1f1f   : > { %4799 = vmatpush.bf16.msrb.mxu0 %v8777_v45 }
0x1f23   : > { %4800 = vmatpush.bf16.msrb.mxu0 %v8783_v1 }
0x1f27   : > { %4845 = vmatpush.bf16.msra.mxu0 %v8790_v9 }
0x1f2b   : > { %4846 = vmatpush.bf16.msra.mxu0 %v8800_v27 }
0x1f2f   : > { %4847 = vmatpush.bf16.msra.mxu0 %v8809_v8 }
0x1f33   : > { %4848 = vmatpush.bf16.msra.mxu0 %v8820_v38 }
0x1f37   : > { %4849 = vmatpush.bf16.msra.mxu0 %v8845_v15 }
0x1f3b   : > { %4850 = vmatpush.bf16.msra.mxu0 %v8857_v28 }
0x1f3f   : > { %4851 = vmatpush.bf16.msra.mxu0 %v8868_v59 }
0x1f43   : > { %4852 = vmatpush.bf16.msra.mxu0 %v8879_v51 }
0x1f83   : > { %v4593_v5 = vpop.f32.mrf.mxu0 }
0x1f84   : > { %v4594_v23 = vadd.f32 %v9370_v13, %v4593_v5  ;;  %v9654_v5 = vld [vmem:[#allocation13 + $0x38] sm:$0xff] }
0x1f85   : > { %10601 = vst [vmem:[#allocation43_spill] sm:$0xff] %v9654_v5 }
0x1f86   : > { %4597 = vmax.xlane.f32.xlu0 %v4594_v23 }
0x1f8b   : > { %v4595_v30 = vpop.f32.mrf.mxu0 }
0x1f8c   : > { %v9658_v30 = vld [vmem:[#allocation13 + $0x30] sm:$0xff] }
0x1f8d   : > { %10603 = vst [vmem:[#allocation44_spill] sm:$0xff] %v9658_v30 }
0x1f93   : > { %v9616_v25 = vpop.f32.mrf.mxu0 }
0x1f9b   : > { %v4675_v53 = vpop.f32.mrf.mxu0 }
0x1f9c   : > { %v10604_v53 = vld [vmem:[#allocation29_spill] sm:$0xff] }
0x1ff9   : > { %v4598_v2 = vpop.xlane.xlu0 %4597 }
0x1ffa   : > { %vm4599_vm0 = vcmp.ge.f32.partialorder %v4594_v23, %v4598_v2  ;;  %v10602_v23 = vld [vmem:[#allocation28_spill] sm:$0xff] }
0x1ffb   : > { %v4600_v55 = vsel %vm4599_vm0, %v10461_v54, 128  ;;  %v9662_v2 = vld [vmem:[#allocation13 + $0x28] sm:$0xff]  ;;  %vm4789_vm0 = vcmp.eq.s32.totalorder %v10461_v54, 8 }
0x1ffc   : > { %v4602_v24 = vshra.s32 %v4600_v55, 16  ;;  %v4601_v44 = vand.u32 65535, %v4600_v55  ;;  %10605 = vst [vmem:[#allocation45_spill] sm:$0xff] %v9662_v2  ;;  %v10606_v55 = vld [vmem:[#allocation30_spill] sm:$0xff] }
0x1ffe   : > { %v4604_v57 = vcvt.s32.f32 %v4602_v24  ;;  %v4603_v34 = vcvt.s32.f32 %v4601_v44  ;;  %v9666_v24 = vld [vmem:[#allocation13 + $0x20] sm:$0xff]  ;;  %v9670_v44 = vld [vmem:[#allocation13 + $0x18] sm:$0xff] }
0x1fff   : > { %10607 = vst [vmem:[#allocation46_spill] sm:$0xff] %v9666_v24 }
0x2000   : > { %4605 = vmin.xlane.f32.xlu1 %v4604_v57  ;;  %10609 = vst [vmem:[#allocation47_spill] sm:$0xff] %v9670_v44 }
0x2073   : > { %v4606_v21 = vpop.xlane.xlu1 %4605 }
0x2074   : > { %vm4607_vm7 = vcmp.eq.f32.partialorder %v4604_v57, %v4606_v21  ;;  %v4612_v4 = vcvt.f32.s32 %v4606_v21  ;;  %v10608_v57 = vld [vmem:[#allocation31_spill] sm:$0xff]  ;;  %v10610_v21 = vld [vmem:[#allocation33_spill] sm:$0xff] }
0x2075   : > { %v4608_v49 = vsel %vm4607_vm7, %v4603_v34, inf  ;;  %v9674_v34 = vld [vmem:[#allocation13 + $0x10] sm:$0xff] }
0x2076   : > { %4609 = vmin.xlane.f32.xlu2 %v4608_v49  ;;  %v4613_v3 = vshll.u32 %v4612_v4, 16  ;;  %10611 = vst [vmem:[#allocation23_spill] sm:$0xff] %v9674_v34  ;;  %v10612_v49 = vld [vmem:[#allocation35_spill] sm:$0xff]  ;;  %v9678_v4 = vld [vmem:[#allocation13 + $0x8] sm:$0xff] }
0x2077   : > { %10613 = vst [vmem:[#allocation24_spill] sm:$0xff] %v9678_v4 }
0x20e9   : > { %v4610_v13 = vpop.xlane.xlu2 %4609 }
0x20ea   : > { %v4611_v12 = vcvt.f32.s32 %v4610_v13  ;;  %v10614_v13 = vld [vmem:[#allocation37_spill] sm:$0xff] }
0x20ec   : > { %v4614_v37 = vadd.s32 %v4613_v3, %v4611_v12  ;;  %v9682_v3 = vld [vmem:[#allocation13] sm:$0xff] }
0x20ed   : > { %10615 = vst [vmem:[#allocation32_spill] sm:$0xff] %v9682_v3 }
0x20ee   : > { %vm4615_vm1 = vcmp.lt.s32.totalorder %v4614_v37, 127 }
0x20ef   : > { %v4616_v56 = vsel %vm4615_vm1, %v4614_v37, 127 }
0x20f0   : > { %vm4617_vm9 = vcmp.eq.s32.totalorder %v10461_v54, %v4616_v56  ;;  %v9622_v43 = vsel %vm4621_vm8, %v4616_v56, %v9541_v22  ;;  %v10596_v22 = vld [vmem:[#allocation38_spill] sm:$0xff] }
0x20f1   : > { %vm6707_vm10 = vmpackc.low %vm4617_vm9, %vm4617_vm9 }
0x20f2   : > { %6708 = vmatmul.msk.bf16.vlgmr.msra.gmra.mxu1 %vm6707_vm10, %v10452_v33  ;;  %6710 = vmatmul.msk.bf16.vlgmr.msra.gmra.mxu2 %vm6707_vm10, %v10452_v33 }
0x20f3   : > { %6712 = vmatmul.msk.bf16.vlgmr.msra.gmra.mxu3 %vm6707_vm10, %v10452_v33  ;;  %4806 = vmatpush.bf16.msra.mxu1 %v10462_v7 }
0x20f4   : > { %4832 = vmatpush.bf16.msra.mxu3 %v8787_v41  ;;  %4819 = vmatpush.bf16.msra.mxu2 %v10463_v62 }
0x20f7   : > { %4807 = vmatpush.bf16.msra.mxu1 %v10464_v47 }
0x20f8   : > { %4833 = vmatpush.bf16.msra.mxu3 %v8798_v29  ;;  %4820 = vmatpush.bf16.msra.mxu2 %v10465_v60 }
0x20fb   : > { %4808 = vmatpush.bf16.msra.mxu1 %v8755_v26 }
0x20fc   : > { %4834 = vmatpush.bf16.msra.mxu3 %v8807_v35  ;;  %4821 = vmatpush.bf16.msra.mxu2 %v8873_v46 }
0x20ff   : > { %4809 = vmatpush.bf16.msra.mxu1 %v8761_v16 }
0x2100   : > { %4835 = vmatpush.bf16.msra.mxu3 %v8818_v6  ;;  %4822 = vmatpush.bf16.msra.mxu2 %v8887_v36 }
0x2102   : > { %4685 = vmatmul.bf16.vlgmr.msrb.gmra.mxu1 %v9595_v0  ;;  %4698 = vmatmul.bf16.vlgmr.msrb.gmra.mxu2 %v9595_v0  ;;  %v10600_v0 = vld [vmem:[#allocation39_spill] sm:$0xff] }
0x2103   : > { %4810 = vmatpush.bf16.msra.mxu1 %v8767_v32 }
0x2104   : > { %4836 = vmatpush.bf16.msra.mxu3 %v8835_v39  ;;  %4823 = vmatpush.bf16.msra.mxu2 %v8896_v52 }
0x2107   : > { %4811 = vmatpush.bf16.msra.mxu1 %v8773_v31 }
0x2108   : > { %4837 = vmatpush.bf16.msra.mxu3 %v8855_v11  ;;  %4824 = vmatpush.bf16.msra.mxu2 %v8901_v58 }
0x210b   : > { %4812 = vmatpush.bf16.msra.mxu1 %v8779_v48 }
0x210c   : > { %4838 = vmatpush.bf16.msra.mxu3 %v8865_v63  ;;  %4825 = vmatpush.bf16.msra.mxu2 %v10596_v22 }
0x210f   : > { %4813 = vmatpush.bf16.msra.mxu1 %v10597_v14 }
0x2110   : > { %4839 = vmatpush.bf16.msra.mxu3 %v10598_v17  ;;  %4826 = vmatpush.bf16.msra.mxu2 %v10600_v0 }
0x2113   : > { %4858 = vmatpush.bf16.msrb.mxu1 %v10599_v20 }
0x2114   : > { %4920 = vmatpush.bf16.msrb.mxu2 %v9654_v5 }
0x2117   : > { %4859 = vmatpush.bf16.msrb.mxu1 %v10602_v23 }
0x2118   : > { %4921 = vmatpush.bf16.msrb.mxu2 %v9658_v30 }
0x211b   : > { %4860 = vmatpush.bf16.msrb.mxu1 %v10604_v53 }
0x211c   : > { %4922 = vmatpush.bf16.msrb.mxu2 %v9662_v2 }
0x211f   : > { %4861 = vmatpush.bf16.msrb.mxu1 %v10606_v55 }
0x2120   : > { %4923 = vmatpush.bf16.msrb.mxu2 %v9666_v24 }
0x2123   : > { %4862 = vmatpush.bf16.msrb.mxu1 %v10608_v57 }
0x2124   : > { %4924 = vmatpush.bf16.msrb.mxu2 %v9670_v44 }
0x2127   : > { %4863 = vmatpush.bf16.msrb.mxu1 %v10610_v21 }
0x2128   : > { %4925 = vmatpush.bf16.msrb.mxu2 %v9674_v34 }
0x212b   : > { %4864 = vmatpush.bf16.msrb.mxu1 %v10612_v49 }
0x212c   : > { %4926 = vmatpush.bf16.msrb.mxu2 %v9678_v4 }
0x212f   : > { %4865 = vmatpush.bf16.msrb.mxu1 %v10614_v13 }
0x2130   : > { %4927 = vmatpush.bf16.msrb.mxu2 %v9682_v3 }
0x216f   : > { %v4634_v12 = vpop.f32.mrf.mxu1 }
0x2170   : > { %v4703_v37 = vadd.f32 %v9616_v25, %v4634_v12 }
0x2172   : > { %v6713_v56 = vmul.f32 -1.442695, %v4703_v37 }
0x2174   : > { %7264 = vpow2.f32 %v6713_v56 }
0x2175   : > { %v4647_v21 = vpop.f32.mrf.mxu2 }
0x2176   : > { %v4660_v44 = vpop.f32.mrf.mxu3 }
0x2177   : > { %v4636_v34 = vpop.f32.mrf.mxu1 }
0x217a   : > { %v7265_v57 = vpop.eup %7264 }
0x217b   : > { %v4707_v49 = vadd.f32 1.0, %v7265_v57 }
0x217d   : > { %7266 = vrcp.f32 %v4707_v49  ;;  %v4649_v24 = vpop.f32.mrf.mxu2  ;;  %v4719_v12 = vand.u32 2147483648, %v4707_v49  ;;  %v4717_v37 = vand.u32 2147483647, %v4707_v49  ;;  %vm4713_vm12 = vweird.f32 %v4707_v49 }
0x217e   : > { %v4662_v55 = vpop.f32.mrf.mxu3 }
0x217f   : > { %v4686_v4 = vpop.f32.mrf.mxu1  ;;  %v4720_v55 = vor.u32 1.1754944e-38, %v4719_v12  ;;  %vm4718_vm14 = vcmp.eq.f32.partialorder %v4717_v37, 8.507059e+37 }
0x2180   : > { %v4723_v2 = vadd.f32 %v4686_v4, %v4647_v21  ;;  %v9686_v4 = vld [vmem:[#allocation11] ss:$0 sm:$0xff] }
0x2182   : > { %v6714_v13 = vmul.f32 -1.442695, %v4723_v2 }
0x2183   : > { %v7267_v53 = vpop.eup %7266 }
0x2184   : > { %7268 = vpow2.f32 %v6714_v13  ;;  %v4709_v30 = vmul.f32 %v7267_v53, %v4707_v49  ;;  %vm4714_vm11 = vweird.f32 %v7267_v53 }
0x2185   : > { %v4699_v3 = vpop.f32.mrf.mxu2  ;;  %vm4715_vm13 = vmor %vm4713_vm12, %vm4714_vm11 }
0x2186   : > { %v4710_v23 = vsub.f32 1.0, %v4709_v30  ;;  %v4743_v30 = vadd.f32 %v9686_v4, %v4699_v3 }
0x2187   : > { %v4688_v5 = vpop.f32.mrf.mxu1 }
0x2188   : > { %v4711_v25 = vmul.f32 %v7267_v53, %v4710_v23 }
0x218a   : > { %v7269_v56 = vpop.eup %7268  ;;  %v4712_v34 = vadd.f32 %v7267_v53, %v4711_v25 }
0x218b   : > { %v4727_v57 = vadd.f32 1.0, %v7269_v56 }
0x218c   : > { %v4716_v24 = vsel %vm4715_vm13, %v7267_v53, %v4712_v34 }
0x218d   : > { %7270 = vrcp.f32 %v4727_v57  ;;  %v4701_v2 = vpop.f32.mrf.mxu2  ;;  %v4721_v21 = vsel %vm4718_vm14, %v4720_v55, %v4716_v24  ;;  %v4739_v17 = vand.u32 2147483648, %v4727_v57  ;;  %v4737_v49 = vand.u32 2147483647, %v4727_v57 }
0x218e   : > { %v4744_v5 = vmul.f32 %v4743_v30, %v4721_v21  ;;  %vm4733_vm2 = vweird.f32 %v4727_v57 }
0x218f   : > { %v4740_v12 = vor.u32 1.1754944e-38, %v4739_v17  ;;  %vm4738_vm4 = vcmp.eq.f32.partialorder %v4737_v49, 8.507059e+37  ;;  %v9717_v17 = vld [vmem:[%s10306_s8] ss:$0 sm:$0xff] }
0x2190   : > { %v4745_v0 = vadd.f32 %v4744_v5, %v4660_v44 }
0x2192   : > { %7272 = vtanh.f32 %v4745_v0 }
0x2193   : > { %v7271_v23 = vpop.eup %7270 }
0x2194   : > { %v4729_v13 = vmul.f32 %v7271_v23, %v4727_v57  ;;  %vm4734_vm15 = vweird.f32 %v7271_v23 }
0x2195   : > { %vm4735_vm3 = vmor %vm4733_vm2, %vm4734_vm15 }
0x2196   : > { %v4730_v20 = vsub.f32 1.0, %v4729_v13 }
0x2198   : > { %v4731_v25 = vmul.f32 %v7271_v23, %v4730_v20  ;;  %v7273_v24 = vpop.eup %7272 }
0x219a   : > { %v4732_v53 = vadd.f32 %v7271_v23, %v4731_v25 }
0x219c   : > { %v4736_v37 = vsel %vm4735_vm3, %v7271_v23, %v4732_v53 }
0x219d   : > { %v4741_v56 = vsel %vm4738_vm4, %v4740_v12, %v4736_v37 }
0x219e   : > { %v4747_v34 = vsub.f32 1.0, %v4741_v56  ;;  %v4749_v55 = vmul.f32 %v4741_v56, %v9591_v40 }
0x21a0   : > { %v4748_v3 = vmul.f32 %v7273_v24, %v4747_v34 }
0x21a2   : > { %v9690_v2 = vadd.f32 %v4749_v55, %v4748_v3 }
0x21a4   : > { %v9694_v20 = vpack.c.bf16 %v9690_v2, %v9690_v2 }
0x21a6   : > { %4760 = vmatmul.bf16.vlgmr.msrb.gmra.mxu3 %v9694_v20 }
0x21a7   : > { %4961 = vmatpush.bf16.msrb.mxu3 %v8735_v19 }
0x21ab   : > { %4962 = vmatpush.bf16.msrb.mxu3 %v8740_v18 }
0x21af   : > { %4963 = vmatpush.bf16.msrb.mxu3 %v8753_v50 }
0x21b3   : > { %4964 = vmatpush.bf16.msrb.mxu3 %v8759_v61 }
0x21b6   : > { %4840 = vmatmul.bf16.vlgmr.msra.gmra.mxu3 %v9694_v20 }
0x21b7   : > { %4965 = vmatpush.bf16.msrb.mxu3 %v8765_v10 }
0x21bb   : > { %4966 = vmatpush.bf16.msrb.mxu3 %v8771_v42 }
0x21bf   : > { %4967 = vmatpush.bf16.msrb.mxu3 %v8777_v45 }
0x21c3   : > { %4968 = vmatpush.bf16.msrb.mxu3 %v8783_v1 }
0x21c7   : > { %5013 = vmatpush.bf16.msra.mxu3 %v8790_v9 }
0x21cb   : > { %5014 = vmatpush.bf16.msra.mxu3 %v8800_v27 }
0x21cf   : > { %5015 = vmatpush.bf16.msra.mxu3 %v8809_v8 }
0x21d3   : > { %5016 = vmatpush.bf16.msra.mxu3 %v8820_v38 }
0x21d7   : > { %5017 = vmatpush.bf16.msra.mxu3 %v8845_v15 }
0x21db   : > { %5018 = vmatpush.bf16.msra.mxu3 %v8857_v28 }
0x21df   : > { %5019 = vmatpush.bf16.msra.mxu3 %v8868_v59 }
0x21e3   : > { %5020 = vmatpush.bf16.msra.mxu3 %v8879_v51 }
0x2229   : > { %v4761_v40 = vpop.f32.mrf.mxu3 }
0x222a   : > { %v4762_v0 = vadd.f32 %v9717_v17, %v4761_v40 }
0x222c   : > { %4765 = vmax.xlane.f32.xlu0 %v4762_v0 }
0x2231   : > { %v4763_v44 = vpop.f32.mrf.mxu3 }
0x2232   : > { %v10619_v44 = vld [vmem:[#allocation43_spill] sm:$0xff] }
0x2239   : > { %v9720_v57 = vpop.f32.mrf.mxu3 }
0x2241   : > { %v4843_v21 = vpop.f32.mrf.mxu3 }
0x2242   : > { %v10620_v21 = vld [vmem:[#allocation28_spill] sm:$0xff] }
0x229f   : > { %v4766_v30 = vpop.xlane.xlu0 %4765 }
0x22a0   : > { %vm4767_vm5 = vcmp.ge.f32.partialorder %v4762_v0, %v4766_v30  ;;  %v10618_v0 = vld [vmem:[#allocation39_spill] sm:$0xff]  ;;  %v10621_v30 = vld [vmem:[#allocation44_spill] sm:$0xff] }
0x22a1   : > { %v4768_v5 = vsel %vm4767_vm5, %v10461_v54, 128  ;;  %vm4957_vm5 = vcmp.eq.s32.totalorder %v10461_v54, 9 }
0x22a2   : > { %v4770_v23 = vshra.s32 %v4768_v5, 16  ;;  %v4769_v25 = vand.u32 65535, %v4768_v5  ;;  %v10622_v5 = vld [vmem:[#allocation29_spill] sm:$0xff] }
0x22a4   : > { %v4772_v13 = vcvt.s32.f32 %v4770_v23  ;;  %v4771_v53 = vcvt.s32.f32 %v4769_v25  ;;  %v10623_v23 = vld [vmem:[#allocation45_spill] sm:$0xff]  ;;  %v10625_v25 = vld [vmem:[#allocation46_spill] sm:$0xff] }
0x22a6   : > { %4773 = vmin.xlane.f32.xlu1 %v4772_v13 }
0x2319   : > { %v4774_v49 = vpop.xlane.xlu1 %4773 }
0x231a   : > { %vm4775_vm6 = vcmp.eq.f32.partialorder %v4772_v13, %v4774_v49  ;;  %v4780_v37 = vcvt.f32.s32 %v4774_v49  ;;  %v10624_v13 = vld [vmem:[#allocation30_spill] sm:$0xff]  ;;  %v10626_v49 = vld [vmem:[#allocation31_spill] sm:$0xff] }
0x231b   : > { %v4776_v12 = vsel %vm4775_vm6, %v4771_v53, inf  ;;  %v10627_v53 = vld [vmem:[#allocation47_spill] sm:$0xff] }
0x231c   : > { %4777 = vmin.xlane.f32.xlu2 %v4776_v12  ;;  %v4781_v34 = vshll.u32 %v4780_v37, 16  ;;  %v10628_v12 = vld [vmem:[#allocation33_spill] sm:$0xff]  ;;  %v10629_v37 = vld [vmem:[#allocation23_spill] sm:$0xff] }
0x238f   : > { %v4778_v56 = vpop.xlane.xlu2 %4777 }
0x2390   : > { %v4779_v24 = vcvt.f32.s32 %v4778_v56  ;;  %v10630_v56 = vld [vmem:[#allocation35_spill] sm:$0xff] }
0x2392   : > { %v4782_v3 = vadd.s32 %v4781_v34, %v4779_v24  ;;  %v10631_v34 = vld [vmem:[#allocation24_spill] sm:$0xff]  ;;  %v10632_v24 = vld [vmem:[#allocation37_spill] sm:$0xff] }
0x2394   : > { %vm4783_vm7 = vcmp.lt.s32.totalorder %v4782_v3, 127 }
0x2395   : > { %v4784_v55 = vsel %vm4783_vm7, %v4782_v3, 127  ;;  %v10633_v3 = vld [vmem:[#allocation32_spill] sm:$0xff] }
0x2396   : > { %vm4785_vm8 = vcmp.eq.s32.totalorder %v10461_v54, %v4784_v55  ;;  %v9726_v40 = vsel %vm4789_vm0, %v4784_v55, %v9622_v43  ;;  %v10616_v43 = vld [vmem:[#allocation36_spill] sm:$0xff] }
0x2397   : > { %vm6716_vm1 = vmpackc.low %vm4785_vm8, %vm4785_vm8 }
0x2398   : > { %6717 = vmatmul.msk.bf16.vlgmr.msrb.gmra.mxu0 %vm6716_vm1, %v10452_v33  ;;  %6719 = vmatmul.msk.bf16.vlgmr.msra.gmra.mxu1 %vm6716_vm1, %v10452_v33 }
0x2399   : > { %6721 = vmatmul.msk.bf16.vlgmr.msra.gmra.mxu2 %vm6716_vm1, %v10452_v33  ;;  %4974 = vmatpush.bf16.msrb.mxu0 %v10462_v7 }
0x239a   : > { %5000 = vmatpush.bf16.msra.mxu2 %v8787_v41  ;;  %4987 = vmatpush.bf16.msra.mxu1 %v10463_v62 }
0x239d   : > { %4975 = vmatpush.bf16.msrb.mxu0 %v10464_v47 }
0x239e   : > { %5001 = vmatpush.bf16.msra.mxu2 %v8798_v29  ;;  %4988 = vmatpush.bf16.msra.mxu1 %v10465_v60 }
0x23a1   : > { %4976 = vmatpush.bf16.msrb.mxu0 %v8755_v26 }
0x23a2   : > { %5002 = vmatpush.bf16.msra.mxu2 %v8807_v35  ;;  %4989 = vmatpush.bf16.msra.mxu1 %v8873_v46 }
0x23a5   : > { %4977 = vmatpush.bf16.msrb.mxu0 %v8761_v16 }
0x23a6   : > { %5003 = vmatpush.bf16.msra.mxu2 %v8818_v6  ;;  %4990 = vmatpush.bf16.msra.mxu1 %v8887_v36 }
0x23a8   : > { %4853 = vmatmul.bf16.vlgmr.msra.gmra.mxu0 %v9694_v20  ;;  %4866 = vmatmul.bf16.vlgmr.msrb.gmra.mxu1 %v9694_v20  ;;  %v10617_v20 = vld [vmem:[#allocation27_spill] sm:$0xff] }
0x23a9   : > { %4978 = vmatpush.bf16.msrb.mxu0 %v8767_v32 }
0x23aa   : > { %5004 = vmatpush.bf16.msra.mxu2 %v8835_v39  ;;  %4991 = vmatpush.bf16.msra.mxu1 %v8896_v52 }
0x23ad   : > { %4979 = vmatpush.bf16.msrb.mxu0 %v8773_v31 }
0x23ae   : > { %5005 = vmatpush.bf16.msra.mxu2 %v8855_v11  ;;  %4992 = vmatpush.bf16.msra.mxu1 %v8901_v58 }
0x23b1   : > { %4980 = vmatpush.bf16.msrb.mxu0 %v8779_v48 }
0x23b2   : > { %5006 = vmatpush.bf16.msra.mxu2 %v8865_v63  ;;  %4993 = vmatpush.bf16.msra.mxu1 %v10596_v22 }
0x23b5   : > { %4981 = vmatpush.bf16.msrb.mxu0 %v10597_v14 }
0x23b6   : > { %5007 = vmatpush.bf16.msra.mxu2 %v10616_v43  ;;  %4994 = vmatpush.bf16.msra.mxu1 %v10618_v0 }
0x23b9   : > { %5026 = vmatpush.bf16.msra.mxu0 %v10617_v20 }
0x23ba   : > { %5088 = vmatpush.bf16.msrb.mxu1 %v10619_v44 }
0x23bd   : > { %5027 = vmatpush.bf16.msra.mxu0 %v10620_v21 }
0x23be   : > { %5089 = vmatpush.bf16.msrb.mxu1 %v10621_v30 }
0x23c1   : > { %5028 = vmatpush.bf16.msra.mxu0 %v10622_v5 }
0x23c2   : > { %5090 = vmatpush.bf16.msrb.mxu1 %v10623_v23 }
0x23c5   : > { %5029 = vmatpush.bf16.msra.mxu0 %v10624_v13 }
0x23c6   : > { %5091 = vmatpush.bf16.msrb.mxu1 %v10625_v25 }
0x23c9   : > { %5030 = vmatpush.bf16.msra.mxu0 %v10626_v49 }
0x23ca   : > { %5092 = vmatpush.bf16.msrb.mxu1 %v10627_v53 }
0x23cd   : > { %5031 = vmatpush.bf16.msra.mxu0 %v10628_v12 }
0x23ce   : > { %5093 = vmatpush.bf16.msrb.mxu1 %v10629_v37 }
0x23d1   : > { %5032 = vmatpush.bf16.msra.mxu0 %v10630_v56 }
0x23d2   : > { %5094 = vmatpush.bf16.msrb.mxu1 %v10631_v34 }
0x23d5   : > { %5033 = vmatpush.bf16.msra.mxu0 %v10632_v24 }
0x23d6   : > { %5095 = vmatpush.bf16.msrb.mxu1 %v10633_v3 }
0x2415   : > { %v4802_v55 = vpop.f32.mrf.mxu0  ;;  %v4815_v13 = vpop.f32.mrf.mxu1 }
0x2416   : > { %v4871_v25 = vadd.f32 %v9720_v57, %v4802_v55 }
0x2418   : > { %v6722_v23 = vmul.f32 -1.442695, %v4871_v25 }
0x241a   : > { %7274 = vpow2.f32 %v6722_v23 }
0x241c   : > { %v4828_v49 = vpop.f32.mrf.mxu2 }
0x241d   : > { %v4804_v53 = vpop.f32.mrf.mxu0  ;;  %v4817_v5 = vpop.f32.mrf.mxu1 }
0x2420   : > { %v7275_v12 = vpop.eup %7274 }
0x2421   : > { %v4875_v30 = vadd.f32 1.0, %v7275_v12 }
0x2423   : > { %7276 = vrcp.f32 %v4875_v30  ;;  %v4887_v23 = vand.u32 2147483648, %v4875_v30  ;;  %v4885_v25 = vand.u32 2147483647, %v4875_v30  ;;  %vm4881_vm10 = vweird.f32 %v4875_v30 }
0x2424   : > { %v4830_v37 = vpop.f32.mrf.mxu2 }
0x2425   : > { %v4854_v56 = vpop.f32.mrf.mxu0  ;;  %v4867_v21 = vpop.f32.mrf.mxu1  ;;  %v4888_v55 = vor.u32 1.1754944e-38, %v4887_v23  ;;  %vm4886_vm12 = vcmp.eq.f32.partialorder %v4885_v25, 8.507059e+37 }
0x2426   : > { %v4891_v34 = vadd.f32 %v4854_v56, %v4815_v13 }
0x2428   : > { %v6723_v44 = vmul.f32 -1.442695, %v4891_v34 }
0x2429   : > { %v7277_v24 = vpop.eup %7276 }
0x242a   : > { %7278 = vpow2.f32 %v6723_v44  ;;  %v4877_v3 = vmul.f32 %v7277_v24, %v4875_v30  ;;  %vm4882_vm9 = vweird.f32 %v7277_v24  ;;  %v4911_v44 = vadd.f32 %v9686_v4, %v4867_v21 }
0x242b   : > { %vm4883_vm11 = vmor %vm4881_vm10, %vm4882_vm9 }
0x242c   : > { %v4878_v0 = vsub.f32 1.0, %v4877_v3 }
0x242d   : > { %v4856_v20 = vpop.f32.mrf.mxu0  ;;  %v4869_v43 = vpop.f32.mrf.mxu1 }
0x242e   : > { %v4879_v57 = vmul.f32 %v7277_v24, %v4878_v0 }
0x2430   : > { %v7279_v53 = vpop.eup %7278  ;;  %v4880_v5 = vadd.f32 %v7277_v24, %v4879_v57 }
0x2431   : > { %v4895_v12 = vadd.f32 1.0, %v7279_v53 }
0x2432   : > { %v4884_v37 = vsel %vm4883_vm11, %v7277_v24, %v4880_v5 }
0x2433   : > { %7280 = vrcp.f32 %v4895_v12  ;;  %v4889_v13 = vsel %vm4886_vm12, %v4888_v55, %v4884_v37  ;;  %v4907_v3 = vand.u32 2147483648, %v4895_v12  ;;  %v4905_v22 = vand.u32 2147483647, %v4895_v12 }
0x2434   : > { %v4912_v56 = vmul.f32 %v4911_v44, %v4889_v13  ;;  %vm4901_vm14 = vweird.f32 %v4895_v12 }
0x2435   : > { %v4908_v24 = vor.u32 1.1754944e-38, %v4907_v3  ;;  %vm4906_vm2 = vcmp.eq.f32.partialorder %v4905_v22, 8.507059e+37 }
0x2436   : > { %v4913_v43 = vadd.f32 %v4912_v56, %v4828_v49 }
0x2438   : > { %7282 = vtanh.f32 %v4913_v43 }
0x2439   : > { %v7281_v34 = vpop.eup %7280 }
0x243a   : > { %v4897_v20 = vmul.f32 %v7281_v34, %v4895_v12  ;;  %vm4902_vm13 = vweird.f32 %v7281_v34 }
0x243b   : > { %vm4903_vm15 = vmor %vm4901_vm14, %vm4902_vm13 }
0x243c   : > { %v4898_v0 = vsub.f32 1.0, %v4897_v20 }
0x243e   : > { %v4899_v14 = vmul.f32 %v7281_v34, %v4898_v0  ;;  %v7283_v53 = vpop.eup %7282 }
0x2440   : > { %v4900_v30 = vadd.f32 %v7281_v34, %v4899_v14 }
0x2442   : > { %v4904_v57 = vsel %vm4903_vm15, %v7281_v34, %v4900_v30 }
0x2443   : > { %v4909_v23 = vsel %vm4906_vm2, %v4908_v24, %v4904_v57 }
0x2444   : > { %v4915_v25 = vsub.f32 1.0, %v4909_v23  ;;  %v4917_v5 = vmul.f32 %v4909_v23, %v9690_v2 }
0x2446   : > { %v4916_v21 = vmul.f32 %v7283_v53, %v4915_v25 }
0x2448   : > { %v9776_v37 = vadd.f32 %v4917_v5, %v4916_v21  ;;  %v10635_v5 = vld [vmem:[#allocation26_spill] sm:$0xff] }
0x244a   : > { %v9780_v49 = vpack.c.bf16 %v9776_v37, %v9776_v37 }
0x244c   : > { %4928 = vmatmul.bf16.vlgmr.msrb.gmra.mxu2 %v9780_v49 }
0x244d   : > { %5129 = vmatpush.bf16.msrb.mxu2 %v8735_v19 }
0x2451   : > { %5130 = vmatpush.bf16.msrb.mxu2 %v8740_v18 }
0x2455   : > { %5131 = vmatpush.bf16.msrb.mxu2 %v8753_v50 }
0x2459   : > { %5132 = vmatpush.bf16.msrb.mxu2 %v8759_v61 }
0x245c   : > { %5008 = vmatmul.bf16.vlgmr.msra.gmra.mxu2 %v9780_v49 }
0x245d   : > { %5133 = vmatpush.bf16.msrb.mxu2 %v8765_v10 }
0x2461   : > { %5134 = vmatpush.bf16.msrb.mxu2 %v8771_v42 }
0x2465   : > { %5135 = vmatpush.bf16.msrb.mxu2 %v8777_v45 }
0x2469   : > { %5136 = vmatpush.bf16.msrb.mxu2 %v8783_v1 }
0x246d   : > { %5181 = vmatpush.bf16.msra.mxu2 %v8790_v9 }
0x2471   : > { %5182 = vmatpush.bf16.msra.mxu2 %v8800_v27 }
0x2475   : > { %5183 = vmatpush.bf16.msra.mxu2 %v8809_v8 }
0x2479   : > { %5184 = vmatpush.bf16.msra.mxu2 %v8820_v38 }
0x247d   : > { %5185 = vmatpush.bf16.msra.mxu2 %v8845_v15 }
0x2481   : > { %5186 = vmatpush.bf16.msra.mxu2 %v8857_v28 }
0x2485   : > { %5187 = vmatpush.bf16.msra.mxu2 %v8868_v59 }
0x2489   : > { %5188 = vmatpush.bf16.msra.mxu2 %v8879_v51 }
0x24cf   : > { %v4929_v22 = vpop.f32.mrf.mxu2 }
0x24d0   : > { %v4930_v14 = vadd.f32 %v9717_v17, %v4929_v22  ;;  %v10637_v22 = vld [vmem:[#allocation27_spill] sm:$0xff] }
0x24d2   : > { %4933 = vmax.xlane.f32.xlu0 %v4930_v14 }
0x24d7   : > { %v4931_v2 = vpop.f32.mrf.mxu2 }
0x24d8   : > { %v10639_v2 = vld [vmem:[#allocation43_spill] sm:$0xff] }
0x24df   : > { %v9801_v12 = vpop.f32.mrf.mxu2 }
0x24e7   : > { %v5011_v55 = vpop.f32.mrf.mxu2 }
0x24e8   : > { %v10640_v55 = vld [vmem:[#allocation28_spill] sm:$0xff] }
0x2545   : > { %v4934_v13 = vpop.xlane.xlu0 %4933 }
0x2546   : > { %vm4935_vm3 = vcmp.ge.f32.partialorder %v4930_v14, %v4934_v13  ;;  %v10638_v14 = vld [vmem:[#allocation39_spill] sm:$0xff]  ;;  %v10641_v13 = vld [vmem:[#allocation44_spill] sm:$0xff] }
0x2547   : > { %v4936_v44 = vsel %vm4935_vm3, %v10461_v54, 128  ;;  %vm5125_vm3 = vcmp.eq.s32.totalorder %v10461_v54, 10 }
0x2548   : > { %v4938_v56 = vshra.s32 %v4936_v44, 16  ;;  %v4937_v20 = vand.u32 65535, %v4936_v44  ;;  %v10642_v44 = vld [vmem:[#allocation29_spill] sm:$0xff] }
0x254a   : > { %v4940_v34 = vcvt.s32.f32 %v4938_v56  ;;  %v4939_v0 = vcvt.s32.f32 %v4937_v20  ;;  %v10643_v56 = vld [vmem:[#allocation45_spill] sm:$0xff]  ;;  %v10645_v20 = vld [vmem:[#allocation46_spill] sm:$0xff] }
0x254c   : > { %4941 = vmin.xlane.f32.xlu1 %v4940_v34 }
0x25bf   : > { %v4942_v43 = vpop.xlane.xlu1 %4941 }
0x25c0   : > { %vm4943_vm4 = vcmp.eq.f32.partialorder %v4940_v34, %v4942_v43  ;;  %v4948_v30 = vcvt.f32.s32 %v4942_v43  ;;  %v10644_v34 = vld [vmem:[#allocation30_spill] sm:$0xff]  ;;  %v10646_v43 = vld [vmem:[#allocation31_spill] sm:$0xff] }
0x25c1   : > { %v4944_v3 = vsel %vm4943_vm4, %v4939_v0, inf  ;;  %v10647_v0 = vld [vmem:[#allocation47_spill] sm:$0xff] }
0x25c2   : > { %4945 = vmin.xlane.f32.xlu2 %v4944_v3  ;;  %v4949_v57 = vshll.u32 %v4948_v30, 16  ;;  %v10648_v3 = vld [vmem:[#allocation33_spill] sm:$0xff]  ;;  %v10649_v30 = vld [vmem:[#allocation23_spill] sm:$0xff] }
0x2635   : > { %v4946_v24 = vpop.xlane.xlu2 %4945 }
0x2636   : > { %v4947_v23 = vcvt.f32.s32 %v4946_v24  ;;  %v10650_v24 = vld [vmem:[#allocation35_spill] sm:$0xff] }
0x2638   : > { %v4950_v25 = vadd.s32 %v4949_v57, %v4947_v23  ;;  %v10651_v57 = vld [vmem:[#allocation24_spill] sm:$0xff]  ;;  %v10652_v23 = vld [vmem:[#allocation37_spill] sm:$0xff] }
0x263a   : > { %vm4951_vm6 = vcmp.lt.s32.totalorder %v4950_v25, 127 }
0x263b   : > { %v4952_v53 = vsel %vm4951_vm6, %v4950_v25, 127  ;;  %v10653_v25 = vld [vmem:[#allocation32_spill] sm:$0xff] }
0x263c   : > { %vm4953_vm0 = vcmp.eq.s32.totalorder %v10461_v54, %v4952_v53  ;;  %v9807_v21 = vsel %vm4957_vm5, %v4952_v53, %v9726_v40  ;;  %v10634_v40 = vld [vmem:[#allocation38_spill] sm:$0xff] }
0x263d   : > { %vm6725_vm7 = vmpackc.low %vm4953_vm0, %vm4953_vm0 }
0x263e   : > { %6726 = vmatmul.msk.bf16.vlgmr.msrb.gmra.mxu3 %vm6725_vm7, %v10452_v33  ;;  %6728 = vmatmul.msk.bf16.vlgmr.msrb.gmra.mxu0 %vm6725_vm7, %v10452_v33 }
0x263f   : > { %6730 = vmatmul.msk.bf16.vlgmr.msra.gmra.mxu1 %vm6725_vm7, %v10452_v33  ;;  %5142 = vmatpush.bf16.msrb.mxu3 %v10462_v7 }
0x2640   : > { %5168 = vmatpush.bf16.msra.mxu1 %v8787_v41  ;;  %5155 = vmatpush.bf16.msrb.mxu0 %v10463_v62 }
0x2643   : > { %5143 = vmatpush.bf16.msrb.mxu3 %v10464_v47 }
0x2644   : > { %5169 = vmatpush.bf16.msra.mxu1 %v8798_v29  ;;  %5156 = vmatpush.bf16.msrb.mxu0 %v10465_v60 }
0x2647   : > { %5144 = vmatpush.bf16.msrb.mxu3 %v8755_v26 }
0x2648   : > { %5170 = vmatpush.bf16.msra.mxu1 %v8807_v35  ;;  %5157 = vmatpush.bf16.msrb.mxu0 %v8873_v46 }
0x264b   : > { %5145 = vmatpush.bf16.msrb.mxu3 %v8761_v16 }
0x264c   : > { %5171 = vmatpush.bf16.msra.mxu1 %v8818_v6  ;;  %5158 = vmatpush.bf16.msrb.mxu0 %v8887_v36 }
0x264e   : > { %5021 = vmatmul.bf16.vlgmr.msra.gmra.mxu3 %v9780_v49  ;;  %5034 = vmatmul.bf16.vlgmr.msra.gmra.mxu0 %v9780_v49  ;;  %v10636_v49 = vld [vmem:[#allocation36_spill] sm:$0xff] }
0x264f   : > { %5146 = vmatpush.bf16.msrb.mxu3 %v8767_v32 }
0x2650   : > { %5172 = vmatpush.bf16.msra.mxu1 %v8835_v39  ;;  %5159 = vmatpush.bf16.msrb.mxu0 %v8896_v52 }
0x2653   : > { %5147 = vmatpush.bf16.msrb.mxu3 %v8773_v31 }
0x2654   : > { %5173 = vmatpush.bf16.msra.mxu1 %v8855_v11  ;;  %5160 = vmatpush.bf16.msrb.mxu0 %v8901_v58 }
0x2657   : > { %5148 = vmatpush.bf16.msrb.mxu3 %v8779_v48 }
0x2658   : > { %5174 = vmatpush.bf16.msra.mxu1 %v8865_v63  ;;  %5161 = vmatpush.bf16.msrb.mxu0 %v10634_v40 }
0x265b   : > { %5149 = vmatpush.bf16.msrb.mxu3 %v10635_v5 }
0x265c   : > { %5175 = vmatpush.bf16.msra.mxu1 %v10636_v49  ;;  %5162 = vmatpush.bf16.msrb.mxu0 %v10638_v14 }
0x265f   : > { %5194 = vmatpush.bf16.msra.mxu3 %v10637_v22 }
0x2660   : > { %5256 = vmatpush.bf16.msra.mxu0 %v10639_v2 }
0x2663   : > { %5195 = vmatpush.bf16.msra.mxu3 %v10640_v55 }
0x2664   : > { %5257 = vmatpush.bf16.msra.mxu0 %v10641_v13 }
0x2667   : > { %5196 = vmatpush.bf16.msra.mxu3 %v10642_v44 }
0x2668   : > { %5258 = vmatpush.bf16.msra.mxu0 %v10643_v56 }
0x266b   : > { %5197 = vmatpush.bf16.msra.mxu3 %v10644_v34 }
0x266c   : > { %5259 = vmatpush.bf16.msra.mxu0 %v10645_v20 }
0x266f   : > { %5198 = vmatpush.bf16.msra.mxu3 %v10646_v43 }
0x2670   : > { %5260 = vmatpush.bf16.msra.mxu0 %v10647_v0 }
0x2673   : > { %5199 = vmatpush.bf16.msra.mxu3 %v10648_v3 }
0x2674   : > { %5261 = vmatpush.bf16.msra.mxu0 %v10649_v30 }
0x2677   : > { %5200 = vmatpush.bf16.msra.mxu3 %v10650_v24 }
0x2678   : > { %5262 = vmatpush.bf16.msra.mxu0 %v10651_v57 }
0x267b   : > { %5201 = vmatpush.bf16.msra.mxu3 %v10652_v23 }
0x267c   : > { %5263 = vmatpush.bf16.msra.mxu0 %v10653_v25 }
0x26bb   : > { %v4983_v53 = vpop.f32.mrf.mxu0 }
0x26bc   : > { %v4996_v34 = vpop.f32.mrf.mxu1 }
0x26c1   : > { %v4970_v56 = vpop.f32.mrf.mxu3 }
0x26c2   : > { %v5039_v20 = vadd.f32 %v9801_v12, %v4970_v56 }
0x26c3   : > { %v4985_v43 = vpop.f32.mrf.mxu0 }
0x26c4   : > { %v6731_v44 = vmul.f32 -1.442695, %v5039_v20  ;;  %v4998_v0 = vpop.f32.mrf.mxu1 }
0x26c6   : > { %7284 = vpow2.f32 %v6731_v44 }
0x26c9   : > { %v4972_v3 = vpop.f32.mrf.mxu3 }
0x26cb   : > { %v5035_v13 = vpop.f32.mrf.mxu0 }
0x26cc   : > { %v7285_v30 = vpop.eup %7284 }
0x26cd   : > { %v5043_v55 = vadd.f32 1.0, %v7285_v30  ;;  %v5079_v30 = vadd.f32 %v9686_v4, %v5035_v13 }
0x26cf   : > { %7286 = vrcp.f32 %v5043_v55  ;;  %v5055_v12 = vand.u32 2147483648, %v5043_v55  ;;  %v5053_v56 = vand.u32 2147483647, %v5043_v55  ;;  %vm5049_vm1 = vweird.f32 %v5043_v55 }
0x26d1   : > { %v5022_v24 = vpop.f32.mrf.mxu3  ;;  %v5056_v3 = vor.u32 1.1754944e-38, %v5055_v12  ;;  %vm5054_vm10 = vcmp.eq.f32.partialorder %v5053_v56, 8.507059e+37 }
0x26d2   : > { %v5059_v57 = vadd.f32 %v5022_v24, %v4983_v53 }
0x26d3   : > { %v5037_v2 = vpop.f32.mrf.mxu0 }
0x26d4   : > { %v6732_v23 = vmul.f32 -1.442695, %v5059_v57 }
0x26d5   : > { %v7287_v14 = vpop.eup %7286 }
0x26d6   : > { %v5045_v25 = vmul.f32 %v7287_v14, %v5043_v55  ;;  %7288 = vpow2.f32 %v6732_v23  ;;  %vm5050_vm8 = vweird.f32 %v7287_v14 }
0x26d7   : > { %vm5051_vm9 = vmor %vm5049_vm1, %vm5050_vm8 }
0x26d8   : > { %v5046_v22 = vsub.f32 1.0, %v5045_v25 }
0x26d9   : > { %v5024_v49 = vpop.f32.mrf.mxu3 }
0x26da   : > { %v5047_v5 = vmul.f32 %v7287_v14, %v5046_v22 }
0x26dc   : > { %v7289_v20 = vpop.eup %7288  ;;  %v5048_v44 = vadd.f32 %v7287_v14, %v5047_v5 }
0x26dd   : > { %v5063_v43 = vadd.f32 1.0, %v7289_v20 }
0x26de   : > { %v5052_v0 = vsel %vm5051_vm9, %v7287_v14, %v5048_v44 }
0x26df   : > { %7290 = vrcp.f32 %v5063_v43  ;;  %v5057_v2 = vsel %vm5054_vm10, %v5056_v3, %v5052_v0  ;;  %v5075_v25 = vand.u32 2147483648, %v5063_v43  ;;  %v5073_v40 = vand.u32 2147483647, %v5063_v43 }
0x26e0   : > { %v5080_v24 = vmul.f32 %v5079_v30, %v5057_v2  ;;  %vm5069_vm12 = vweird.f32 %v5063_v43 }
0x26e1   : > { %v5076_v14 = vor.u32 1.1754944e-38, %v5075_v25  ;;  %vm5074_vm14 = vcmp.eq.f32.partialorder %v5073_v40, 8.507059e+37 }
0x26e2   : > { %v5081_v49 = vadd.f32 %v5080_v24, %v4996_v34 }
0x26e4   : > { %7292 = vtanh.f32 %v5081_v49 }
0x26e5   : > { %v7291_v57 = vpop.eup %7290 }
0x26e6   : > { %v5065_v23 = vmul.f32 %v7291_v57, %v5063_v43  ;;  %vm5070_vm11 = vweird.f32 %v7291_v57 }
0x26e7   : > { %vm5071_vm13 = vmor %vm5069_vm12, %vm5070_vm11 }
0x26e8   : > { %v5066_v22 = vsub.f32 1.0, %v5065_v23 }
0x26ea   : > { %v5067_v53 = vmul.f32 %v7291_v57, %v5066_v22  ;;  %v7293_v20 = vpop.eup %7292 }
0x26ec   : > { %v5068_v5 = vadd.f32 %v7291_v57, %v5067_v53 }
0x26ee   : > { %v5072_v55 = vsel %vm5071_vm13, %v7291_v57, %v5068_v5 }
0x26ef   : > { %v5077_v12 = vsel %vm5074_vm14, %v5076_v14, %v5072_v55 }
0x26f0   : > { %v5083_v56 = vsub.f32 1.0, %v5077_v12  ;;  %v5085_v44 = vmul.f32 %v5077_v12, %v9776_v37 }
0x26f2   : > { %v5084_v13 = vmul.f32 %v7293_v20, %v5083_v56 }
0x26f4   : > { %v9857_v0 = vadd.f32 %v5085_v44, %v5084_v13  ;;  %v10655_v44 = vld [vmem:[#allocation26_spill] sm:$0xff] }
0x26f6   : > { %v9861_v34 = vpack.c.bf16 %v9857_v0, %v9857_v0 }
0x26f8   : > { %5096 = vmatmul.bf16.vlgmr.msrb.gmra.mxu1 %v9861_v34 }
0x26f9   : > { %5297 = vmatpush.bf16.msrb.mxu1 %v8735_v19 }
0x26fd   : > { %5298 = vmatpush.bf16.msrb.mxu1 %v8740_v18 }
0x2701   : > { %5299 = vmatpush.bf16.msrb.mxu1 %v8753_v50 }
0x2705   : > { %5300 = vmatpush.bf16.msrb.mxu1 %v8759_v61 }
0x2708   : > { %5176 = vmatmul.bf16.vlgmr.msra.gmra.mxu1 %v9861_v34 }
0x2709   : > { %5301 = vmatpush.bf16.msrb.mxu1 %v8765_v10 }
0x270d   : > { %5302 = vmatpush.bf16.msrb.mxu1 %v8771_v42 }
0x2711   : > { %5303 = vmatpush.bf16.msrb.mxu1 %v8777_v45 }
0x2715   : > { %5304 = vmatpush.bf16.msrb.mxu1 %v8783_v1 }
0x2719   : > { %5349 = vmatpush.bf16.msra.mxu1 %v8790_v9 }
0x271d   : > { %5350 = vmatpush.bf16.msra.mxu1 %v8800_v27 }
0x2721   : > { %5351 = vmatpush.bf16.msra.mxu1 %v8809_v8 }
0x2725   : > { %5352 = vmatpush.bf16.msra.mxu1 %v8820_v38 }
0x2729   : > { %5353 = vmatpush.bf16.msra.mxu1 %v8845_v15 }
0x272d   : > { %5354 = vmatpush.bf16.msra.mxu1 %v8857_v28 }
0x2731   : > { %5355 = vmatpush.bf16.msra.mxu1 %v8868_v59 }
0x2735   : > { %5356 = vmatpush.bf16.msra.mxu1 %v8879_v51 }
0x2775   : > { %v5097_v37 = vpop.f32.mrf.mxu1 }
0x2776   : > { %v5098_v40 = vadd.f32 %v9717_v17, %v5097_v37  ;;  %v10657_v37 = vld [vmem:[#allocation27_spill] sm:$0xff] }
0x2778   : > { %5101 = vmax.xlane.f32.xlu0 %v5098_v40 }
0x277d   : > { %v5099_v43 = vpop.f32.mrf.mxu1 }
0x277e   : > { %v10659_v43 = vld [vmem:[#allocation43_spill] sm:$0xff] }
0x2785   : > { %v9882_v3 = vpop.f32.mrf.mxu1 }
0x278d   : > { %v5179_v2 = vpop.f32.mrf.mxu1 }
0x278e   : > { %v10660_v2 = vld [vmem:[#allocation28_spill] sm:$0xff] }
0x27eb   : > { %v5102_v30 = vpop.xlane.xlu0 %5101 }
0x27ec   : > { %vm5103_vm15 = vcmp.ge.f32.partialorder %v5098_v40, %v5102_v30  ;;  %v10658_v40 = vld [vmem:[#allocation39_spill] sm:$0xff]  ;;  %v10661_v30 = vld [vmem:[#allocation44_spill] sm:$0xff] }
0x27ed   : > { %v5104_v24 = vsel %vm5103_vm15, %v10461_v54, 128  ;;  %vm5293_vm15 = vcmp.eq.s32.totalorder %v10461_v54, 11 }
0x27ee   : > { %v5106_v57 = vshra.s32 %v5104_v24, 16  ;;  %v5105_v49 = vand.u32 65535, %v5104_v24  ;;  %v10662_v24 = vld [vmem:[#allocation29_spill] sm:$0xff] }
0x27f0   : > { %v5108_v23 = vcvt.s32.f32 %v5106_v57  ;;  %v5107_v25 = vcvt.s32.f32 %v5105_v49  ;;  %v10663_v57 = vld [vmem:[#allocation45_spill] sm:$0xff]  ;;  %v10665_v49 = vld [vmem:[#allocation46_spill] sm:$0xff] }
0x27f2   : > { %5109 = vmin.xlane.f32.xlu1 %v5108_v23 }
0x2865   : > { %v5110_v22 = vpop.xlane.xlu1 %5109 }
0x2866   : > { %vm5111_vm2 = vcmp.eq.f32.partialorder %v5108_v23, %v5110_v22  ;;  %v5116_v5 = vcvt.f32.s32 %v5110_v22  ;;  %v10664_v23 = vld [vmem:[#allocation30_spill] sm:$0xff]  ;;  %v10666_v22 = vld [vmem:[#allocation31_spill] sm:$0xff] }
0x2867   : > { %v5112_v53 = vsel %vm5111_vm2, %v5107_v25, inf  ;;  %v10667_v25 = vld [vmem:[#allocation47_spill] sm:$0xff] }
0x2868   : > { %5113 = vmin.xlane.f32.xlu2 %v5112_v53  ;;  %v5117_v55 = vshll.u32 %v5116_v5, 16  ;;  %v10668_v53 = vld [vmem:[#allocation33_spill] sm:$0xff]  ;;  %v10669_v5 = vld [vmem:[#allocation23_spill] sm:$0xff] }
0x28db   : > { %v5114_v14 = vpop.xlane.xlu2 %5113 }
0x28dc   : > { %v5115_v12 = vcvt.f32.s32 %v5114_v14  ;;  %v10670_v14 = vld [vmem:[#allocation35_spill] sm:$0xff] }
0x28de   : > { %v5118_v56 = vadd.s32 %v5117_v55, %v5115_v12  ;;  %v10671_v55 = vld [vmem:[#allocation24_spill] sm:$0xff]  ;;  %v10672_v12 = vld [vmem:[#allocation37_spill] sm:$0xff] }
0x28e0   : > { %vm5119_vm4 = vcmp.lt.s32.totalorder %v5118_v56, 127 }
0x28e1   : > { %v5120_v20 = vsel %vm5119_vm4, %v5118_v56, 127  ;;  %v10673_v56 = vld [vmem:[#allocation32_spill] sm:$0xff] }
0x28e2   : > { %vm5121_vm5 = vcmp.eq.s32.totalorder %v10461_v54, %v5120_v20  ;;  %v9888_v13 = vsel %vm5125_vm3, %v5120_v20, %v9807_v21  ;;  %v10654_v21 = vld [vmem:[#allocation38_spill] sm:$0xff] }
0x28e3   : > { %vm6734_vm6 = vmpackc.low %vm5121_vm5, %vm5121_vm5 }
0x28e4   : > { %6735 = vmatmul.msk.bf16.vlgmr.msrb.gmra.mxu2 %vm6734_vm6, %v10452_v33  ;;  %6737 = vmatmul.msk.bf16.vlgmr.msrb.gmra.mxu3 %vm6734_vm6, %v10452_v33 }
0x28e5   : > { %6739 = vmatmul.msk.bf16.vlgmr.msrb.gmra.mxu0 %vm6734_vm6, %v10452_v33  ;;  %5310 = vmatpush.bf16.msrb.mxu2 %v10462_v7 }
0x28e6   : > { %5336 = vmatpush.bf16.msrb.mxu0 %v8787_v41  ;;  %5323 = vmatpush.bf16.msrb.mxu3 %v10463_v62 }
0x28e9   : > { %5311 = vmatpush.bf16.msrb.mxu2 %v10464_v47 }
0x28ea   : > { %5337 = vmatpush.bf16.msrb.mxu0 %v8798_v29  ;;  %5324 = vmatpush.bf16.msrb.mxu3 %v10465_v60 }
0x28ed   : > { %5312 = vmatpush.bf16.msrb.mxu2 %v8755_v26 }
0x28ee   : > { %5338 = vmatpush.bf16.msrb.mxu0 %v8807_v35  ;;  %5325 = vmatpush.bf16.msrb.mxu3 %v8873_v46 }
0x28f1   : > { %5313 = vmatpush.bf16.msrb.mxu2 %v8761_v16 }
0x28f2   : > { %5339 = vmatpush.bf16.msrb.mxu0 %v8818_v6  ;;  %5326 = vmatpush.bf16.msrb.mxu3 %v8887_v36 }
0x28f4   : > { %5189 = vmatmul.bf16.vlgmr.msra.gmra.mxu2 %v9861_v34  ;;  %5202 = vmatmul.bf16.vlgmr.msra.gmra.mxu3 %v9861_v34  ;;  %v10656_v34 = vld [vmem:[#allocation36_spill] sm:$0xff] }
0x28f5   : > { %5314 = vmatpush.bf16.msrb.mxu2 %v8767_v32 }
0x28f6   : > { %5340 = vmatpush.bf16.msrb.mxu0 %v8835_v39  ;;  %5327 = vmatpush.bf16.msrb.mxu3 %v8896_v52 }
0x28f9   : > { %5315 = vmatpush.bf16.msrb.mxu2 %v8773_v31 }
0x28fa   : > { %5341 = vmatpush.bf16.msrb.mxu0 %v8855_v11  ;;  %5328 = vmatpush.bf16.msrb.mxu3 %v8901_v58 }
0x28fd   : > { %5316 = vmatpush.bf16.msrb.mxu2 %v8779_v48 }
0x28fe   : > { %5342 = vmatpush.bf16.msrb.mxu0 %v8865_v63  ;;  %5329 = vmatpush.bf16.msrb.mxu3 %v10654_v21 }
0x2901   : > { %5317 = vmatpush.bf16.msrb.mxu2 %v10655_v44 }
0x2902   : > { %5343 = vmatpush.bf16.msrb.mxu0 %v10656_v34  ;;  %5330 = vmatpush.bf16.msrb.mxu3 %v10658_v40 }
0x2905   : > { %5362 = vmatpush.bf16.msra.mxu2 %v10657_v37 }
0x2906   : > { %5424 = vmatpush.bf16.msra.mxu3 %v10659_v43 }
0x2909   : > { %5363 = vmatpush.bf16.msra.mxu2 %v10660_v2 }
0x290a   : > { %5425 = vmatpush.bf16.msra.mxu3 %v10661_v30 }
0x290d   : > { %5364 = vmatpush.bf16.msra.mxu2 %v10662_v24 }
0x290e   : > { %5426 = vmatpush.bf16.msra.mxu3 %v10663_v57 }
0x2911   : > { %5365 = vmatpush.bf16.msra.mxu2 %v10664_v23 }
0x2912   : > { %5427 = vmatpush.bf16.msra.mxu3 %v10665_v49 }
0x2915   : > { %5366 = vmatpush.bf16.msra.mxu2 %v10666_v22 }
0x2916   : > { %5428 = vmatpush.bf16.msra.mxu3 %v10667_v25 }
0x2919   : > { %5367 = vmatpush.bf16.msra.mxu2 %v10668_v53 }
0x291a   : > { %5429 = vmatpush.bf16.msra.mxu3 %v10669_v5 }
0x291d   : > { %5368 = vmatpush.bf16.msra.mxu2 %v10670_v14 }
0x291e   : > { %5430 = vmatpush.bf16.msra.mxu3 %v10671_v55 }
0x2921   : > { %5369 = vmatpush.bf16.msra.mxu2 %v10672_v12 }
0x2922   : > { %5431 = vmatpush.bf16.msra.mxu3 %v10673_v56 }
0x2962   : > { %v5164_v20 = vpop.f32.mrf.mxu0 }
0x2967   : > { %v5138_v43 = vpop.f32.mrf.mxu2  ;;  %v5151_v30 = vpop.f32.mrf.mxu3 }
0x2968   : > { %v5207_v57 = vadd.f32 %v9882_v3, %v5138_v43 }
0x296a   : > { %v6740_v49 = vmul.f32 -1.442695, %v5207_v57  ;;  %v5166_v22 = vpop.f32.mrf.mxu0 }
0x296c   : > { %7294 = vpow2.f32 %v6740_v49 }
0x296f   : > { %v5140_v25 = vpop.f32.mrf.mxu2  ;;  %v5153_v53 = vpop.f32.mrf.mxu3 }
0x2972   : > { %v7295_v23 = vpop.eup %7294 }
0x2973   : > { %v5211_v5 = vadd.f32 1.0, %v7295_v23 }
0x2975   : > { %7296 = vrcp.f32 %v5211_v5  ;;  %v5223_v3 = vand.u32 2147483648, %v5211_v5  ;;  %v5221_v22 = vand.u32 2147483647, %v5211_v5  ;;  %vm5217_vm7 = vweird.f32 %v5211_v5 }
0x2977   : > { %v5190_v14 = vpop.f32.mrf.mxu2  ;;  %v5203_v24 = vpop.f32.mrf.mxu3  ;;  %v5224_v49 = vor.u32 1.1754944e-38, %v5223_v3  ;;  %vm5222_vm1 = vcmp.eq.f32.partialorder %v5221_v22, 8.507059e+37 }
0x2978   : > { %v5227_v55 = vadd.f32 %v5190_v14, %v5151_v30 }
0x297a   : > { %v6741_v2 = vmul.f32 -1.442695, %v5227_v55 }
0x297b   : > { %v7297_v12 = vpop.eup %7296 }
0x297c   : > { %7298 = vpow2.f32 %v6741_v2  ;;  %v5213_v56 = vmul.f32 %v7297_v12, %v5211_v5  ;;  %vm5218_vm0 = vweird.f32 %v7297_v12  ;;  %v5247_v2 = vadd.f32 %v9686_v4, %v5203_v24 }
0x297d   : > { %vm5219_vm8 = vmor %vm5217_vm7, %vm5218_vm0 }
0x297e   : > { %v5214_v40 = vsub.f32 1.0, %v5213_v56 }
0x297f   : > { %v5192_v37 = vpop.f32.mrf.mxu2  ;;  %v5205_v34 = vpop.f32.mrf.mxu3 }
0x2980   : > { %v5215_v44 = vmul.f32 %v7297_v12, %v5214_v40 }
0x2982   : > { %v7299_v43 = vpop.eup %7298  ;;  %v5216_v57 = vadd.f32 %v7297_v12, %v5215_v44 }
0x2983   : > { %v5231_v53 = vadd.f32 1.0, %v7299_v43 }
0x2984   : > { %v5220_v23 = vsel %vm5219_vm8, %v7297_v12, %v5216_v57 }
0x2985   : > { %7300 = vrcp.f32 %v5231_v53  ;;  %v5225_v14 = vsel %vm5222_vm1, %v5224_v49, %v5220_v23  ;;  %v5243_v55 = vand.u32 2147483648, %v5231_v53  ;;  %v5241_v21 = vand.u32 2147483647, %v5231_v53 }
0x2986   : > { %v5248_v30 = vmul.f32 %v5247_v2, %v5225_v14  ;;  %vm5237_vm10 = vweird.f32 %v5231_v53 }
0x2987   : > { %v5244_v12 = vor.u32 1.1754944e-38, %v5243_v55  ;;  %vm5242_vm12 = vcmp.eq.f32.partialorder %v5241_v21, 8.507059e+37 }
0x2988   : > { %v5249_v34 = vadd.f32 %v5248_v30, %v5164_v20 }
0x298a   : > { %7302 = vtanh.f32 %v5249_v34 }
0x298b   : > { %v7301_v25 = vpop.eup %7300 }
0x298c   : > { %v5233_v37 = vmul.f32 %v7301_v25, %v5231_v53  ;;  %vm5238_vm9 = vweird.f32 %v7301_v25 }
0x298d   : > { %vm5239_vm11 = vmor %vm5237_vm10, %vm5238_vm9 }
0x298e   : > { %v5234_v40 = vsub.f32 1.0, %v5233_v37 }
0x2990   : > { %v5235_v56 = vmul.f32 %v7301_v25, %v5234_v40  ;;  %v7303_v43 = vpop.eup %7302 }
0x2992   : > { %v5236_v44 = vadd.f32 %v7301_v25, %v5235_v56 }
0x2994   : > { %v5240_v5 = vsel %vm5239_vm11, %v7301_v25, %v5236_v44 }
0x2995   : > { %v5245_v3 = vsel %vm5242_vm12, %v5244_v12, %v5240_v5 }
0x2996   : > { %v5251_v22 = vsub.f32 1.0, %v5245_v3  ;;  %v5253_v24 = vmul.f32 %v5245_v3, %v9857_v0 }
0x2998   : > { %v5252_v4 = vmul.f32 %v7303_v43, %v5251_v22  ;;  %v10675_v43 = vld [vmem:[#allocation26_spill] sm:$0xff] }
0x299a   : > { %v9938_v57 = vadd.f32 %v5253_v24, %v5252_v4  ;;  %v10676_v4 = vld [vmem:[#allocation36_spill] sm:$0xff]  ;;  %v10677_v24 = vld [vmem:[#allocation27_spill] sm:$0xff] }
0x299c   : > { %v9942_v20 = vpack.c.bf16 %v9938_v57, %v9938_v57 }
0x299e   : > { %5264 = vmatmul.bf16.vlgmr.msra.gmra.mxu0 %v9942_v20 }
0x299f   : > { %5465 = vmatpush.bf16.msra.mxu0 %v8735_v19 }
0x29a3   : > { %5466 = vmatpush.bf16.msra.mxu0 %v8740_v18 }
0x29a7   : > { %5467 = vmatpush.bf16.msra.mxu0 %v8753_v50 }
0x29ab   : > { %5468 = vmatpush.bf16.msra.mxu0 %v8759_v61 }
0x29ae   : > { %5344 = vmatmul.bf16.vlgmr.msrb.gmra.mxu0 %v9942_v20 }
0x29af   : > { %5469 = vmatpush.bf16.msra.mxu0 %v8765_v10 }
0x29b3   : > { %5470 = vmatpush.bf16.msra.mxu0 %v8771_v42 }
0x29b7   : > { %5471 = vmatpush.bf16.msra.mxu0 %v8777_v45 }
0x29bb   : > { %5472 = vmatpush.bf16.msra.mxu0 %v8783_v1 }
0x29bf   : > { %5517 = vmatpush.bf16.msrb.mxu0 %v8790_v9 }
0x29c3   : > { %5518 = vmatpush.bf16.msrb.mxu0 %v8800_v27 }
0x29c7   : > { %5519 = vmatpush.bf16.msrb.mxu0 %v8809_v8 }
0x29cb   : > { %5520 = vmatpush.bf16.msrb.mxu0 %v8820_v38 }
0x29cf   : > { %5521 = vmatpush.bf16.msrb.mxu0 %v8845_v15 }
0x29d3   : > { %5522 = vmatpush.bf16.msrb.mxu0 %v8857_v28 }
0x29d7   : > { %5523 = vmatpush.bf16.msrb.mxu0 %v8868_v59 }
0x29db   : > { %5524 = vmatpush.bf16.msrb.mxu0 %v8879_v51 }
0x2a1b   : > { %v5265_v0 = vpop.f32.mrf.mxu0 }
0x2a1c   : > { %v5266_v21 = vadd.f32 %v9717_v17, %v5265_v0  ;;  %v10001_v0 = vld [vmem:[#allocation13 + $0x38] sm:$0xff] }
0x2a1d   : > { %10679 = vst [vmem:[#allocation25_spill] sm:$0xff] %v10001_v0 }
0x2a1e   : > { %5269 = vmax.xlane.f32.xlu0 %v5266_v21 }
0x2a23   : > { %v5267_v53 = vpop.f32.mrf.mxu0 }
0x2a24   : > { %v10005_v53 = vld [vmem:[#allocation13 + $0x30] sm:$0xff] }
0x2a25   : > { %10681 = vst [vmem:[#allocation34_spill] sm:$0xff] %v10005_v53 }
0x2a2b   : > { %v9963_v23 = vpop.f32.mrf.mxu0 }
0x2a33   : > { %v5347_v49 = vpop.f32.mrf.mxu0 }
0x2a34   : > { %v10682_v49 = vld [vmem:[#allocation29_spill] sm:$0xff] }
0x2a91   : > { %v5270_v14 = vpop.xlane.xlu0 %5269 }
0x2a92   : > { %vm5271_vm13 = vcmp.ge.f32.partialorder %v5266_v21, %v5270_v14  ;;  %v10680_v21 = vld [vmem:[#allocation28_spill] sm:$0xff] }
0x2a93   : > { %v5272_v2 = vsel %vm5271_vm13, %v10461_v54, 128  ;;  %v10009_v14 = vld [vmem:[#allocation13 + $0x28] sm:$0xff]  ;;  %vm5461_vm13 = vcmp.eq.s32.totalorder %v10461_v54, 12 }
0x2a94   : > { %v5274_v30 = vshra.s32 %v5272_v2, 16  ;;  %v5273_v37 = vand.u32 65535, %v5272_v2  ;;  %10683 = vst [vmem:[#allocation40_spill] sm:$0xff] %v10009_v14  ;;  %v10684_v2 = vld [vmem:[#allocation30_spill] sm:$0xff] }
0x2a96   : > { %v5276_v25 = vcvt.s32.f32 %v5274_v30  ;;  %v5275_v40 = vcvt.s32.f32 %v5273_v37  ;;  %v10013_v30 = vld [vmem:[#allocation13 + $0x20] sm:$0xff]  ;;  %v10017_v37 = vld [vmem:[#allocation13 + $0x18] sm:$0xff] }
0x2a97   : > { %10685 = vst [vmem:[#allocation41_spill] sm:$0xff] %v10013_v30 }
0x2a98   : > { %5277 = vmin.xlane.f32.xlu1 %v5276_v25  ;;  %10687 = vst [vmem:[#allocation42_spill] sm:$0xff] %v10017_v37 }
0x2b0b   : > { %v5278_v34 = vpop.xlane.xlu1 %5277 }
0x2b0c   : > { %vm5279_vm14 = vcmp.eq.f32.partialorder %v5276_v25, %v5278_v34  ;;  %v5284_v56 = vcvt.f32.s32 %v5278_v34  ;;  %v10686_v25 = vld [vmem:[#allocation31_spill] sm:$0xff]  ;;  %v10688_v34 = vld [vmem:[#allocation33_spill] sm:$0xff] }
0x2b0d   : > { %v5280_v55 = vsel %vm5279_vm14, %v5275_v40, inf  ;;  %v10021_v40 = vld [vmem:[#allocation13 + $0x10] sm:$0xff] }
0x2b0e   : > { %5281 = vmin.xlane.f32.xlu2 %v5280_v55  ;;  %v5285_v44 = vshll.u32 %v5284_v56, 16  ;;  %10689 = vst [vmem:[#allocation43_spill] sm:$0xff] %v10021_v40  ;;  %v10690_v55 = vld [vmem:[#allocation35_spill] sm:$0xff]  ;;  %v10025_v56 = vld [vmem:[#allocation13 + $0x8] sm:$0xff] }
0x2b0f   : > { %10691 = vst [vmem:[#allocation44_spill] sm:$0xff] %v10025_v56 }
0x2b81   : > { %v5282_v17 = vpop.xlane.xlu2 %5281 }
0x2b82   : > { %v5283_v12 = vcvt.f32.s32 %v5282_v17  ;;  %v10692_v17 = vld [vmem:[#allocation37_spill] sm:$0xff] }
0x2b84   : > { %v5286_v5 = vadd.s32 %v5285_v44, %v5283_v12  ;;  %v10029_v44 = vld [vmem:[#allocation13] sm:$0xff] }
0x2b85   : > { %10693 = vst [vmem:[#allocation45_spill] sm:$0xff] %v10029_v44 }
0x2b86   : > { %vm5287_vm2 = vcmp.lt.s32.totalorder %v5286_v5, 127 }
0x2b87   : > { %v5288_v3 = vsel %vm5287_vm2, %v5286_v5, 127 }
0x2b88   : > { %vm5289_vm3 = vcmp.eq.s32.totalorder %v10461_v54, %v5288_v3  ;;  %v9969_v22 = vsel %vm5293_vm15, %v5288_v3, %v9888_v13  ;;  %v10674_v13 = vld [vmem:[#allocation38_spill] sm:$0xff] }
0x2b89   : > { %vm6743_vm4 = vmpackc.low %vm5289_vm3, %vm5289_vm3 }
0x2b8a   : > { %6744 = vmatmul.msk.bf16.vlgmr.msrb.gmra.mxu1 %vm6743_vm4, %v10452_v33  ;;  %6746 = vmatmul.msk.bf16.vlgmr.msrb.gmra.mxu2 %vm6743_vm4, %v10452_v33 }
0x2b8b   : > { %6748 = vmatmul.msk.bf16.vlgmr.msrb.gmra.mxu3 %vm6743_vm4, %v10452_v33  ;;  %5478 = vmatpush.bf16.msrb.mxu1 %v10462_v7 }
0x2b8c   : > { %5504 = vmatpush.bf16.msrb.mxu3 %v8787_v41  ;;  %5491 = vmatpush.bf16.msrb.mxu2 %v10463_v62 }
0x2b8f   : > { %5479 = vmatpush.bf16.msrb.mxu1 %v10464_v47 }
0x2b90   : > { %5505 = vmatpush.bf16.msrb.mxu3 %v8798_v29  ;;  %5492 = vmatpush.bf16.msrb.mxu2 %v10465_v60 }
0x2b93   : > { %5480 = vmatpush.bf16.msrb.mxu1 %v8755_v26 }
0x2b94   : > { %5506 = vmatpush.bf16.msrb.mxu3 %v8807_v35  ;;  %5493 = vmatpush.bf16.msrb.mxu2 %v8873_v46 }
0x2b97   : > { %5481 = vmatpush.bf16.msrb.mxu1 %v8761_v16 }
0x2b98   : > { %5507 = vmatpush.bf16.msrb.mxu3 %v8818_v6  ;;  %5494 = vmatpush.bf16.msrb.mxu2 %v8887_v36 }
0x2b9a   : > { %5357 = vmatmul.bf16.vlgmr.msra.gmra.mxu1 %v9942_v20  ;;  %5370 = vmatmul.bf16.vlgmr.msra.gmra.mxu2 %v9942_v20  ;;  %v10678_v20 = vld [vmem:[#allocation39_spill] sm:$0xff] }
0x2b9b   : > { %5482 = vmatpush.bf16.msrb.mxu1 %v8767_v32 }
0x2b9c   : > { %5508 = vmatpush.bf16.msrb.mxu3 %v8835_v39  ;;  %5495 = vmatpush.bf16.msrb.mxu2 %v8896_v52 }
0x2b9f   : > { %5483 = vmatpush.bf16.msrb.mxu1 %v8773_v31 }
0x2ba0   : > { %5509 = vmatpush.bf16.msrb.mxu3 %v8855_v11  ;;  %5496 = vmatpush.bf16.msrb.mxu2 %v8901_v58 }
0x2ba3   : > { %5484 = vmatpush.bf16.msrb.mxu1 %v8779_v48 }
0x2ba4   : > { %5510 = vmatpush.bf16.msrb.mxu3 %v8865_v63  ;;  %5497 = vmatpush.bf16.msrb.mxu2 %v10674_v13 }
0x2ba7   : > { %5485 = vmatpush.bf16.msrb.mxu1 %v10675_v43 }
0x2ba8   : > { %5511 = vmatpush.bf16.msrb.mxu3 %v10676_v4  ;;  %5498 = vmatpush.bf16.msrb.mxu2 %v10678_v20 }
0x2bab   : > { %5530 = vmatpush.bf16.msra.mxu1 %v10677_v24 }
0x2bac   : > { %5592 = vmatpush.bf16.msra.mxu2 %v10001_v0 }
0x2baf   : > { %5531 = vmatpush.bf16.msra.mxu1 %v10680_v21 }
0x2bb0   : > { %5593 = vmatpush.bf16.msra.mxu2 %v10005_v53 }
0x2bb3   : > { %5532 = vmatpush.bf16.msra.mxu1 %v10682_v49 }
0x2bb4   : > { %5594 = vmatpush.bf16.msra.mxu2 %v10009_v14 }
0x2bb7   : > { %5533 = vmatpush.bf16.msra.mxu1 %v10684_v2 }
0x2bb8   : > { %5595 = vmatpush.bf16.msra.mxu2 %v10013_v30 }
0x2bbb   : > { %5534 = vmatpush.bf16.msra.mxu1 %v10686_v25 }
0x2bbc   : > { %5596 = vmatpush.bf16.msra.mxu2 %v10017_v37 }
0x2bbf   : > { %5535 = vmatpush.bf16.msra.mxu1 %v10688_v34 }
0x2bc0   : > { %5597 = vmatpush.bf16.msra.mxu2 %v10021_v40 }
0x2bc3   : > { %5536 = vmatpush.bf16.msra.mxu1 %v10690_v55 }
0x2bc4   : > { %5598 = vmatpush.bf16.msra.mxu2 %v10025_v56 }
0x2bc7   : > { %5537 = vmatpush.bf16.msra.mxu1 %v10692_v17 }
0x2bc8   : > { %5599 = vmatpush.bf16.msra.mxu2 %v10029_v44 }
0x2c07   : > { %v5306_v12 = vpop.f32.mrf.mxu1 }
0x2c08   : > { %v5375_v5 = vadd.f32 %v9963_v23, %v5306_v12 }
0x2c0a   : > { %v6749_v3 = vmul.f32 -1.442695, %v5375_v5 }
0x2c0c   : > { %7304 = vpow2.f32 %v6749_v3 }
0x2c0d   : > { %v5319_v34 = vpop.f32.mrf.mxu2 }
0x2c0e   : > { %v5332_v37 = vpop.f32.mrf.mxu3 }
0x2c0f   : > { %v5308_v40 = vpop.f32.mrf.mxu1 }
0x2c12   : > { %v7305_v25 = vpop.eup %7304 }
0x2c13   : > { %v5379_v55 = vadd.f32 1.0, %v7305_v25 }
0x2c15   : > { %7306 = vrcp.f32 %v5379_v55  ;;  %v5321_v30 = vpop.f32.mrf.mxu2  ;;  %v5391_v12 = vand.u32 2147483648, %v5379_v55  ;;  %v5389_v5 = vand.u32 2147483647, %v5379_v55  ;;  %vm5385_vm6 = vweird.f32 %v5379_v55 }
0x2c16   : > { %v5334_v2 = vpop.f32.mrf.mxu3 }
0x2c17   : > { %v5358_v56 = vpop.f32.mrf.mxu1  ;;  %v5392_v2 = vor.u32 1.1754944e-38, %v5391_v12  ;;  %vm5390_vm7 = vcmp.eq.f32.partialorder %v5389_v5, 8.507059e+37 }
0x2c18   : > { %v5395_v14 = vadd.f32 %v5358_v56, %v5319_v34  ;;  %v10033_v56 = vld [vmem:[#allocation11] ss:$0 sm:$0xff] }
0x2c1a   : > { %v6750_v17 = vmul.f32 -1.442695, %v5395_v14 }
0x2c1b   : > { %v7307_v49 = vpop.eup %7306 }
0x2c1c   : > { %7308 = vpow2.f32 %v6750_v17  ;;  %v5381_v53 = vmul.f32 %v7307_v49, %v5379_v55  ;;  %vm5386_vm5 = vweird.f32 %v7307_v49 }
0x2c1d   : > { %v5371_v44 = vpop.f32.mrf.mxu2  ;;  %vm5387_vm0 = vmor %vm5385_vm6, %vm5386_vm5 }
0x2c1e   : > { %v5382_v21 = vsub.f32 1.0, %v5381_v53  ;;  %v5415_v53 = vadd.f32 %v10033_v56, %v5371_v44 }
0x2c1f   : > { %v5360_v0 = vpop.f32.mrf.mxu1 }
0x2c20   : > { %v5383_v23 = vmul.f32 %v7307_v49, %v5382_v21 }
0x2c22   : > { %v7309_v3 = vpop.eup %7308  ;;  %v5384_v40 = vadd.f32 %v7307_v49, %v5383_v23 }
0x2c23   : > { %v5399_v25 = vadd.f32 1.0, %v7309_v3 }
0x2c24   : > { %v5388_v30 = vsel %vm5387_vm0, %v7307_v49, %v5384_v40 }
0x2c25   : > { %7310 = vrcp.f32 %v5399_v25  ;;  %v5373_v14 = vpop.f32.mrf.mxu2  ;;  %v5393_v34 = vsel %vm5390_vm7, %v5392_v2, %v5388_v30  ;;  %v5411_v4 = vand.u32 2147483648, %v5399_v25  ;;  %v5409_v55 = vand.u32 2147483647, %v5399_v25 }
0x2c26   : > { %v5416_v0 = vmul.f32 %v5415_v53, %v5393_v34  ;;  %vm5405_vm1 = vweird.f32 %v5399_v25 }
0x2c27   : > { %v5412_v12 = vor.u32 1.1754944e-38, %v5411_v4  ;;  %vm5410_vm10 = vcmp.eq.f32.partialorder %v5409_v55, 8.507059e+37  ;;  %v10064_v4 = vld [vmem:[%s10306_s8] ss:$0 sm:$0xff] }
0x2c28   : > { %v5417_v20 = vadd.f32 %v5416_v0, %v5332_v37 }
0x2c2a   : > { %7312 = vtanh.f32 %v5417_v20 }
0x2c2b   : > { %v7311_v21 = vpop.eup %7310 }
0x2c2c   : > { %v5401_v17 = vmul.f32 %v7311_v21, %v5399_v25  ;;  %vm5406_vm8 = vweird.f32 %v7311_v21 }
0x2c2d   : > { %vm5407_vm9 = vmor %vm5405_vm1, %vm5406_vm8 }
0x2c2e   : > { %v5402_v24 = vsub.f32 1.0, %v5401_v17 }
0x2c30   : > { %v5403_v23 = vmul.f32 %v7311_v21, %v5402_v24  ;;  %v7313_v30 = vpop.eup %7312 }
0x2c32   : > { %v5404_v49 = vadd.f32 %v7311_v21, %v5403_v23 }
0x2c34   : > { %v5408_v5 = vsel %vm5407_vm9, %v7311_v21, %v5404_v49 }
0x2c35   : > { %v5413_v3 = vsel %vm5410_vm10, %v5412_v12, %v5408_v5 }
0x2c36   : > { %v5419_v40 = vsub.f32 1.0, %v5413_v3  ;;  %v5421_v2 = vmul.f32 %v5413_v3, %v9938_v57 }
0x2c38   : > { %v5420_v44 = vmul.f32 %v7313_v30, %v5419_v40 }
0x2c3a   : > { %v10037_v14 = vadd.f32 %v5421_v2, %v5420_v44 }
0x2c3c   : > { %v10041_v24 = vpack.c.bf16 %v10037_v14, %v10037_v14 }
0x2c3e   : > { %5432 = vmatmul.bf16.vlgmr.msra.gmra.mxu3 %v10041_v24 }
0x2c3f   : > { %5633 = vmatpush.bf16.msra.mxu3 %v8735_v19 }
0x2c43   : > { %5634 = vmatpush.bf16.msra.mxu3 %v8740_v18 }
0x2c47   : > { %5635 = vmatpush.bf16.msra.mxu3 %v8753_v50 }
0x2c4b   : > { %5636 = vmatpush.bf16.msra.mxu3 %v8759_v61 }
0x2c4e   : > { %5512 = vmatmul.bf16.vlgmr.msrb.gmra.mxu3 %v10041_v24 }
0x2c4f   : > { %5637 = vmatpush.bf16.msra.mxu3 %v8765_v10 }
0x2c53   : > { %5638 = vmatpush.bf16.msra.mxu3 %v8771_v42 }
0x2c57   : > { %5639 = vmatpush.bf16.msra.mxu3 %v8777_v45 }
0x2c5b   : > { %5640 = vmatpush.bf16.msra.mxu3 %v8783_v1 }
0x2c5f   : > { %5685 = vmatpush.bf16.msrb.mxu3 %v8790_v9 }
0x2c63   : > { %5686 = vmatpush.bf16.msrb.mxu3 %v8800_v27 }
0x2c67   : > { %5687 = vmatpush.bf16.msrb.mxu3 %v8809_v8 }
0x2c6b   : > { %5688 = vmatpush.bf16.msrb.mxu3 %v8820_v38 }
0x2c6f   : > { %5689 = vmatpush.bf16.msrb.mxu3 %v8845_v15 }
0x2c73   : > { %5690 = vmatpush.bf16.msrb.mxu3 %v8857_v28 }
0x2c77   : > { %5691 = vmatpush.bf16.msrb.mxu3 %v8868_v59 }
0x2c7b   : > { %5692 = vmatpush.bf16.msrb.mxu3 %v8879_v51 }
0x2cc1   : > { %v5433_v57 = vpop.f32.mrf.mxu3 }
0x2cc2   : > { %v5434_v20 = vadd.f32 %v10064_v4, %v5433_v57 }
0x2cc4   : > { %5437 = vmax.xlane.f32.xlu0 %v5434_v20 }
0x2cc9   : > { %v5435_v37 = vpop.f32.mrf.mxu3 }
0x2cca   : > { %v10697_v37 = vld [vmem:[#allocation25_spill] sm:$0xff] }
0x2cd1   : > { %v10067_v25 = vpop.f32.mrf.mxu3 }
0x2cd9   : > { %v5515_v34 = vpop.f32.mrf.mxu3 }
0x2cda   : > { %v10698_v34 = vld [vmem:[#allocation28_spill] sm:$0xff] }
0x2d37   : > { %v5438_v53 = vpop.xlane.xlu0 %5437 }
0x2d38   : > { %vm5439_vm11 = vcmp.ge.f32.partialorder %v5434_v20, %v5438_v53  ;;  %v10696_v20 = vld [vmem:[#allocation39_spill] sm:$0xff]  ;;  %v10699_v53 = vld [vmem:[#allocation34_spill] sm:$0xff] }
0x2d39   : > { %v5440_v0 = vsel %vm5439_vm11, %v10461_v54, 128  ;;  %vm5629_vm11 = vcmp.eq.s32.totalorder %v10461_v54, 13 }
0x2d3a   : > { %v5442_v21 = vshra.s32 %v5440_v0, 16  ;;  %v5441_v23 = vand.u32 65535, %v5440_v0  ;;  %v10700_v0 = vld [vmem:[#allocation29_spill] sm:$0xff] }
0x2d3c   : > { %v5444_v17 = vcvt.s32.f32 %v5442_v21  ;;  %v5443_v49 = vcvt.s32.f32 %v5441_v23  ;;  %v10701_v21 = vld [vmem:[#allocation40_spill] sm:$0xff]  ;;  %v10703_v23 = vld [vmem:[#allocation41_spill] sm:$0xff] }
0x2d3e   : > { %5445 = vmin.xlane.f32.xlu1 %v5444_v17 }
0x2db1   : > { %v5446_v55 = vpop.xlane.xlu1 %5445 }
0x2db2   : > { %vm5447_vm12 = vcmp.eq.f32.partialorder %v5444_v17, %v5446_v55  ;;  %v5452_v5 = vcvt.f32.s32 %v5446_v55  ;;  %v10702_v17 = vld [vmem:[#allocation30_spill] sm:$0xff]  ;;  %v10704_v55 = vld [vmem:[#allocation31_spill] sm:$0xff] }
0x2db3   : > { %v5448_v12 = vsel %vm5447_vm12, %v5443_v49, inf  ;;  %v10705_v49 = vld [vmem:[#allocation42_spill] sm:$0xff] }
0x2db4   : > { %5449 = vmin.xlane.f32.xlu2 %v5448_v12  ;;  %v5453_v40 = vshll.u32 %v5452_v5, 16  ;;  %v10706_v12 = vld [vmem:[#allocation33_spill] sm:$0xff]  ;;  %v10707_v5 = vld [vmem:[#allocation43_spill] sm:$0xff] }
0x2e27   : > { %v5450_v3 = vpop.xlane.xlu2 %5449 }
0x2e28   : > { %v5451_v30 = vcvt.f32.s32 %v5450_v3  ;;  %v10708_v3 = vld [vmem:[#allocation35_spill] sm:$0xff] }
0x2e2a   : > { %v5454_v44 = vadd.s32 %v5453_v40, %v5451_v30  ;;  %v10709_v40 = vld [vmem:[#allocation44_spill] sm:$0xff]  ;;  %v10710_v30 = vld [vmem:[#allocation37_spill] sm:$0xff] }
0x2e2c   : > { %vm5455_vm14 = vcmp.lt.s32.totalorder %v5454_v44, 127 }
0x2e2d   : > { %v5456_v2 = vsel %vm5455_vm14, %v5454_v44, 127  ;;  %v10711_v44 = vld [vmem:[#allocation45_spill] sm:$0xff] }
0x2e2e   : > { %vm5457_vm15 = vcmp.eq.s32.totalorder %v10461_v54, %v5456_v2  ;;  %v10073_v57 = vsel %vm5461_vm13, %v5456_v2, %v9969_v22  ;;  %v10694_v22 = vld [vmem:[#allocation36_spill] sm:$0xff] }
0x2e2f   : > { %vm6752_vm2 = vmpackc.low %vm5457_vm15, %vm5457_vm15 }
0x2e30   : > { %6753 = vmatmul.msk.bf16.vlgmr.msra.gmra.mxu0 %vm6752_vm2, %v10452_v33  ;;  %6755 = vmatmul.msk.bf16.vlgmr.msrb.gmra.mxu1 %vm6752_vm2, %v10452_v33 }
0x2e31   : > { %6757 = vmatmul.msk.bf16.vlgmr.msrb.gmra.mxu2 %vm6752_vm2, %v10452_v33  ;;  %5646 = vmatpush.bf16.msra.mxu0 %v10462_v7 }
0x2e32   : > { %5672 = vmatpush.bf16.msrb.mxu2 %v8787_v41  ;;  %5659 = vmatpush.bf16.msrb.mxu1 %v10463_v62 }
0x2e35   : > { %5647 = vmatpush.bf16.msra.mxu0 %v10464_v47 }
0x2e36   : > { %5673 = vmatpush.bf16.msrb.mxu2 %v8798_v29  ;;  %5660 = vmatpush.bf16.msrb.mxu1 %v10465_v60 }
0x2e39   : > { %5648 = vmatpush.bf16.msra.mxu0 %v8755_v26 }
0x2e3a   : > { %5674 = vmatpush.bf16.msrb.mxu2 %v8807_v35  ;;  %5661 = vmatpush.bf16.msrb.mxu1 %v8873_v46 }
0x2e3d   : > { %5649 = vmatpush.bf16.msra.mxu0 %v8761_v16 }
0x2e3e   : > { %5675 = vmatpush.bf16.msrb.mxu2 %v8818_v6  ;;  %5662 = vmatpush.bf16.msrb.mxu1 %v8887_v36 }
0x2e40   : > { %5525 = vmatmul.bf16.vlgmr.msrb.gmra.mxu0 %v10041_v24  ;;  %5538 = vmatmul.bf16.vlgmr.msra.gmra.mxu1 %v10041_v24  ;;  %v10695_v24 = vld [vmem:[#allocation27_spill] sm:$0xff] }
0x2e41   : > { %5650 = vmatpush.bf16.msra.mxu0 %v8767_v32 }
0x2e42   : > { %5676 = vmatpush.bf16.msrb.mxu2 %v8835_v39  ;;  %5663 = vmatpush.bf16.msrb.mxu1 %v8896_v52 }
0x2e45   : > { %5651 = vmatpush.bf16.msra.mxu0 %v8773_v31 }
0x2e46   : > { %5677 = vmatpush.bf16.msrb.mxu2 %v8855_v11  ;;  %5664 = vmatpush.bf16.msrb.mxu1 %v8901_v58 }
0x2e49   : > { %5652 = vmatpush.bf16.msra.mxu0 %v8779_v48 }
0x2e4a   : > { %5678 = vmatpush.bf16.msrb.mxu2 %v8865_v63  ;;  %5665 = vmatpush.bf16.msrb.mxu1 %v10674_v13 }
0x2e4d   : > { %5653 = vmatpush.bf16.msra.mxu0 %v10675_v43 }
0x2e4e   : > { %5679 = vmatpush.bf16.msrb.mxu2 %v10694_v22  ;;  %5666 = vmatpush.bf16.msrb.mxu1 %v10696_v20 }
0x2e51   : > { %5698 = vmatpush.bf16.msrb.mxu0 %v10695_v24 }
0x2e52   : > { %5760 = vmatpush.bf16.msra.mxu1 %v10697_v37 }
0x2e55   : > { %5699 = vmatpush.bf16.msrb.mxu0 %v10698_v34 }
0x2e56   : > { %5761 = vmatpush.bf16.msra.mxu1 %v10699_v53 }
0x2e59   : > { %5700 = vmatpush.bf16.msrb.mxu0 %v10700_v0 }
0x2e5a   : > { %5762 = vmatpush.bf16.msra.mxu1 %v10701_v21 }
0x2e5d   : > { %5701 = vmatpush.bf16.msrb.mxu0 %v10702_v17 }
0x2e5e   : > { %5763 = vmatpush.bf16.msra.mxu1 %v10703_v23 }
0x2e61   : > { %5702 = vmatpush.bf16.msrb.mxu0 %v10704_v55 }
0x2e62   : > { %5764 = vmatpush.bf16.msra.mxu1 %v10705_v49 }
0x2e65   : > { %5703 = vmatpush.bf16.msrb.mxu0 %v10706_v12 }
0x2e66   : > { %5765 = vmatpush.bf16.msra.mxu1 %v10707_v5 }
0x2e69   : > { %5704 = vmatpush.bf16.msrb.mxu0 %v10708_v3 }
0x2e6a   : > { %5766 = vmatpush.bf16.msra.mxu1 %v10709_v40 }
0x2e6d   : > { %5705 = vmatpush.bf16.msrb.mxu0 %v10710_v30 }
0x2e6e   : > { %5767 = vmatpush.bf16.msra.mxu1 %v10711_v44 }
0x2ead   : > { %v5474_v2 = vpop.f32.mrf.mxu0  ;;  %v5487_v17 = vpop.f32.mrf.mxu1 }
0x2eae   : > { %v5543_v23 = vadd.f32 %v10067_v25, %v5474_v2 }
0x2eb0   : > { %v6758_v21 = vmul.f32 -1.442695, %v5543_v23 }
0x2eb2   : > { %7314 = vpow2.f32 %v6758_v21 }
0x2eb4   : > { %v5500_v55 = vpop.f32.mrf.mxu2 }
0x2eb5   : > { %v5476_v49 = vpop.f32.mrf.mxu0  ;;  %v5489_v0 = vpop.f32.mrf.mxu1 }
0x2eb8   : > { %v7315_v12 = vpop.eup %7314 }
0x2eb9   : > { %v5547_v53 = vadd.f32 1.0, %v7315_v12 }
0x2ebb   : > { %7316 = vrcp.f32 %v5547_v53  ;;  %v5559_v21 = vand.u32 2147483648, %v5547_v53  ;;  %v5557_v23 = vand.u32 2147483647, %v5547_v53  ;;  %vm5553_vm4 = vweird.f32 %v5547_v53 }
0x2ebc   : > { %v5502_v5 = vpop.f32.mrf.mxu2 }
0x2ebd   : > { %v5526_v3 = vpop.f32.mrf.mxu0  ;;  %v5539_v34 = vpop.f32.mrf.mxu1  ;;  %v5560_v2 = vor.u32 1.1754944e-38, %v5559_v21  ;;  %vm5558_vm6 = vcmp.eq.f32.partialorder %v5557_v23, 8.507059e+37 }
0x2ebe   : > { %v5563_v40 = vadd.f32 %v5526_v3, %v5487_v17 }
0x2ec0   : > { %v6759_v37 = vmul.f32 -1.442695, %v5563_v40 }
0x2ec1   : > { %v7317_v30 = vpop.eup %7316 }
0x2ec2   : > { %7318 = vpow2.f32 %v6759_v37  ;;  %v5549_v44 = vmul.f32 %v7317_v30, %v5547_v53  ;;  %vm5554_vm3 = vweird.f32 %v7317_v30  ;;  %v5583_v37 = vadd.f32 %v10033_v56, %v5539_v34 }
0x2ec3   : > { %vm5555_vm5 = vmor %vm5553_vm4, %vm5554_vm3 }
0x2ec4   : > { %v5550_v20 = vsub.f32 1.0, %v5549_v44 }
0x2ec5   : > { %v5528_v24 = vpop.f32.mrf.mxu0  ;;  %v5541_v22 = vpop.f32.mrf.mxu1 }
0x2ec6   : > { %v5551_v25 = vmul.f32 %v7317_v30, %v5550_v20 }
0x2ec8   : > { %v7319_v49 = vpop.eup %7318  ;;  %v5552_v0 = vadd.f32 %v7317_v30, %v5551_v25 }
0x2ec9   : > { %v5567_v12 = vadd.f32 1.0, %v7319_v49 }
0x2eca   : > { %v5556_v5 = vsel %vm5555_vm5, %v7317_v30, %v5552_v0 }
0x2ecb   : > { %7320 = vrcp.f32 %v5567_v12  ;;  %v5561_v17 = vsel %vm5558_vm6, %v5560_v2, %v5556_v5  ;;  %v5579_v44 = vand.u32 2147483648, %v5567_v12  ;;  %v5577_v13 = vand.u32 2147483647, %v5567_v12 }
0x2ecc   : > { %v5584_v3 = vmul.f32 %v5583_v37, %v5561_v17  ;;  %vm5573_vm7 = vweird.f32 %v5567_v12 }
0x2ecd   : > { %v5580_v30 = vor.u32 1.1754944e-38, %v5579_v44  ;;  %vm5578_vm1 = vcmp.eq.f32.partialorder %v5577_v13, 8.507059e+37 }
0x2ece   : > { %v5585_v22 = vadd.f32 %v5584_v3, %v5500_v55 }
0x2ed0   : > { %7322 = vtanh.f32 %v5585_v22 }
0x2ed1   : > { %v7321_v40 = vpop.eup %7320 }
0x2ed2   : > { %v5569_v24 = vmul.f32 %v7321_v40, %v5567_v12  ;;  %vm5574_vm0 = vweird.f32 %v7321_v40 }
0x2ed3   : > { %vm5575_vm8 = vmor %vm5573_vm7, %vm5574_vm0 }
0x2ed4   : > { %v5570_v20 = vsub.f32 1.0, %v5569_v24 }
0x2ed6   : > { %v5571_v43 = vmul.f32 %v7321_v40, %v5570_v20  ;;  %v7323_v49 = vpop.eup %7322 }
0x2ed8   : > { %v5572_v53 = vadd.f32 %v7321_v40, %v5571_v43 }
0x2eda   : > { %v5576_v25 = vsel %vm5575_vm8, %v7321_v40, %v5572_v53 }
0x2edb   : > { %v5581_v21 = vsel %vm5578_vm1, %v5580_v30, %v5576_v25 }
0x2edc   : > { %v5587_v23 = vsub.f32 1.0, %v5581_v21  ;;  %v5589_v0 = vmul.f32 %v5581_v21, %v10037_v14 }
0x2ede   : > { %v5588_v34 = vmul.f32 %v7323_v49, %v5587_v23 }
0x2ee0   : > { %v10123_v5 = vadd.f32 %v5589_v0, %v5588_v34 }
0x2ee2   : > { %v10127_v55 = vpack.c.bf16 %v10123_v5, %v10123_v5 }
0x2ee4   : > { %5600 = vmatmul.bf16.vlgmr.msra.gmra.mxu2 %v10127_v55 }
0x2ee5   : > { %5801 = vmatpush.bf16.msra.mxu2 %v8735_v19 }
0x2ee9   : > { %5802 = vmatpush.bf16.msra.mxu2 %v8740_v18 }
0x2eed   : > { %5803 = vmatpush.bf16.msra.mxu2 %v8753_v50 }
0x2ef1   : > { %5804 = vmatpush.bf16.msra.mxu2 %v8759_v61 }
0x2ef4   : > { %5680 = vmatmul.bf16.vlgmr.msrb.gmra.mxu2 %v10127_v55 }
0x2ef5   : > { %5805 = vmatpush.bf16.msra.mxu2 %v8765_v10 }
0x2ef9   : > { %5806 = vmatpush.bf16.msra.mxu2 %v8771_v42 }
0x2efd   : > { %5807 = vmatpush.bf16.msra.mxu2 %v8777_v45 }
0x2f01   : > { %5808 = vmatpush.bf16.msra.mxu2 %v8783_v1 }
0x2f05   : > { %5853 = vmatpush.bf16.msrb.mxu2 %v8790_v9 }
0x2f09   : > { %5854 = vmatpush.bf16.msrb.mxu2 %v8800_v27 }
0x2f0d   : > { %5855 = vmatpush.bf16.msrb.mxu2 %v8809_v8 }
0x2f11   : > { %5856 = vmatpush.bf16.msrb.mxu2 %v8820_v38 }
0x2f15   : > { %5857 = vmatpush.bf16.msrb.mxu2 %v8845_v15 }
0x2f19   : > { %5858 = vmatpush.bf16.msrb.mxu2 %v8857_v28 }
0x2f1d   : > { %5859 = vmatpush.bf16.msrb.mxu2 %v8868_v59 }
0x2f21   : > { %5860 = vmatpush.bf16.msrb.mxu2 %v8879_v51 }
0x2f67   : > { %v5601_v19 = vpop.f32.mrf.mxu2 }
0x2f68   : > { %v5602_v18 = vadd.f32 %v10064_v4, %v5601_v19 }
0x2f6a   : > { %5605 = vmax.xlane.f32.xlu0 %v5602_v18 }
0x2f6f   : > { %v5603_v50 = vpop.f32.mrf.mxu2 }
0x2f77   : > { %v10148_v61 = vpop.f32.mrf.mxu2 }
0x2f7f   : > { %v5683_v10 = vpop.f32.mrf.mxu2 }
0x2fdd   : > { %v5606_v42 = vpop.xlane.xlu0 %5605 }
0x2fde   : > { %vm5607_vm9 = vcmp.ge.f32.partialorder %v5602_v18, %v5606_v42 }
0x2fdf   : > { %v5608_v45 = vsel %vm5607_vm9, %v10461_v54, 128  ;;  %vm5797_vm9 = vcmp.eq.s32.totalorder %v10461_v54, 14 }
0x2fe0   : > { %v5610_v1 = vshra.s32 %v5608_v45, 16  ;;  %v5609_v27 = vand.u32 65535, %v5608_v45 }
0x2fe2   : > { %v5612_v9 = vcvt.s32.f32 %v5610_v1  ;;  %v5611_v38 = vcvt.s32.f32 %v5609_v27 }
0x2fe4   : > { %5613 = vmin.xlane.f32.xlu1 %v5612_v9 }
0x3057   : > { %v5614_v8 = vpop.xlane.xlu1 %5613 }
0x3058   : > { %vm5615_vm10 = vcmp.eq.f32.partialorder %v5612_v9, %v5614_v8  ;;  %v5620_v28 = vcvt.f32.s32 %v5614_v8 }
0x3059   : > { %v5616_v15 = vsel %vm5615_vm10, %v5611_v38, inf }
0x305a   : > { %5617 = vmin.xlane.f32.xlu2 %v5616_v15  ;;  %v5621_v51 = vshll.u32 %v5620_v28, 16 }
0x30cd   : > { %v5618_v59 = vpop.xlane.xlu2 %5617 }
0x30ce   : > { %v5619_v13 = vcvt.f32.s32 %v5618_v59 }
0x30d0   : > { %v5622_v43 = vadd.s32 %v5621_v51, %v5619_v13 }
0x30d2   : > { %vm5623_vm12 = vcmp.lt.s32.totalorder %v5622_v43, 127 }
0x30d3   : > { %v5624_v14 = vsel %vm5623_vm12, %v5622_v43, 127 }
0x30d4   : > { %vm5625_vm13 = vcmp.eq.s32.totalorder %v10461_v54, %v5624_v14  ;;  %v10154_v12 = vsel %vm5629_vm11, %v5624_v14, %v10073_v57 }
0x30d5   : > { %vm6761_vm14 = vmpackc.low %vm5625_vm13, %vm5625_vm13 }
0x30d6   : > { %6762 = vmatmul.msk.bf16.vlgmr.msra.gmra.mxu3 %vm6761_vm14, %v10452_v33  ;;  %6764 = vmatmul.msk.bf16.vlgmr.msra.gmra.mxu0 %vm6761_vm14, %v10452_v33 }
0x30d7   : > { %6766 = vmatmul.msk.bf16.vlgmr.msrb.gmra.mxu1 %vm6761_vm14, %v10452_v33  ;;  %5814 = vmatpush.bf16.msra.mxu3 %v10462_v7  ;;  %v10728_v7 = vld [vmem:[#allocation35_spill] sm:$0xff] }
0x30d8   : > { %5840 = vmatpush.bf16.msrb.mxu1 %v8787_v41  ;;  %5827 = vmatpush.bf16.msra.mxu0 %v10463_v62  ;;  %v10714_v41 = vld [vmem:[#allocation36_spill] sm:$0xff] }
0x30d9   : > { %v10729_v62 = vld [vmem:[#allocation44_spill] sm:$0xff] }
0x30db   : > { %5815 = vmatpush.bf16.msra.mxu3 %v10464_v47  ;;  %v10730_v47 = vld [vmem:[#allocation37_spill] sm:$0xff] }
0x30dc   : > { %5841 = vmatpush.bf16.msrb.mxu1 %v8798_v29  ;;  %5828 = vmatpush.bf16.msra.mxu0 %v10465_v60  ;;  %v10716_v29 = vld [vmem:[#allocation39_spill] sm:$0xff]  ;;  %v10731_v60 = vld [vmem:[#allocation45_spill] sm:$0xff] }
0x30df   : > { %5816 = vmatpush.bf16.msra.mxu3 %v8755_v26  ;;  %v10712_v26 = vld [vmem:[#allocation38_spill] sm:$0xff] }
0x30e0   : > { %5842 = vmatpush.bf16.msrb.mxu1 %v8807_v35  ;;  %5829 = vmatpush.bf16.msra.mxu0 %v8873_v46  ;;  %v10717_v35 = vld [vmem:[#allocation25_spill] sm:$0xff]  ;;  %v10724_v46 = vld [vmem:[#allocation31_spill] sm:$0xff] }
0x30e3   : > { %5817 = vmatpush.bf16.msra.mxu3 %v8761_v16  ;;  %v10713_v16 = vld [vmem:[#allocation26_spill] sm:$0xff] }
0x30e4   : > { %5843 = vmatpush.bf16.msrb.mxu1 %v8818_v6  ;;  %5830 = vmatpush.bf16.msra.mxu0 %v8887_v36  ;;  %v10719_v6 = vld [vmem:[#allocation34_spill] sm:$0xff] }
0x30e5   : > { %v10725_v36 = vld [vmem:[#allocation42_spill] sm:$0xff] }
0x30e6   : > { %5693 = vmatmul.bf16.vlgmr.msrb.gmra.mxu3 %v10127_v55  ;;  %5706 = vmatmul.bf16.vlgmr.msrb.gmra.mxu0 %v10127_v55 }
0x30e7   : > { %5818 = vmatpush.bf16.msra.mxu3 %v8767_v32  ;;  %v10715_v32 = vld [vmem:[#allocation27_spill] sm:$0xff] }
0x30e8   : > { %5844 = vmatpush.bf16.msrb.mxu1 %v8835_v39  ;;  %5831 = vmatpush.bf16.msra.mxu0 %v8896_v52  ;;  %v10720_v39 = vld [vmem:[#allocation29_spill] sm:$0xff] }
0x30e9   : > { %v10726_v52 = vld [vmem:[#allocation33_spill] sm:$0xff] }
0x30eb   : > { %5819 = vmatpush.bf16.msra.mxu3 %v8773_v31  ;;  %v10718_v31 = vld [vmem:[#allocation28_spill] sm:$0xff] }
0x30ec   : > { %5845 = vmatpush.bf16.msrb.mxu1 %v8855_v11  ;;  %5832 = vmatpush.bf16.msra.mxu0 %v8901_v58  ;;  %v10722_v11 = vld [vmem:[#allocation30_spill] sm:$0xff]  ;;  %v10727_v58 = vld [vmem:[#allocation43_spill] sm:$0xff] }
0x30ef   : > { %5820 = vmatpush.bf16.msra.mxu3 %v8779_v48  ;;  %v10721_v48 = vld [vmem:[#allocation40_spill] sm:$0xff] }
0x30f0   : > { %5846 = vmatpush.bf16.msrb.mxu1 %v8865_v63  ;;  %5833 = vmatpush.bf16.msra.mxu0 %v10712_v26  ;;  %v10723_v63 = vld [vmem:[#allocation41_spill] sm:$0xff] }
0x30f3   : > { %5821 = vmatpush.bf16.msra.mxu3 %v10713_v16 }
0x30f4   : > { %5847 = vmatpush.bf16.msrb.mxu1 %v10714_v41  ;;  %5834 = vmatpush.bf16.msra.mxu0 %v10716_v29 }
0x30f7   : > { %5866 = vmatpush.bf16.msrb.mxu3 %v10715_v32 }
0x30f8   : > { %5928 = vmatpush.bf16.msrb.mxu0 %v10717_v35 }
0x30fb   : > { %5867 = vmatpush.bf16.msrb.mxu3 %v10718_v31 }
0x30fc   : > { %5929 = vmatpush.bf16.msrb.mxu0 %v10719_v6 }
0x30ff   : > { %5868 = vmatpush.bf16.msrb.mxu3 %v10720_v39 }
0x3100   : > { %5930 = vmatpush.bf16.msrb.mxu0 %v10721_v48 }
0x3103   : > { %5869 = vmatpush.bf16.msrb.mxu3 %v10722_v11 }
0x3104   : > { %5931 = vmatpush.bf16.msrb.mxu0 %v10723_v63 }
0x3107   : > { %5870 = vmatpush.bf16.msrb.mxu3 %v10724_v46 }
0x3108   : > { %5932 = vmatpush.bf16.msrb.mxu0 %v10725_v36 }
0x310b   : > { %5871 = vmatpush.bf16.msrb.mxu3 %v10726_v52 }
0x310c   : > { %5933 = vmatpush.bf16.msrb.mxu0 %v10727_v58 }
0x310f   : > { %5872 = vmatpush.bf16.msrb.mxu3 %v10728_v7 }
0x3110   : > { %5934 = vmatpush.bf16.msrb.mxu0 %v10729_v62 }
0x3113   : > { %5873 = vmatpush.bf16.msrb.mxu3 %v10730_v47 }
0x3114   : > { %5935 = vmatpush.bf16.msrb.mxu0 %v10731_v60 }
0x3153   : > { %v5655_v57 = vpop.f32.mrf.mxu0 }
0x3154   : > { %v5668_v2 = vpop.f32.mrf.mxu1 }
0x3159   : > { %v5642_v17 = vpop.f32.mrf.mxu3 }
0x315a   : > { %v5711_v37 = vadd.f32 %v10148_v61, %v5642_v17 }
0x315b   : > { %v5657_v3 = vpop.f32.mrf.mxu0 }
0x315c   : > { %v6767_v40 = vmul.f32 -1.442695, %v5711_v37  ;;  %v5670_v24 = vpop.f32.mrf.mxu1 }
0x315e   : > { %7324 = vpow2.f32 %v6767_v40 }
0x3161   : > { %v5644_v22 = vpop.f32.mrf.mxu3 }
0x3163   : > { %v5707_v20 = vpop.f32.mrf.mxu0 }
0x3164   : > { %v7325_v44 = vpop.eup %7324  ;;  %v5751_v27 = vadd.f32 %v10033_v56, %v5707_v20 }
0x3165   : > { %v5715_v53 = vadd.f32 1.0, %v7325_v44 }
0x3167   : > { %7326 = vrcp.f32 %v5715_v53  ;;  %v5727_v18 = vand.u32 2147483648, %v5715_v53  ;;  %v5725_v50 = vand.u32 2147483647, %v5715_v53  ;;  %vm5721_vm2 = vweird.f32 %v5715_v53 }
0x3169   : > { %v5694_v30 = vpop.f32.mrf.mxu3  ;;  %v5728_v1 = vor.u32 1.1754944e-38, %v5727_v18  ;;  %vm5726_vm4 = vcmp.eq.f32.partialorder %v5725_v50, 8.507059e+37 }
0x316a   : > { %v5731_v25 = vadd.f32 %v5694_v30, %v5655_v57 }
0x316b   : > { %v5709_v21 = vpop.f32.mrf.mxu0 }
0x316c   : > { %v6768_v23 = vmul.f32 -1.442695, %v5731_v25 }
0x316d   : > { %v7327_v49 = vpop.eup %7326 }
0x316e   : > { %v5717_v34 = vmul.f32 %v7327_v49, %v5715_v53  ;;  %7328 = vpow2.f32 %v6768_v23  ;;  %vm5722_vm15 = vweird.f32 %v7327_v49 }
0x316f   : > { %vm5723_vm3 = vmor %vm5721_vm2, %vm5722_vm15 }
0x3170   : > { %v5718_v0 = vsub.f32 1.0, %v5717_v34 }
0x3171   : > { %v5696_v55 = vpop.f32.mrf.mxu3 }
0x3172   : > { %v5719_v19 = vmul.f32 %v7327_v49, %v5718_v0 }
0x3174   : > { %v7329_v61 = vpop.eup %7328  ;;  %v5720_v10 = vadd.f32 %v7327_v49, %v5719_v19 }
0x3175   : > { %v5735_v42 = vadd.f32 1.0, %v7329_v61 }
0x3176   : > { %v5724_v45 = vsel %vm5723_vm3, %v7327_v49, %v5720_v10 }
0x3177   : > { %7330 = vrcp.f32 %v5735_v42  ;;  %v5729_v9 = vsel %vm5726_vm4, %v5728_v1, %v5724_v45  ;;  %v5747_v51 = vand.u32 2147483648, %v5735_v42  ;;  %v5745_v43 = vand.u32 2147483647, %v5735_v42 }
0x3178   : > { %v5752_v8 = vmul.f32 %v5751_v27, %v5729_v9  ;;  %vm5741_vm6 = vweird.f32 %v5735_v42 }
0x3179   : > { %v5748_v26 = vor.u32 1.1754944e-38, %v5747_v51  ;;  %vm5746_vm7 = vcmp.eq.f32.partialorder %v5745_v43, 8.507059e+37 }
0x317a   : > { %v5753_v28 = vadd.f32 %v5752_v8, %v5668_v2 }
0x317c   : > { %7332 = vtanh.f32 %v5753_v28 }
0x317d   : > { %v7331_v38 = vpop.eup %7330 }
0x317e   : > { %v5737_v15 = vmul.f32 %v7331_v38, %v5735_v42  ;;  %vm5742_vm5 = vweird.f32 %v7331_v38 }
0x317f   : > { %vm5743_vm0 = vmor %vm5741_vm6, %vm5742_vm5 }
0x3180   : > { %v5738_v59 = vsub.f32 1.0, %v5737_v15 }
0x3182   : > { %v5739_v13 = vmul.f32 %v7331_v38, %v5738_v59  ;;  %v7333_v29 = vpop.eup %7332 }
0x3184   : > { %v5740_v14 = vadd.f32 %v7331_v38, %v5739_v13 }
0x3186   : > { %v5744_v16 = vsel %vm5743_vm0, %v7331_v38, %v5740_v14 }
0x3187   : > { %v5749_v41 = vsel %vm5746_vm7, %v5748_v26, %v5744_v16 }
0x3188   : > { %v5755_v32 = vsub.f32 1.0, %v5749_v41  ;;  %v5757_v31 = vmul.f32 %v5749_v41, %v10123_v5 }
0x318a   : > { %v5756_v35 = vmul.f32 %v7333_v29, %v5755_v32 }
0x318c   : > { %v10204_v6 = vadd.f32 %v5757_v31, %v5756_v35 }
0x318e   : > { %v5759_v39 = vpack.c.bf16 %v10204_v6, %v10204_v6 }
0x3190   : > { %5768 = vmatmul.bf16.vlgmr.msra.gmra.mxu1 %v5759_v39 }
0x31a0   : > { %5848 = vmatmul.bf16.vlgmr.msrb.gmra.mxu1 %v5759_v39 }
0x320d   : > { %v5769_v48 = vpop.f32.mrf.mxu1 }
0x320e   : > { %v5770_v11 = vadd.f32 %v10064_v4, %v5769_v48 }
0x3210   : > { %5773 = vmax.xlane.f32.xlu0 %v5770_v11 }
0x3215   : > { %v5771_v63 = vpop.f32.mrf.mxu1 }
0x321d   : > { %v5849_v46 = vpop.f32.mrf.mxu1 }
0x3225   : > { %v5851_v36 = vpop.f32.mrf.mxu1 }
0x3283   : > { %v5774_v52 = vpop.xlane.xlu0 %5773 }
0x3284   : > { %vm5775_vm8 = vcmp.ge.f32.partialorder %v5770_v11, %v5774_v52 }
0x3285   : > { %v5776_v58 = vsel %vm5775_vm8, %v10461_v54, 128  ;;  %vm5961_vm8 = vcmp.eq.s32.totalorder %v10461_v54, 15 }
0x3286   : > { %v5778_v7 = vshra.s32 %v5776_v58, 16  ;;  %v5777_v62 = vand.u32 65535, %v5776_v58 }
0x3288   : > { %v5780_v5 = vcvt.s32.f32 %v5778_v7  ;;  %v5779_v60 = vcvt.s32.f32 %v5777_v62 }
0x328a   : > { %5781 = vmin.xlane.f32.xlu1 %v5780_v5 }
0x32fd   : > { %v5782_v47 = vpop.xlane.xlu1 %5781 }
0x32fe   : > { %vm5783_vm1 = vcmp.eq.f32.partialorder %v5780_v5, %v5782_v47  ;;  %v5788_v2 = vcvt.f32.s32 %v5782_v47 }
0x32ff   : > { %v5784_v57 = vsel %vm5783_vm1, %v5779_v60, inf }
0x3300   : > { %5785 = vmin.xlane.f32.xlu2 %v5784_v57  ;;  %v5789_v37 = vshll.u32 %v5788_v2, 16 }
0x3373   : > { %v5786_v17 = vpop.xlane.xlu2 %5785 }
0x3374   : > { %v5787_v3 = vcvt.f32.s32 %v5786_v17 }
0x3376   : > { %v5790_v40 = vadd.s32 %v5789_v37, %v5787_v3 }
0x3378   : > { %vm5791_vm10 = vcmp.lt.s32.totalorder %v5790_v40, 127 }
0x3379   : > { %v5792_v24 = vsel %vm5791_vm10, %v5790_v40, 127 }
0x337a   : > { %vm5793_vm11 = vcmp.eq.s32.totalorder %v10461_v54, %v5792_v24  ;;  %v10213_v22 = vsel %vm5797_vm9, %v5792_v24, %v10154_v12 }
0x337b   : > { %vm6770_vm12 = vmpackc.low %vm5793_vm11, %vm5793_vm11 }
0x337c   : > { %6771 = vmatmul.msk.bf16.vlgmr.msra.gmra.mxu2 %vm6770_vm12, %v10452_v33  ;;  %6773 = vmatmul.msk.bf16.vlgmr.msra.gmra.mxu3 %vm6770_vm12, %v10452_v33 }
0x337d   : > { %6775 = vmatmul.msk.bf16.vlgmr.msra.gmra.mxu0 %vm6770_vm12, %v10452_v33  ;;  %vm5973_vm12 = vcmask 130048  }
0x338c   : > { %5861 = vmatmul.bf16.vlgmr.msrb.gmra.mxu2 %v5759_v39  ;;  %5874 = vmatmul.bf16.vlgmr.msrb.gmra.mxu3 %v5759_v39 }
0x33fa   : > { %v5836_v20 = vpop.f32.mrf.mxu0 }
0x33ff   : > { %v5810_v44 = vpop.f32.mrf.mxu2  ;;  %v5823_v53 = vpop.f32.mrf.mxu3 }
0x3400   : > { %v5879_v30 = vadd.f32 %v5849_v46, %v5810_v44 }
0x3402   : > { %v6776_v25 = vmul.f32 -1.442695, %v5879_v30  ;;  %v5838_v21 = vpop.f32.mrf.mxu0 }
0x3404   : > { %7334 = vpow2.f32 %v6776_v25 }
0x3407   : > { %v5812_v23 = vpop.f32.mrf.mxu2  ;;  %v5825_v49 = vpop.f32.mrf.mxu3 }
0x340a   : > { %v7335_v12 = vpop.eup %7334 }
0x340b   : > { %v5883_v34 = vadd.f32 1.0, %v7335_v12 }
0x340d   : > { %7336 = vrcp.f32 %v5883_v34  ;;  %v5895_v1 = vand.u32 2147483648, %v5883_v34  ;;  %v5893_v9 = vand.u32 2147483647, %v5883_v34  ;;  %vm5889_vm14 = vweird.f32 %v5883_v34 }
0x340f   : > { %v5862_v0 = vpop.f32.mrf.mxu2  ;;  %v5875_v55 = vpop.f32.mrf.mxu3  ;;  %v5896_v28 = vor.u32 1.1754944e-38, %v5895_v1  ;;  %vm5894_vm2 = vcmp.eq.f32.partialorder %v5893_v9, 8.507059e+37 }
0x3410   : > { %v5899_v19 = vadd.f32 %v5862_v0, %v5823_v53  ;;  %v5919_v51 = vadd.f32 %v10033_v56, %v5875_v55 }
0x3412   : > { %v6777_v18 = vmul.f32 -1.442695, %v5899_v19 }
0x3413   : > { %v7337_v50 = vpop.eup %7336 }
0x3414   : > { %7338 = vpow2.f32 %v6777_v18  ;;  %v5885_v33 = vmul.f32 %v7337_v50, %v5883_v34  ;;  %vm5890_vm13 = vweird.f32 %v7337_v50 }
0x3415   : > { %vm5891_vm15 = vmor %vm5889_vm14, %vm5890_vm13 }
0x3416   : > { %v5886_v61 = vsub.f32 1.0, %v5885_v33 }
0x3417   : > { %v5864_v10 = vpop.f32.mrf.mxu2  ;;  %v5877_v42 = vpop.f32.mrf.mxu3 }
0x3418   : > { %v5887_v45 = vmul.f32 %v7337_v50, %v5886_v61 }
0x341a   : > { %v7339_v27 = vpop.eup %7338  ;;  %v5888_v8 = vadd.f32 %v7337_v50, %v5887_v45 }
0x341b   : > { %v5903_v38 = vadd.f32 1.0, %v7339_v27 }
0x341c   : > { %v5892_v15 = vsel %vm5891_vm15, %v7337_v50, %v5888_v8 }
0x341d   : > { %7340 = vrcp.f32 %v5903_v38  ;;  %v5897_v59 = vsel %vm5894_vm2, %v5896_v28, %v5892_v15  ;;  %v5915_v41 = vand.u32 2147483648, %v5903_v38  ;;  %v5913_v29 = vand.u32 2147483647, %v5903_v38 }
0x341e   : > { %v5920_v13 = vmul.f32 %v5919_v51, %v5897_v59  ;;  %vm5909_vm4 = vweird.f32 %v5903_v38 }
0x341f   : > { %v5916_v31 = vor.u32 1.1754944e-38, %v5915_v41  ;;  %vm5914_vm6 = vcmp.eq.f32.partialorder %v5913_v29, 8.507059e+37 }
0x3420   : > { %v5921_v26 = vadd.f32 %v5920_v13, %v5836_v20 }
0x3422   : > { %7342 = vtanh.f32 %v5921_v26 }
0x3423   : > { %v7341_v43 = vpop.eup %7340 }
0x3424   : > { %v5905_v14 = vmul.f32 %v7341_v43, %v5903_v38  ;;  %vm5910_vm3 = vweird.f32 %v7341_v43 }
0x3425   : > { %vm5911_vm5 = vmor %vm5909_vm4, %vm5910_vm3 }
0x3426   : > { %v5906_v16 = vsub.f32 1.0, %v5905_v14 }
0x3428   : > { %v5907_v32 = vmul.f32 %v7341_v43, %v5906_v16  ;;  %v7343_v63 = vpop.eup %7342 }
0x342a   : > { %v5908_v35 = vadd.f32 %v7341_v43, %v5907_v32 }
0x342c   : > { %v5912_v39 = vsel %vm5911_vm5, %v7341_v43, %v5908_v35 }
0x342d   : > { %v5917_v48 = vsel %vm5914_vm6, %v5916_v31, %v5912_v39 }
0x342e   : > { %v5923_v11 = vsub.f32 1.0, %v5917_v48  ;;  %v5925_v46 = vmul.f32 %v5917_v48, %v10204_v6 }
0x3430   : > { %v5924_v56 = vmul.f32 %v7343_v63, %v5923_v11 }
0x3432   : > { %v5926_v36 = vadd.f32 %v5925_v46, %v5924_v56 }
0x3434   : > { %v5927_v52 = vpack.c.bf16 %v5926_v36, %v5926_v36 }
0x3436   : > { %5936 = vmatmul.bf16.vlgmr.msrb.gmra.mxu0 %v5927_v52 }
0x34b3   : > { %v5937_v58 = vpop.f32.mrf.mxu0 }
0x34b4   : > { %v5938_v7 = vadd.f32 %v10064_v4, %v5937_v58 }
0x34b6   : > { %5941 = vmax.xlane.f32.xlu0 %v5938_v7 }
0x34bb   : > { %v5939_v5 = vpop.f32.mrf.mxu0 }
0x3529   : > { %v5942_v62 = vpop.xlane.xlu0 %5941 }
0x352a   : > { %vm5943_vm0 = vcmp.ge.f32.partialorder %v5938_v7, %v5942_v62 }
0x352b   : > { %v5944_v47 = vsel %vm5943_vm0, %v10461_v54, 128  ;;  %v10732_v54 = vmov 0  }
0x352c   : > { %v5946_v60 = vshra.s32 %v5944_v47, 16  ;;  %v5945_v2 = vand.u32 65535, %v5944_v47 }
0x352e   : > { %v5948_v57 = vcvt.s32.f32 %v5946_v60  ;;  %v5947_v6 = vcvt.s32.f32 %v5945_v2 }
0x3530   : > { %5949 = vmin.xlane.f32.xlu1 %v5948_v57 }
0x35a3   : > { %v5950_v17 = vpop.xlane.xlu1 %5949 }
0x35a4   : > { %vm5951_vm7 = vcmp.eq.f32.partialorder %v5948_v57, %v5950_v17  ;;  %v5956_v3 = vcvt.f32.s32 %v5950_v17 }
0x35a5   : > { %v5952_v37 = vsel %vm5951_vm7, %v5947_v6, inf }
0x35a6   : > { %5953 = vmin.xlane.f32.xlu2 %v5952_v37  ;;  %v5957_v40 = vshll.u32 %v5956_v3, 16 }
0x3619   : > { %v5954_v4 = vpop.xlane.xlu2 %5953 }
0x361a   : > { %v5955_v24 = vcvt.f32.s32 %v5954_v4 }
0x361c   : > { %v5958_v20 = vadd.s32 %v5957_v40, %v5955_v24 }
0x361e   : > { %vm5959_vm1 = vcmp.lt.s32.totalorder %v5958_v20, 127 }
0x361f   : > { %v5960_v44 = vsel %vm5959_vm1, %v5958_v20, 127 }
0x3620   : > { %v5964_v53 = vsel %vm5961_vm8, %v5960_v44, %v10213_v22 }
0x3621   : > { %vm5965_vm9 = vcmp.eq.s32.totalorder %v5964_v53, 5  ;;  %vm5966_vm10 = vcmp.eq.s32.totalorder %v5964_v53, 6  ;;  %vm5968_vm11 = vcmp.eq.s32.totalorder %v5964_v53, 7  ;;  %vm5975_vm14 = vcmp.ne.s32.totalorder %v5964_v53, 4 }
0x3622   : > { %vm5967_vm13 = vmor %vm5965_vm9, %vm5966_vm10  ;;  %vm5970_vm2 = vcmp.eq.s32.totalorder %v5964_v53, 8  ;;  %v5976_v22 = vsel %vm5975_vm14, 1, %v10732_v54 }
0x3623   : > { %vm5969_vm15 = vmor %vm5967_vm13, %vm5968_vm11  ;;  %5977 = vst.msk [vmem:[%s484_s30] sm:$0xff] %vm5973_vm12, %v5976_v22 }
0x3624   : > { %vm10241_vm3 = vmor %vm5969_vm15, %vm5970_vm2 }
0x3625   : > { %v5972_v25 = vsel %vm10241_vm3, 9, %v5964_v53 }
0x3626   : > { %7617 = shalt.err (!%p7614_p9)
}
0x3627   : > { %6897 = dma.vmem_to_hbm [thread:$0]  (%p7882_p4), %s6011_s6, 128, %s6013_s20, %s5984_s21   ;;  %5974 = vst.msk [vmem:[%s477_s18] sm:$0xff] %vm5973_vm12, %v5972_v25 }
0x3628   : > { %s5979_s4 = scalar_lea.sflag [#allocation4], %s7913_s19  ;;  %s7632_s30 = sshra.s32 %s10246_s5, 4  ;;  %s7633_s30 = int_to_ptr.hbm [resolvable:$true] %s7632_s30 }
0x3629   : > { %s7634_s24 = scalar_lea.hbm %s7633_s30, 8  ;;  %s7638_s29 = scalar_lea.hbm %s10307_s9, 16 }
0x362a   : > { %p7635_p10 = scmp.ne.s32.totalorder %s7633_s30, %s7634_s24  ;;  %p7639_p0 = scmp.lt.s32.totalorder %s7633_s30, %s10307_s9 }
0x362b   : > { %p7640_p2 = scmp.lt.s32.totalorder %s7638_s29, %s7634_s24 }
0x362c   : > { %p7636_p13 = pnand %p7635_p10, %p7882_p4 }
0x362d   : > { %p7641_p1 = por %p7640_p2, %p7639_p0 }
0x362e   : > { %p7637_p11 = pneg %p7636_p13 }
0x3630   : > { %p7642_p3 = pnand %p7641_p1, %p7637_p11 }
0x3632   : > { %7645 = shalt.err (!%p7642_p3)
}
0x3633   : > { %6896 = dma.vmem_to_hbm [thread:$0]  (%p7882_p4), %s5997_s2, 128, %s10246_s5, %s5979_s4  }
0x3634 PF: > { %s6024_s19 = sand.u32 1, %s7688_s13   ;;  %p10735_p5 = scmp.ge.s32.totalorder %s7700_s16, 2 }
0x3635   : > { %s6025_s12 = scalar_lea.sflag [#allocation4], %s6024_s19 }
0x3636   : > { %p6924_p12 = pnand %p10735_p5, %p7886_p6 }
0x3638   : > { %p6925_p7 = pneg %p6924_p12 }
0x363a   : > { %7679 = dma.done.wait (%p6925_p7), %s6025_s12, 128  }
0x363b   : > { %7681 = vsyncadd (%p6925_p7), %s6025_s12, 4294967168  ;;  %s6035_s6 = scalar_lea.sflag [#allocation16], %s6024_s19 }
0x363c   : > { %7683 = dma.done.wait (%p6925_p7), %s6035_s6, 128  }
0x363d   : > { %7685 = vsyncadd (%p6925_p7), %s6035_s6, 4294967168  ;;  %p30_p4 = scmp.ge.s32.totalorder %s7856_s28, 4   ;;  %s10736_s13 = smov %s7692_s14 }
0x363e   : > { %s10737_s14 = smov %s7696_s15  ;;  %s10738_s15 = smov %s7867_s17 }
0x363f   : > { %s10739_s16 = smov %s7856_s28  ;;  %32 = sbr.rel (!%p30_p4) target bundleno = 16 (0x10), region = 142 }
0x3644   :  { %6041 = vsyncpa [#allocation3], 1 }
0x3645   :  { %6043 = vsyncpa [#allocation3 + $0x1], 1 }
0x3646   :  { %6044 = vsyncpa [#allocation6], 1 }
0x3647   :  { %6045 = vsyncpa [#allocation9], 1 }
0x3648   :  { %6046 = vsyncpa [#allocation12], 1 }
0x3649   :  { %6047 = vsyncpa [#allocation4], 1 }
0x364a   :  { %6049 = vsyncpa [#allocation4 + $0x1], 1 }
0x364b   :  { %6050 = vsyncpa [#allocation16], 1 }
0x364c   :  { %6052 = vsyncpa [#allocation16 + $0x1], 1 }

</bundles_post_ra>
